<compile_context>
chip_gen: v5e
topology: v5e:2x2
jax: 0.10.0
libtpu: 0.0.40
codegen_flags: <defaults>
</compile_context>

<pallas_src>
import jax
import jax.numpy as jnp
from jax.experimental import pallas as pl
from jax.experimental.pallas import tpu as pltpu

_LANE = 128
_PAD_L = 16          # left W-halo so interior stores are bf16 sublane-aligned


# ----------------------------- Pallas kernel --------------------------------

def _basic_block_kernel(x_ref, w1_ref, w2_ref, s1_ref, b1_ref, s2_ref, b2_ref,
                        out_ref, xp_ref, midp_ref, col_ref):
    """One (batch, H-tile) grid step of the fused BasicBlock forward.

    x_ref:    (1, H+4, W, C) f32   whole H-padded image (resident across h)
    w*_ref:   (9*C, C)       bf16  tap-major conv weights
    s*/b*:    (1, C)         f32   folded BN scale / bias
    out_ref:  (1, TH, W, C)  f32   output tile (rows [h*TH, (h+1)*TH))
    xp_ref:   (TH+4, W+_PAD_L+1, C) bf16  W-padded x rows for this tile
    midp_ref: (TH+2, W+_PAD_L+1, C) bf16  W-padded relu(bn1(conv1)) rows
    col_ref:  (TH+2, W, 9*C)        bf16  im2col scratch (reused by both convs)
    """
    _, TH, W, C = out_ref.shape
    h = pl.program_id(1)
    n_h = pl.num_programs(1)
    mm_dtype = xp_ref.dtype

    # One-time (per batch element) halo zeroing: interior writes below never
    # touch the W-halo columns, and scratch persists across the sequential
    # ("arbitrary") h-steps of one batch element on a core.
    @pl.when(h == 0)
    def _():
        xp_ref[...] = jnp.zeros_like(xp_ref)
        midp_ref[...] = jnp.zeros_like(midp_ref)

    # -- stage 0: stage this tile's x rows (tile needs padded rows
    #    [h*TH, h*TH + TH+4) because two stacked 3x3 convs need a 2-row halo).
    #    Interior store starts at sublane offset 16 -> aligned, unmasked.
    row0 = pl.multiple_of(h * TH, TH)
    xp_ref[:, _PAD_L:_PAD_L + W, :] = (
        x_ref[0, pl.ds(row0, TH + 4), :, :].astype(mm_dtype))

    # -- conv1: im2col (bf16) + ONE MXU matmul with K = 9*C ------------------
    for kh in range(3):
        for kw in range(3):
            tap = kh * 3 + kw
            col_ref[:, :, tap * C:(tap + 1) * C] = (
                xp_ref[kh:kh + TH + 2, _PAD_L - 1 + kw:_PAD_L - 1 + kw + W, :])
    y1 = jnp.dot(col_ref[...].reshape((TH + 2) * W, 9 * C), w1_ref[...],
                 preferred_element_type=jnp.float32)
    y1 = jnp.maximum(y1 * s1_ref[...] + b1_ref[...], 0.0)     # bn1 + relu (f32)
    midp_ref[:, _PAD_L:_PAD_L + W, :] = (
        y1.reshape(TH + 2, W, C).astype(mm_dtype))

    # conv2's vertical zero-padding: mid rows just outside the image are zero,
    # not conv1-of-zero-extended-x, so overwrite the edge halo rows.
    @pl.when(h == 0)
    def _():
        midp_ref[0, _PAD_L:_PAD_L + W, :] = jnp.zeros((W, C), mm_dtype)

    @pl.when(h == n_h - 1)
    def _():
        midp_ref[TH + 1, _PAD_L:_PAD_L + W, :] = jnp.zeros((W, C), mm_dtype)

    # -- conv2: im2col + ONE matmul + bn2 + residual + relu ------------------
    for kh in range(3):
        for kw in range(3):
            tap = kh * 3 + kw
            col_ref[0:TH, :, tap * C:(tap + 1) * C] = (
                midp_ref[kh:kh + TH, _PAD_L - 1 + kw:_PAD_L - 1 + kw + W, :])
    y2 = jnp.dot(col_ref[0:TH, :, :].reshape(TH * W, 9 * C), w2_ref[...],
                 preferred_element_type=jnp.float32)
    y2 = y2 * s2_ref[...] + b2_ref[...]                        # bn2 (f32)
    identity = x_ref[0, pl.ds(h * TH + 2, TH), :, :]           # residual, f32
    y2 = y2.reshape(TH, W, C) + identity
    out_ref[0] = jnp.maximum(y2, 0.0).astype(out_ref.dtype)


# ------------------------------ JAX wrapper ----------------------------------

def _round_up(v, m):
    return (v + m - 1) // m * m


def _fold_bn(gamma, beta, running_mean, running_var, eps=1e-5):
    scale = gamma / jnp.sqrt(running_var + eps)
    return scale, beta - running_mean * scale


def _pick_h_tile(H):
    # TODO(synk): re-derive per generation (v7x has 64 MiB VMEM vs 128 MiB on
    # v5e/v6e) when targeting 56x56 / C_pad>=256 shapes; keep all buffers well
    # under the scoped limit.
    for th in (8, 16, 4, 2):
        if H % th == 0:
            return th
    return H


def basic_block_forward(x_nchw, params, matmul_dtype=jnp.bfloat16):
    """BasicBlock forward. Input/output in PyTorch NCHW layout (f32)."""
    N, C, H, W = x_nchw.shape
    C_pad = _round_up(max(C, _LANE), _LANE)
    TH = _pick_h_tile(H)
    n_h = H // TH

    # NHWC, f32, channels lane-padded, H padded by 2 on each side (the
    # vertical halo of the two stacked 3x3 convs).
    x = jnp.transpose(x_nchw, (0, 2, 3, 1)).astype(jnp.float32)
    x = jnp.pad(x, ((0, 0), (2, 2), (0, 0), (0, C_pad - C)))

    def prep_w(w_oihw):
        # OIHW -> HWIO, zero-pad Cin/Cout to C_pad, tap-major (9*Cpad, Cpad).
        w = jnp.transpose(w_oihw, (2, 3, 1, 0))
        w = jnp.pad(w, ((0, 0), (0, 0), (0, C_pad - C), (0, C_pad - C)))
        return w.reshape(9 * C_pad, C_pad).astype(matmul_dtype)

    def prep_vec(v):
        return jnp.pad(v.astype(jnp.float32), (0, C_pad - C)).reshape(1, C_pad)

    w1 = prep_w(params["conv1_w"])
    w2 = prep_w(params["conv2_w"])
    s1, b1 = _fold_bn(params["bn1_gamma"], params["bn1_beta"],
                      params["bn1_mean"], params["bn1_var"])
    s2, b2 = _fold_bn(params["bn2_gamma"], params["bn2_beta"],
                      params["bn2_mean"], params["bn2_var"])
    s1, b1, s2, b2 = prep_vec(s1), prep_vec(b1), prep_vec(s2), prep_vec(b2)

    wdt = jnp.dtype(matmul_dtype).itemsize
    flops = 2 * 9 * C_pad * C_pad * N * n_h * ((TH + 2) * W + TH * W)
    bytes_accessed = (x.size * 4 + N * H * W * C_pad * 4
                      + (w1.size + w2.size) * wdt + 4 * C_pad * 4)

    out = pl.pallas_call(
        _basic_block_kernel,
        out_shape=jax.ShapeDtypeStruct((N, H, W, C_pad), jnp.float32),
        grid_spec=pltpu.PrefetchScalarGridSpec(
            num_scalar_prefetch=0,
            grid=(N, n_h),
            in_specs=[
                # whole H-padded image, constant in h -> fetched once per n
                pl.BlockSpec((1, H + 4, W, C_pad), lambda n, h: (n, 0, 0, 0)),
                pl.BlockSpec((9 * C_pad, C_pad), lambda n, h: (0, 0)),   # w1
                pl.BlockSpec((9 * C_pad, C_pad), lambda n, h: (0, 0)),   # w2
                pl.BlockSpec((1, C_pad), lambda n, h: (0, 0)),           # s1
                pl.BlockSpec((1, C_pad), lambda n, h: (0, 0)),           # b1
                pl.BlockSpec((1, C_pad), lambda n, h: (0, 0)),           # s2
                pl.BlockSpec((1, C_pad), lambda n, h: (0, 0)),           # b2
            ],
            out_specs=pl.BlockSpec((1, TH, W, C_pad),
                                   lambda n, h: (n, h, 0, 0)),
            scratch_shapes=[
                pltpu.VMEM((TH + 4, W + _PAD_L + 1, C_pad), matmul_dtype),
                pltpu.VMEM((TH + 2, W + _PAD_L + 1, C_pad), matmul_dtype),
                pltpu.VMEM((TH + 2, W, 9 * C_pad), matmul_dtype),
            ]),
        compiler_params=pltpu.CompilerParams(
            # batch axis parallel (megacore); H-tile axis must stay
            # "arbitrary" so the one-time halo zeroing at h==0 is seen by
            # every subsequent h-step of the same batch element on a core.
            dimension_semantics=("parallel", "arbitrary"),
            vmem_limit_bytes=32 * 1024 * 1024),
        cost_estimate=pl.CostEstimate(flops=int(flops), transcendentals=0,
                                      bytes_accessed=int(bytes_accessed)),
    )(x, w1, w2, s1, b1, s2, b2)

    out = out[..., :C]
    return jnp.transpose(out, (0, 3, 1, 2))  # -> NCHW


# ----------------------------- reference (glue) ------------------------------

def _reference_forward(x_nchw, params):
    """Pure-JAX f32 reference (lax conv) for a correctness sanity check."""
    def conv(x, w):
        return jax.lax.conv_general_dilated(
            x, w, window_strides=(1, 1), padding=((1, 1), (1, 1)),
            dimension_numbers=("NCHW", "OIHW", "NCHW"))

    def bn(x, g, b, m, v, eps=1e-5):
        g, b, m, v = (a.reshape(1, -1, 1, 1) for a in (g, b, m, v))
        return (x - m) / jnp.sqrt(v + eps) * g + b

    out = jax.nn.relu(bn(conv(x_nchw, params["conv1_w"]),
                         params["bn1_gamma"], params["bn1_beta"],
                         params["bn1_mean"], params["bn1_var"]))
    out = bn(conv(out, params["conv2_w"]),
             params["bn2_gamma"], params["bn2_beta"],
             params["bn2_mean"], params["bn2_var"])
    return jax.nn.relu(out + x_nchw)


# ---------------------------------- main -------------------------------------

if __name__ == "__main__":
    N, C, H, W = 2, 4, 16, 16          # inplanes = planes = 4, stride = 1
    key = jax.random.PRNGKey(0)
    ks = jax.random.split(key, 8)

    x = jax.random.normal(ks[0], (N, C, H, W), jnp.float32)

    params = {
        "conv1_w": 0.1 * jax.random.normal(ks[1], (C, C, 3, 3), jnp.float32),
        "conv2_w": 0.1 * jax.random.normal(ks[2], (C, C, 3, 3), jnp.float32),
        "bn1_gamma": 1.0 + 0.1 * jax.random.normal(ks[3], (C,), jnp.float32),
        "bn1_beta": 0.1 * jax.random.normal(ks[4], (C,), jnp.float32),
        "bn1_mean": 0.05 * jax.random.normal(ks[5], (C,), jnp.float32),
        "bn1_var": jnp.abs(1.0 + 0.1 * jax.random.normal(ks[6], (C,), jnp.float32)),
        "bn2_gamma": 1.0 + 0.1 * jax.random.normal(ks[7], (C,), jnp.float32),
        "bn2_beta": jnp.linspace(-0.1, 0.1, C, dtype=jnp.float32),
        "bn2_mean": jnp.linspace(-0.05, 0.05, C, dtype=jnp.float32),
        "bn2_var": jnp.linspace(0.9, 1.1, C, dtype=jnp.float32),
    }

    out = jax.block_until_ready(basic_block_forward(x, params))
    ref = jax.block_until_ready(_reference_forward(x, params))

    assert out.shape == (N, C, H, W)
    # Tolerance sized for bf16 MXU operands / bf16 intermediate activation
    # (f32 accumulation, BN epilogue, and residual path).
    max_err = float(jnp.max(jnp.abs(out - ref)))
    assert jnp.allclose(out, ref, atol=5e-2, rtol=5e-2), f"max abs err {max_err}"
    print("KERNEL_OK")
</pallas_src>

<mosaic_0001>
module attributes {stable_mosaic.version = 11 : i64} {
  func.func @_basic_block_kernel(%arg0: i32, %arg1: i32, %arg2: memref<1x20x16x128xf32, #tpu.memory_space<vmem>>, %arg3: memref<1152x128xbf16, #tpu.memory_space<vmem>>, %arg4: memref<1152x128xbf16, #tpu.memory_space<vmem>>, %arg5: memref<1x128xf32, #tpu.memory_space<vmem>>, %arg6: memref<1x128xf32, #tpu.memory_space<vmem>>, %arg7: memref<1x128xf32, #tpu.memory_space<vmem>>, %arg8: memref<1x128xf32, #tpu.memory_space<vmem>>, %arg9: memref<1x8x16x128xf32, #tpu.memory_space<vmem>>, %arg10: memref<12x33x128xbf16, #tpu.memory_space<vmem>>, %arg11: memref<10x33x128xbf16, #tpu.memory_space<vmem>>, %arg12: memref<10x16x1152xbf16, #tpu.memory_space<vmem>>) attributes {dimension_semantics = [#tpu.dimension_semantics<parallel>, #tpu.dimension_semantics<arbitrary>], iteration_bounds = array<i64: 2, 2>, scalar_prefetch = 0 : i64, scratch_operands = 3 : i64, tpu.core_type = #tpu.core_type<tc>, window_params = [{transform_indices = @transform_0, window_bounds = array<i64: 1, 20, 16, 128>}, {pipeline_mode = #tpu.pipeline_mode<synchronous>, transform_indices = @transform_1, window_bounds = array<i64: 1152, 128>}, {pipeline_mode = #tpu.pipeline_mode<synchronous>, transform_indices = @transform_2, window_bounds = array<i64: 1152, 128>}, {pipeline_mode = #tpu.pipeline_mode<synchronous>, transform_indices = @transform_3, window_bounds = array<i64: 1, 128>}, {pipeline_mode = #tpu.pipeline_mode<synchronous>, transform_indices = @transform_4, window_bounds = array<i64: 1, 128>}, {pipeline_mode = #tpu.pipeline_mode<synchronous>, transform_indices = @transform_5, window_bounds = array<i64: 1, 128>}, {pipeline_mode = #tpu.pipeline_mode<synchronous>, transform_indices = @transform_6, window_bounds = array<i64: 1, 128>}, {transform_indices = @transform_7, window_bounds = array<i64: 1, 8, 16, 128>}]} {
    %c0_i32 = arith.constant 0 : i32
    %0 = arith.cmpi eq, %arg1, %c0_i32 : i32
    %1 = arith.extui %0 : i1 to i32
    %c0_i32_0 = arith.constant 0 : i32
    %2 = arith.cmpi ne, %1, %c0_i32_0 : i32
    scf.if %2 {
      %cst_136 = arith.constant 0.000000e+00 : bf16
      %89 = vector.broadcast %cst_136 : bf16 to vector<12x33x128xbf16>
      %c0_137 = arith.constant 0 : index
      %c0_138 = arith.constant 0 : index
      %c0_139 = arith.constant 0 : index
      %90 = vector.load %arg10[%c0_137, %c0_138, %c0_139] : memref<12x33x128xbf16, #tpu.memory_space<vmem>>, vector<12x33x128xbf16>
      tpu.vector_store %arg10[%c0_137, %c0_138, %c0_139], %89 {strides = array<i32>} : memref<12x33x128xbf16, #tpu.memory_space<vmem>>, vector<12x33x128xbf16>,
      %cst_140 = arith.constant 0.000000e+00 : bf16
      %91 = vector.broadcast %cst_140 : bf16 to vector<10x33x128xbf16>
      %c0_141 = arith.constant 0 : index
      %c0_142 = arith.constant 0 : index
      %c0_143 = arith.constant 0 : index
      %92 = vector.load %arg11[%c0_141, %c0_142, %c0_143] : memref<10x33x128xbf16, #tpu.memory_space<vmem>>, vector<10x33x128xbf16>
      tpu.vector_store %arg11[%c0_141, %c0_142, %c0_143], %91 {strides = array<i32>} : memref<10x33x128xbf16, #tpu.memory_space<vmem>>, vector<10x33x128xbf16>,
    } else {
    }
    %c8_i32 = arith.constant 8 : i32
    %3 = arith.muli %arg1, %c8_i32 : i32
    %4 = tpu.assume_multiple %3, 8 : i32
    %c0 = arith.constant 0 : index
    %5 = arith.index_cast %4 : i32 to index
    %c0_1 = arith.constant 0 : index
    %c0_2 = arith.constant 0 : index
    %6 = vector.load %arg2[%c0, %5, %c0_1, %c0_2] : memref<1x20x16x128xf32, #tpu.memory_space<vmem>>, vector<1x12x16x128xf32>
    %7 = vector.shape_cast %6 : vector<1x12x16x128xf32> to vector<12x16x128xf32>
    %8 = arith.truncf %7 : vector<12x16x128xf32> to vector<12x16x128xbf16>
    %c0_3 = arith.constant 0 : index
    %c16 = arith.constant 16 : index
    %c0_4 = arith.constant 0 : index
    %9 = vector.load %arg10[%c0_3, %c16, %c0_4] : memref<12x33x128xbf16, #tpu.memory_space<vmem>>, vector<12x16x128xbf16>
    tpu.vector_store %arg10[%c0_3, %c16, %c0_4], %8 {strides = array<i32>} : memref<12x33x128xbf16, #tpu.memory_space<vmem>>, vector<12x16x128xbf16>,
    %c0_5 = arith.constant 0 : index
    %c15 = arith.constant 15 : index
    %c0_6 = arith.constant 0 : index
    %10 = vector.load %arg10[%c0_5, %c15, %c0_6] : memref<12x33x128xbf16, #tpu.memory_space<vmem>>, vector<10x16x128xbf16>
    %c0_7 = arith.constant 0 : index
    %c0_8 = arith.constant 0 : index
    %c0_9 = arith.constant 0 : index
    %11 = vector.load %arg12[%c0_7, %c0_8, %c0_9] : memref<10x16x1152xbf16, #tpu.memory_space<vmem>>, vector<10x16x128xbf16>
    tpu.vector_store %arg12[%c0_7, %c0_8, %c0_9], %10 {strides = array<i32>} : memref<10x16x1152xbf16, #tpu.memory_space<vmem>>, vector<10x16x128xbf16>,
    %c0_10 = arith.constant 0 : index
    %c16_11 = arith.constant 16 : index
    %c0_12 = arith.constant 0 : index
    %12 = vector.load %arg10[%c0_10, %c16_11, %c0_12] : memref<12x33x128xbf16, #tpu.memory_space<vmem>>, vector<10x16x128xbf16>
    %c0_13 = arith.constant 0 : index
    %c0_14 = arith.constant 0 : index
    %c128 = arith.constant 128 : index
    %13 = vector.load %arg12[%c0_13, %c0_14, %c128] : memref<10x16x1152xbf16, #tpu.memory_space<vmem>>, vector<10x16x128xbf16>
    tpu.vector_store %arg12[%c0_13, %c0_14, %c128], %12 {strides = array<i32>} : memref<10x16x1152xbf16, #tpu.memory_space<vmem>>, vector<10x16x128xbf16>,
    %c0_15 = arith.constant 0 : index
    %c17 = arith.constant 17 : index
    %c0_16 = arith.constant 0 : index
    %14 = vector.load %arg10[%c0_15, %c17, %c0_16] : memref<12x33x128xbf16, #tpu.memory_space<vmem>>, vector<10x16x128xbf16>
    %c0_17 = arith.constant 0 : index
    %c0_18 = arith.constant 0 : index
    %c256 = arith.constant 256 : index
    %15 = vector.load %arg12[%c0_17, %c0_18, %c256] : memref<10x16x1152xbf16, #tpu.memory_space<vmem>>, vector<10x16x128xbf16>
    tpu.vector_store %arg12[%c0_17, %c0_18, %c256], %14 {strides = array<i32>} : memref<10x16x1152xbf16, #tpu.memory_space<vmem>>, vector<10x16x128xbf16>,
    %c1 = arith.constant 1 : index
    %c15_19 = arith.constant 15 : index
    %c0_20 = arith.constant 0 : index
    %16 = vector.load %arg10[%c1, %c15_19, %c0_20] : memref<12x33x128xbf16, #tpu.memory_space<vmem>>, vector<10x16x128xbf16>
    %c0_21 = arith.constant 0 : index
    %c0_22 = arith.constant 0 : index
    %c384 = arith.constant 384 : index
    %17 = vector.load %arg12[%c0_21, %c0_22, %c384] : memref<10x16x1152xbf16, #tpu.memory_space<vmem>>, vector<10x16x128xbf16>
    tpu.vector_store %arg12[%c0_21, %c0_22, %c384], %16 {strides = array<i32>} : memref<10x16x1152xbf16, #tpu.memory_space<vmem>>, vector<10x16x128xbf16>,
    %c1_23 = arith.constant 1 : index
    %c16_24 = arith.constant 16 : index
    %c0_25 = arith.constant 0 : index
    %18 = vector.load %arg10[%c1_23, %c16_24, %c0_25] : memref<12x33x128xbf16, #tpu.memory_space<vmem>>, vector<10x16x128xbf16>
    %c0_26 = arith.constant 0 : index
    %c0_27 = arith.constant 0 : index
    %c512 = arith.constant 512 : index
    %19 = vector.load %arg12[%c0_26, %c0_27, %c512] : memref<10x16x1152xbf16, #tpu.memory_space<vmem>>, vector<10x16x128xbf16>
    tpu.vector_store %arg12[%c0_26, %c0_27, %c512], %18 {strides = array<i32>} : memref<10x16x1152xbf16, #tpu.memory_space<vmem>>, vector<10x16x128xbf16>,
    %c1_28 = arith.constant 1 : index
    %c17_29 = arith.constant 17 : index
    %c0_30 = arith.constant 0 : index
    %20 = vector.load %arg10[%c1_28, %c17_29, %c0_30] : memref<12x33x128xbf16, #tpu.memory_space<vmem>>, vector<10x16x128xbf16>
    %c0_31 = arith.constant 0 : index
    %c0_32 = arith.constant 0 : index
    %c640 = arith.constant 640 : index
    %21 = vector.load %arg12[%c0_31, %c0_32, %c640] : memref<10x16x1152xbf16, #tpu.memory_space<vmem>>, vector<10x16x128xbf16>
    tpu.vector_store %arg12[%c0_31, %c0_32, %c640], %20 {strides = array<i32>} : memref<10x16x1152xbf16, #tpu.memory_space<vmem>>, vector<10x16x128xbf16>,
    %c2 = arith.constant 2 : index
    %c15_33 = arith.constant 15 : index
    %c0_34 = arith.constant 0 : index
    %22 = vector.load %arg10[%c2, %c15_33, %c0_34] : memref<12x33x128xbf16, #tpu.memory_space<vmem>>, vector<10x16x128xbf16>
    %c0_35 = arith.constant 0 : index
    %c0_36 = arith.constant 0 : index
    %c768 = arith.constant 768 : index
    %23 = vector.load %arg12[%c0_35, %c0_36, %c768] : memref<10x16x1152xbf16, #tpu.memory_space<vmem>>, vector<10x16x128xbf16>
    tpu.vector_store %arg12[%c0_35, %c0_36, %c768], %22 {strides = array<i32>} : memref<10x16x1152xbf16, #tpu.memory_space<vmem>>, vector<10x16x128xbf16>,
    %c2_37 = arith.constant 2 : index
    %c16_38 = arith.constant 16 : index
    %c0_39 = arith.constant 0 : index
    %24 = vector.load %arg10[%c2_37, %c16_38, %c0_39] : memref<12x33x128xbf16, #tpu.memory_space<vmem>>, vector<10x16x128xbf16>
    %c0_40 = arith.constant 0 : index
    %c0_41 = arith.constant 0 : index
    %c896 = arith.constant 896 : index
    %25 = vector.load %arg12[%c0_40, %c0_41, %c896] : memref<10x16x1152xbf16, #tpu.memory_space<vmem>>, vector<10x16x128xbf16>
    tpu.vector_store %arg12[%c0_40, %c0_41, %c896], %24 {strides = array<i32>} : memref<10x16x1152xbf16, #tpu.memory_space<vmem>>, vector<10x16x128xbf16>,
    %c2_42 = arith.constant 2 : index
    %c17_43 = arith.constant 17 : index
    %c0_44 = arith.constant 0 : index
    %26 = vector.load %arg10[%c2_42, %c17_43, %c0_44] : memref<12x33x128xbf16, #tpu.memory_space<vmem>>, vector<10x16x128xbf16>
    %c0_45 = arith.constant 0 : index
    %c0_46 = arith.constant 0 : index
    %c1024 = arith.constant 1024 : index
    %27 = vector.load %arg12[%c0_45, %c0_46, %c1024] : memref<10x16x1152xbf16, #tpu.memory_space<vmem>>, vector<10x16x128xbf16>
    tpu.vector_store %arg12[%c0_45, %c0_46, %c1024], %26 {strides = array<i32>} : memref<10x16x1152xbf16, #tpu.memory_space<vmem>>, vector<10x16x128xbf16>,
    %c0_47 = arith.constant 0 : index
    %c0_48 = arith.constant 0 : index
    %c0_49 = arith.constant 0 : index
    %28 = vector.load %arg12[%c0_47, %c0_48, %c0_49] : memref<10x16x1152xbf16, #tpu.memory_space<vmem>>, vector<10x16x1152xbf16>
    %29 = vector.shape_cast %28 : vector<10x16x1152xbf16> to vector<160x1152xbf16>
    %c0_50 = arith.constant 0 : index
    %c0_51 = arith.constant 0 : index
    %30 = vector.load %arg3[%c0_50, %c0_51] : memref<1152x128xbf16, #tpu.memory_space<vmem>>, vector<1152x128xbf16>
    %cst = arith.constant dense<0.000000e+00> : vector<160x128xf32>
    %31 = tpu.matmul %29, %30, %cst {dimension_numbers = #tpu.dot_dimension_numbers<[1], [0], [0], [1], [0, 0, 1, 1], [], []>} : vector<160x1152xbf16>, vector<1152x128xbf16>, vector<160x128xf32> -> vector<160x128xf32>
    %c0_52 = arith.constant 0 : index
    %c0_53 = arith.constant 0 : index
    %32 = vector.load %arg5[%c0_52, %c0_53] : memref<1x128xf32, #tpu.memory_space<vmem>>, vector<1x128xf32>
    %33 = vector.broadcast %32 : vector<1x128xf32> to vector<160x128xf32>
    %34 = arith.mulf %31, %33 : vector<160x128xf32>
    %c0_54 = arith.constant 0 : index
    %c0_55 = arith.constant 0 : index
    %35 = vector.load %arg6[%c0_54, %c0_55] : memref<1x128xf32, #tpu.memory_space<vmem>>, vector<1x128xf32>
    %36 = vector.broadcast %35 : vector<1x128xf32> to vector<160x128xf32>
    %37 = arith.addf %34, %36 : vector<160x128xf32>
    %cst_56 = arith.constant 0.000000e+00 : f32
    %38 = vector.broadcast %cst_56 : f32 to vector<160x128xf32>
    %39 = arith.maximumf %37, %38 : vector<160x128xf32>
    %40 = vector.shape_cast %39 : vector<160x128xf32> to vector<10x16x128xf32>
    %41 = arith.truncf %40 : vector<10x16x128xf32> to vector<10x16x128xbf16>
    %c0_57 = arith.constant 0 : index
    %c16_58 = arith.constant 16 : index
    %c0_59 = arith.constant 0 : index
    %42 = vector.load %arg11[%c0_57, %c16_58, %c0_59] : memref<10x33x128xbf16, #tpu.memory_space<vmem>>, vector<10x16x128xbf16>
    tpu.vector_store %arg11[%c0_57, %c16_58, %c0_59], %41 {strides = array<i32>} : memref<10x33x128xbf16, #tpu.memory_space<vmem>>, vector<10x16x128xbf16>,
    %c0_i32_60 = arith.constant 0 : i32
    %43 = arith.cmpi eq, %arg1, %c0_i32_60 : i32
    %44 = arith.extui %43 : i1 to i32
    %c0_i32_61 = arith.constant 0 : i32
    %45 = arith.cmpi ne, %44, %c0_i32_61 : i32
    scf.if %45 {
      %cst_136 = arith.constant 0.000000e+00 : bf16
      %89 = vector.broadcast %cst_136 : bf16 to vector<16x128xbf16>
      %c0_137 = arith.constant 0 : index
      %c16_138 = arith.constant 16 : index
      %c0_139 = arith.constant 0 : index
      %90 = vector.load %arg11[%c0_137, %c16_138, %c0_139] : memref<10x33x128xbf16, #tpu.memory_space<vmem>>, vector<1x16x128xbf16>
      %91 = vector.shape_cast %90 : vector<1x16x128xbf16> to vector<16x128xbf16>
      %92 = vector.shape_cast %89 : vector<16x128xbf16> to vector<1x16x128xbf16>
      tpu.vector_store %arg11[%c0_137, %c16_138, %c0_139], %92 {strides = array<i32>} : memref<10x33x128xbf16, #tpu.memory_space<vmem>>, vector<1x16x128xbf16>,
    } else {
    }
    %c1_i32 = arith.constant 1 : i32
    %46 = arith.cmpi eq, %arg1, %c1_i32 : i32
    %47 = arith.extui %46 : i1 to i32
    %c0_i32_62 = arith.constant 0 : i32
    %48 = arith.cmpi ne, %47, %c0_i32_62 : i32
    scf.if %48 {
      %cst_136 = arith.constant 0.000000e+00 : bf16
      %89 = vector.broadcast %cst_136 : bf16 to vector<16x128xbf16>
      %c9 = arith.constant 9 : index
      %c16_137 = arith.constant 16 : index
      %c0_138 = arith.constant 0 : index
      %90 = vector.load %arg11[%c9, %c16_137, %c0_138] : memref<10x33x128xbf16, #tpu.memory_space<vmem>>, vector<1x16x128xbf16>
      %91 = vector.shape_cast %90 : vector<1x16x128xbf16> to vector<16x128xbf16>
      %92 = vector.shape_cast %89 : vector<16x128xbf16> to vector<1x16x128xbf16>
      tpu.vector_store %arg11[%c9, %c16_137, %c0_138], %92 {strides = array<i32>} : memref<10x33x128xbf16, #tpu.memory_space<vmem>>, vector<1x16x128xbf16>,
    } else {
    }
    %c0_63 = arith.constant 0 : index
    %c15_64 = arith.constant 15 : index
    %c0_65 = arith.constant 0 : index
    %49 = vector.load %arg11[%c0_63, %c15_64, %c0_65] : memref<10x33x128xbf16, #tpu.memory_space<vmem>>, vector<8x16x128xbf16>
    %c0_66 = arith.constant 0 : index
    %c0_67 = arith.constant 0 : index
    %c0_68 = arith.constant 0 : index
    %50 = vector.load %arg12[%c0_66, %c0_67, %c0_68] : memref<10x16x1152xbf16, #tpu.memory_space<vmem>>, vector<8x16x128xbf16>
    tpu.vector_store %arg12[%c0_66, %c0_67, %c0_68], %49 {strides = array<i32>} : memref<10x16x1152xbf16, #tpu.memory_space<vmem>>, vector<8x16x128xbf16>,
    %c0_69 = arith.constant 0 : index
    %c16_70 = arith.constant 16 : index
    %c0_71 = arith.constant 0 : index
    %51 = vector.load %arg11[%c0_69, %c16_70, %c0_71] : memref<10x33x128xbf16, #tpu.memory_space<vmem>>, vector<8x16x128xbf16>
    %c0_72 = arith.constant 0 : index
    %c0_73 = arith.constant 0 : index
    %c128_74 = arith.constant 128 : index
    %52 = vector.load %arg12[%c0_72, %c0_73, %c128_74] : memref<10x16x1152xbf16, #tpu.memory_space<vmem>>, vector<8x16x128xbf16>
    tpu.vector_store %arg12[%c0_72, %c0_73, %c128_74], %51 {strides = array<i32>} : memref<10x16x1152xbf16, #tpu.memory_space<vmem>>, vector<8x16x128xbf16>,
    %c0_75 = arith.constant 0 : index
    %c17_76 = arith.constant 17 : index
    %c0_77 = arith.constant 0 : index
    %53 = vector.load %arg11[%c0_75, %c17_76, %c0_77] : memref<10x33x128xbf16, #tpu.memory_space<vmem>>, vector<8x16x128xbf16>
    %c0_78 = arith.constant 0 : index
    %c0_79 = arith.constant 0 : index
    %c256_80 = arith.constant 256 : index
    %54 = vector.load %arg12[%c0_78, %c0_79, %c256_80] : memref<10x16x1152xbf16, #tpu.memory_space<vmem>>, vector<8x16x128xbf16>
    tpu.vector_store %arg12[%c0_78, %c0_79, %c256_80], %53 {strides = array<i32>} : memref<10x16x1152xbf16, #tpu.memory_space<vmem>>, vector<8x16x128xbf16>,
    %c1_81 = arith.constant 1 : index
    %c15_82 = arith.constant 15 : index
    %c0_83 = arith.constant 0 : index
    %55 = vector.load %arg11[%c1_81, %c15_82, %c0_83] : memref<10x33x128xbf16, #tpu.memory_space<vmem>>, vector<8x16x128xbf16>
    %c0_84 = arith.constant 0 : index
    %c0_85 = arith.constant 0 : index
    %c384_86 = arith.constant 384 : index
    %56 = vector.load %arg12[%c0_84, %c0_85, %c384_86] : memref<10x16x1152xbf16, #tpu.memory_space<vmem>>, vector<8x16x128xbf16>
    tpu.vector_store %arg12[%c0_84, %c0_85, %c384_86], %55 {strides = array<i32>} : memref<10x16x1152xbf16, #tpu.memory_space<vmem>>, vector<8x16x128xbf16>,
    %c1_87 = arith.constant 1 : index
    %c16_88 = arith.constant 16 : index
    %c0_89 = arith.constant 0 : index
    %57 = vector.load %arg11[%c1_87, %c16_88, %c0_89] : memref<10x33x128xbf16, #tpu.memory_space<vmem>>, vector<8x16x128xbf16>
    %c0_90 = arith.constant 0 : index
    %c0_91 = arith.constant 0 : index
    %c512_92 = arith.constant 512 : index
    %58 = vector.load %arg12[%c0_90, %c0_91, %c512_92] : memref<10x16x1152xbf16, #tpu.memory_space<vmem>>, vector<8x16x128xbf16>
    tpu.vector_store %arg12[%c0_90, %c0_91, %c512_92], %57 {strides = array<i32>} : memref<10x16x1152xbf16, #tpu.memory_space<vmem>>, vector<8x16x128xbf16>,
    %c1_93 = arith.constant 1 : index
    %c17_94 = arith.constant 17 : index
    %c0_95 = arith.constant 0 : index
    %59 = vector.load %arg11[%c1_93, %c17_94, %c0_95] : memref<10x33x128xbf16, #tpu.memory_space<vmem>>, vector<8x16x128xbf16>
    %c0_96 = arith.constant 0 : index
    %c0_97 = arith.constant 0 : index
    %c640_98 = arith.constant 640 : index
    %60 = vector.load %arg12[%c0_96, %c0_97, %c640_98] : memref<10x16x1152xbf16, #tpu.memory_space<vmem>>, vector<8x16x128xbf16>
    tpu.vector_store %arg12[%c0_96, %c0_97, %c640_98], %59 {strides = array<i32>} : memref<10x16x1152xbf16, #tpu.memory_space<vmem>>, vector<8x16x128xbf16>,
    %c2_99 = arith.constant 2 : index
    %c15_100 = arith.constant 15 : index
    %c0_101 = arith.constant 0 : index
    %61 = vector.load %arg11[%c2_99, %c15_100, %c0_101] : memref<10x33x128xbf16, #tpu.memory_space<vmem>>, vector<8x16x128xbf16>
    %c0_102 = arith.constant 0 : index
    %c0_103 = arith.constant 0 : index
    %c768_104 = arith.constant 768 : index
    %62 = vector.load %arg12[%c0_102, %c0_103, %c768_104] : memref<10x16x1152xbf16, #tpu.memory_space<vmem>>, vector<8x16x128xbf16>
    tpu.vector_store %arg12[%c0_102, %c0_103, %c768_104], %61 {strides = array<i32>} : memref<10x16x1152xbf16, #tpu.memory_space<vmem>>, vector<8x16x128xbf16>,
    %c2_105 = arith.constant 2 : index
    %c16_106 = arith.constant 16 : index
    %c0_107 = arith.constant 0 : index
    %63 = vector.load %arg11[%c2_105, %c16_106, %c0_107] : memref<10x33x128xbf16, #tpu.memory_space<vmem>>, vector<8x16x128xbf16>
    %c0_108 = arith.constant 0 : index
    %c0_109 = arith.constant 0 : index
    %c896_110 = arith.constant 896 : index
    %64 = vector.load %arg12[%c0_108, %c0_109, %c896_110] : memref<10x16x1152xbf16, #tpu.memory_space<vmem>>, vector<8x16x128xbf16>
    tpu.vector_store %arg12[%c0_108, %c0_109, %c896_110], %63 {strides = array<i32>} : memref<10x16x1152xbf16, #tpu.memory_space<vmem>>, vector<8x16x128xbf16>,
    %c2_111 = arith.constant 2 : index
    %c17_112 = arith.constant 17 : index
    %c0_113 = arith.constant 0 : index
    %65 = vector.load %arg11[%c2_111, %c17_112, %c0_113] : memref<10x33x128xbf16, #tpu.memory_space<vmem>>, vector<8x16x128xbf16>
    %c0_114 = arith.constant 0 : index
    %c0_115 = arith.constant 0 : index
    %c1024_116 = arith.constant 1024 : index
    %66 = vector.load %arg12[%c0_114, %c0_115, %c1024_116] : memref<10x16x1152xbf16, #tpu.memory_space<vmem>>, vector<8x16x128xbf16>
    tpu.vector_store %arg12[%c0_114, %c0_115, %c1024_116], %65 {strides = array<i32>} : memref<10x16x1152xbf16, #tpu.memory_space<vmem>>, vector<8x16x128xbf16>,
    %c0_117 = arith.constant 0 : index
    %c0_118 = arith.constant 0 : index
    %c0_119 = arith.constant 0 : index
    %67 = vector.load %arg12[%c0_117, %c0_118, %c0_119] : memref<10x16x1152xbf16, #tpu.memory_space<vmem>>, vector<8x16x1152xbf16>
    %68 = vector.shape_cast %67 : vector<8x16x1152xbf16> to vector<128x1152xbf16>
    %c0_120 = arith.constant 0 : index
    %c0_121 = arith.constant 0 : index
    %69 = vector.load %arg4[%c0_120, %c0_121] : memref<1152x128xbf16, #tpu.memory_space<vmem>>, vector<1152x128xbf16>
    %cst_122 = arith.constant dense<0.000000e+00> : vector<128x128xf32>
    %70 = tpu.matmul %68, %69, %cst_122 {dimension_numbers = #tpu.dot_dimension_numbers<[1], [0], [0], [1], [0, 0, 1, 1], [], []>} : vector<128x1152xbf16>, vector<1152x128xbf16>, vector<128x128xf32> -> vector<128x128xf32>
    %c0_123 = arith.constant 0 : index
    %c0_124 = arith.constant 0 : index
    %71 = vector.load %arg7[%c0_123, %c0_124] : memref<1x128xf32, #tpu.memory_space<vmem>>, vector<1x128xf32>
    %72 = vector.broadcast %71 : vector<1x128xf32> to vector<128x128xf32>
    %73 = arith.mulf %70, %72 : vector<128x128xf32>
    %c0_125 = arith.constant 0 : index
    %c0_126 = arith.constant 0 : index
    %74 = vector.load %arg8[%c0_125, %c0_126] : memref<1x128xf32, #tpu.memory_space<vmem>>, vector<1x128xf32>
    %75 = vector.broadcast %74 : vector<1x128xf32> to vector<128x128xf32>
    %76 = arith.addf %73, %75 : vector<128x128xf32>
    %c8_i32_127 = arith.constant 8 : i32
    %77 = arith.muli %arg1, %c8_i32_127 : i32
    %c2_i32 = arith.constant 2 : i32
    %78 = arith.addi %77, %c2_i32 : i32
    %c0_128 = arith.constant 0 : index
    %79 = arith.index_cast %78 : i32 to index
    %c0_129 = arith.constant 0 : index
    %c0_130 = arith.constant 0 : index
    %80 = vector.load %arg2[%c0_128, %79, %c0_129, %c0_130] : memref<1x20x16x128xf32, #tpu.memory_space<vmem>>, vector<1x8x16x128xf32>
    %81 = vector.shape_cast %80 : vector<1x8x16x128xf32> to vector<8x16x128xf32>
    %82 = vector.shape_cast %76 : vector<128x128xf32> to vector<8x16x128xf32>
    %83 = arith.addf %82, %81 : vector<8x16x128xf32>
    %cst_131 = arith.constant 0.000000e+00 : f32
    %84 = vector.broadcast %cst_131 : f32 to vector<8x16x128xf32>
    %85 = arith.maximumf %83, %84 : vector<8x16x128xf32>
    %c0_132 = arith.constant 0 : index
    %c0_133 = arith.constant 0 : index
    %c0_134 = arith.constant 0 : index
    %c0_135 = arith.constant 0 : index
    %86 = vector.load %arg9[%c0_132, %c0_133, %c0_134, %c0_135] : memref<1x8x16x128xf32, #tpu.memory_space<vmem>>, vector<1x8x16x128xf32>
    %87 = vector.shape_cast %86 : vector<1x8x16x128xf32> to vector<8x16x128xf32>
    %88 = vector.shape_cast %85 : vector<8x16x128xf32> to vector<1x8x16x128xf32>
    tpu.vector_store %arg9[%c0_132, %c0_133, %c0_134, %c0_135], %88 {strides = array<i32>} : memref<1x8x16x128xf32, #tpu.memory_space<vmem>>, vector<1x8x16x128xf32>,
    return
  }
  func.func @transform_0(%arg0: i32, %arg1: i32) -> (i32, i32, i32, i32) {
    %c0_i32 = arith.constant 0 : i32
    %c0_i32_0 = arith.constant 0 : i32
    %c0_i32_1 = arith.constant 0 : i32
    %c0_i32_2 = arith.constant 0 : i32
    return %arg0, %c0_i32, %c0_i32_0, %c0_i32_1 : i32, i32, i32, i32
  }
  func.func @transform_1(%arg0: i32, %arg1: i32) -> (i32, i32) {
    %c0_i32 = arith.constant 0 : i32
    %c0_i32_0 = arith.constant 0 : i32
    %c0_i32_1 = arith.constant 0 : i32
    return %c0_i32, %c0_i32_0 : i32, i32
  }
  func.func @transform_2(%arg0: i32, %arg1: i32) -> (i32, i32) {
    %c0_i32 = arith.constant 0 : i32
    %c0_i32_0 = arith.constant 0 : i32
    %c0_i32_1 = arith.constant 0 : i32
    return %c0_i32, %c0_i32_0 : i32, i32
  }
  func.func @transform_3(%arg0: i32, %arg1: i32) -> (i32, i32) {
    %c0_i32 = arith.constant 0 : i32
    %c0_i32_0 = arith.constant 0 : i32
    %c0_i32_1 = arith.constant 0 : i32
    return %c0_i32, %c0_i32_0 : i32, i32
  }
  func.func @transform_4(%arg0: i32, %arg1: i32) -> (i32, i32) {
    %c0_i32 = arith.constant 0 : i32
    %c0_i32_0 = arith.constant 0 : i32
    %c0_i32_1 = arith.constant 0 : i32
    return %c0_i32, %c0_i32_0 : i32, i32
  }
  func.func @transform_5(%arg0: i32, %arg1: i32) -> (i32, i32) {
    %c0_i32 = arith.constant 0 : i32
    %c0_i32_0 = arith.constant 0 : i32
    %c0_i32_1 = arith.constant 0 : i32
    return %c0_i32, %c0_i32_0 : i32, i32
  }
  func.func @transform_6(%arg0: i32, %arg1: i32) -> (i32, i32) {
    %c0_i32 = arith.constant 0 : i32
    %c0_i32_0 = arith.constant 0 : i32
    %c0_i32_1 = arith.constant 0 : i32
    return %c0_i32, %c0_i32_0 : i32, i32
  }
  func.func @transform_7(%arg0: i32, %arg1: i32) -> (i32, i32, i32, i32) {
    %c0_i32 = arith.constant 0 : i32
    %c0_i32_0 = arith.constant 0 : i32
    %c0_i32_1 = arith.constant 0 : i32
    return %arg0, %arg1, %c0_i32, %c0_i32_0 : i32, i32, i32, i32
  }
}

</mosaic_0001>

<bundles_post_ra>
// kernel: tpu_custom_call.1
= control target key start
LH: loop header
LB: loop body
LE: loop exit
PB: predicated region body
PF: predicated region fallthrough
CT: control target
= control target key end

     0   :  { %s11008_s0 = inlined_call_operand.hbm [shape: f32[2,20,16,128], index: 0, kind: input, shape index: {}]   ;;  %s11009_s1 = inlined_call_operand.hbm [shape: bf16[1152,128], index: 1, kind: input, shape index: {}]   ;;  %s11010_s2 = inlined_call_operand.hbm [shape: bf16[1152,128], index: 2, kind: input, shape index: {}]   ;;  %s11011_s3 = inlined_call_operand.vmem [shape: f32[1,128], index: 3, kind: input, shape index: {}]   ;;  %s11012_s4 = inlined_call_operand.vmem [shape: f32[1,128], index: 4, kind: input, shape index: {}]   ;;  %s11013_s5 = inlined_call_operand.vmem [shape: f32[1,128], index: 5, kind: input, shape index: {}]   ;;  %s11014_s6 = inlined_call_operand.vmem [shape: f32[1,128], index: 6, kind: input, shape index: {}]   ;;  %s11015_s7 = inlined_call_operand.hbm [shape: f32[2,16,16,128], index: 7, kind: output, shape index: {}]  }
   0x1   :  { %11024 = sst [smem:[#allocation22_spill]] %s11009_s1 }
   0x2   :  { %11025 = sst [smem:[#allocation23_spill]] %s11010_s2 }
   0x3   :  { %11026 = sst [smem:[#allocation24_spill]] %s11013_s5 }
   0x4   :  { %11027 = sst [smem:[#allocation25_spill]] %s11014_s6 }
   0x5   :  { %11028 = sst [smem:[#allocation26_spill]] %s11015_s7 }
   0x6   :  { %12 = vsyncpa [#allocation6], 0 }
   0x7   :  { %14 = vsyncpa [#allocation6 + $0x1], 0 }
   0x8   :  { %15 = vsyncpa [#allocation9], 0 }
   0x9   :  { %16 = vsyncpa [#allocation7], 0 }
   0xa   :  { %18 = vsyncpa [#allocation7 + $0x1], 0  ;;  %s9658_s24 = smov 0   ;;  %s9660_s25 = smov 0  }
   0xb   :  { %s9662_s26 = smov 0   ;;  %s9664_s27 = smov 0  }
   0xc   :  { %s9666_s28 = smov 0   ;;  %s9668_s29 = smov 0  }
   0xd   :  { %s9670_s30 = smov 0   ;;  %s9672_s8 = smov 0  }
   0xe   :  { %s9674_s9 = smov 0   ;;  %s9676_s10 = smov 0  }
   0xf   :  { %s9678_s11 = smov 0  }
  0x10 LB: > { %11029 = sst [smem:[#allocation15_spill]] %s9565_s24  ;;  %s7540_s12 = sadd.s32 4294967295, %s9605_s11   ;;  %s9605_s11 = sphi %s9678_s11, %s24_s11   ;;  %s9601_s10 = sphi %s9676_s10, %s11068_s10   ;;  %s9597_s9 = sphi %s9674_s9, %s11067_s9   ;;  %s9593_s8 = sphi %s9672_s8, %s11066_s8   ;;  %s9589_s30 = sphi %s9670_s30, %s11057_s30   ;;  %s9585_s29 = sphi %s9668_s29, %s11065_s29   ;;  %s9581_s28 = sphi %s9666_s28, %s11064_s28   ;;  %s9577_s27 = sphi %s9664_s27, %s11063_s27   ;;  %s9573_s26 = sphi %s9662_s26, %s11062_s26   ;;  %s9569_s25 = sphi %s9660_s25, %s11061_s25   ;;  %s9565_s24 = sphi %s9658_s24, %s11060_s24  }
  0x11   : > { %11030 = sst [smem:[#allocation16_spill]] %s9593_s8  ;;  %s7541_s13 = sadd.s32 4294967294, %s9605_s11  }
  0x12   : > { %11031 = sst [smem:[#allocation17_spill]] %s9597_s9  ;;  %p56_p0 = scmp.ne.s32.totalorder %s9581_s28, %s9577_s27 }
  0x13   : > { %p9714_p1 = scmp.eq.s32.totalorder %s7540_s12, 0  ;;  %p207_p2 = scmp.ne.s32.totalorder %s9573_s26, %s9569_s25 }
  0x14   : > { %p208_p3 = scmp.eq.s32.totalorder %s7540_s12, 3  ;;  %p213_p5 = scmp.ne.s32.totalorder %s9569_s25, %s9565_s24 }
  0x15   : > { %p9722_p4 = por %p9714_p1, %p56_p0  ;;  %p214_p7 = scmp.eq.s32.totalorder %s7541_s13, 3 }
  0x16   : > { %p9728_p6 = por %p208_p3, %p207_p2  ;;  %p7542_p8 = scmp.ge.s32.totalorder %s9605_s11, 1 }
  0x17   : > { %p221_p9 = scmp.lt.s32.totalorder %s9605_s11, 5  ;;  %p9734_p10 = por %p214_p7, %p213_p5 }
  0x18   : > { %s11034_s16 = scalar_select %p9728_p6, 1, 0 }
  0x19   : > { %s11036_s17 = scalar_select %p9734_p10, 1, 0 }
  0x1a   : > { %11035 = sst [smem:[#allocation18_spill]] %s11034_s16  ;;  %p9738_p11 = pnand %p7542_p8, %p221_p9 }
  0x1b   : > { %11037 = sst [smem:[#allocation19_spill]] %s11036_s17  ;;  %s9607_s22 = smov [#allocation8]  }
  0x1c   : > { %s11039_s1 = sld [smem:[#allocation22_spill]]  ;;  %p9265_p12 = pneg %p9738_p11 }
  0x1d   : > { %s234_s23 = sshll.u32 %s9607_s22, 4  ;;  %s11040_s2 = sld [smem:[#allocation23_spill]]  ;;  %s235_s23 = int_to_ptr.vmem [resolvable:$true] %s234_s23 }
  0x1e   : > { %p9266_p13 = pnand %p9265_p12, %p9714_p1  ;;  %s9608_s19 = smov 64  }
  0x1f   : > { %s9609_s20 = smov 4   ;;  %s33_s17 = sadd.s32 1, %s9597_s9 }
  0x20   : > { %p34_p0 = scmp.ge.s32.totalorder %s33_s17, 2  ;;  %s36_s27 = sadd.s32 1, %s9601_s10 }
  0x21   : > { %s43_s12 = sadd.s32 1, %s9585_s29  ;;  %p50_p2 = scmp.ne.s32.totalorder %s9585_s29, %s9581_s28 }
  0x22   : > { %s232_s21 = sshll.u32 %s11039_s1, 4  ;;  %s9610_s1 = smov [#allocation10]   ;;  %s233_s21 = int_to_ptr.hbm [resolvable:$true] %s232_s21 }
  0x23   : > { %s246_s13 = sshll.u32 %s11040_s2, 4  ;;  %s248_s22 = sshll.u32 %s9610_s1, 4  ;;  %s247_s13 = int_to_ptr.hbm [resolvable:$true] %s246_s13  ;;  %s249_s22 = int_to_ptr.vmem [resolvable:$true] %s248_s22 }
  0x24   : > { %9268 = dma.hbm_to_vmem [thread:$0]  (!%p9266_p13), %s233_s21, 9216, %s235_s23, [#allocation9], %s9608_s19, %s9608_s19, %s9609_s20  }
  0x25   : > { %9271 = dma.hbm_to_vmem [thread:$0]  (!%p9266_p13), %s247_s13, 9216, %s249_s22, [#allocation9], %s9608_s19, %s9608_s19, %s9609_s20  }
  0x26   : > { %s11070_s17 = smov (%p34_p0, %s33_s17), 0  ;;  %s11072_s27 = smov (!%p34_p0, %s36_s27), %s9601_s10 }
  0x27   : > { %11041 = sst [smem:[#allocation20_spill]] %s11070_s17  ;;  %p51_p3 = scmp.eq.s32.totalorder %s9605_s11, 0 }
  0x28   : > { %s193_s21 = ssub.s32 %s9597_s9, %s11070_s17  ;;  %p38_p5 = scmp.ge.s32.totalorder %s11072_s27, 2 }
  0x29   : > { %s197_s1 = sadd.s32 1, %s9573_s26  ;;  %p9764_p7 = por %p51_p3, %p50_p2 }
  0x2a   : > { %p9282_p8 = scmp.lt.s32.totalorder %s9605_s11, 4  ;;  %s11074_s27 = smov (%p38_p5, %s11072_s27), 0 }
  0x2b   : > { %11043 = sst [smem:[#allocation21_spill]] %s11074_s27  ;;  %s274_s13 = sand.u32 1, %s9585_s29  }
  0x2c   : > { %s9251_s19 = smul.u32 320, %s9601_s10  ;;  %s40_s20 = ssub.s32 %s9601_s10, %s11074_s27 }
  0x2d   : > { %p41_p9 = scmp.eq.s32.totalorder %s40_s20, 0  ;;  %s194_s22 = sor.u32 %s193_s21, %s40_s20 }
  0x2e   : > { %p195_p12 = scmp.eq.s32.totalorder %s194_s22, 0  ;;  %s9250_s2 = smul.u32 320, %s274_s13 }
  0x2f   : > { %s9776_s17 = scalar_select %p41_p9, %s9585_s29, %s43_s12  }
  0x30   : > { %s9779_s9 = scalar_select %p195_p12, %s9573_s26, %s197_s1  }
  0x31   : > { %s283_s7 = scalar_lea.hbm %s11008_s0, %s9251_s19  ;;  %s278_s6 = scalar_lea.vmem [#allocation5], %s9250_s2 }
  0x32   : > { %s284_s8 = sshll.u32 %s283_s7, 4  ;;  %s286_s5 = sshll.u32 %s278_s6, 4  ;;  %s285_s8 = int_to_ptr.hbm [resolvable:$true] %s284_s8  ;;  %s287_s5 = int_to_ptr.vmem [resolvable:$true] %s286_s5 }
  0x33   : > { %p9273_p13 = pnand %p9282_p8, %p9764_p7  ;;  %s275_s27 = scalar_lea.sflag [#allocation6], %s274_s13 }
  0x34   : > { %s9611_s21 = smov 128   ;;  %s9612_s20 = smov 8  }
  0x35   : > { %9275 = dma.hbm_to_vmem [thread:$0]  (!%p9273_p13), %s285_s8, 5120, %s287_s5, %s275_s27, %s9611_s21, %s9611_s21, %s9612_s20  }
  0x36   : > { %298 = sbr.rel (%p9738_p11) target bundleno = 1415 (0x587), region = 48  ;;  %s300_s12 = sand.u32 (!%p9738_p11), 1, %s9581_s28  }
  0x37   : > { %s9791_s24 = smul.u32 (!%p9738_p11), 320, %s300_s12  ;;  %s301_s2 = scalar_lea.sflag (!%p9738_p11), [#allocation6], %s300_s12 }
  0x39   : > { %s304_s6 = scalar_lea.vmem (!%p9738_p11), [#allocation5], %s9791_s24 }
  0x3b   : > { %9552 = dma.done.wait (%p9722_p4), %s301_s2, 5120  }
  0x3c   : > { %9554 = vsyncadd (%p9722_p4), %s301_s2, 4294962176 }
  0x3d   : > { %9556 = dma.done.wait (%p9714_p1), [#allocation9], 18432  }
  0x3e   : > { %9558 = vsyncadd (%p9714_p1), [#allocation9], 4294948864  ;;  %s343_s5 = sand.u32 1, %s9569_s25   ;;  %p7551_p11 = scmp.ne.s32.totalorder %s9589_s30, 0 }
  0x3f   : > { %s7550_s7 = sshll.u32 %s343_s5, 7 }
  0x40   : > { %s9805_s8 = scalar_lea.vmem [#allocation11], %s7550_s7  ;;  %351 = sbr.rel (%p7551_p11) target bundleno = 158 (0x9e), region = 64 }
  0x45   : > { %v9613_v0 = vmov 0   ;;  %vm356_vm0 = vcmask 1040384   ;;  %vm357_vm1 = vsmask.f32 256  ;;  %v359_v2 = vld [vmem:[#allocation2 + $0x10] sm:$0x1] }
  0x46   : > { %353 = vst [vmem:[#allocation2 + $0x4] sm:$0xf] %v9613_v0  ;;  %vm9872_vm2 = vmand %vm356_vm0, %vm357_vm1  ;;  %v366_v3 = vld [vmem:[#allocation2 + $0x24] sm:$0x1]  ;;  %v373_v4 = vld [vmem:[#allocation2 + $0x38] sm:$0x1] }
  0x47   : > { %354 = vst [vmem:[#allocation2 + $0x8] sm:$0xf] %v9613_v0  ;;  %v360_v5 = vsel %vm9872_vm2, 0, %v359_v2  ;;  %v380_v6 = vld [vmem:[#allocation2 + $0x4c] sm:$0x1]  ;;  %v367_v7 = vsel %vm9872_vm2, 0, %v366_v3 }
  0x48   : > { %355 = vst [vmem:[#allocation2 + $0xc] sm:$0xf] %v9613_v0  ;;  %v387_v8 = vld [vmem:[#allocation2 + $0x60] sm:$0x1]  ;;  %v374_v9 = vsel %vm9872_vm2, 0, %v373_v4  ;;  %v381_v11 = vsel %vm9872_vm2, 0, %v380_v6 }
  0x49   : > { %363 = vst [vmem:[#allocation2 + $0x18] sm:$0xf] %v9613_v0  ;;  %v394_v10 = vld [vmem:[#allocation2 + $0x74] sm:$0x1]  ;;  %v401_v12 = vld [vmem:[#allocation2 + $0x88] sm:$0x1] }
  0x4a   : > { %364 = vst [vmem:[#allocation2 + $0x1c] sm:$0xf] %v9613_v0  ;;  %v388_v13 = vsel %vm9872_vm2, 0, %v387_v8  ;;  %v408_v14 = vld [vmem:[#allocation2 + $0x9c] sm:$0x1]  ;;  %v395_v15 = vsel %vm9872_vm2, 0, %v394_v10 }
  0x4b   : > { %365 = vst [vmem:[#allocation2 + $0x20] sm:$0xf] %v9613_v0  ;;  %v415_v16 = vld [vmem:[#allocation2 + $0xb0] sm:$0x1]  ;;  %v402_v17 = vsel %vm9872_vm2, 0, %v401_v12  ;;  %v409_v19 = vsel %vm9872_vm2, 0, %v408_v14 }
  0x4c   : > { %370 = vst [vmem:[#allocation2 + $0x2c] sm:$0xf] %v9613_v0  ;;  %v422_v18 = vld [vmem:[#allocation2 + $0xc4] sm:$0x1]  ;;  %v429_v20 = vld [vmem:[#allocation2 + $0xd8] sm:$0x1] }
  0x4d   : > { %371 = vst [vmem:[#allocation2 + $0x30] sm:$0xf] %v9613_v0  ;;  %v416_v21 = vsel %vm9872_vm2, 0, %v415_v16  ;;  %v436_v22 = vld [vmem:[#allocation2 + $0xec] sm:$0x1]  ;;  %v423_v23 = vsel %vm9872_vm2, 0, %v422_v18 }
  0x4e   : > { %372 = vst [vmem:[#allocation2 + $0x34] sm:$0xf] %v9613_v0  ;;  %v443_v24 = vld [vmem:[#allocation3 + $0x10] sm:$0x1]  ;;  %v430_v25 = vsel %vm9872_vm2, 0, %v429_v20  ;;  %v437_v27 = vsel %vm9872_vm2, 0, %v436_v22 }
  0x4f   : > { %377 = vst [vmem:[#allocation2 + $0x40] sm:$0xf] %v9613_v0  ;;  %v450_v26 = vld [vmem:[#allocation3 + $0x24] sm:$0x1]  ;;  %v457_v28 = vld [vmem:[#allocation3 + $0x38] sm:$0x1] }
  0x50   : > { %378 = vst [vmem:[#allocation2 + $0x44] sm:$0xf] %v9613_v0  ;;  %v444_v29 = vsel %vm9872_vm2, 0, %v443_v24  ;;  %v464_v30 = vld [vmem:[#allocation3 + $0x4c] sm:$0x1]  ;;  %v451_v31 = vsel %vm9872_vm2, 0, %v450_v26 }
  0x51   : > { %379 = vst [vmem:[#allocation2 + $0x48] sm:$0xf] %v9613_v0  ;;  %v471_v32 = vld [vmem:[#allocation3 + $0x60] sm:$0x1]  ;;  %v458_v33 = vsel %vm9872_vm2, 0, %v457_v28  ;;  %v465_v35 = vsel %vm9872_vm2, 0, %v464_v30 }
  0x52   : > { %384 = vst [vmem:[#allocation2 + $0x54] sm:$0xf] %v9613_v0  ;;  %v478_v34 = vld [vmem:[#allocation3 + $0x74] sm:$0x1]  ;;  %v485_v36 = vld [vmem:[#allocation3 + $0x88] sm:$0x1] }
  0x53   : > { %385 = vst [vmem:[#allocation2 + $0x58] sm:$0xf] %v9613_v0  ;;  %v472_v37 = vsel %vm9872_vm2, 0, %v471_v32  ;;  %v492_v38 = vld [vmem:[#allocation3 + $0x9c] sm:$0x1]  ;;  %v479_v39 = vsel %vm9872_vm2, 0, %v478_v34 }
  0x54   : > { %386 = vst [vmem:[#allocation2 + $0x5c] sm:$0xf] %v9613_v0  ;;  %v499_v40 = vld [vmem:[#allocation3 + $0xb0] sm:$0x1]  ;;  %v486_v41 = vsel %vm9872_vm2, 0, %v485_v36  ;;  %v493_v43 = vsel %vm9872_vm2, 0, %v492_v38 }
  0x55   : > { %391 = vst [vmem:[#allocation2 + $0x68] sm:$0xf] %v9613_v0  ;;  %v506_v42 = vld [vmem:[#allocation3 + $0xc4] sm:$0x1]  ;;  %v500_v44 = vsel %vm9872_vm2, 0, %v499_v40 }
  0x56   : > { %392 = vst [vmem:[#allocation2 + $0x6c] sm:$0xf] %v9613_v0  ;;  %v507_v45 = vsel %vm9872_vm2, 0, %v506_v42 }
  0x57   : > { %393 = vst [vmem:[#allocation2 + $0x70] sm:$0xf] %v9613_v0 }
  0x58   : > { %398 = vst [vmem:[#allocation2 + $0x7c] sm:$0xf] %v9613_v0 }
  0x59   : > { %399 = vst [vmem:[#allocation2 + $0x80] sm:$0xf] %v9613_v0 }
  0x5a   : > { %400 = vst [vmem:[#allocation2 + $0x84] sm:$0xf] %v9613_v0 }
  0x5b   : > { %405 = vst [vmem:[#allocation2 + $0x90] sm:$0xf] %v9613_v0 }
  0x5c   : > { %406 = vst [vmem:[#allocation2 + $0x94] sm:$0xf] %v9613_v0 }
  0x5d   : > { %407 = vst [vmem:[#allocation2 + $0x98] sm:$0xf] %v9613_v0 }
  0x5e   : > { %412 = vst [vmem:[#allocation2 + $0xa4] sm:$0xf] %v9613_v0 }
  0x5f   : > { %413 = vst [vmem:[#allocation2 + $0xa8] sm:$0xf] %v9613_v0 }
  0x60   : > { %414 = vst [vmem:[#allocation2 + $0xac] sm:$0xf] %v9613_v0 }
  0x61   : > { %419 = vst [vmem:[#allocation2 + $0xb8] sm:$0xf] %v9613_v0 }
  0x62   : > { %420 = vst [vmem:[#allocation2 + $0xbc] sm:$0xf] %v9613_v0 }
  0x63   : > { %421 = vst [vmem:[#allocation2 + $0xc0] sm:$0xf] %v9613_v0 }
  0x64   : > { %426 = vst [vmem:[#allocation2 + $0xcc] sm:$0xf] %v9613_v0 }
  0x65   : > { %427 = vst [vmem:[#allocation2 + $0xd0] sm:$0xf] %v9613_v0 }
  0x66   : > { %428 = vst [vmem:[#allocation2 + $0xd4] sm:$0xf] %v9613_v0 }
  0x67   : > { %433 = vst [vmem:[#allocation2 + $0xe0] sm:$0xf] %v9613_v0 }
  0x68   : > { %434 = vst [vmem:[#allocation2 + $0xe4] sm:$0xf] %v9613_v0 }
  0x69   : > { %435 = vst [vmem:[#allocation2 + $0xe8] sm:$0xf] %v9613_v0 }
  0x6a   : > { %440 = vst [vmem:[#allocation3 + $0x4] sm:$0xf] %v9613_v0 }
  0x6b   : > { %441 = vst [vmem:[#allocation3 + $0x8] sm:$0xf] %v9613_v0 }
  0x6c   : > { %442 = vst [vmem:[#allocation3 + $0xc] sm:$0xf] %v9613_v0 }
  0x6d   : > { %447 = vst [vmem:[#allocation3 + $0x18] sm:$0xf] %v9613_v0 }
  0x6e   : > { %448 = vst [vmem:[#allocation3 + $0x1c] sm:$0xf] %v9613_v0 }
  0x6f   : > { %449 = vst [vmem:[#allocation3 + $0x20] sm:$0xf] %v9613_v0 }
  0x70   : > { %454 = vst [vmem:[#allocation3 + $0x2c] sm:$0xf] %v9613_v0 }
  0x71   : > { %455 = vst [vmem:[#allocation3 + $0x30] sm:$0xf] %v9613_v0 }
  0x72   : > { %456 = vst [vmem:[#allocation3 + $0x34] sm:$0xf] %v9613_v0 }
  0x73   : > { %461 = vst [vmem:[#allocation3 + $0x40] sm:$0xf] %v9613_v0 }
  0x74   : > { %462 = vst [vmem:[#allocation3 + $0x44] sm:$0xf] %v9613_v0 }
  0x75   : > { %463 = vst [vmem:[#allocation3 + $0x48] sm:$0xf] %v9613_v0 }
  0x76   : > { %468 = vst [vmem:[#allocation3 + $0x54] sm:$0xf] %v9613_v0 }
  0x77   : > { %469 = vst [vmem:[#allocation3 + $0x58] sm:$0xf] %v9613_v0 }
  0x78   : > { %470 = vst [vmem:[#allocation3 + $0x5c] sm:$0xf] %v9613_v0 }
  0x79   : > { %475 = vst [vmem:[#allocation3 + $0x68] sm:$0xf] %v9613_v0 }
  0x7a   : > { %476 = vst [vmem:[#allocation3 + $0x6c] sm:$0xf] %v9613_v0 }
  0x7b   : > { %477 = vst [vmem:[#allocation3 + $0x70] sm:$0xf] %v9613_v0 }
  0x7c   : > { %482 = vst [vmem:[#allocation3 + $0x7c] sm:$0xf] %v9613_v0 }
  0x7d   : > { %483 = vst [vmem:[#allocation3 + $0x80] sm:$0xf] %v9613_v0 }
  0x7e   : > { %484 = vst [vmem:[#allocation3 + $0x84] sm:$0xf] %v9613_v0 }
  0x7f   : > { %489 = vst [vmem:[#allocation3 + $0x90] sm:$0xf] %v9613_v0 }
  0x80   : > { %490 = vst [vmem:[#allocation3 + $0x94] sm:$0xf] %v9613_v0 }
  0x81   : > { %491 = vst [vmem:[#allocation3 + $0x98] sm:$0xf] %v9613_v0 }
  0x82   : > { %496 = vst [vmem:[#allocation3 + $0xa4] sm:$0xf] %v9613_v0 }
  0x83   : > { %497 = vst [vmem:[#allocation3 + $0xa8] sm:$0xf] %v9613_v0 }
  0x84   : > { %498 = vst [vmem:[#allocation3 + $0xac] sm:$0xf] %v9613_v0 }
  0x85   : > { %503 = vst [vmem:[#allocation3 + $0xb8] sm:$0xf] %v9613_v0 }
  0x86   : > { %504 = vst [vmem:[#allocation3 + $0xbc] sm:$0xf] %v9613_v0 }
  0x87   : > { %505 = vst [vmem:[#allocation3 + $0xc0] sm:$0xf] %v9613_v0 }
  0x88   : > { %361 = vst [vmem:[#allocation2 + $0x10] sm:$0x1] %v360_v5 }
  0x89   : > { %368 = vst [vmem:[#allocation2 + $0x24] sm:$0x1] %v367_v7 }
  0x8a   : > { %375 = vst [vmem:[#allocation2 + $0x38] sm:$0x1] %v374_v9 }
  0x8b   : > { %382 = vst [vmem:[#allocation2 + $0x4c] sm:$0x1] %v381_v11 }
  0x8c   : > { %389 = vst [vmem:[#allocation2 + $0x60] sm:$0x1] %v388_v13 }
  0x8d   : > { %396 = vst [vmem:[#allocation2 + $0x74] sm:$0x1] %v395_v15 }
  0x8e   : > { %403 = vst [vmem:[#allocation2 + $0x88] sm:$0x1] %v402_v17 }
  0x8f   : > { %410 = vst [vmem:[#allocation2 + $0x9c] sm:$0x1] %v409_v19 }
  0x90   : > { %417 = vst [vmem:[#allocation2 + $0xb0] sm:$0x1] %v416_v21 }
  0x91   : > { %424 = vst [vmem:[#allocation2 + $0xc4] sm:$0x1] %v423_v23 }
  0x92   : > { %431 = vst [vmem:[#allocation2 + $0xd8] sm:$0x1] %v430_v25 }
  0x93   : > { %438 = vst [vmem:[#allocation2 + $0xec] sm:$0x1] %v437_v27 }
  0x94   : > { %445 = vst [vmem:[#allocation3 + $0x10] sm:$0x1] %v444_v29 }
  0x95   : > { %452 = vst [vmem:[#allocation3 + $0x24] sm:$0x1] %v451_v31 }
  0x96   : > { %459 = vst [vmem:[#allocation3 + $0x38] sm:$0x1] %v458_v33 }
  0x97   : > { %466 = vst [vmem:[#allocation3 + $0x4c] sm:$0x1] %v465_v35 }
  0x98   : > { %473 = vst [vmem:[#allocation3 + $0x60] sm:$0x1] %v472_v37 }
  0x99   : > { %480 = vst [vmem:[#allocation3 + $0x74] sm:$0x1] %v479_v39 }
  0x9a   : > { %487 = vst [vmem:[#allocation3 + $0x88] sm:$0x1] %v486_v41 }
  0x9b   : > { %494 = vst [vmem:[#allocation3 + $0x9c] sm:$0x1] %v493_v43 }
  0x9c   : > { %501 = vst [vmem:[#allocation3 + $0xb0] sm:$0x1] %v500_v44 }
  0x9d   : > { %508 = vst [vmem:[#allocation3 + $0xc4] sm:$0x1] %v507_v45 }
  0x9e PF: > { %v8957_v46 = vld [vmem:[#allocation8 + $0x38] sm:$0xff]  ;;  %s8859_s14 = sshll.u32 %s9589_s30, 7  ;;  %v8956_v48 = vld [vmem:[#allocation8 + $0x30] sm:$0xff]  ;;  %v8955_v50 = vld [vmem:[#allocation8 + $0x28] sm:$0xff]  ;;  %vm614_vm3 = vsmask.f32 256 }
  0x9f   : > { %v8965_v47 = vld [vmem:[#allocation8 + $0x78] sm:$0xff]  ;;  %3648 = vmatpush.bf16.msra.mxu0 %v8957_v46  ;;  %v8964_v49 = vld [vmem:[#allocation8 + $0x70] sm:$0xff]  ;;  %s9927_s15 = scalar_lea.vmem %s304_s6, %s8859_s14 [#allocation5]  ;;  %v8963_v53 = vld [vmem:[#allocation8 + $0x68] sm:$0xff]  ;;  %vm615_vm4 = vsmask.f32 4368 }
  0xa0   : > { %3707 = vmatpush.bf16.msra.mxu1 %v8965_v47  ;;  %9234 = vmatpush.bf16.msra.mxu3 %v8965_v47  ;;  %v512_v51 = vld [vmem:[%s9927_s15] sm:$0xff]  ;;  %v513_v52 = vld [vmem:[%s9927_s15 + $0x8] sm:$0xff]  ;;  %v526_v56 = vld [vmem:[%s9927_s15 + $0x70] sm:$0xff]  ;;  %vm947_vm6 = vsmask.f32 3328 }
  0xa1   : > { %v9171_v54 = vpack.c.bf16 %v513_v52, %v512_v51  ;;  %v584_v55 = vld [vmem:[#allocation2 + $0x4] sm:$0x8]  ;;  %v527_v57 = vld [vmem:[%s9927_s15 + $0x78] sm:$0xff]  ;;  %v550_v58 = vpack.c.bf16 %v526_v56, %v526_v56  ;;  %v514_v60 = vld [vmem:[%s9927_s15 + $0x10] sm:$0xff]  ;;  %vm948_vm7 = vsmask.f32 7440 }
  0xa2   : > { %v9933_v59 = vld [vmem:[#allocation8 + $0xb8] sm:$0xff]  ;;  %v8954_v61 = vld [vmem:[#allocation8 + $0x20] sm:$0xff]  ;;  %v551_v62 = vpack.c.bf16 %v527_v57, %v527_v57  ;;  %v515_v63 = vld [vmem:[%s9927_s15 + $0x18] sm:$0xff]  ;;  %v538_v0 = vpack.c.bf16 %v514_v60, %v514_v60  ;;  %v618_v4 = vshrl.u32 %v584_v55, 16 }
  0xa3   : > { %3649 = vmatpush.bf16.msra.mxu0 %v8956_v48  ;;  %9223 = vst [vmem:[#allocation2 + $0x8] sm:$0xff] %v9171_v54   ;;  %v587_v1 = vld [vmem:[#allocation2 + $0x18] sm:$0x8]  ;;  %v528_v2 = vld [vmem:[%s9927_s15 + $0x80] sm:$0xff]  ;;  %v8962_v3 = vld [vmem:[#allocation8 + $0x60] sm:$0xff]  ;;  %9242 = vmatpush.bf16.msra.mxu2 %v9933_v59  ;;  %v539_v5 = vpack.c.bf16 %v515_v63, %v515_v63 }
  0xa4   : > { %3708 = vmatpush.bf16.msra.mxu1 %v8964_v49  ;;  %9235 = vmatpush.bf16.msra.mxu3 %v8964_v49  ;;  %574 = vst [vmem:[#allocation2 + $0x94] sm:$0xf] %v550_v58  ;;  %v529_v6 = vld [vmem:[%s9927_s15 + $0x88] sm:$0xff]  ;;  %v516_v7 = vld [vmem:[%s9927_s15 + $0x20] sm:$0xff]  ;;  %v640_v8 = vshrl.u32 %v587_v1, 16  ;;  %v7554_v14 = vrot.slane %v618_v4, 11  ;;  %vm9946_vm5 = vmor %vm614_vm3, %vm615_vm4 }
  0xa5   : > { %575 = vst [vmem:[#allocation2 + $0x98] sm:$0xf] %v551_v62  ;;  %v9191_v9 = vpack.c.bf16 %v529_v6, %v528_v2  ;;  %v517_v10 = vld [vmem:[%s9927_s15 + $0x28] sm:$0xff]  ;;  %v8953_v12 = vld [vmem:[#allocation8 + $0x18] sm:$0xff]  ;;  %v8952_v19 = vld [vmem:[#allocation8 + $0x10] sm:$0xff] }
  0xa6   : > { %562 = vst [vmem:[#allocation2 + $0x1c] sm:$0xf] %v538_v0  ;;  %v9176_v11 = vpack.c.bf16 %v517_v10, %v516_v7  ;;  %v8961_v13 = vld [vmem:[#allocation8 + $0x58] sm:$0xff]  ;;  %v9942_v15 = vrot.slane %v640_v8, 11  ;;  %v8960_v20 = vld [vmem:[#allocation8 + $0x50] sm:$0xff]  ;;  %v8951_v35 = vld [vmem:[#allocation8 + $0x8] sm:$0xff] }
  0xa7   : > { %3650 = vmatpush.bf16.msra.mxu0 %v8955_v50  ;;  %563 = vst [vmem:[#allocation2 + $0x20] sm:$0xf] %v539_v5  ;;  %v8959_v36 = vld [vmem:[#allocation8 + $0x48] sm:$0xff]  ;;  %v9954_v49 = vld [vmem:[#allocation8 + $0xb0] sm:$0xff]  ;;  %v8950_v52 = vld [vmem:[#allocation8] sm:$0xff] }
  0xa8   : > { %3709 = vmatpush.bf16.msra.mxu1 %v8963_v53  ;;  %9236 = vmatpush.bf16.msra.mxu3 %v8963_v53  ;;  %9227 = vst [vmem:[#allocation2 + $0xa8] sm:$0xff] %v9191_v9   ;;  %v8958_v53 = vld [vmem:[#allocation8 + $0x40] sm:$0xff]  ;;  %v9957_v55 = vld [vmem:[#allocation8 + $0xa8] sm:$0xff]  ;;  %v8981_v2 = vld [vmem:[#allocation8 + $0xf8] sm:$0xff] }
  0xa9   : > { %9224 = vst [vmem:[#allocation2 + $0x30] sm:$0xff] %v9176_v11   ;;  %9243 = vmatpush.bf16.msra.mxu2 %v9954_v49  ;;  %v530_v63 = vld [vmem:[%s9927_s15 + $0x90] sm:$0xff]  ;;  %v590_v1 = vld [vmem:[#allocation2 + $0x2c] sm:$0x8]  ;;  %v531_v9 = vld [vmem:[%s9927_s15 + $0x98] sm:$0xff] }
  0xaa   : > { %v585_v16 = vld [vmem:[#allocation2 + $0x8] sm:$0xf]  ;;  %v586_v17 = vld [vmem:[#allocation2 + $0xc] sm:$0xf]  ;;  %v662_v7 = vshrl.u32 %v590_v1, 16  ;;  %vm10004_vm8 = vmor %vm947_vm6, %vm948_vm7 }
  0xab   : > { %3651 = vmatpush.bf16.msra.mxu0 %v8954_v61  ;;  %v877_v18 = vld [vmem:[#allocation2 + $0x8] sm:$0xf]  ;;  %v623_v21 = vshrl.u32 %v585_v16, 16  ;;  %v626_v22 = vshll.u32 %v585_v16, 16  ;;  %v632_v23 = vshrl.u32 %v586_v17, 16  ;;  %v635_v24 = vshll.u32 %v586_v17, 16 }
  0xac   : > { %3710 = vmatpush.bf16.msra.mxu1 %v8962_v3  ;;  %9237 = vmatpush.bf16.msra.mxu3 %v8962_v3  ;;  %v878_v25 = vld [vmem:[#allocation2 + $0xc] sm:$0xf]  ;;  %897 = vst [vmem:[#allocation4 + $0x4] sm:$0xf] %v877_v18  ;;  %v891_v26 = vld [vmem:[#allocation2 + $0x94] sm:$0xf] }
  0xad   : > { %v892_v27 = vld [vmem:[#allocation2 + $0x98] sm:$0xf]  ;;  %v625_v28 = vrot.slane %v623_v21, 7  ;;  %v634_v29 = vrot.slane %v632_v23, 7  ;;  %898 = vst [vmem:[#allocation4 + $0x28] sm:$0xf] %v878_v25  ;;  %9244 = vmatpush.bf16.msra.mxu2 %v9957_v55 }
  0xae   : > { %v588_v30 = vld [vmem:[#allocation2 + $0x1c] sm:$0xf]  ;;  %911 = vst [vmem:[#allocation4 + $0x1fc] sm:$0xf] %v891_v26  ;;  %v589_v32 = vld [vmem:[#allocation2 + $0x20] sm:$0xf] }
  0xaf   : > { %3652 = vmatpush.bf16.msra.mxu0 %v8953_v12  ;;  %v645_v33 = vshrl.u32 %v588_v30, 16  ;;  %v648_v34 = vshll.u32 %v588_v30, 16  ;;  %v628_v37 = vor.u32 %v626_v22, %v625_v28  ;;  %v630_v38 = vrot.slane %v625_v28, 4  ;;  %912 = vst [vmem:[#allocation4 + $0x220] sm:$0xf] %v892_v27  ;;  %v9966_v3 = vld [vmem:[#allocation8 + $0xa0] sm:$0xff] }
  0xb0   : > { %3711 = vmatpush.bf16.msra.mxu1 %v8961_v13  ;;  %9238 = vmatpush.bf16.msra.mxu3 %v8961_v13  ;;  %v637_v39 = vor.u32 %v635_v24, %v634_v29  ;;  %v654_v40 = vshrl.u32 %v589_v32, 16  ;;  %v879_v41 = vld [vmem:[#allocation2 + $0x1c] sm:$0xf]  ;;  %v657_v43 = vshll.u32 %v589_v32, 16  ;;  %v880_v44 = vld [vmem:[#allocation2 + $0x20] sm:$0xf]  ;;  %v555_v29 = vpack.c.bf16 %v531_v9, %v531_v9 }
  0xb1   : > { %v647_v42 = vrot.slane %v645_v33, 7  ;;  %899 = vst [vmem:[#allocation4 + $0x4c] sm:$0xf] %v879_v41  ;;  %v629_v45 = vsel %vm9946_vm5, %v7554_v14, %v628_v37  ;;  %v893_v48 = vld [vmem:[#allocation2 + $0xa8] sm:$0xf]  ;;  %v8980_v12 = vld [vmem:[#allocation8 + $0xf0] sm:$0xff]  ;;  %9245 = vmatpush.bf16.msra.mxu2 %v9966_v3 }
  0xb2   : > { %v638_v46 = vsel %vm9946_vm5, %v630_v38, %v637_v39  ;;  %v656_v47 = vrot.slane %v654_v40, 7  ;;  %900 = vst [vmem:[#allocation4 + $0x70] sm:$0xf] %v880_v44  ;;  %v894_v58 = vld [vmem:[#allocation2 + $0xac] sm:$0xf]  ;;  %v7556_v17 = vrot.slane %v662_v7, 11 }
  0xb3   : > { %3653 = vmatpush.bf16.msra.mxu0 %v8952_v19  ;;  %857 = vst [vmem:[#allocation4] sm:$0xf] %v629_v45  ;;  %v650_v50 = vor.u32 %v648_v34, %v647_v42  ;;  %v652_v51 = vrot.slane %v647_v42, 4  ;;  %v8860_v56 = vld [vmem:[#allocation4 + $0x4] sm:$0xf]  ;;  %v9971_v22 = vld [vmem:[#allocation8 + $0x98] sm:$0xff] }
  0xb4   : > { %3712 = vmatpush.bf16.msra.mxu1 %v8960_v20  ;;  %9239 = vmatpush.bf16.msra.mxu3 %v8960_v20  ;;  %858 = vst [vmem:[#allocation4 + $0x24] sm:$0xf] %v638_v46  ;;  %v659_v54 = vor.u32 %v657_v43, %v656_v47  ;;  %v7588_v60 = vld [vmem:[#allocation4 + $0x24] sm:$0xf0]  ;;  %v591_v4 = vld [vmem:[#allocation2 + $0x30] sm:$0xf]  ;;  %v554_v20 = vpack.c.bf16 %v530_v63, %v530_v63 }
  0xb5   : > { %v651_v57 = vsel %vm9946_vm5, %v9942_v15, %v650_v50  ;;  %913 = vst [vmem:[#allocation4 + $0x244] sm:$0xf] %v893_v48  ;;  %v8923_v61 = vld [vmem:[#allocation4 + $0x1fc] sm:$0xf]  ;;  %v7591_v5 = vor.u32 %v8860_v56, %v7588_v60  ;;  %v667_v8 = vshrl.u32 %v591_v4, 16  ;;  %v670_v13 = vshll.u32 %v591_v4, 16  ;;  %9246 = vmatpush.bf16.msra.mxu2 %v9971_v22 }
  0xb6   : > { %v660_v62 = vsel %vm9946_vm5, %v652_v51, %v659_v54  ;;  %859 = vst [vmem:[#allocation4 + $0x48] sm:$0xf] %v651_v57  ;;  %v7840_v0 = vld [vmem:[#allocation4 + $0x21c] sm:$0xf0]  ;;  %v592_v6 = vld [vmem:[#allocation2 + $0x34] sm:$0xf] }
  0xb7   : > { %3654 = vmatpush.bf16.msra.mxu0 %v8951_v35  ;;  %860 = vst [vmem:[#allocation4 + $0x6c] sm:$0xf] %v660_v62  ;;  %v7843_v11 = vor.u32 %v8923_v61, %v7840_v0  ;;  %v676_v14 = vshrl.u32 %v592_v6, 16  ;;  %v679_v15 = vshll.u32 %v592_v6, 16  ;;  %v669_v18 = vrot.slane %v667_v8, 7  ;;  %v518_v25 = vld [vmem:[%s9927_s15 + $0x30] sm:$0xff] }
  0xb8   : > { %3713 = vmatpush.bf16.msra.mxu1 %v8959_v36  ;;  %9240 = vmatpush.bf16.msra.mxu3 %v8959_v36  ;;  %914 = vst [vmem:[#allocation4 + $0x268] sm:$0xf] %v894_v58  ;;  %v881_v19 = vld [vmem:[#allocation2 + $0x30] sm:$0xf]  ;;  %v882_v24 = vld [vmem:[#allocation2 + $0x34] sm:$0xf]  ;;  %v542_v32 = vpack.c.bf16 %v518_v25, %v518_v25 }
  0xb9   : > { %v678_v23 = vrot.slane %v676_v14, 7  ;;  %v672_v26 = vor.u32 %v670_v13, %v669_v18  ;;  %v674_v27 = vrot.slane %v669_v18, 4  ;;  %901 = vst [vmem:[#allocation4 + $0x94] sm:$0xf] %v881_v19  ;;  %v519_v28 = vld [vmem:[%s9927_s15 + $0x38] sm:$0xff]  ;;  %v8979_v33 = vld [vmem:[#allocation8 + $0xe8] sm:$0xff] }
  0xba   : > { %v7586_v10 = vld [vmem:[#allocation4] sm:$0xf]  ;;  %902 = vst [vmem:[#allocation4 + $0xb8] sm:$0xf] %v882_v24  ;;  %v543_v36 = vpack.c.bf16 %v519_v28, %v519_v28  ;;  %v928_v37 = vld [vmem:[#allocation2 + $0x4c] sm:$0x1] }
  0xbb   : > { %3655 = vmatpush.bf16.msra.mxu0 %v8950_v52  ;;  %v8864_v16 = vld [vmem:[#allocation4 + $0x20] sm:$0xf0]  ;;  %v673_v30 = vsel %vm9946_vm5, %v7556_v17, %v672_v26  ;;  %578 = vst [vmem:[#allocation2 + $0xbc] sm:$0xf] %v554_v20  ;;  %v593_v38 = vld [vmem:[#allocation2 + $0x40] sm:$0x8] }
  0xbc   : > { %3714 = vmatpush.bf16.msra.mxu1 %v8958_v53  ;;  %9241 = vmatpush.bf16.msra.mxu3 %v8958_v53  ;;  %v7587_v21 = vor.u32 %v8864_v16, %v7586_v10  ;;  %861 = vst [vmem:[#allocation4 + $0x90] sm:$0xf] %v673_v30  ;;  %v9981_v35 = vld [vmem:[#allocation8 + $0x90] sm:$0xff]  ;;  %v520_v39 = vld [vmem:[%s9927_s15 + $0x40] sm:$0xff]  ;;  %v521_v42 = vld [vmem:[%s9927_s15 + $0x48] sm:$0xff]  ;;  %v1042_v51 = vshll.u32 %v928_v37, 16 }
  0xbd   : > { %579 = vst [vmem:[#allocation2 + $0xc0] sm:$0xf] %v555_v29  ;;  %v8869_v40 = vld [vmem:[#allocation4 + $0x4c] sm:$0xf]  ;;  %v1231_v41 = vld [vmem:[#allocation2 + $0x18] sm:$0x8]  ;;  %9247 = vmatpush.bf16.msra.mxu2 %v9981_v35  ;;  %v9181_v46 = vpack.c.bf16 %v521_v42, %v520_v39 }
  0xbe   : > { %3656 = vmatmul.bf16.vlgmr.msra.gmra.mxu0 %v7587_v21  ;;  %566 = vst [vmem:[#allocation2 + $0x44] sm:$0xf] %v542_v32  ;;  %v7624_v43 = vld [vmem:[#allocation4 + $0x6c] sm:$0xf0]  ;;  %v9987_v45 = vld [vmem:[#allocation8 + $0x88] sm:$0xff]  ;;  %v684_v52 = vshrl.u32 %v593_v38, 16 }
  0xbf   : > { %3766 = vmatpush.bf16.msrb.mxu0 %v9933_v59  ;;  %3715 = vmatmul.bf16.vlgmr.msra.gmra.mxu1 %v7591_v5  ;;  %v681_v59 = vor.u32 %v679_v15, %v678_v23  ;;  %v8978_v44 = vld [vmem:[#allocation8 + $0xe0] sm:$0xff]  ;;  %567 = vst [vmem:[#allocation2 + $0x48] sm:$0xf] %v543_v36  ;;  %v7622_v47 = vld [vmem:[#allocation4 + $0x48] sm:$0xf]  ;;  %v1262_v54 = vshrl.u32 %v1231_v41, 16  ;;  %v7627_v62 = vor.u32 %v8869_v40, %v7624_v43 }
  0xc0   : > { %3825 = vmatpush.bf16.msrb.mxu3 %v8981_v2  ;;  %v8873_v48 = vld [vmem:[#allocation4 + $0x68] sm:$0xf0]  ;;  %v7876_v50 = vld [vmem:[#allocation4 + $0x264] sm:$0xf0]  ;;  %v1232_v53 = vld [vmem:[#allocation2 + $0x1c] sm:$0xf] }
  0xc1   : > { %3750 = vmatmul.bf16.vlgmr.msra.gmra.mxu3 %v7843_v11  ;;  %v682_v34 = vsel %vm9946_vm5, %v674_v27, %v681_v59  ;;  %v8977_v56 = vld [vmem:[#allocation8 + $0xd8] sm:$0xff]  ;;  %v1267_v58 = vshrl.u32 %v1232_v53, 16  ;;  %v1270_v60 = vshll.u32 %v1232_v53, 16  ;;  %9248 = vmatpush.bf16.msra.mxu2 %v9987_v45  ;;  %v9991_v63 = vld [vmem:[#allocation8 + $0x80] sm:$0xff]  ;;  %9225 = vst [vmem:[#allocation2 + $0x58] sm:$0xff] %v9181_v46   ;;  %v9993_v4 = vrot.slane %v1042_v51, 5 }
  0xc2   : > { %862 = vst [vmem:[#allocation4 + $0xb4] sm:$0xf] %v682_v34  ;;  %v1233_v57 = vld [vmem:[#allocation2 + $0x20] sm:$0xf]  ;;  %v9995_v5 = vrot.slane %v684_v52, 11  ;;  %v7564_v6 = vrot.slane %v1262_v54, 11  ;;  %v7623_v8 = vor.u32 %v8873_v48, %v7622_v47 }
  0xc3   : > { %3767 = vmatpush.bf16.msrb.mxu0 %v9954_v49  ;;  %v8932_v49 = vld [vmem:[#allocation4 + $0x244] sm:$0xf]  ;;  %v1276_v61 = vshrl.u32 %v1233_v57, 16  ;;  %v1269_v0 = vrot.slane %v1267_v58, 7  ;;  %v1279_v1 = vshll.u32 %v1233_v57, 16  ;;  %v8975_v59 = vld [vmem:[#allocation8 + $0xc8] sm:$0xff] }
  0xc4   : > { %3826 = vmatpush.bf16.msrb.mxu3 %v8980_v12  ;;  %v896_v2 = vld [vmem:[#allocation2 + $0xc0] sm:$0xf]  ;;  %v7879_v9 = vor.u32 %v8932_v49, %v7876_v50  ;;  %v8974_v49 = vld [vmem:[#allocation8 + $0xc0] sm:$0xff]  ;;  %v596_v57 = vld [vmem:[#allocation2 + $0x54] sm:$0x8] }
  0xc5   : > { %v1278_v7 = vrot.slane %v1276_v61, 7  ;;  %916 = vst [vmem:[#allocation4 + $0x2b0] sm:$0xf] %v896_v2  ;;  %v926_v10 = vld [vmem:[#allocation2 + $0x44] sm:$0xf]  ;;  %v1272_v12 = vor.u32 %v1270_v60, %v1269_v0  ;;  %9249 = vmatpush.bf16.msra.mxu2 %v9991_v63  ;;  %v1274_v36 = vrot.slane %v1269_v0, 4 }
  0xc6   : > { %v594_v11 = vld [vmem:[#allocation2 + $0x44] sm:$0xf]  ;;  %v927_v13 = vld [vmem:[#allocation2 + $0x48] sm:$0xf]  ;;  %v1023_v14 = vshrl.u32 %v926_v10, 16  ;;  %v1026_v15 = vshll.u32 %v926_v10, 16 }
  0xc7   : > { %3768 = vmatpush.bf16.msrb.mxu0 %v9957_v55  ;;  %v895_v55 = vld [vmem:[#allocation2 + $0xbc] sm:$0xf]  ;;  %v595_v16 = vld [vmem:[#allocation2 + $0x48] sm:$0xf]  ;;  %v1281_v17 = vor.u32 %v1279_v1, %v1278_v7  ;;  %v1032_v18 = vshll.u32 %v927_v13, 16  ;;  %v1036_v19 = vshrl.u32 %v927_v13, 16  ;;  %v1273_v32 = vsel %vm9946_vm5, %v7564_v6, %v1272_v12 }
  0xc8   : > { %3827 = vmatpush.bf16.msrb.mxu3 %v8979_v33  ;;  %915 = vst [vmem:[#allocation4 + $0x28c] sm:$0xf] %v895_v55  ;;  %v689_v20 = vshrl.u32 %v594_v11, 16  ;;  %v692_v21 = vshll.u32 %v594_v11, 16  ;;  %v883_v23 = vld [vmem:[#allocation2 + $0x44] sm:$0xf] }
  0xc9   : > { %v1025_v24 = vrot.slane %v1023_v14, 4  ;;  %v1028_v25 = vrot.slane %v1026_v15, 5  ;;  %v698_v26 = vshrl.u32 %v595_v16, 16  ;;  %v701_v27 = vshll.u32 %v595_v16, 16  ;;  %v884_v28 = vld [vmem:[#allocation2 + $0x48] sm:$0xf] }
  0xca   : > { %v1034_v29 = vrot.slane %v1032_v18, 5  ;;  %v1038_v30 = vrot.slane %v1036_v19, 4  ;;  %903 = vst [vmem:[#allocation4 + $0xdc] sm:$0xf] %v883_v23  ;;  %v929_v37 = vld [vmem:[#allocation2 + $0x58] sm:$0xf]  ;;  %v1282_v47 = vsel %vm9946_vm5, %v1274_v36, %v1281_v17 }
  0xcb   : > { %3769 = vmatpush.bf16.msrb.mxu0 %v9966_v3  ;;  %v8976_v3 = vld [vmem:[#allocation8 + $0xd0] sm:$0xff]  ;;  %v1029_v33 = vor.u32 %v1028_v25, %v1025_v24  ;;  %v700_v34 = vrot.slane %v698_v26, 7  ;;  %904 = vst [vmem:[#allocation4 + $0x100] sm:$0xf] %v884_v28  ;;  %v1047_v43 = vshrl.u32 %v929_v37, 16  ;;  %v522_v24 = vld [vmem:[%s9927_s15 + $0x50] sm:$0xff] }
  0xcc   : > { %3828 = vmatpush.bf16.msrb.mxu3 %v8978_v44  ;;  %v1039_v39 = vor.u32 %v1038_v30, %v1034_v29  ;;  %v930_v42 = vld [vmem:[#allocation2 + $0x5c] sm:$0xf]  ;;  %1501 = vst [vmem:[#allocation4 + $0xc] sm:$0xf] %v1273_v32  ;;  %v931_v51 = vld [vmem:[#allocation2 + $0x60] sm:$0x1]  ;;  %v546_v36 = vpack.c.bf16 %v522_v24, %v522_v24 }
  0xcd   : > { %v1030_v44 = vrot.slane %v1029_v33, 4  ;;  %v703_v46 = vor.u32 %v701_v27, %v700_v34  ;;  %1502 = vst [vmem:[#allocation4 + $0x30] sm:$0xf] %v1282_v47  ;;  %v1049_v52 = vrot.slane %v1047_v43, 4  ;;  %v8878_v58 = vld [vmem:[#allocation4 + $0x94] sm:$0xf] }
  0xce   : > { %3661 = vmatmul.bf16.gmra.mxu0 %v7623_v8  ;;  %v1040_v48 = vrot.slane %v1039_v39, 4  ;;  %v7660_v60 = vld [vmem:[#allocation4 + $0xb4] sm:$0xf0]  ;;  %v1066_v0 = vshll.u32 %v931_v51, 16  ;;  %v597_v1 = vld [vmem:[#allocation2 + $0x58] sm:$0xf] }
  0xcf   : > { %3770 = vmatpush.bf16.msrb.mxu0 %v9971_v22  ;;  %3720 = vmatmul.bf16.gmra.mxu1 %v7627_v62  ;;  %v691_v22 = vrot.slane %v689_v20, 7  ;;  %v1035_v53 = vsel %vm10004_vm8, %v1030_v44, %v1034_v29  ;;  %v1060_v62 = vshrl.u32 %v930_v42, 16  ;;  %v7658_v2 = vld [vmem:[#allocation4 + $0x90] sm:$0xf]  ;;  %v598_v8 = vld [vmem:[#allocation2 + $0x5c] sm:$0xf]  ;;  %v7663_v18 = vor.u32 %v8878_v58, %v7660_v60 }
  0xd0   : > { %3829 = vmatpush.bf16.msrb.mxu3 %v8977_v56  ;;  %v1056_v56 = vshll.u32 %v930_v42, 16  ;;  %v1045_v61 = vsel %vm10004_vm8, %v1040_v48, %v9993_v4  ;;  %1216 = vst [vmem:[#allocation4 + $0xe0] sm:$0xf] %v1035_v53  ;;  %v7912_v10 = vld [vmem:[#allocation4 + $0x2ac] sm:$0xf0]  ;;  %v711_v12 = vshrl.u32 %v597_v1, 16 }
  0xd1   : > { %3755 = vmatmul.bf16.gmra.mxu3 %v7879_v9  ;;  %v694_v40 = vor.u32 %v692_v21, %v691_v22  ;;  %v696_v41 = vrot.slane %v691_v22, 4  ;;  %1217 = vst [vmem:[#allocation4 + $0x104] sm:$0xf] %v1045_v61  ;;  %v706_v9 = vshrl.u32 %v596_v57, 16  ;;  %v714_v13 = vshll.u32 %v597_v1, 16  ;;  %v523_v28 = vld [vmem:[%s9927_s15 + $0x58] sm:$0xff] }
  0xd2   : > { %v1058_v7 = vrot.slane %v1056_v56, 5  ;;  %v1068_v14 = vrot.slane %v1066_v0, 5  ;;  %v720_v15 = vshrl.u32 %v598_v8, 16  ;;  %v723_v16 = vshll.u32 %v598_v8, 16  ;;  %v885_v17 = vld [vmem:[#allocation2 + $0x58] sm:$0xf] }
  0xd3   : > { %3771 = vmatpush.bf16.msrb.mxu0 %v9981_v35  ;;  %v1050_v35 = vshll.u32 %v929_v37, 16  ;;  %v695_v50 = vsel %vm9946_vm5, %v9995_v5, %v694_v40  ;;  %v704_v54 = vsel %vm9946_vm5, %v696_v41, %v703_v46  ;;  %v8882_v5 = vld [vmem:[#allocation4 + $0xb0] sm:$0xf0]  ;;  %v7558_v20 = vrot.slane %v706_v9, 11  ;;  %v886_v23 = vld [vmem:[#allocation2 + $0x5c] sm:$0xf] }
  0xd4   : > { %3830 = vmatpush.bf16.msrb.mxu3 %v8976_v3  ;;  %863 = vst [vmem:[#allocation4 + $0xd8] sm:$0xf] %v695_v50  ;;  %v8941_v3 = vld [vmem:[#allocation4 + $0x28c] sm:$0xf]  ;;  %v713_v21 = vrot.slane %v711_v12, 7  ;;  %v7659_v25 = vor.u32 %v8882_v5, %v7658_v2  ;;  %v547_v41 = vpack.c.bf16 %v523_v28, %v523_v28 }
  0xd5   : > { %v1052_v55 = vrot.slane %v1050_v35, 5  ;;  %864 = vst [vmem:[#allocation4 + $0xfc] sm:$0xf] %v704_v54  ;;  %v7915_v26 = vor.u32 %v8941_v3, %v7912_v10  ;;  %v1234_v34 = vld [vmem:[#allocation2 + $0x2c] sm:$0x8]  ;;  %v524_v9 = vld [vmem:[%s9927_s15 + $0x60] sm:$0xff] }
  0xd6   : > { %v716_v29 = vor.u32 %v714_v13, %v713_v21  ;;  %v718_v30 = vrot.slane %v713_v21, 4  ;;  %905 = vst [vmem:[#allocation4 + $0x124] sm:$0xf] %v885_v17  ;;  %v1235_v40 = vld [vmem:[#allocation2 + $0x30] sm:$0xf]  ;;  %v1284_v44 = vshrl.u32 %v1234_v34, 16 }
  0xd7   : > { %3772 = vmatpush.bf16.msrb.mxu0 %v9987_v45  ;;  %v1053_v6 = vor.u32 %v1052_v55, %v1049_v52  ;;  %v1062_v45 = vrot.slane %v1060_v62, 4  ;;  %906 = vst [vmem:[#allocation4 + $0x148] sm:$0xf] %v886_v23  ;;  %v1236_v43 = vld [vmem:[#allocation2 + $0x34] sm:$0xf]  ;;  %v1289_v46 = vshrl.u32 %v1235_v40, 16 }
  0xd8   : > { %3831 = vmatpush.bf16.msrb.mxu3 %v8975_v59  ;;  %v7702_v59 = vld [vmem:[#allocation4 + $0xe0] sm:$0xf]  ;;  %v8892_v22 = vld [vmem:[#allocation4 + $0x100] sm:$0xf0]  ;;  %v717_v39 = vsel %vm9946_vm5, %v7558_v20, %v716_v29  ;;  %v1292_v47 = vshll.u32 %v1235_v40, 16  ;;  %v1298_v35 = vshrl.u32 %v1236_v43, 16 }
  0xd9   : > { %v1054_v11 = vrot.slane %v1053_v6, 4  ;;  %v1063_v4 = vor.u32 %v1062_v45, %v1058_v7  ;;  %v7703_v37 = vor.u32 %v8892_v22, %v7702_v59  ;;  %865 = vst [vmem:[#allocation4 + $0x120] sm:$0xf] %v717_v39  ;;  %v1301_v48 = vshll.u32 %v1236_v43, 16  ;;  %v934_v51 = vld [vmem:[#allocation2 + $0x74] sm:$0x1] }
  0xda   : > { %v1291_v50 = vrot.slane %v1289_v46, 7  ;;  %570 = vst [vmem:[#allocation2 + $0x6c] sm:$0xf] %v546_v36  ;;  %v1300_v52 = vrot.slane %v1298_v35, 7  ;;  %v1090_v53 = vshll.u32 %v934_v51, 16 }
  0xdb   : > { %3773 = vmatpush.bf16.msrb.mxu0 %v9991_v63  ;;  %v1059_v19 = vsel %vm10004_vm8, %v1054_v11, %v1058_v7  ;;  %v1064_v27 = vrot.slane %v1063_v4, 4  ;;  %v722_v63 = vrot.slane %v720_v15, 7  ;;  %3789 = vmatmul.bf16.vlgmr.msra.gmra.mxu2 %v7703_v37  ;;  %571 = vst [vmem:[#allocation2 + $0x70] sm:$0xf] %v547_v41  ;;  %v10032_v54 = vld [vmem:[#allocation4 + $0xd8] sm:$0xf] }
  0xdc   : > { %3832 = vmatpush.bf16.msrb.mxu3 %v8974_v49  ;;  %1218 = vst [vmem:[#allocation4 + $0x128] sm:$0xf] %v1059_v19  ;;  %v7565_v49 = vrot.slane %v1284_v44, 11  ;;  %v8887_v55 = vld [vmem:[#allocation4 + $0xdc] sm:$0xf]  ;;  %v1294_v60 = vor.u32 %v1292_v47, %v1291_v50  ;;  %v1296_v61 = vrot.slane %v1291_v50, 4  ;;  %v1303_v1 = vor.u32 %v1301_v48, %v1300_v52 }
  0xdd   : > { %v1069_v32 = vsel %vm10004_vm8, %v1064_v27, %v1068_v14  ;;  %v725_v33 = vor.u32 %v723_v16, %v722_v63  ;;  %v7696_v56 = vld [vmem:[#allocation4 + $0xfc] sm:$0xf0]  ;;  %v10034_v57 = vld [vmem:[#allocation4 + $0xc] sm:$0xf]  ;;  %v7596_v58 = vld [vmem:[#allocation4 + $0x2c] sm:$0xf0] }
  0xde   : > { %1219 = vst [vmem:[#allocation4 + $0x14c] sm:$0xf] %v1069_v32  ;;  %3666 = vmatmul.bf16.gmra.mxu0 %v7659_v25  ;;  %v599_v62 = vld [vmem:[#allocation2 + $0x68] sm:$0x8]  ;;  %v8891_v0 = vld [vmem:[#allocation4 + $0xf8] sm:$0xf0]  ;;  %v1295_v7 = vsel %vm9946_vm5, %v7565_v49, %v1294_v60  ;;  %v1304_v45 = vsel %vm9946_vm5, %v1296_v61, %v1303_v1  ;;  %v7699_v16 = vor.u32 %v8887_v55, %v7696_v56 }
  0xdf   : > { %3725 = vmatmul.bf16.gmra.mxu1 %v7663_v18  ;;  %v726_v42 = vsel %vm9946_vm5, %v718_v30, %v725_v33  ;;  %v728_v2 = vshrl.u32 %v599_v62, 16  ;;  %v1237_v5 = vld [vmem:[#allocation2 + $0x40] sm:$0x8]  ;;  %v1238_v8 = vld [vmem:[#allocation2 + $0x44] sm:$0xf]  ;;  %v10041_v10 = vrot.slane %v1090_v53, 5  ;;  %v7695_v15 = vor.u32 %v8891_v0, %v10032_v54 }
  0xe0   : > { %866 = vst [vmem:[#allocation4 + $0x144] sm:$0xf] %v726_v42  ;;  %v525_v11 = vld [vmem:[%s9927_s15 + $0x68] sm:$0xff]  ;;  %v1306_v13 = vshrl.u32 %v1237_v5, 16  ;;  %v1311_v4 = vshrl.u32 %v1238_v8, 16  ;;  %v1314_v14 = vshll.u32 %v1238_v8, 16  ;;  %v7599_v17 = vor.u32 %v10034_v57, %v7596_v58 }
  0xe1   : > { %3760 = vmatmul.bf16.gmra.mxu3 %v7915_v26  ;;  %1503 = vst [vmem:[#allocation4 + $0x54] sm:$0xf] %v1295_v7  ;;  %v7559_v12 = vrot.slane %v728_v2, 11  ;;  %v932_v18 = vld [vmem:[#allocation2 + $0x6c] sm:$0xf]  ;;  %v9186_v63 = vpack.c.bf16 %v525_v11, %v524_v9 }
  0xe2   : > { %1504 = vst [vmem:[#allocation4 + $0x78] sm:$0xf] %v1304_v45  ;;  %v600_v19 = vld [vmem:[#allocation2 + $0x6c] sm:$0xf]  ;;  %v1239_v21 = vld [vmem:[#allocation2 + $0x48] sm:$0xf] }
  0xe3   : > { %v7738_v6 = vld [vmem:[#allocation4 + $0x128] sm:$0xf]  ;;  %v887_v20 = vld [vmem:[#allocation2 + $0x6c] sm:$0xf]  ;;  %v933_v24 = vld [vmem:[#allocation2 + $0x70] sm:$0xf] }
  0xe4   : > { %v1071_v25 = vshrl.u32 %v932_v18, 16  ;;  %v1074_v26 = vshll.u32 %v932_v18, 16  ;;  %v601_v27 = vld [vmem:[#allocation2 + $0x70] sm:$0xf]  ;;  %v1080_v28 = vshll.u32 %v933_v24, 16  ;;  %v1084_v59 = vshrl.u32 %v933_v24, 16 }
  0xe5   : > { %v8901_v3 = vld [vmem:[#allocation4 + $0x148] sm:$0xf0]  ;;  %v733_v29 = vshrl.u32 %v600_v19, 16  ;;  %v736_v30 = vshll.u32 %v600_v19, 16  ;;  %v888_v22 = vld [vmem:[#allocation2 + $0x70] sm:$0xf] }
  0xe6   : > { %v7739_v23 = vor.u32 %v8901_v3, %v7738_v6  ;;  %v1073_v32 = vrot.slane %v1071_v25, 4  ;;  %v1076_v33 = vrot.slane %v1074_v26, 5  ;;  %v742_v34 = vshrl.u32 %v601_v27, 16  ;;  %907 = vst [vmem:[#allocation4 + $0x16c] sm:$0xf] %v887_v20 }
  0xe7   : > { %v745_v36 = vshll.u32 %v601_v27, 16  ;;  %v1082_v37 = vrot.slane %v1080_v28, 5  ;;  %v1086_v39 = vrot.slane %v1084_v59, 4  ;;  %v735_v40 = vrot.slane %v733_v29, 7  ;;  %908 = vst [vmem:[#allocation4 + $0x190] sm:$0xf] %v888_v22 }
  0xe8   : > { %v7566_v41 = vrot.slane %v1306_v13, 11  ;;  %v1077_v42 = vor.u32 %v1076_v33, %v1073_v32  ;;  %v744_v43 = vrot.slane %v742_v34, 7  ;;  %v1313_v44 = vrot.slane %v1311_v4, 7  ;;  %9226 = vst [vmem:[#allocation2 + $0x80] sm:$0xff] %v9186_v63   ;;  %v937_v50 = vld [vmem:[#allocation2 + $0x88] sm:$0x1] }
  0xe9   : > { %v1320_v46 = vshrl.u32 %v1239_v21, 16  ;;  %v1087_v47 = vor.u32 %v1086_v39, %v1082_v37  ;;  %v738_v35 = vor.u32 %v736_v30, %v735_v40  ;;  %v740_v48 = vrot.slane %v735_v40, 4  ;;  %v602_v54 = vld [vmem:[#allocation2 + $0x7c] sm:$0x8]  ;;  %v1240_v60 = vld [vmem:[#allocation2 + $0x54] sm:$0x8] }
  0xea   : > { %v1323_v49 = vshll.u32 %v1239_v21, 16  ;;  %v1078_v51 = vrot.slane %v1077_v42, 4  ;;  %v747_v52 = vor.u32 %v745_v36, %v744_v43  ;;  %v1316_v53 = vor.u32 %v1314_v14, %v1313_v44  ;;  %v10059_v8 = vld [vmem:[#allocation2 + $0x58] sm:$0xf]  ;;  %v8896_v13 = vld [vmem:[#allocation4 + $0x124] sm:$0xf] }
  0xeb   : > { %3794 = vmatmul.bf16.gmra.mxu2 %v7739_v23  ;;  %v1088_v55 = vrot.slane %v1087_v47, 4  ;;  %v739_v56 = vsel %vm9946_vm5, %v7559_v12, %v738_v35  ;;  %v1318_v57 = vrot.slane %v1313_v44, 4  ;;  %v1322_v58 = vrot.slane %v1320_v46, 7  ;;  %v7730_v12 = vld [vmem:[#allocation4 + $0x120] sm:$0xf] }
  0xec   : > { %v1083_v61 = vsel %vm10004_vm8, %v1078_v51, %v1082_v37  ;;  %v748_v62 = vsel %vm9946_vm5, %v740_v48, %v747_v52  ;;  %867 = vst [vmem:[#allocation4 + $0x168] sm:$0xf] %v739_v56  ;;  %v1114_v0 = vshll.u32 %v937_v50, 16  ;;  %v1317_v2 = vsel %vm9946_vm5, %v7566_v41, %v1316_v53  ;;  %v7732_v4 = vld [vmem:[#allocation4 + $0x144] sm:$0xf0] }
  0xed   : > { %v1093_v1 = vsel %vm10004_vm8, %v1088_v55, %v10041_v10  ;;  %1220 = vst [vmem:[#allocation4 + $0x170] sm:$0xf] %v1083_v61  ;;  %v1325_v5 = vor.u32 %v1323_v49, %v1322_v58  ;;  %v750_v7 = vshrl.u32 %v602_v54, 16  ;;  %v1328_v9 = vshrl.u32 %v1240_v60, 16  ;;  %v8900_v10 = vld [vmem:[#allocation4 + $0x140] sm:$0xf0] }
  0xee   : > { %3671 = vmatmul.bf16.gmra.mxu0 %v7695_v15  ;;  %1221 = vst [vmem:[#allocation4 + $0x194] sm:$0xf] %v1093_v1  ;;  %v10057_v6 = vrot.slane %v1114_v0, 5  ;;  %v8870_v18 = vld [vmem:[#allocation4 + $0x54] sm:$0xf]  ;;  %v1333_v29 = vshrl.u32 %v10059_v8, 16  ;;  %v7731_v39 = vor.u32 %v8900_v10, %v7730_v12  ;;  %v7735_v40 = vor.u32 %v8896_v13, %v7732_v4 }
  0xef   : > { %3730 = vmatmul.bf16.gmra.mxu1 %v7699_v16  ;;  %868 = vst [vmem:[#allocation4 + $0x18c] sm:$0xf] %v748_v62  ;;  %v1326_v3 = vsel %vm9946_vm5, %v1318_v57, %v1325_v5  ;;  %v935_v45 = vld [vmem:[#allocation2 + $0x80] sm:$0xf]  ;;  %v936_v11 = vld [vmem:[#allocation2 + $0x84] sm:$0xf] }
  0xf0   : > { %1505 = vst [vmem:[#allocation4 + $0x9c] sm:$0xf] %v1317_v2  ;;  %v1095_v14 = vshrl.u32 %v935_v45, 16  ;;  %v1098_v15 = vshll.u32 %v935_v45, 16  ;;  %v1104_v16 = vshll.u32 %v936_v11, 16  ;;  %v7560_v33 = vrot.slane %v750_v7, 11 }
  0xf1   : > { %3833 = vmatmul.bf16.vlgmr.msrb.gmra.mxu3 %v7599_v17  ;;  %v1108_v17 = vshrl.u32 %v936_v11, 16  ;;  %1506 = vst [vmem:[#allocation4 + $0xc0] sm:$0xf] %v1326_v3  ;;  %v603_v19 = vld [vmem:[#allocation2 + $0x80] sm:$0xf]  ;;  %v7567_v35 = vrot.slane %v1328_v9, 11 }
  0xf2   : > { %v604_v20 = vld [vmem:[#allocation2 + $0x84] sm:$0xf]  ;;  %v1097_v21 = vrot.slane %v1095_v14, 4  ;;  %v1100_v23 = vrot.slane %v1098_v15, 5  ;;  %v1106_v24 = vrot.slane %v1104_v16, 5  ;;  %v755_v63 = vshrl.u32 %v603_v19, 16 }
  0xf3   : > { %v1110_v25 = vrot.slane %v1108_v17, 4  ;;  %v889_v26 = vld [vmem:[#allocation2 + $0x80] sm:$0xf]  ;;  %v7632_v27 = vld [vmem:[#allocation4 + $0x74] sm:$0xf0]  ;;  %v758_v28 = vshll.u32 %v603_v19, 16 }
  0xf4   : > { %v764_v59 = vshrl.u32 %v604_v20, 16  ;;  %v7774_v30 = vld [vmem:[#allocation4 + $0x170] sm:$0xf]  ;;  %v1101_v22 = vor.u32 %v1100_v23, %v1097_v21  ;;  %v767_v34 = vshll.u32 %v604_v20, 16  ;;  %v890_v36 = vld [vmem:[#allocation2 + $0x84] sm:$0xf]  ;;  %v7635_v44 = vor.u32 %v8870_v18, %v7632_v27 }
  0xf5   : > { %v1111_v32 = vor.u32 %v1110_v25, %v1106_v24  ;;  %v1242_v37 = vld [vmem:[#allocation2 + $0x5c] sm:$0xf]  ;;  %v8910_v41 = vld [vmem:[#allocation4 + $0x190] sm:$0xf0]  ;;  %v757_v42 = vrot.slane %v755_v63, 7  ;;  %v1335_v55 = vrot.slane %v1333_v29, 7 }
  0xf6   : > { %v766_v43 = vrot.slane %v764_v59, 7  ;;  %909 = vst [vmem:[#allocation4 + $0x1b4] sm:$0xf] %v889_v26  ;;  %v1102_v46 = vrot.slane %v1101_v22, 4  ;;  %v7775_v48 = vor.u32 %v8910_v41, %v7774_v30  ;;  %v938_v52 = vld [vmem:[#allocation2 + $0x94] sm:$0xf] }
  0xf7   : > { %v1112_v47 = vrot.slane %v1111_v32, 4  ;;  %910 = vst [vmem:[#allocation4 + $0x1d8] sm:$0xf] %v890_v36  ;;  %v760_v49 = vor.u32 %v758_v28, %v757_v42  ;;  %v762_v50 = vrot.slane %v757_v42, 4  ;;  %v1336_v56 = vshll.u32 %v10059_v8, 16 }
  0xf8   : > { %v769_v51 = vor.u32 %v767_v34, %v766_v43  ;;  %v1107_v53 = vsel %vm10004_vm8, %v1102_v46, %v1106_v24  ;;  %v939_v57 = vld [vmem:[#allocation2 + $0x98] sm:$0xf]  ;;  %v1342_v61 = vshrl.u32 %v1242_v37, 16  ;;  %v940_v62 = vld [vmem:[#allocation2 + $0x9c] sm:$0x1]  ;;  %v1340_v1 = vrot.slane %v1335_v55, 4 }
  0xf9   : > { %v1117_v54 = vsel %vm10004_vm8, %v1112_v47, %v10057_v6  ;;  %1222 = vst [vmem:[#allocation4 + $0x1b8] sm:$0xf] %v1107_v53  ;;  %v761_v58 = vsel %vm9946_vm5, %v7560_v33, %v760_v49  ;;  %v1338_v0 = vor.u32 %v1336_v56, %v1335_v55  ;;  %v1345_v2 = vshll.u32 %v1242_v37, 16  ;;  %v10076_v12 = vld [vmem:[#allocation4 + $0x16c] sm:$0xf] }
  0xfa   : > { %v770_v60 = vsel %vm9946_vm5, %v762_v50, %v769_v51  ;;  %1223 = vst [vmem:[#allocation4 + $0x1dc] sm:$0xf] %v1117_v54  ;;  %v1119_v5 = vshrl.u32 %v938_v52, 16  ;;  %v1344_v6 = vrot.slane %v1342_v61, 7  ;;  %v1122_v7 = vshll.u32 %v938_v52, 16 }
  0xfb   : > { %3799 = vmatmul.bf16.gmra.mxu2 %v7775_v48  ;;  %869 = vst [vmem:[#allocation4 + $0x1b0] sm:$0xf] %v761_v58  ;;  %v1128_v8 = vshll.u32 %v939_v57, 16  ;;  %v1132_v9 = vshrl.u32 %v939_v57, 16  ;;  %v1339_v3 = vsel %vm9946_vm5, %v7567_v35, %v1338_v0  ;;  %v1138_v11 = vshll.u32 %v940_v62, 16 }
  0xfc   : > { %870 = vst [vmem:[#allocation4 + $0x1d4] sm:$0xf] %v770_v60  ;;  %v1121_v45 = vrot.slane %v1119_v5, 4  ;;  %v10078_v10 = vld [vmem:[#allocation4 + $0x18c] sm:$0xf0]  ;;  %v1347_v13 = vor.u32 %v1345_v2, %v1344_v6  ;;  %v1124_v4 = vrot.slane %v1122_v7, 5 }
  0xfd   : > { %1507 = vst [vmem:[#allocation4 + $0xe4] sm:$0xf] %v1339_v3  ;;  %v1130_v14 = vrot.slane %v1128_v8, 5  ;;  %v1134_v15 = vrot.slane %v1132_v9, 4  ;;  %v1140_v16 = vrot.slane %v1138_v11, 5  ;;  %v7771_v34 = vor.u32 %v10076_v12, %v10078_v10 }
  0xfe   : > { %3676 = vmatmul.bf16.gmra.mxu0 %v7731_v39  ;;  %v605_v17 = vld [vmem:[#allocation2 + $0x90] sm:$0x8]  ;;  %v606_v18 = vld [vmem:[#allocation2 + $0x94] sm:$0xf]  ;;  %v7766_v19 = vld [vmem:[#allocation4 + $0x168] sm:$0xf]  ;;  %v1348_v21 = vsel %vm9946_vm5, %v1340_v1, %v1347_v13  ;;  %v1125_v23 = vor.u32 %v1124_v4, %v1121_v45 }
  0xff   : > { %3735 = vmatmul.bf16.gmra.mxu1 %v7735_v40  ;;  %v8909_v20 = vld [vmem:[#allocation4 + $0x188] sm:$0xf0]  ;;  %v607_v24 = vld [vmem:[#allocation2 + $0x98] sm:$0xf]  ;;  %v772_v25 = vshrl.u32 %v605_v17, 16  ;;  %v777_v26 = vshrl.u32 %v606_v18, 16  ;;  %v1135_v27 = vor.u32 %v1134_v15, %v1130_v14 }
 0x100   : > { %1508 = vst [vmem:[#allocation4 + $0x108] sm:$0xf] %v1348_v21  ;;  %v780_v63 = vshll.u32 %v606_v18, 16  ;;  %v786_v28 = vshrl.u32 %v607_v24, 16  ;;  %v1243_v59 = vld [vmem:[#allocation2 + $0x68] sm:$0x8]  ;;  %v7767_v35 = vor.u32 %v8909_v20, %v7766_v19 }
 0x101   : > { %3838 = vmatmul.bf16.gmra.mxu3 %v7635_v44  ;;  %v8879_v29 = vld [vmem:[#allocation4 + $0x9c] sm:$0xf]  ;;  %v1126_v30 = vrot.slane %v1125_v23, 4  ;;  %v7561_v22 = vrot.slane %v772_v25, 11  ;;  %v779_v32 = vrot.slane %v777_v26, 7  ;;  %v789_v33 = vshll.u32 %v607_v24, 16 }
 0x102   : > { %v7668_v36 = vld [vmem:[#allocation4 + $0xbc] sm:$0xf0]  ;;  %v1136_v37 = vrot.slane %v1135_v27, 4  ;;  %v788_v39 = vrot.slane %v786_v28, 7  ;;  %v1244_v40 = vld [vmem:[#allocation2 + $0x6c] sm:$0xf] }
 0x103   : > { %v7810_v41 = vld [vmem:[#allocation4 + $0x1b8] sm:$0xf]  ;;  %v1131_v42 = vsel %vm10004_vm8, %v1126_v30, %v1130_v14  ;;  %v782_v43 = vor.u32 %v780_v63, %v779_v32  ;;  %v784_v44 = vrot.slane %v779_v32, 4  ;;  %v1350_v47 = vshrl.u32 %v1243_v59, 16  ;;  %v8919_v48 = vld [vmem:[#allocation4 + $0x1d8] sm:$0xf0] }
 0x104   : > { %v1245_v46 = vld [vmem:[#allocation2 + $0x70] sm:$0xf]  ;;  %v1141_v49 = vsel %vm10004_vm8, %v1136_v37, %v1140_v16  ;;  %1224 = vst [vmem:[#allocation4 + $0x200] sm:$0xf] %v1131_v42  ;;  %v791_v50 = vor.u32 %v789_v33, %v788_v39  ;;  %v1355_v51 = vshrl.u32 %v1244_v40, 16  ;;  %v1358_v54 = vshll.u32 %v1244_v40, 16 }
 0x105   : > { %1225 = vst [vmem:[#allocation4 + $0x224] sm:$0xf] %v1141_v49  ;;  %v783_v52 = vsel %vm9946_vm5, %v7561_v22, %v782_v43  ;;  %v7568_v53 = vrot.slane %v1350_v47, 11  ;;  %v1364_v55 = vshrl.u32 %v1245_v46, 16  ;;  %v7671_v56 = vor.u32 %v8879_v29, %v7668_v36  ;;  %v941_v61 = vld [vmem:[#allocation2 + $0xa8] sm:$0xf] }
 0x106   : > { %v792_v57 = vsel %vm9946_vm5, %v784_v44, %v791_v50  ;;  %871 = vst [vmem:[#allocation4 + $0x1f8] sm:$0xf] %v783_v52  ;;  %v1357_v58 = vrot.slane %v1355_v51, 7  ;;  %v1367_v60 = vshll.u32 %v1245_v46, 16  ;;  %v7811_v62 = vor.u32 %v8919_v48, %v7810_v41  ;;  %v942_v6 = vld [vmem:[#allocation2 + $0xac] sm:$0xf] }
 0x107   : > { %872 = vst [vmem:[#allocation4 + $0x21c] sm:$0xf] %v792_v57  ;;  %v1366_v0 = vrot.slane %v1364_v55, 7  ;;  %v1143_v1 = vshrl.u32 %v941_v61, 16  ;;  %v943_v7 = vld [vmem:[#allocation2 + $0xb0] sm:$0x1] }
 0x108   : > { %v1360_v2 = vor.u32 %v1358_v54, %v1357_v58  ;;  %v1362_v5 = vrot.slane %v1357_v58, 4  ;;  %v1146_v8 = vshll.u32 %v941_v61, 16  ;;  %v1152_v45 = vshll.u32 %v942_v6, 16  ;;  %v608_v4 = vld [vmem:[#allocation2 + $0xa4] sm:$0x8] }
 0x109   : > { %v1369_v9 = vor.u32 %v1367_v60, %v1366_v0  ;;  %v1145_v3 = vrot.slane %v1143_v1, 4  ;;  %v1156_v11 = vshrl.u32 %v942_v6, 16  ;;  %v1162_v13 = vshll.u32 %v943_v7, 16  ;;  %v609_v14 = vld [vmem:[#allocation2 + $0xa8] sm:$0xf] }
 0x10a   : > { %v1361_v12 = vsel %vm9946_vm5, %v7568_v53, %v1360_v2  ;;  %v1148_v10 = vrot.slane %v1146_v8, 5  ;;  %v1154_v16 = vrot.slane %v1152_v45, 5  ;;  %v610_v18 = vld [vmem:[#allocation2 + $0xac] sm:$0xf]  ;;  %v794_v20 = vshrl.u32 %v608_v4, 16 }
 0x10b   : > { %3804 = vmatmul.bf16.gmra.mxu2 %v7811_v62  ;;  %v1370_v15 = vsel %vm9946_vm5, %v1362_v5, %v1369_v9  ;;  %1509 = vst [vmem:[#allocation4 + $0x12c] sm:$0xf] %v1361_v12  ;;  %v1158_v17 = vrot.slane %v1156_v11, 4  ;;  %v1164_v23 = vrot.slane %v1162_v13, 5  ;;  %v799_v24 = vshrl.u32 %v609_v14, 16 }
 0x10c   : > { %1510 = vst [vmem:[#allocation4 + $0x150] sm:$0xf] %v1370_v15  ;;  %v1149_v19 = vor.u32 %v1148_v10, %v1145_v3  ;;  %v802_v25 = vshll.u32 %v609_v14, 16  ;;  %v1246_v26 = vld [vmem:[#allocation2 + $0x7c] sm:$0x8]  ;;  %v808_v59 = vshrl.u32 %v610_v18, 16 }
 0x10d   : > { %v1159_v21 = vor.u32 %v1158_v17, %v1154_v16  ;;  %v8914_v27 = vld [vmem:[#allocation4 + $0x1b4] sm:$0xf]  ;;  %v7804_v63 = vld [vmem:[#allocation4 + $0x1d4] sm:$0xf0]  ;;  %v811_v29 = vshll.u32 %v610_v18, 16  ;;  %v7562_v33 = vrot.slane %v794_v20, 11 }
 0x10e   : > { %3681 = vmatmul.bf16.gmra.mxu0 %v7767_v35  ;;  %v1150_v28 = vrot.slane %v1149_v19, 4  ;;  %v7802_v30 = vld [vmem:[#allocation4 + $0x1b0] sm:$0xf]  ;;  %v8918_v22 = vld [vmem:[#allocation4 + $0x1d0] sm:$0xf0]  ;;  %v810_v39 = vrot.slane %v808_v59, 7  ;;  %v7807_v53 = vor.u32 %v8914_v27, %v7804_v63 }
 0x10f   : > { %3740 = vmatmul.bf16.gmra.mxu1 %v7771_v34  ;;  %v1160_v32 = vrot.slane %v1159_v21, 4  ;;  %v801_v34 = vrot.slane %v799_v24, 7  ;;  %v1247_v36 = vld [vmem:[#allocation2 + $0x80] sm:$0xf]  ;;  %v1248_v40 = vld [vmem:[#allocation2 + $0x84] sm:$0xf]  ;;  %v7803_v60 = vor.u32 %v8918_v22, %v7802_v30 }
 0x110   : > { %v1155_v37 = vsel %vm10004_vm8, %v1150_v28, %v1154_v16  ;;  %v1372_v41 = vshrl.u32 %v1246_v26, 16  ;;  %v1377_v42 = vshrl.u32 %v1247_v36, 16  ;;  %v8888_v43 = vld [vmem:[#allocation4 + $0xe4] sm:$0xf]  ;;  %v7704_v44 = vld [vmem:[#allocation4 + $0x104] sm:$0xf0]  ;;  %v813_v50 = vor.u32 %v811_v29, %v810_v39 }
 0x111   : > { %3843 = vmatmul.bf16.gmra.mxu3 %v7671_v56  ;;  %v1165_v46 = vsel %vm10004_vm8, %v1160_v32, %v1164_v23  ;;  %1226 = vst [vmem:[#allocation4 + $0x248] sm:$0xf] %v1155_v37  ;;  %v804_v47 = vor.u32 %v802_v25, %v801_v34  ;;  %v806_v35 = vrot.slane %v801_v34, 4  ;;  %v1380_v48 = vshll.u32 %v1247_v36, 16  ;;  %v7846_v49 = vld [vmem:[#allocation4 + $0x200] sm:$0xf] }
 0x112   : > { %1227 = vst [vmem:[#allocation4 + $0x26c] sm:$0xf] %v1165_v46  ;;  %v7569_v51 = vrot.slane %v1372_v41, 11  ;;  %v1379_v52 = vrot.slane %v1377_v42, 7  ;;  %v8928_v54 = vld [vmem:[#allocation4 + $0x220] sm:$0xf0]  ;;  %v7707_v8 = vor.u32 %v8888_v43, %v7704_v44 }
 0x113   : > { %v805_v55 = vsel %vm9946_vm5, %v7562_v33, %v804_v47  ;;  %v1386_v56 = vshrl.u32 %v1248_v40, 16  ;;  %v1389_v57 = vshll.u32 %v1248_v40, 16  ;;  %v944_v58 = vld [vmem:[#allocation2 + $0xbc] sm:$0xf]  ;;  %v814_v61 = vsel %vm9946_vm5, %v806_v35, %v813_v50  ;;  %v945_v1 = vld [vmem:[#allocation2 + $0xc0] sm:$0xf] }
 0x114   : > { %873 = vst [vmem:[#allocation4 + $0x240] sm:$0xf] %v805_v55  ;;  %v1382_v62 = vor.u32 %v1380_v48, %v1379_v52  ;;  %v1384_v0 = vrot.slane %v1379_v52, 4  ;;  %v1167_v5 = vshrl.u32 %v944_v58, 16  ;;  %v1170_v6 = vshll.u32 %v944_v58, 16 }
 0x115   : > { %874 = vst [vmem:[#allocation4 + $0x264] sm:$0xf] %v814_v61  ;;  %v1388_v2 = vrot.slane %v1386_v56, 7  ;;  %v1176_v7 = vshll.u32 %v945_v1, 16  ;;  %v7847_v9 = vor.u32 %v8928_v54, %v7846_v49  ;;  %v946_v45 = vld [vmem:[#allocation2 + $0xc4] sm:$0x1] }
 0x116   : > { %v1383_v3 = vsel %vm9946_vm5, %v7569_v51, %v1382_v62  ;;  %v1180_v11 = vshrl.u32 %v945_v1, 16  ;;  %v1169_v10 = vrot.slane %v1167_v5, 4  ;;  %v1172_v13 = vrot.slane %v1170_v6, 5  ;;  %v612_v16 = vld [vmem:[#allocation2 + $0xbc] sm:$0xf] }
 0x117   : > { %v1391_v12 = vor.u32 %v1389_v57, %v1388_v2  ;;  %1511 = vst [vmem:[#allocation4 + $0x174] sm:$0xf] %v1383_v3  ;;  %v1178_v4 = vrot.slane %v1176_v7, 5  ;;  %v1186_v15 = vshll.u32 %v946_v45, 16  ;;  %v613_v19 = vld [vmem:[#allocation2 + $0xc0] sm:$0xf] }
 0x118   : > { %v1182_v14 = vrot.slane %v1180_v11, 4  ;;  %v1173_v18 = vor.u32 %v1172_v13, %v1169_v10  ;;  %v821_v20 = vshrl.u32 %v612_v16, 16  ;;  %v611_v24 = vld [vmem:[#allocation2 + $0xb8] sm:$0x8]  ;;  %v830_v25 = vshrl.u32 %v613_v19, 16 }
 0x119   : > { %v1392_v17 = vsel %vm9946_vm5, %v1384_v0, %v1391_v12  ;;  %v1188_v23 = vrot.slane %v1186_v15, 5  ;;  %v816_v27 = vshrl.u32 %v611_v24, 16  ;;  %v824_v28 = vshll.u32 %v612_v16, 16  ;;  %v1249_v34 = vld [vmem:[#allocation2 + $0x90] sm:$0x8] }
 0x11a   : > { %1512 = vst [vmem:[#allocation4 + $0x198] sm:$0xf] %v1392_v17  ;;  %v1183_v21 = vor.u32 %v1182_v14, %v1178_v4  ;;  %v1174_v26 = vrot.slane %v1173_v18, 4  ;;  %v823_v63 = vrot.slane %v821_v20, 7  ;;  %v832_v29 = vrot.slane %v830_v25, 7 }
 0x11b   : > { %3809 = vmatmul.bf16.gmra.mxu2 %v7847_v9  ;;  %v833_v30 = vshll.u32 %v613_v19, 16  ;;  %v7563_v32 = vrot.slane %v816_v27, 11  ;;  %v1250_v36 = vld [vmem:[#allocation2 + $0x94] sm:$0xf]  ;;  %v1394_v41 = vshrl.u32 %v1249_v34, 16 }
 0x11c   : > { %v1184_v59 = vrot.slane %v1183_v21, 4  ;;  %v1179_v22 = vsel %vm10004_vm8, %v1174_v26, %v1178_v4  ;;  %v826_v33 = vor.u32 %v824_v28, %v823_v63  ;;  %v828_v39 = vrot.slane %v823_v63, 4  ;;  %v1251_v43 = vld [vmem:[#allocation2 + $0x98] sm:$0xf]  ;;  %v7838_v51 = vld [vmem:[#allocation4 + $0x1f8] sm:$0xf] }
 0x11d   : > { %1228 = vst [vmem:[#allocation4 + $0x290] sm:$0xf] %v1179_v22  ;;  %v835_v40 = vor.u32 %v833_v30, %v832_v29  ;;  %v1399_v44 = vshrl.u32 %v1250_v36, 16  ;;  %v1402_v46 = vshll.u32 %v1250_v36, 16  ;;  %v1408_v35 = vshrl.u32 %v1251_v43, 16 }
 0x11e   : > { %3686 = vmatmul.bf16.gmra.mxu0 %v7803_v60  ;;  %v1189_v37 = vsel %vm10004_vm8, %v1184_v59, %v1188_v23  ;;  %v827_v42 = vsel %vm9946_vm5, %v7563_v32, %v826_v33  ;;  %v1411_v48 = vshll.u32 %v1251_v43, 16  ;;  %v7570_v49 = vrot.slane %v1394_v41, 11  ;;  %v8927_v52 = vld [vmem:[#allocation4 + $0x218] sm:$0xf0]  ;;  %v8897_v54 = vld [vmem:[#allocation4 + $0x12c] sm:$0xf] }
 0x11f   : > { %3745 = vmatmul.bf16.gmra.mxu1 %v7807_v53  ;;  %1229 = vst [vmem:[#allocation4 + $0x2b4] sm:$0xf] %v1189_v37  ;;  %v836_v47 = vsel %vm9946_vm5, %v828_v39, %v835_v40  ;;  %v1401_v50 = vrot.slane %v1399_v44, 7  ;;  %v1410_v53 = vrot.slane %v1408_v35, 7  ;;  %v7740_v55 = vld [vmem:[#allocation4 + $0x14c] sm:$0xf0]  ;;  %v7839_v0 = vor.u32 %v8927_v52, %v7838_v51 }
 0x120   : > { %875 = vst [vmem:[#allocation4 + $0x288] sm:$0xf] %v827_v42  ;;  %v7882_v58 = vld [vmem:[#allocation4 + $0x248] sm:$0xf]  ;;  %v8937_v60 = vld [vmem:[#allocation4 + $0x268] sm:$0xf0]  ;;  %v7743_v1 = vor.u32 %v8897_v54, %v7740_v55 }
 0x121   : > { %3848 = vmatmul.bf16.gmra.mxu3 %v7707_v8  ;;  %876 = vst [vmem:[#allocation4 + $0x2ac] sm:$0xf] %v836_v47  ;;  %v1404_v56 = vor.u32 %v1402_v46, %v1401_v50  ;;  %v1406_v57 = vrot.slane %v1401_v50, 4  ;;  %v1413_v61 = vor.u32 %v1411_v48, %v1410_v53  ;;  %v917_v5 = vld [vmem:[#allocation2 + $0x8] sm:$0xf]  ;;  %v7883_v6 = vor.u32 %v8937_v60, %v7882_v58 }
 0x122   : > { %v918_v7 = vld [vmem:[#allocation2 + $0xc] sm:$0xf]  ;;  %v951_v8 = vshrl.u32 %v917_v5, 16  ;;  %v954_v9 = vshll.u32 %v917_v5, 16  ;;  %v1253_v11 = vld [vmem:[#allocation2 + $0xa8] sm:$0xf] }
 0x123   : > { %v1405_v62 = vsel %vm9946_vm5, %v7570_v49, %v1404_v56  ;;  %v1414_v2 = vsel %vm9946_vm5, %v1406_v57, %v1413_v61  ;;  %v960_v3 = vshll.u32 %v918_v7, 16  ;;  %v964_v45 = vshrl.u32 %v918_v7, 16  ;;  %v1254_v12 = vld [vmem:[#allocation2 + $0xac] sm:$0xf]  ;;  %v919_v10 = vld [vmem:[#allocation2 + $0x10] sm:$0x1] }
 0x124   : > { %1513 = vst [vmem:[#allocation4 + $0x1bc] sm:$0xf] %v1405_v62  ;;  %v953_v13 = vrot.slane %v951_v8, 4  ;;  %v956_v4 = vrot.slane %v954_v9, 5  ;;  %v970_v16 = vshll.u32 %v919_v10, 16  ;;  %v1421_v18 = vshrl.u32 %v1253_v11, 16 }
 0x125   : > { %1514 = vst [vmem:[#allocation4 + $0x1e0] sm:$0xf] %v1414_v2  ;;  %v962_v14 = vrot.slane %v960_v3, 5  ;;  %v966_v15 = vrot.slane %v964_v45, 4  ;;  %v1252_v17 = vld [vmem:[#allocation2 + $0xa4] sm:$0x8] }
 0x126   : > { %v1424_v19 = vshll.u32 %v1253_v11, 16  ;;  %v1430_v20 = vshrl.u32 %v1254_v12, 16  ;;  %v957_v21 = vor.u32 %v956_v4, %v953_v13  ;;  %v1416_v24 = vshrl.u32 %v1252_v17, 16  ;;  %v7874_v36 = vld [vmem:[#allocation4 + $0x240] sm:$0xf] }
 0x127   : > { %v967_v23 = vor.u32 %v966_v15, %v962_v14  ;;  %v1433_v25 = vshll.u32 %v1254_v12, 16  ;;  %v972_v26 = vrot.slane %v970_v16, 5  ;;  %v1423_v27 = vrot.slane %v1421_v18, 7  ;;  %v8936_v37 = vld [vmem:[#allocation4 + $0x260] sm:$0xf0] }
 0x128   : > { %v1432_v63 = vrot.slane %v1430_v20, 7  ;;  %v958_v28 = vrot.slane %v957_v21, 4  ;;  %v7571_v29 = vrot.slane %v1416_v24, 11  ;;  %v8906_v41 = vld [vmem:[#allocation4 + $0x174] sm:$0xf]  ;;  %v7875_v47 = vor.u32 %v8936_v37, %v7874_v36  ;;  %v532_v21 = vld [vmem:[%s9927_s15 + $0xa0] sm:$0xff] }
 0x129   : > { %v968_v59 = vrot.slane %v967_v23, 4  ;;  %v1426_v30 = vor.u32 %v1424_v19, %v1423_v27  ;;  %v1428_v22 = vrot.slane %v1423_v27, 4  ;;  %v7776_v42 = vld [vmem:[#allocation4 + $0x194] sm:$0xf0]  ;;  %v7918_v43 = vld [vmem:[#allocation4 + $0x290] sm:$0xf] }
 0x12a   : > { %v1435_v32 = vor.u32 %v1433_v25, %v1432_v63  ;;  %v963_v33 = vsel %vm10004_vm8, %v958_v28, %v962_v14  ;;  %v8946_v44 = vld [vmem:[#allocation4 + $0x2b0] sm:$0xf0]  ;;  %v7779_v35 = vor.u32 %v8906_v41, %v7776_v42  ;;  %v920_v49 = vld [vmem:[#allocation2 + $0x1c] sm:$0xf]  ;;  %v921_v50 = vld [vmem:[#allocation2 + $0x20] sm:$0xf] }
 0x12b   : > { %3814 = vmatmul.bf16.gmra.mxu2 %v7883_v6  ;;  %v973_v34 = vsel %vm10004_vm8, %v968_v59, %v972_v26  ;;  %1210 = vst [vmem:[#allocation4 + $0x8] sm:$0xf] %v963_v33  ;;  %v1427_v39 = vsel %vm9946_vm5, %v7571_v29, %v1426_v30  ;;  %v7919_v48 = vor.u32 %v8946_v44, %v7918_v43  ;;  %v975_v52 = vshrl.u32 %v920_v49, 16  ;;  %v1256_v57 = vld [vmem:[#allocation2 + $0xbc] sm:$0xf]  ;;  %v533_v23 = vld [vmem:[%s9927_s15 + $0xa8] sm:$0xff] }
 0x12c   : > { %v1436_v40 = vsel %vm9946_vm5, %v1428_v22, %v1435_v32  ;;  %1211 = vst [vmem:[#allocation4 + $0x2c] sm:$0xf] %v973_v34  ;;  %v978_v53 = vshll.u32 %v920_v49, 16  ;;  %v984_v54 = vshll.u32 %v921_v50, 16  ;;  %v988_v55 = vshrl.u32 %v921_v50, 16  ;;  %v8988_v27 = vld [vmem:[#allocation8 + $0x130] sm:$0xff] }
 0x12d   : > { %1515 = vst [vmem:[#allocation4 + $0x204] sm:$0xf] %v1427_v39  ;;  %v977_v58 = vrot.slane %v975_v52, 4  ;;  %v922_v2 = vld [vmem:[#allocation2 + $0x24] sm:$0x1]  ;;  %v1443_v5 = vshrl.u32 %v1256_v57, 16  ;;  %v9196_v59 = vpack.c.bf16 %v533_v23, %v532_v21 }
 0x12e   : > { %3691 = vmatmul.bf16.gmra.mxu0 %v7839_v0  ;;  %1516 = vst [vmem:[#allocation4 + $0x228] sm:$0xf] %v1436_v40  ;;  %v980_v60 = vrot.slane %v978_v53, 5  ;;  %v986_v61 = vrot.slane %v984_v54, 5  ;;  %v990_v62 = vrot.slane %v988_v55, 4  ;;  %v994_v8 = vshll.u32 %v922_v2, 16 }
 0x12f   : > { %v1257_v0 = vld [vmem:[#allocation2 + $0xc0] sm:$0xf]  ;;  %v1255_v9 = vld [vmem:[#allocation2 + $0xb8] sm:$0x8]  ;;  %v1446_v3 = vshll.u32 %v1256_v57, 16  ;;  %v1445_v11 = vrot.slane %v1443_v5, 7 }
 0x130   : > { %v981_v6 = vor.u32 %v980_v60, %v977_v58  ;;  %v991_v7 = vor.u32 %v990_v62, %v986_v61  ;;  %v1438_v45 = vshrl.u32 %v1255_v9, 16  ;;  %v1452_v12 = vshrl.u32 %v1257_v0, 16  ;;  %v7910_v29 = vld [vmem:[#allocation4 + $0x288] sm:$0xf]  ;;  %v8945_v30 = vld [vmem:[#allocation4 + $0x2a8] sm:$0xf0] }
 0x131   : > { %3853 = vmatmul.bf16.gmra.mxu3 %v7743_v1  ;;  %v8989_v1 = vld [vmem:[#allocation8 + $0x138] sm:$0xff]  ;;  %v996_v14 = vrot.slane %v994_v8, 5  ;;  %v1455_v15 = vshll.u32 %v1257_v0, 16  ;;  %v1448_v18 = vor.u32 %v1446_v3, %v1445_v11  ;;  %v1450_v19 = vrot.slane %v1445_v11, 4  ;;  %v8915_v32 = vld [vmem:[#allocation4 + $0x1bc] sm:$0xf] }
 0x132   : > { %3884 = vmatpush.bf16.msra.mxu0 %v8989_v1  ;;  %v982_v13 = vrot.slane %v981_v6, 4  ;;  %v992_v4 = vrot.slane %v991_v7, 4  ;;  %v7572_v17 = vrot.slane %v1438_v45, 11  ;;  %v1454_v20 = vrot.slane %v1452_v12, 7  ;;  %v7812_v33 = vld [vmem:[#allocation4 + $0x1dc] sm:$0xf0] }
 0x133   : > { %9228 = vst [vmem:[#allocation2 + $0xd0] sm:$0xff] %v9196_v59   ;;  %v8987_v36 = vld [vmem:[#allocation8 + $0x128] sm:$0xff]  ;;  %v7911_v39 = vor.u32 %v8945_v30, %v7910_v29  ;;  %v7815_v40 = vor.u32 %v8915_v32, %v7812_v33  ;;  %v9005_v44 = vld [vmem:[#allocation8 + $0x1b8] sm:$0xff]  ;;  %v8986_v54 = vld [vmem:[#allocation8 + $0x120] sm:$0xff] }
 0x134   : > { %v987_v25 = vsel %vm10004_vm8, %v982_v13, %v986_v61  ;;  %v997_v26 = vsel %vm10004_vm8, %v992_v4, %v996_v14  ;;  %v1449_v63 = vsel %vm9946_vm5, %v7572_v17, %v1448_v18  ;;  %v1457_v28 = vor.u32 %v1455_v15, %v1454_v20  ;;  %v923_v41 = vld [vmem:[#allocation2 + $0x30] sm:$0xf]  ;;  %v924_v42 = vld [vmem:[#allocation2 + $0x34] sm:$0xf]  ;;  %4002 = vmatpush.bf16.msrb.mxu2 %v9005_v44  ;;  %v9013_v50 = vld [vmem:[#allocation8 + $0x1f8] sm:$0xff] }
 0x135   : > { %1212 = vst [vmem:[#allocation4 + $0x50] sm:$0xf] %v987_v25  ;;  %v1012_v49 = vshrl.u32 %v924_v42, 16  ;;  %v925_v55 = vld [vmem:[#allocation2 + $0x38] sm:$0x1]  ;;  %4061 = vmatpush.bf16.msra.mxu3 %v9013_v50  ;;  %v8997_v58 = vld [vmem:[#allocation8 + $0x178] sm:$0xff] }
 0x136   : > { %1213 = vst [vmem:[#allocation4 + $0x74] sm:$0xf] %v997_v26  ;;  %3885 = vmatpush.bf16.msra.mxu0 %v8988_v27  ;;  %v1458_v22 = vsel %vm9946_vm5, %v1450_v19, %v1457_v28  ;;  %v9004_v60 = vld [vmem:[#allocation8 + $0x1b0] sm:$0xff]  ;;  %v1018_v62 = vshll.u32 %v925_v55, 16  ;;  %v1258_v0 = vld [vmem:[#allocation2 + $0xcc] sm:$0x8]  ;;  %3943 = vmatpush.bf16.msrb.mxu1 %v8997_v58 }
 0x137   : > { %1517 = vst [vmem:[#allocation4 + $0x24c] sm:$0xf] %v1449_v63  ;;  %v1014_v57 = vrot.slane %v1012_v49, 4  ;;  %v1460_v6 = vshrl.u32 %v1258_v0, 16  ;;  %v9012_v8 = vld [vmem:[#allocation8 + $0x1f0] sm:$0xff]  ;;  %v9003_v18 = vld [vmem:[#allocation8 + $0x1a8] sm:$0xff] }
 0x138   : > { %1518 = vst [vmem:[#allocation4 + $0x270] sm:$0xf] %v1458_v22  ;;  %4003 = vmatpush.bf16.msrb.mxu2 %v9004_v60  ;;  %v1020_v3 = vrot.slane %v1018_v62, 5  ;;  %v8996_v17 = vld [vmem:[#allocation8 + $0x170] sm:$0xff]  ;;  %v7594_v26 = vld [vmem:[#allocation4 + $0x8] sm:$0xf] }
 0x139   : > { %4062 = vmatpush.bf16.msra.mxu3 %v9012_v8  ;;  %v7573_v20 = vrot.slane %v1460_v6, 11  ;;  %v9011_v27 = vld [vmem:[#allocation8 + $0x1e8] sm:$0xff]  ;;  %v8865_v59 = vld [vmem:[#allocation4 + $0x28] sm:$0xf0]  ;;  %v8924_v29 = vld [vmem:[#allocation4 + $0x204] sm:$0xf] }
 0x13a   : > { %3886 = vmatpush.bf16.msra.mxu0 %v8987_v36  ;;  %v1259_v2 = vld [vmem:[#allocation2 + $0xd0] sm:$0xf]  ;;  %v1260_v5 = vld [vmem:[#allocation2 + $0xd4] sm:$0xf]  ;;  %3944 = vmatpush.bf16.msrb.mxu1 %v8996_v17  ;;  %v8985_v30 = vld [vmem:[#allocation8 + $0x118] sm:$0xff] }
 0x13b   : > { %v3657_v51 = vpop.f32.mrf.mxu0  ;;  %3819 = vmatmul.bf16.gmra.mxu2 %v7919_v48  ;;  %v1465_v45 = vshrl.u32 %v1259_v2, 16  ;;  %v1468_v11 = vshll.u32 %v1259_v2, 16  ;;  %v1474_v4 = vshrl.u32 %v1260_v5, 16  ;;  %v1477_v14 = vshll.u32 %v1260_v5, 16  ;;  %v7848_v32 = vld [vmem:[#allocation4 + $0x224] sm:$0xf0] }
 0x13c   : > { %v3716_v46 = vpop.f32.mrf.mxu1  ;;  %4004 = vmatpush.bf16.msrb.mxu2 %v9003_v18  ;;  %v8995_v33 = vld [vmem:[#allocation8 + $0x168] sm:$0xff]  ;;  %v9002_v36 = vld [vmem:[#allocation8 + $0x1a0] sm:$0xff]  ;;  %v7851_v44 = vor.u32 %v8924_v29, %v7848_v32  ;;  %v9001_v50 = vld [vmem:[#allocation8 + $0x198] sm:$0xff] }
 0x13d   : > { %v10128_v56 = vadd.f32 %v3716_v46, %v3657_v51  ;;  %v999_v46 = vshrl.u32 %v923_v41, 16  ;;  %v1467_v21 = vrot.slane %v1465_v45, 7  ;;  %v1476_v25 = vrot.slane %v1474_v4, 7  ;;  %4063 = vmatpush.bf16.msra.mxu3 %v9011_v27  ;;  %v8994_v49 = vld [vmem:[#allocation8 + $0x160] sm:$0xff]  ;;  %v1561_v62 = vld [vmem:[#allocation2 + $0x1c] sm:$0xf] }
 0x13e   : > { %3696 = vmatmul.bf16.gmra.mxu0 %v7875_v47  ;;  %v1002_v47 = vshll.u32 %v923_v41, 16  ;;  %3945 = vmatpush.bf16.msrb.mxu1 %v8995_v33  ;;  %v9010_v41 = vld [vmem:[#allocation8 + $0x1e0] sm:$0xff]  ;;  %v1562_v2 = vld [vmem:[#allocation2 + $0x20] sm:$0xf]  ;;  %v1592_v5 = vshrl.u32 %v1561_v62, 16  ;;  %v1595_v6 = vshll.u32 %v1561_v62, 16 }
 0x13f   : > { %v1001_v51 = vrot.slane %v999_v46, 4  ;;  %3887 = vmatpush.bf16.msra.mxu0 %v8986_v54  ;;  %v1470_v63 = vor.u32 %v1468_v11, %v1467_v21  ;;  %v1472_v28 = vrot.slane %v1467_v21, 4  ;;  %v1479_v22 = vor.u32 %v1477_v14, %v1476_v25  ;;  %v1873_v46 = vld [vmem:[#allocation2 + $0x30] sm:$0xf]  ;;  %v8984_v54 = vld [vmem:[#allocation8 + $0x110] sm:$0xff]  ;;  %v8993_v8 = vld [vmem:[#allocation8 + $0x158] sm:$0xff] }
 0x140   : > { %v1004_v52 = vrot.slane %v1002_v47, 5  ;;  %4005 = vmatpush.bf16.msrb.mxu2 %v9002_v36  ;;  %v1874_v47 = vld [vmem:[#allocation2 + $0x34] sm:$0xf]  ;;  %v1872_v55 = vld [vmem:[#allocation2 + $0x2c] sm:$0x8]  ;;  %v1594_v14 = vrot.slane %v1592_v5, 4 }
 0x141   : > { %3858 = vmatmul.bf16.gmra.mxu3 %v7779_v35  ;;  %v1008_v35 = vshll.u32 %v924_v42, 16  ;;  %v1903_v58 = vshrl.u32 %v1872_v55, 16  ;;  %v1563_v4 = vld [vmem:[#allocation2 + $0x24] sm:$0x1]  ;;  %v1597_v17 = vrot.slane %v1595_v6, 5 }
 0x142   : > { %v1005_v61 = vor.u32 %v1004_v52, %v1001_v51  ;;  %4064 = vmatpush.bf16.msra.mxu3 %v9010_v41  ;;  %v1908_v51 = vshrl.u32 %v1873_v46, 16  ;;  %v1917_v52 = vshrl.u32 %v1874_v47, 16  ;;  %3946 = vmatpush.bf16.msrb.mxu1 %v8994_v49  ;;  %v1521_v32 = vld [vmem:[#allocation2 + $0x1c] sm:$0xf]  ;;  %v1522_v33 = vld [vmem:[#allocation2 + $0x20] sm:$0xf] }
 0x143   : > { %v10136_v24 = vpop.f32.mrf.mxu0  ;;  %v1010_v53 = vrot.slane %v1008_v35, 5  ;;  %3888 = vmatpush.bf16.msra.mxu0 %v8985_v30  ;;  %v8992_v30 = vld [vmem:[#allocation8 + $0x150] sm:$0xff]  ;;  %1541 = vst [vmem:[#allocation4 + $0x10] sm:$0xf] %v1521_v32  ;;  %v2162_v36 = vld [vmem:[#allocation2 + $0x30] sm:$0xf] }
 0x144   : > { %v10130_v10 = vpop.f32.mrf.mxu3  ;;  %v10132_v16 = vpop.f32.mrf.mxu1  ;;  %v1006_v9 = vrot.slane %v1005_v61, 4  ;;  %4006 = vmatpush.bf16.msrb.mxu2 %v9001_v50  ;;  %v1910_v60 = vrot.slane %v1908_v51, 7  ;;  %v1911_v61 = vshll.u32 %v1873_v46, 16  ;;  %v1919_v0 = vrot.slane %v1917_v52, 7  ;;  %v8933_v41 = vld [vmem:[#allocation4 + $0x24c] sm:$0xf] }
 0x145   : > { %v1015_v1 = vor.u32 %v1014_v57, %v1010_v53  ;;  %v9009_v57 = vld [vmem:[#allocation8 + $0x1d8] sm:$0xff]  ;;  %1542 = vst [vmem:[#allocation4 + $0x34] sm:$0xf] %v1522_v33  ;;  %v8982_v46 = vld [vmem:[#allocation8 + $0x100] sm:$0xff]  ;;  %v8991_v50 = vld [vmem:[#allocation8 + $0x148] sm:$0xff] }
 0x146   : > { %v1011_v19 = vsel %vm10004_vm8, %v1006_v9, %v1010_v53  ;;  %4065 = vmatpush.bf16.msra.mxu3 %v9009_v57  ;;  %v9000_v9 = vld [vmem:[#allocation8 + $0x190] sm:$0xff]  ;;  %v1913_v45 = vor.u32 %v1911_v61, %v1910_v60  ;;  %v1915_v11 = vrot.slane %v1910_v60, 4  ;;  %3947 = vmatpush.bf16.msrb.mxu1 %v8993_v8  ;;  %2182 = vst [vmem:[#allocation4 + $0x1c] sm:$0xf] %v2162_v36  ;;  %v7884_v49 = vld [vmem:[#allocation4 + $0x26c] sm:$0xf0] }
 0x147   : > { %v1016_v13 = vrot.slane %v1015_v1, 4  ;;  %1214 = vst [vmem:[#allocation4 + $0x98] sm:$0xf] %v1011_v19  ;;  %v1920_v1 = vshll.u32 %v1874_v47, 16  ;;  %3889 = vmatpush.bf16.msra.mxu0 %v8984_v54  ;;  %v8983_v19 = vld [vmem:[#allocation8 + $0x108] sm:$0xff]  ;;  %v8998_v51 = vld [vmem:[#allocation8 + $0x180] sm:$0xff] }
 0x148   : > { %4007 = vmatpush.bf16.msrb.mxu2 %v9000_v9  ;;  %v1876_v6 = vld [vmem:[#allocation2 + $0x44] sm:$0xf]  ;;  %v1565_v32 = vld [vmem:[#allocation2 + $0x34] sm:$0xf] }
 0x149   : > { %v1021_v23 = vsel %vm10004_vm8, %v1016_v13, %v1020_v3  ;;  %v7574_v3 = vrot.slane %v1903_v58, 11  ;;  %v1922_v13 = vor.u32 %v1920_v1, %v1919_v0  ;;  %v9006_v58 = vld [vmem:[#allocation8 + $0x1c0] sm:$0xff]  ;;  %v7887_v0 = vor.u32 %v8933_v41, %v7884_v49 }
 0x14a   : > { %1215 = vst [vmem:[#allocation4 + $0xbc] sm:$0xf] %v1021_v23  ;;  %v1601_v23 = vshll.u32 %v1562_v2, 16  ;;  %3948 = vmatpush.bf16.msrb.mxu1 %v8992_v30 }
 0x14b   : > { %v3662_v43 = vpop.f32.mrf.mxu0  ;;  %v1914_v21 = vsel %vm9946_vm5, %v7574_v3, %v1913_v45  ;;  %v1923_v27 = vsel %vm9946_vm5, %v1915_v11, %v1922_v13  ;;  %3890 = vmatpush.bf16.msra.mxu0 %v8983_v19  ;;  %v8990_v3 = vld [vmem:[#allocation8 + $0x140] sm:$0xff]  ;;  %v1930_v11 = vshrl.u32 %v1876_v6, 16 }
 0x14c   : > { %v10146_v34 = vpop.f32.mrf.mxu3  ;;  %v3721_v37 = vpop.f32.mrf.mxu1  ;;  %2142 = vst [vmem:[#allocation4 + $0x18] sm:$0xf] %v1914_v21  ;;  %v1603_v47 = vrot.slane %v1601_v23, 5  ;;  %v1877_v45 = vld [vmem:[#allocation2 + $0x48] sm:$0xf]  ;;  %v9021_v23 = vld [vmem:[#allocation8 + $0x238] sm:$0xff] }
 0x14d   : > { %v10148_v48 = vadd.f32 %v3721_v37, %v3662_v43  ;;  %v1471_v37 = vsel %vm9946_vm5, %v7573_v20, %v1470_v63  ;;  %v7595_v43 = vor.u32 %v8865_v59, %v7594_v26  ;;  %v9008_v20 = vld [vmem:[#allocation8 + $0x1d0] sm:$0xff]  ;;  %v1598_v63 = vor.u32 %v1597_v17, %v1594_v14  ;;  %2143 = vst [vmem:[#allocation4 + $0x3c] sm:$0xf] %v1923_v27  ;;  %v1875_v14 = vld [vmem:[#allocation2 + $0x40] sm:$0x8] }
 0x14e   : > { %3701 = vmatmul.bf16.gmra.mxu0 %v7911_v39  ;;  %v1480_v39 = vsel %vm9946_vm5, %v1472_v28, %v1479_v22  ;;  %1519 = vst [vmem:[#allocation4 + $0x294] sm:$0xf] %v1471_v37  ;;  %v1605_v28 = vshrl.u32 %v1562_v2, 16  ;;  %v1611_v59 = vshll.u32 %v1563_v4, 16  ;;  %4066 = vmatpush.bf16.msra.mxu3 %v9008_v20  ;;  %v8999_v22 = vld [vmem:[#allocation8 + $0x188] sm:$0xff]  ;;  %v1939_v17 = vshrl.u32 %v1877_v45, 16 }
 0x14f   : > { %1520 = vst [vmem:[#allocation4 + $0x2b8] sm:$0xf] %v1480_v39  ;;  %v7630_v37 = vld [vmem:[#allocation4 + $0x50] sm:$0xf]  ;;  %v8874_v39 = vld [vmem:[#allocation4 + $0x70] sm:$0xf0]  ;;  %4008 = vmatpush.bf16.msrb.mxu2 %v8999_v22  ;;  %3891 = vmatpush.bf16.msra.mxu0 %v8982_v46 }
 0x150   : > { %v1613_v55 = vrot.slane %v1611_v59, 5  ;;  %3949 = vmatpush.bf16.msrb.mxu1 %v8991_v50  ;;  %v7631_v62 = vor.u32 %v8874_v39, %v7630_v37  ;;  %v1925_v19 = vshrl.u32 %v1875_v14, 16  ;;  %v1932_v20 = vrot.slane %v1930_v11, 7  ;;  %v1564_v22 = vld [vmem:[#allocation2 + $0x30] sm:$0xf] }
 0x151   : > { %3863 = vmatmul.bf16.gmra.mxu3 %v7815_v40  ;;  %v1933_v27 = vshll.u32 %v1876_v6, 16  ;;  %v1566_v37 = vld [vmem:[#allocation2 + $0x38] sm:$0x1]  ;;  %v1616_v39 = vshrl.u32 %v1564_v22, 16  ;;  %v1619_v41 = vshll.u32 %v1564_v22, 16 }
 0x152   : > { %v7575_v59 = vrot.slane %v1925_v19, 11  ;;  %v1937_v30 = vrot.slane %v1932_v20, 4  ;;  %v2165_v6 = vld [vmem:[#allocation2 + $0x48] sm:$0xf] }
 0x153   : > { %v10154_v15 = vpop.f32.mrf.mxu0  ;;  %4009 = vmatpush.bf16.msrb.mxu2 %v8998_v51  ;;  %v7610_v60 = vld [vmem:[#allocation4 + $0x18] sm:$0xf]  ;;  %v1935_v33 = vor.u32 %v1933_v27, %v1932_v20  ;;  %v1618_v51 = vrot.slane %v1616_v39, 4  ;;  %2185 = vst [vmem:[#allocation4 + $0x88] sm:$0xf] %v2165_v6 }
 0x154   : > { %v10150_v7 = vpop.f32.mrf.mxu3  ;;  %v10152_v12 = vpop.f32.mrf.mxu1  ;;  %v8867_v2 = vld [vmem:[#allocation4 + $0x38] sm:$0xf0]  ;;  %3950 = vmatpush.bf16.msrb.mxu1 %v8990_v3 }
 0x155   : > { %v7611_v9 = vor.u32 %v8867_v2, %v7610_v60  ;;  %v1936_v49 = vsel %vm9946_vm5, %v7575_v59, %v1935_v33  ;;  %v8883_v2 = vld [vmem:[#allocation4 + $0xb8] sm:$0xf0]  ;;  %v8942_v3 = vld [vmem:[#allocation4 + $0x294] sm:$0xf]  ;;  %v1879_v59 = vld [vmem:[#allocation2 + $0x58] sm:$0xf] }
 0x156   : > { %2144 = vst [vmem:[#allocation4 + $0x60] sm:$0xf] %v1936_v49  ;;  %v7920_v11 = vld [vmem:[#allocation4 + $0x2b4] sm:$0xf0] }
 0x157   : > { %4010 = vmatmul.bf16.vlgmr.msrb.gmra.mxu2 %v7611_v9  ;;  %v7923_v27 = vor.u32 %v8942_v3, %v7920_v11 }
 0x15b   : > { %v3667_v35 = vpop.f32.mrf.mxu0 }
 0x15c   : > { %v10164_v40 = vpop.f32.mrf.mxu3  ;;  %v3726_v42 = vpop.f32.mrf.mxu1 }
 0x15d   : > { %v10166_v53 = vadd.f32 %v3726_v42, %v3667_v35  ;;  %v9007_v42 = vld [vmem:[#allocation8 + $0x1c8] sm:$0xff]  ;;  %v1607_v35 = vrot.slane %v1605_v28, 4  ;;  %v1942_v28 = vshll.u32 %v1877_v45, 16 }
 0x15e   : > { %3774 = vmatmul.bf16.vlgmr.msrb.gmra.mxu0 %v7595_v43  ;;  %v10174_v26 = vpop.f32.mrf.mxu2  ;;  %v2163_v43 = vld [vmem:[#allocation2 + $0x34] sm:$0xf]  ;;  %4067 = vmatpush.bf16.msra.mxu3 %v9007_v42 }
 0x15f   : > { %2183 = vst [vmem:[#allocation4 + $0x40] sm:$0xf] %v2163_v43  ;;  %v1608_v54 = vor.u32 %v1607_v35, %v1603_v47  ;;  %4120 = vmatpush.bf16.msrb.mxu0 %v9021_v23  ;;  %v1629_v43 = vshrl.u32 %v1565_v32, 16 }
 0x161   : > { %3868 = vmatmul.bf16.gmra.mxu3 %v7851_v44  ;;  %v1599_v44 = vrot.slane %v1598_v63, 4  ;;  %v1609_v5 = vrot.slane %v1608_v54, 4  ;;  %v1941_v63 = vrot.slane %v1939_v17, 7  ;;  %v1631_v9 = vrot.slane %v1629_v43, 4 }
 0x162   : > { %4068 = vmatpush.bf16.msra.mxu3 %v9006_v58  ;;  %v1524_v58 = vld [vmem:[#allocation2 + $0x34] sm:$0xf] }
 0x163   : > { %v10178_v29 = vpop.f32.mrf.mxu0  ;;  %v1604_v52 = vsel %vm10004_vm8, %v1599_v44, %v1603_v47  ;;  %v1614_v4 = vsel %vm10004_vm8, %v1609_v5, %v1613_v55  ;;  %v1944_v36 = vor.u32 %v1942_v28, %v1941_v63  ;;  %v1635_v44 = vshll.u32 %v1566_v37, 16  ;;  %v1523_v55 = vld [vmem:[#allocation2 + $0x30] sm:$0xf]  ;;  %1544 = vst [vmem:[#allocation4 + $0x7c] sm:$0xf] %v1524_v58 }
 0x164   : > { %v10168_v18 = vpop.f32.mrf.mxu3  ;;  %v10172_v25 = vpop.f32.mrf.mxu1  ;;  %1851 = vst [vmem:[#allocation4 + $0x14] sm:$0xf] %v1604_v52  ;;  %v1621_v52 = vrot.slane %v1619_v41, 5  ;;  %v7646_v28 = vld [vmem:[#allocation4 + $0x60] sm:$0xf] }
 0x165   : > { %1852 = vst [vmem:[#allocation4 + $0x38] sm:$0xf] %v1614_v4  ;;  %v1945_v50 = vsel %vm9946_vm5, %v1937_v30, %v1944_v36  ;;  %v1637_v4 = vrot.slane %v1635_v44, 5  ;;  %v1880_v30 = vld [vmem:[#allocation2 + $0x5c] sm:$0xf]  ;;  %v1952_v36 = vshrl.u32 %v1879_v59, 16 }
 0x166   : > { %v10184_v1 = vpop.f32.mrf.mxu2  ;;  %2145 = vst [vmem:[#allocation4 + $0x84] sm:$0xf] %v1945_v50  ;;  %v1961_v37 = vshrl.u32 %v1880_v30, 16 }
 0x167   : > { %1543 = vst [vmem:[#allocation4 + $0x58] sm:$0xf] %v1523_v55  ;;  %v1954_v44 = vrot.slane %v1952_v36, 7  ;;  %v8866_v36 = vld [vmem:[#allocation4 + $0x30] sm:$0xf0] }
 0x168   : > { %v1963_v49 = vrot.slane %v1961_v37, 7  ;;  %v2167_v37 = vld [vmem:[#allocation2 + $0x5c] sm:$0xf] }
 0x169   : > { %2187 = vst [vmem:[#allocation4 + $0xd0] sm:$0xf] %v2167_v37 }
 0x16b   : > { %v3672_v8 = vpop.f32.mrf.mxu0  ;;  %v8862_v35 = vld [vmem:[#allocation4 + $0x14] sm:$0xf] }
 0x16c   : > { %v10182_v57 = vpop.f32.mrf.mxu3  ;;  %v3731_v61 = vpop.f32.mrf.mxu1  ;;  %v7604_v60 = vld [vmem:[#allocation4 + $0x34] sm:$0xf0] }
 0x16d   : > { %v3732_v13 = vadd.f32 %v3731_v61, %v3672_v8  ;;  %v2164_v61 = vld [vmem:[#allocation2 + $0x44] sm:$0xf]  ;;  %v7607_v5 = vor.u32 %v8862_v35, %v7604_v60  ;;  %v1955_v35 = vshll.u32 %v1879_v59, 16  ;;  %v1959_v60 = vrot.slane %v1954_v44, 4 }
 0x16e   : > { %3779 = vmatmul.bf16.gmra.mxu0 %v7631_v62  ;;  %v3795_v47 = vpop.f32.mrf.mxu2  ;;  %v1622_v62 = vor.u32 %v1621_v52, %v1618_v51  ;;  %2184 = vst [vmem:[#allocation4 + $0x64] sm:$0xf] %v2164_v61  ;;  %v1964_v51 = vshll.u32 %v1880_v30, 16  ;;  %v1567_v52 = vld [vmem:[#allocation2 + $0x44] sm:$0xf] }
 0x16f   : > { %v10189_v21 = vadd.f32 %v10174_v26, %v3732_v13  ;;  %v1625_v26 = vshll.u32 %v1565_v32, 16  ;;  %3951 = vmatmul.bf16.vlgmr.msrb.gmra.mxu1 %v7607_v5  ;;  %v8876_v32 = vld [vmem:[#allocation4 + $0x80] sm:$0xf0]  ;;  %v1957_v58 = vor.u32 %v1955_v35, %v1954_v44  ;;  %v1568_v61 = vld [vmem:[#allocation2 + $0x48] sm:$0xf]  ;;  %v1643_v5 = vshll.u32 %v1567_v52, 16 }
 0x170   : > { %v1623_v45 = vrot.slane %v1622_v62, 4  ;;  %v7647_v41 = vor.u32 %v8876_v32, %v7646_v28  ;;  %v1966_v62 = vor.u32 %v1964_v51, %v1963_v49  ;;  %v1653_v3 = vshrl.u32 %v1568_v61, 16  ;;  %v1525_v28 = vld [vmem:[#allocation2 + $0x44] sm:$0xf]  ;;  %v1526_v30 = vld [vmem:[#allocation2 + $0x48] sm:$0xf] }
 0x171   : > { %3873 = vmatmul.bf16.gmra.mxu3 %v7887_v0  ;;  %v7666_v0 = vld [vmem:[#allocation4 + $0x98] sm:$0xf]  ;;  %v1627_v8 = vrot.slane %v1625_v26, 5  ;;  %v1878_v26 = vld [vmem:[#allocation2 + $0x54] sm:$0x8] }
 0x172   : > { %v7667_v23 = vor.u32 %v8883_v2, %v7666_v0  ;;  %v1947_v43 = vshrl.u32 %v1878_v26, 16  ;;  %4015 = vmatmul.bf16.gmra.mxu2 %v7647_v41  ;;  %v1569_v0 = vld [vmem:[#allocation2 + $0x4c] sm:$0x1]  ;;  %v1640_v2 = vshrl.u32 %v1567_v52, 16  ;;  %1545 = vst [vmem:[#allocation4 + $0xa0] sm:$0xf] %v1525_v28 }
 0x173   : > { %v10199_v54 = vpop.f32.mrf.mxu0  ;;  %v1632_v13 = vor.u32 %v1631_v9, %v1627_v8  ;;  %v1628_v14 = vsel %vm10004_vm8, %v1623_v45, %v1627_v8  ;;  %v1649_v9 = vshll.u32 %v1568_v61, 16  ;;  %1546 = vst [vmem:[#allocation4 + $0xc4] sm:$0xf] %v1526_v30  ;;  %v1655_v41 = vrot.slane %v1653_v3, 4  ;;  %v8863_v26 = vld [vmem:[#allocation4 + $0x1c] sm:$0xf] }
 0x174   : > { %v10191_v42 = vpop.f32.mrf.mxu3  ;;  %v10193_v46 = vpop.f32.mrf.mxu1  ;;  %1853 = vst [vmem:[#allocation4 + $0x5c] sm:$0xf] %v1628_v14  ;;  %v7576_v55 = vrot.slane %v1947_v43, 11  ;;  %v1642_v14 = vrot.slane %v1640_v2, 4  ;;  %v7612_v44 = vld [vmem:[#allocation4 + $0x3c] sm:$0xf0] }
 0x175   : > { %v1633_v19 = vrot.slane %v1632_v13, 4  ;;  %v9020_v13 = vld [vmem:[#allocation8 + $0x230] sm:$0xff] }
 0x176   : > { %v10205_v63 = vpop.f32.mrf.mxu2  ;;  %4121 = vmatpush.bf16.msrb.mxu0 %v9020_v13 }
 0x177   : > { %v1638_v33 = vsel %vm10004_vm8, %v1633_v19, %v1637_v4  ;;  %v1967_v4 = vsel %vm9946_vm5, %v1959_v60, %v1966_v62  ;;  %v1645_v19 = vrot.slane %v1643_v5, 5  ;;  %v7615_v62 = vor.u32 %v8863_v26, %v7612_v44  ;;  %v1882_v5 = vld [vmem:[#allocation2 + $0x6c] sm:$0xf]  ;;  %v1572_v26 = vld [vmem:[#allocation2 + $0x60] sm:$0x1] }
 0x178   : > { %1854 = vst [vmem:[#allocation4 + $0x80] sm:$0xf] %v1638_v33  ;;  %v7602_v33 = vld [vmem:[#allocation4 + $0x10] sm:$0xf]  ;;  %v1974_v13 = vshrl.u32 %v1882_v5, 16  ;;  %v1977_v28 = vshll.u32 %v1882_v5, 16 }
 0x179   : > { %2147 = vst [vmem:[#allocation4 + $0xcc] sm:$0xf] %v1967_v4  ;;  %v1646_v32 = vor.u32 %v1645_v19, %v1642_v14  ;;  %v7603_v61 = vor.u32 %v8866_v36, %v7602_v33  ;;  %v1881_v19 = vld [vmem:[#allocation2 + $0x68] sm:$0x8]  ;;  %v1683_v5 = vshll.u32 %v1572_v26, 16 }
 0x17b   : > { %v3677_v22 = vpop.f32.mrf.mxu0  ;;  %v8871_v8 = vld [vmem:[#allocation4 + $0x5c] sm:$0xf]  ;;  %v1647_v43 = vrot.slane %v1646_v32, 4  ;;  %v1570_v32 = vld [vmem:[#allocation2 + $0x58] sm:$0xf] }
 0x17c   : > { %v10203_v17 = vpop.f32.mrf.mxu3  ;;  %v3736_v20 = vpop.f32.mrf.mxu1  ;;  %v1667_v44 = vshll.u32 %v1570_v32, 16 }
 0x17d   : > { %v3737_v39 = vadd.f32 %v3736_v20, %v3677_v22  ;;  %v1659_v20 = vshll.u32 %v1569_v0, 16  ;;  %v2166_v22 = vld [vmem:[#allocation2 + $0x58] sm:$0xf] }
 0x17e   : > { %3784 = vmatmul.bf16.gmra.mxu0 %v7667_v23  ;;  %v3800_v11 = vpop.f32.mrf.mxu2  ;;  %2186 = vst [vmem:[#allocation4 + $0xac] sm:$0xf] %v2166_v22 }
 0x17f   : > { %v10209_v50 = vadd.f32 %v3795_v47, %v3737_v39  ;;  %v1958_v47 = vsel %vm9946_vm5, %v7576_v55, %v1957_v58  ;;  %v1651_v39 = vrot.slane %v1649_v9, 5  ;;  %v1661_v49 = vrot.slane %v1659_v20, 5 }
 0x180   : > { %2146 = vst [vmem:[#allocation4 + $0xa8] sm:$0xf] %v1958_v47  ;;  %v8885_v2 = vld [vmem:[#allocation4 + $0xc8] sm:$0xf0]  ;;  %v1969_v20 = vshrl.u32 %v1881_v19, 16 }
 0x181   : > { %3878 = vmatmul.bf16.gmra.mxu3 %v7923_v27  ;;  %v7640_v27 = vld [vmem:[#allocation4 + $0x7c] sm:$0xf0]  ;;  %v1656_v35 = vor.u32 %v1655_v41, %v1651_v39  ;;  %v1652_v51 = vsel %vm10004_vm8, %v1647_v43, %v1651_v39  ;;  %v1571_v39 = vld [vmem:[#allocation2 + $0x5c] sm:$0xf]  ;;  %v1664_v43 = vshrl.u32 %v1570_v32, 16 }
 0x182   : > { %v7643_v59 = vor.u32 %v8871_v8, %v7640_v27  ;;  %1855 = vst [vmem:[#allocation4 + $0xa4] sm:$0xf] %v1652_v51  ;;  %v1883_v8 = vld [vmem:[#allocation2 + $0x70] sm:$0xf]  ;;  %v1976_v27 = vrot.slane %v1974_v13, 7  ;;  %v7577_v33 = vrot.slane %v1969_v20, 11 }
 0x183   : > { %v10219_v23 = vpop.f32.mrf.mxu0  ;;  %v1657_v58 = vrot.slane %v1656_v35, 4  ;;  %v1983_v4 = vshrl.u32 %v1883_v8, 16  ;;  %v1986_v22 = vshll.u32 %v1883_v8, 16  ;;  %v1673_v51 = vshll.u32 %v1571_v39, 16  ;;  %v7638_v20 = vld [vmem:[#allocation4 + $0x58] sm:$0xf] }
 0x184   : > { %v10211_v6 = vpop.f32.mrf.mxu3  ;;  %v10215_v45 = vpop.f32.mrf.mxu1  ;;  %3956 = vmatmul.bf16.gmra.mxu1 %v7643_v59  ;;  %v1979_v36 = vor.u32 %v1977_v28, %v1976_v27  ;;  %v1981_v37 = vrot.slane %v1976_v27, 4  ;;  %v8875_v27 = vld [vmem:[#allocation4 + $0x78] sm:$0xf0]  ;;  %v2169_v28 = vld [vmem:[#allocation2 + $0x70] sm:$0xf] }
 0x185   : > { %v1662_v3 = vsel %vm10004_vm8, %v1657_v58, %v1661_v49  ;;  %v1985_v30 = vrot.slane %v1983_v4, 7  ;;  %v1528_v4 = vld [vmem:[#allocation2 + $0x5c] sm:$0xf]  ;;  %2189 = vst [vmem:[#allocation4 + $0x118] sm:$0xf] %v2169_v28 }
 0x186   : > { %v10225_v0 = vpop.f32.mrf.mxu2  ;;  %1856 = vst [vmem:[#allocation4 + $0xc8] sm:$0xf] %v1662_v3  ;;  %v8872_v32 = vld [vmem:[#allocation4 + $0x64] sm:$0xf] }
 0x187   : > { %v7682_v55 = vld [vmem:[#allocation4 + $0xa8] sm:$0xf]  ;;  %v1988_v41 = vor.u32 %v1986_v22, %v1985_v30  ;;  %1548 = vst [vmem:[#allocation4 + $0x10c] sm:$0xf] %v1528_v4  ;;  %v1675_v30 = vrot.slane %v1673_v51, 5  ;;  %v7639_v51 = vor.u32 %v8875_v27, %v7638_v20 }
 0x188   : > { %v7683_v9 = vor.u32 %v8885_v2, %v7682_v55  ;;  %v1677_v55 = vshrl.u32 %v1571_v39, 16  ;;  %v1669_v2 = vrot.slane %v1667_v44, 5 }
 0x189   : > { %v8880_v49 = vld [vmem:[#allocation4 + $0xa4] sm:$0xf] }
 0x18a   : > { %4020 = vmatmul.bf16.gmra.mxu2 %v7683_v9  ;;  %v1527_v9 = vld [vmem:[#allocation2 + $0x58] sm:$0xf]  ;;  %v1679_v22 = vrot.slane %v1677_v55, 4 }
 0x18b   : > { %v3682_v47 = vpop.f32.mrf.mxu0  ;;  %1547 = vst [vmem:[#allocation4 + $0xe8] sm:$0xf] %v1527_v9 }
 0x18c   : > { %v10223_v52 = vpop.f32.mrf.mxu3  ;;  %v3741_v60 = vpop.f32.mrf.mxu1  ;;  %v1680_v39 = vor.u32 %v1679_v22, %v1675_v30 }
 0x18d   : > { %v3742_v14 = vadd.f32 %v3741_v60, %v3682_v47  ;;  %v7676_v47 = vld [vmem:[#allocation4 + $0xc4] sm:$0xf0] }
 0x18e   : > { %3892 = vmatmul.bf16.vlgmr.msra.gmra.mxu0 %v7603_v61  ;;  %v3805_v60 = vpop.f32.mrf.mxu2  ;;  %v1989_v61 = vsel %vm9946_vm5, %v1981_v37, %v1988_v41  ;;  %v7679_v13 = vor.u32 %v8880_v49, %v7676_v47  ;;  %v7648_v37 = vld [vmem:[#allocation4 + $0x84] sm:$0xf0]  ;;  %v1685_v41 = vrot.slane %v1683_v5, 5  ;;  %v1681_v49 = vrot.slane %v1680_v39, 4  ;;  %v1574_v39 = vld [vmem:[#allocation2 + $0x70] sm:$0xf] }
 0x18f   : > { %v10229_v59 = vadd.f32 %v3800_v11, %v3742_v14  ;;  %v1980_v11 = vsel %vm9946_vm5, %v7577_v33, %v1979_v36  ;;  %2149 = vst [vmem:[#allocation4 + $0x114] sm:$0xf] %v1989_v61  ;;  %v2168_v14 = vld [vmem:[#allocation2 + $0x6c] sm:$0xf]  ;;  %v9019_v33 = vld [vmem:[#allocation8 + $0x228] sm:$0xff]  ;;  %v7651_v55 = vor.u32 %v8872_v32, %v7648_v37 }
 0x190   : > { %2148 = vst [vmem:[#allocation4 + $0xf0] sm:$0xf] %v1980_v11  ;;  %4122 = vmatpush.bf16.msrb.mxu0 %v9019_v33  ;;  %v1686_v5 = vsel %vm10004_vm8, %v1681_v49, %v1685_v41  ;;  %v1573_v32 = vld [vmem:[#allocation2 + $0x6c] sm:$0xf] }
 0x191   : > { %4069 = vmatmul.bf16.vlgmr.msra.gmra.mxu3 %v7615_v62  ;;  %v1666_v62 = vrot.slane %v1664_v43, 4  ;;  %2188 = vst [vmem:[#allocation4 + $0xf4] sm:$0xf] %v2168_v14  ;;  %v1884_v14 = vld [vmem:[#allocation2 + $0x7c] sm:$0x8]  ;;  %v1691_v49 = vshll.u32 %v1573_v32, 16 }
 0x192   : > { %1858 = vst [vmem:[#allocation4 + $0x110] sm:$0xf] %v1686_v5 }
 0x193   : > { %v3684_v8 = vpop.f32.mrf.mxu0  ;;  %v1670_v19 = vor.u32 %v1669_v2, %v1666_v62  ;;  %v1885_v62 = vld [vmem:[#allocation2 + $0x80] sm:$0xf]  ;;  %v1886_v2 = vld [vmem:[#allocation2 + $0x84] sm:$0xf] }
 0x194   : > { %v10231_v35 = vpop.f32.mrf.mxu3  ;;  %v3743_v58 = vpop.f32.mrf.mxu1  ;;  %3961 = vmatmul.bf16.gmra.mxu1 %v7679_v13  ;;  %v1996_v9 = vshrl.u32 %v1885_v62, 16  ;;  %v2005_v13 = vshrl.u32 %v1886_v2, 16  ;;  %v2008_v22 = vshll.u32 %v1886_v2, 16 }
 0x195   : > { %v10237_v3 = vadd.f32 %v3743_v58, %v3684_v8  ;;  %v1671_v36 = vrot.slane %v1670_v19, 4  ;;  %v1991_v19 = vshrl.u32 %v1884_v14, 16  ;;  %v1529_v14 = vld [vmem:[#allocation2 + $0x6c] sm:$0xf] }
 0x196   : > { %v10243_v58 = vpop.f32.mrf.mxu2  ;;  %v8894_v61 = vld [vmem:[#allocation4 + $0x110] sm:$0xf0]  ;;  %v1998_v28 = vrot.slane %v1996_v9, 7  ;;  %v2007_v27 = vrot.slane %v2005_v13, 7  ;;  %v1693_v9 = vrot.slane %v1691_v49, 5 }
 0x197   : > { %v1676_v26 = vsel %vm10004_vm8, %v1671_v36, %v1675_v30  ;;  %v7718_v44 = vld [vmem:[#allocation4 + $0xf0] sm:$0xf]  ;;  %v1999_v30 = vshll.u32 %v1885_v62, 16  ;;  %v7578_v33 = vrot.slane %v1991_v19, 11  ;;  %v1697_v62 = vshll.u32 %v1574_v39, 16 }
 0x198   : > { %1857 = vst [vmem:[#allocation4 + $0xec] sm:$0xf] %v1676_v26  ;;  %v7719_v47 = vor.u32 %v8894_v61, %v7718_v44  ;;  %v2003_v37 = vrot.slane %v1998_v28, 4  ;;  %v2010_v41 = vor.u32 %v2008_v22, %v2007_v27  ;;  %v1575_v26 = vld [vmem:[#allocation2 + $0x74] sm:$0x1]  ;;  %v1688_v44 = vshrl.u32 %v1573_v32, 16 }
 0x199   : > { %v2001_v36 = vor.u32 %v1999_v30, %v1998_v28  ;;  %v3734_v19 = vadd.f32 %v10193_v46, %v10199_v54  ;;  %v1530_v30 = vld [vmem:[#allocation2 + $0x70] sm:$0xf]  ;;  %1549 = vst [vmem:[#allocation4 + $0x130] sm:$0xf] %v1529_v14  ;;  %v7674_v22 = vld [vmem:[#allocation4 + $0xa0] sm:$0xf] }
 0x19a   : > { %4025 = vmatmul.bf16.gmra.mxu2 %v7719_v47  ;;  %v2011_v47 = vsel %vm9946_vm5, %v2003_v37, %v2010_v41  ;;  %v1690_v5 = vrot.slane %v1688_v44, 4  ;;  %v8884_v32 = vld [vmem:[#allocation4 + $0xc0] sm:$0xf0]  ;;  %1550 = vst [vmem:[#allocation4 + $0x154] sm:$0xf] %v1530_v30 }
 0x19b   : > { %v3687_v8 = vpop.f32.mrf.mxu0  ;;  %2151 = vst [vmem:[#allocation4 + $0x15c] sm:$0xf] %v2011_v47  ;;  %v3793_v46 = vadd.f32 %v10184_v1, %v3734_v19  ;;  %v1889_v19 = vld [vmem:[#allocation2 + $0x98] sm:$0xf] }
 0x19c   : > { %v10241_v43 = vpop.f32.mrf.mxu3  ;;  %v3746_v11 = vpop.f32.mrf.mxu1  ;;  %v1694_v27 = vor.u32 %v1693_v9, %v1690_v5  ;;  %v9018_v5 = vld [vmem:[#allocation8 + $0x220] sm:$0xff] }
 0x19d   : > { %v3747_v4 = vadd.f32 %v3746_v11, %v3687_v8  ;;  %4123 = vmatpush.bf16.msrb.mxu0 %v9018_v5 }
 0x19e   : > { %3897 = vmatmul.bf16.gmra.mxu0 %v7639_v51  ;;  %v1701_v51 = vshrl.u32 %v1574_v39, 16  ;;  %v3810_v8 = vpop.f32.mrf.mxu2  ;;  %v8881_v39 = vld [vmem:[#allocation4 + $0xac] sm:$0xf]  ;;  %v1695_v41 = vrot.slane %v1694_v27, 4  ;;  %v1887_v27 = vld [vmem:[#allocation2 + $0x90] sm:$0x8] }
 0x19f   : > { %v10247_v20 = vadd.f32 %v3805_v60, %v3747_v4  ;;  %v8889_v61 = vld [vmem:[#allocation4 + $0xec] sm:$0xf]  ;;  %v2002_v60 = vsel %vm9946_vm5, %v7578_v33, %v2001_v36  ;;  %v7712_v4 = vld [vmem:[#allocation4 + $0x10c] sm:$0xf0]  ;;  %v1699_v36 = vrot.slane %v1697_v62, 5  ;;  %v7675_v62 = vor.u32 %v8884_v32, %v7674_v22 }
 0x1a0   : > { %2150 = vst [vmem:[#allocation4 + $0x138] sm:$0xf] %v2002_v60  ;;  %v7715_v28 = vor.u32 %v8889_v61, %v7712_v4  ;;  %v2171_v33 = vld [vmem:[#allocation2 + $0x84] sm:$0xf]  ;;  %v1703_v37 = vrot.slane %v1701_v51, 4 }
 0x1a1   : > { %4074 = vmatmul.bf16.gmra.mxu3 %v7651_v55  ;;  %v1707_v55 = vshll.u32 %v1575_v26, 16  ;;  %v7684_v26 = vld [vmem:[#allocation4 + $0xcc] sm:$0xf0]  ;;  %2191 = vst [vmem:[#allocation4 + $0x160] sm:$0xf] %v2171_v33  ;;  %v1700_v54 = vsel %vm10004_vm8, %v1695_v41, %v1699_v36  ;;  %v2013_v33 = vshrl.u32 %v1887_v27, 16  ;;  %v3739_v27 = vadd.f32 %v10215_v45, %v10219_v23 }
 0x1a2   : > { %v1704_v44 = vor.u32 %v1703_v37, %v1699_v36  ;;  %1859 = vst [vmem:[#allocation4 + $0x134] sm:$0xf] %v1700_v54  ;;  %v7687_v51 = vor.u32 %v8881_v39, %v7684_v26  ;;  %v8903_v9 = vld [vmem:[#allocation4 + $0x158] sm:$0xf0]  ;;  %v2027_v37 = vshrl.u32 %v1889_v19, 16  ;;  %v2030_v39 = vshll.u32 %v1889_v19, 16 }
 0x1a3   : > { %v10256_v13 = vpop.f32.mrf.mxu0  ;;  %v1709_v49 = vrot.slane %v1707_v55, 5  ;;  %v1888_v4 = vld [vmem:[#allocation2 + $0x94] sm:$0xf]  ;;  %v1576_v41 = vld [vmem:[#allocation2 + $0x80] sm:$0xf]  ;;  %v7579_v26 = vrot.slane %v2013_v33, 11 }
 0x1a4   : > { %v3849_v11 = vpop.f32.mrf.mxu3  ;;  %3966 = vmatmul.bf16.gmra.mxu1 %v7715_v28  ;;  %v1705_v60 = vrot.slane %v1704_v44, 4  ;;  %v2018_v30 = vshrl.u32 %v1888_v4, 16  ;;  %v2021_v32 = vshll.u32 %v1888_v4, 16  ;;  %v2029_v54 = vrot.slane %v2027_v37, 7 }
 0x1a5   : > { %v10252_v2 = vadd.f32 %v3849_v11, %v10189_v21  ;;  %v2170_v21 = vld [vmem:[#allocation2 + $0x80] sm:$0xf] }
 0x1a6   : > { %2190 = vst [vmem:[#allocation4 + $0x13c] sm:$0xf] %v2170_v21  ;;  %v10265_v28 = vpop.f32.mrf.mxu2  ;;  %v1710_v1 = vsel %vm10004_vm8, %v1705_v60, %v1709_v49  ;;  %v2020_v22 = vrot.slane %v2018_v30, 7  ;;  %v1577_v49 = vld [vmem:[#allocation2 + $0x84] sm:$0xf]  ;;  %v2032_v4 = vor.u32 %v2030_v39, %v2029_v54 }
 0x1a7   : > { %v7754_v61 = vld [vmem:[#allocation4 + $0x138] sm:$0xf]  ;;  %1860 = vst [vmem:[#allocation4 + $0x158] sm:$0xf] %v1710_v1  ;;  %v1531_v30 = vld [vmem:[#allocation2 + $0x80] sm:$0xf] }
 0x1a8   : > { %v7755_v55 = vor.u32 %v8903_v9, %v7754_v61  ;;  %v2023_v44 = vor.u32 %v2021_v32, %v2020_v22  ;;  %v1721_v9 = vshll.u32 %v1577_v49, 16  ;;  %1551 = vst [vmem:[#allocation4 + $0x178] sm:$0xf] %v1531_v30  ;;  %v2172_v32 = vld [vmem:[#allocation2 + $0x94] sm:$0xf] }
 0x1a9   : > { %v8898_v60 = vld [vmem:[#allocation4 + $0x134] sm:$0xf]  ;;  %v7710_v39 = vld [vmem:[#allocation4 + $0xe8] sm:$0xf]  ;;  %2192 = vst [vmem:[#allocation4 + $0x184] sm:$0xf] %v2172_v32 }
 0x1aa   : > { %4030 = vmatmul.bf16.gmra.mxu2 %v7755_v55  ;;  %v2024_v5 = vsel %vm9946_vm5, %v7579_v26, %v2023_v44  ;;  %v1723_v26 = vrot.slane %v1721_v9, 5  ;;  %v8890_v54 = vld [vmem:[#allocation4 + $0xf4] sm:$0xf]  ;;  %v1890_v32 = vld [vmem:[#allocation2 + $0xa4] sm:$0x8] }
 0x1ab   : > { %v3692_v14 = vpop.f32.mrf.mxu0  ;;  %2152 = vst [vmem:[#allocation4 + $0x180] sm:$0xf] %v2024_v5  ;;  %v1892_v30 = vld [vmem:[#allocation2 + $0xac] sm:$0xf] }
 0x1ac   : > { %v3851_v11 = vpop.f32.mrf.mxu3  ;;  %v3752_v21 = vadd.f32 %v10130_v10, %v3692_v14  ;;  %v1578_v10 = vld [vmem:[#allocation2 + $0x88] sm:$0x1] }
 0x1ad   : > { %v10263_v47 = vadd.f32 %v3851_v11, %v3793_v46  ;;  %v2025_v46 = vrot.slane %v2020_v22, 4  ;;  %v1712_v11 = vshrl.u32 %v1576_v41, 16  ;;  %v1731_v55 = vshll.u32 %v1578_v10, 16  ;;  %v7720_v10 = vld [vmem:[#allocation4 + $0x114] sm:$0xf0] }
 0x1ae   : > { %v10270_v36 = vadd.f32 %v3810_v8, %v3752_v21  ;;  %3902 = vmatmul.bf16.gmra.mxu0 %v7675_v62  ;;  %v1715_v8 = vshll.u32 %v1576_v41, 16  ;;  %v1725_v62 = vshrl.u32 %v1577_v49, 16  ;;  %v7748_v19 = vld [vmem:[#allocation4 + $0x154] sm:$0xf0]  ;;  %v1532_v21 = vld [vmem:[#allocation2 + $0x84] sm:$0xf]  ;;  %v3815_v37 = vpop.f32.mrf.mxu2  ;;  %v7723_v9 = vor.u32 %v8890_v54, %v7720_v10 }
 0x1af   : > { %v1714_v14 = vrot.slane %v1712_v11, 4  ;;  %v7751_v33 = vor.u32 %v8898_v60, %v7748_v19  ;;  %v2033_v22 = vsel %vm9946_vm5, %v2025_v46, %v2032_v4  ;;  %v8893_v49 = vld [vmem:[#allocation4 + $0x108] sm:$0xf0]  ;;  %1552 = vst [vmem:[#allocation4 + $0x19c] sm:$0xf] %v1532_v21  ;;  %v1733_v11 = vrot.slane %v1731_v55, 5 }
 0x1b0   : > { %2153 = vst [vmem:[#allocation4 + $0x1a4] sm:$0xf] %v2033_v22  ;;  %v1717_v41 = vrot.slane %v1715_v8, 5  ;;  %v1727_v44 = vrot.slane %v1725_v62, 4  ;;  %v3798_v46 = vadd.f32 %v10205_v63, %v3739_v27  ;;  %v7711_v8 = vor.u32 %v8893_v49, %v7710_v39  ;;  %v1891_v19 = vld [vmem:[#allocation2 + $0xa8] sm:$0xf] }
 0x1b1   : > { %4079 = vmatmul.bf16.gmra.mxu3 %v7687_v51  ;;  %v2040_v55 = vshrl.u32 %v1891_v19, 16  ;;  %v2049_v63 = vshrl.u32 %v1892_v30, 16  ;;  %v2035_v39 = vshrl.u32 %v1890_v32, 16  ;;  %v9017_v49 = vld [vmem:[#allocation8 + $0x218] sm:$0xff] }
 0x1b2   : > { %v1718_v45 = vor.u32 %v1717_v41, %v1714_v14  ;;  %v1728_v23 = vor.u32 %v1727_v44, %v1723_v26  ;;  %v7790_v62 = vld [vmem:[#allocation4 + $0x180] sm:$0xf]  ;;  %4124 = vmatpush.bf16.msrb.mxu0 %v9017_v49 }
 0x1b3   : > { %v10277_v1 = vpop.f32.mrf.mxu0  ;;  %v2042_v41 = vrot.slane %v2040_v55, 7  ;;  %v2051_v54 = vrot.slane %v2049_v63, 7 }
 0x1b4   : > { %v3854_v61 = vpop.f32.mrf.mxu3  ;;  %3971 = vmatmul.bf16.gmra.mxu1 %v7751_v33  ;;  %v1719_v60 = vrot.slane %v1718_v45, 4  ;;  %v1729_v5 = vrot.slane %v1728_v23, 4  ;;  %v7580_v45 = vrot.slane %v2035_v39, 11  ;;  %v7746_v39 = vld [vmem:[#allocation4 + $0x130] sm:$0xf] }
 0x1b5   : > { %v10275_v51 = vadd.f32 %v3854_v61, %v10209_v50  ;;  %v2173_v50 = vld [vmem:[#allocation2 + $0x98] sm:$0xf]  ;;  %v2047_v23 = vrot.slane %v2042_v41, 4 }
 0x1b6   : > { %2193 = vst [vmem:[#allocation4 + $0x1a8] sm:$0xf] %v2173_v50  ;;  %v1724_v33 = vsel %vm10004_vm8, %v1719_v60, %v1723_v26  ;;  %v1734_v14 = vsel %vm10004_vm8, %v1729_v5, %v1733_v11  ;;  %v2043_v26 = vshll.u32 %v1891_v19, 16  ;;  %v3817_v10 = vpop.f32.mrf.mxu2  ;;  %v2052_v11 = vshll.u32 %v1892_v30, 16  ;;  %v1581_v60 = vld [vmem:[#allocation2 + $0x9c] sm:$0x1] }
 0x1b7   : > { %v8912_v22 = vld [vmem:[#allocation4 + $0x1a0] sm:$0xf0]  ;;  %1861 = vst [vmem:[#allocation4 + $0x17c] sm:$0xf] %v1724_v33 }
 0x1b8   : > { %v7791_v50 = vor.u32 %v8912_v22, %v7790_v62  ;;  %1862 = vst [vmem:[#allocation4 + $0x1a0] sm:$0xf] %v1734_v14  ;;  %v2054_v62 = vor.u32 %v2052_v11, %v2051_v54  ;;  %v1755_v14 = vshll.u32 %v1581_v60, 16  ;;  %v2175_v54 = vld [vmem:[#allocation2 + $0xac] sm:$0xf] }
 0x1b9   : > { %2195 = vst [vmem:[#allocation4 + $0x1f0] sm:$0xf] %v2175_v54 }
 0x1ba   : > { %4035 = vmatmul.bf16.gmra.mxu2 %v7791_v50  ;;  %v2055_v63 = vsel %vm9946_vm5, %v2047_v23, %v2054_v62  ;;  %v1534_v50 = vld [vmem:[#allocation2 + $0x98] sm:$0xf] }
 0x1bb   : > { %v3697_v21 = vpop.f32.mrf.mxu0  ;;  %2155 = vst [vmem:[#allocation4 + $0x1ec] sm:$0xf] %v2055_v63 }
 0x1bc   : > { %v3856_v61 = vpop.f32.mrf.mxu3  ;;  %v3757_v27 = vadd.f32 %v10150_v7, %v3697_v21  ;;  %v2045_v7 = vor.u32 %v2043_v26, %v2042_v41  ;;  %v8899_v41 = vld [vmem:[#allocation4 + $0x13c] sm:$0xf]  ;;  %v2174_v26 = vld [vmem:[#allocation2 + $0xa8] sm:$0xf]  ;;  %1554 = vst [vmem:[#allocation4 + $0x1e4] sm:$0xf] %v1534_v50 }
 0x1bd   : > { %v10284_v4 = vadd.f32 %v3856_v61, %v3798_v46  ;;  %v1579_v46 = vld [vmem:[#allocation2 + $0x94] sm:$0xf]  ;;  %v1580_v61 = vld [vmem:[#allocation2 + $0x98] sm:$0xf]  ;;  %2194 = vst [vmem:[#allocation4 + $0x1cc] sm:$0xf] %v2174_v26 }
 0x1be   : > { %v10291_v44 = vadd.f32 %v3815_v37, %v3757_v27  ;;  %3907 = vmatmul.bf16.gmra.mxu0 %v7711_v8  ;;  %v1736_v21 = vshrl.u32 %v1579_v46, 16  ;;  %v1739_v37 = vshll.u32 %v1579_v46, 16  ;;  %v1745_v33 = vshll.u32 %v1580_v61, 16  ;;  %v8907_v30 = vld [vmem:[#allocation4 + $0x17c] sm:$0xf]  ;;  %v3820_v62 = vpop.f32.mrf.mxu2 }
 0x1bf   : > { %v1749_v19 = vshrl.u32 %v1580_v61, 16  ;;  %v1533_v27 = vld [vmem:[#allocation2 + $0x94] sm:$0xf]  ;;  %v7784_v32 = vld [vmem:[#allocation4 + $0x19c] sm:$0xf0]  ;;  %v3803_v61 = vadd.f32 %v10225_v0, %v10237_v3 }
 0x1c0   : > { %v7787_v49 = vor.u32 %v8907_v30, %v7784_v32  ;;  %1553 = vst [vmem:[#allocation4 + $0x1c0] sm:$0xf] %v1533_v27  ;;  %v1738_v11 = vrot.slane %v1736_v21, 4  ;;  %v1747_v23 = vrot.slane %v1745_v33, 5  ;;  %v7756_v46 = vld [vmem:[#allocation4 + $0x15c] sm:$0xf0] }
 0x1c1   : > { %4084 = vmatmul.bf16.gmra.mxu3 %v7723_v9  ;;  %v2046_v9 = vsel %vm9946_vm5, %v7580_v45, %v2045_v7  ;;  %v1741_v7 = vrot.slane %v1739_v37, 5  ;;  %v7759_v63 = vor.u32 %v8899_v41, %v7756_v46  ;;  %v1894_v33 = vld [vmem:[#allocation2 + $0xbc] sm:$0xf]  ;;  %v1893_v26 = vld [vmem:[#allocation2 + $0xb8] sm:$0x8] }
 0x1c2   : > { %2154 = vst [vmem:[#allocation4 + $0x1c8] sm:$0xf] %v2046_v9  ;;  %v2062_v50 = vshrl.u32 %v1894_v33, 16 }
 0x1c3   : > { %v3699_v55 = vpop.f32.mrf.mxu0  ;;  %v1742_v60 = vor.u32 %v1741_v7, %v1738_v11  ;;  %v2065_v11 = vshll.u32 %v1894_v33, 16 }
 0x1c4   : > { %v3859_v5 = vpop.f32.mrf.mxu3  ;;  %v3759_v22 = vadd.f32 %v10164_v40, %v3699_v55  ;;  %3976 = vmatmul.bf16.gmra.mxu1 %v7787_v49  ;;  %v1751_v40 = vrot.slane %v1749_v19, 4  ;;  %v1757_v55 = vrot.slane %v1755_v14, 5  ;;  %v1895_v19 = vld [vmem:[#allocation2 + $0xc0] sm:$0xf]  ;;  %v2064_v41 = vrot.slane %v2062_v50, 7 }
 0x1c5   : > { %v10294_v8 = vadd.f32 %v3859_v5, %v10229_v59  ;;  %v8902_v59 = vld [vmem:[#allocation4 + $0x150] sm:$0xf0]  ;;  %v1743_v37 = vrot.slane %v1742_v60, 4  ;;  %v2071_v14 = vshrl.u32 %v1895_v19, 16 }
 0x1c6   : > { %v10301_v45 = vadd.f32 %v3817_v10, %v3759_v22  ;;  %v1752_v9 = vor.u32 %v1751_v40, %v1747_v23  ;;  %v7747_v10 = vor.u32 %v8902_v59, %v7746_v39  ;;  %v8921_v22 = vld [vmem:[#allocation4 + $0x1e8] sm:$0xf0]  ;;  %v2057_v59 = vshrl.u32 %v1893_v26, 16  ;;  %v1583_v60 = vld [vmem:[#allocation2 + $0xac] sm:$0xf]  ;;  %v3822_v50 = vpop.f32.mrf.mxu2 }
 0x1c7   : > { %v1748_v49 = vsel %vm10004_vm8, %v1743_v37, %v1747_v23  ;;  %v2073_v7 = vrot.slane %v2071_v14, 7  ;;  %v2069_v46 = vrot.slane %v2064_v41, 4  ;;  %v2074_v40 = vshll.u32 %v1895_v19, 16 }
 0x1c8   : > { %v1753_v32 = vrot.slane %v1752_v9, 4  ;;  %1863 = vst [vmem:[#allocation4 + $0x1c4] sm:$0xf] %v1748_v49  ;;  %v2067_v23 = vor.u32 %v2065_v11, %v2064_v41  ;;  %v3748_v9 = vpop.f32.mrf.mxu1  ;;  %v1536_v49 = vld [vmem:[#allocation2 + $0xac] sm:$0xf] }
 0x1c9   : > { %v7826_v21 = vld [vmem:[#allocation4 + $0x1c8] sm:$0xf]  ;;  %v3749_v26 = vadd.f32 %v3748_v9, %v10256_v13  ;;  %v8911_v41 = vld [vmem:[#allocation4 + $0x198] sm:$0xf0]  ;;  %1556 = vst [vmem:[#allocation4 + $0x22c] sm:$0xf] %v1536_v49 }
 0x1ca   : > { %v7827_v3 = vor.u32 %v8921_v22, %v7826_v21  ;;  %v1758_v39 = vsel %vm10004_vm8, %v1753_v32, %v1757_v55  ;;  %v2076_v21 = vor.u32 %v2074_v40, %v2073_v7  ;;  %v1773_v22 = vshrl.u32 %v1583_v60, 16  ;;  %v2177_v7 = vld [vmem:[#allocation2 + $0xc0] sm:$0xf]  ;;  %v8908_v40 = vld [vmem:[#allocation4 + $0x184] sm:$0xf] }
 0x1cb   : > { %v3702_v27 = vpop.f32.mrf.mxu0  ;;  %1864 = vst [vmem:[#allocation4 + $0x1e8] sm:$0xf] %v1758_v39  ;;  %v2176_v39 = vld [vmem:[#allocation2 + $0xbc] sm:$0xf] }
 0x1cc   : > { %v3861_v5 = vpop.f32.mrf.mxu3  ;;  %v3762_v0 = vadd.f32 %v10168_v18, %v3702_v27  ;;  %4040 = vmatmul.bf16.gmra.mxu2 %v7827_v3  ;;  %v7581_v18 = vrot.slane %v2057_v59, 11  ;;  %v1535_v3 = vld [vmem:[#allocation2 + $0xa8] sm:$0xf]  ;;  %v7782_v59 = vld [vmem:[#allocation4 + $0x178] sm:$0xf] }
 0x1cd   : > { %v10305_v30 = vadd.f32 %v3861_v5, %v3803_v61  ;;  %v1582_v61 = vld [vmem:[#allocation2 + $0xa8] sm:$0xf]  ;;  %v1584_v5 = vld [vmem:[#allocation2 + $0xb0] sm:$0x1]  ;;  %1555 = vst [vmem:[#allocation4 + $0x208] sm:$0xf] %v1535_v3 }
 0x1ce   : > { %v10312_v54 = vadd.f32 %v3820_v62, %v3762_v0  ;;  %3912 = vmatmul.bf16.gmra.mxu0 %v7747_v10  ;;  %v1760_v37 = vshrl.u32 %v1582_v61, 16  ;;  %v1763_v27 = vshll.u32 %v1582_v61, 16  ;;  %v1769_v62 = vshll.u32 %v1583_v60, 16  ;;  %v7792_v60 = vld [vmem:[#allocation4 + $0x1a4] sm:$0xf0] }
 0x1cf   : > { %v2068_v33 = vsel %vm9946_vm5, %v7581_v18, %v2067_v23  ;;  %v1779_v32 = vshll.u32 %v1584_v5, 16  ;;  %v2077_v0 = vsel %vm9946_vm5, %v2069_v46, %v2076_v21  ;;  %2196 = vst [vmem:[#allocation4 + $0x214] sm:$0xf] %v2176_v39  ;;  %v3808_v5 = vadd.f32 %v10243_v58, %v3749_v26 }
 0x1d0   : > { %2156 = vst [vmem:[#allocation4 + $0x210] sm:$0xf] %v2068_v33  ;;  %v1762_v23 = vrot.slane %v1760_v37, 4  ;;  %v1765_v61 = vrot.slane %v1763_v27, 5  ;;  %v1771_v13 = vrot.slane %v1769_v62, 5 }
 0x1d1   : > { %4089 = vmatmul.bf16.gmra.mxu3 %v7759_v63  ;;  %v9016_v63 = vld [vmem:[#allocation8 + $0x210] sm:$0xff]  ;;  %2157 = vst [vmem:[#allocation4 + $0x234] sm:$0xf] %v2077_v0  ;;  %v1897_v37 = vld [vmem:[#allocation2 + $0xd0] sm:$0xf] }
 0x1d2   : > { %4125 = vmatpush.bf16.msrb.mxu0 %v9016_v63  ;;  %v7820_v11 = vld [vmem:[#allocation4 + $0x1e4] sm:$0xf0]  ;;  %2197 = vst [vmem:[#allocation4 + $0x238] sm:$0xf] %v2177_v7  ;;  %v1766_v9 = vor.u32 %v1765_v61, %v1762_v23  ;;  %v1781_v63 = vrot.slane %v1779_v32, 5  ;;  %v2087_v7 = vshll.u32 %v1897_v37, 16  ;;  %v3719_v61 = vadd.f32 %v10132_v16, %v10136_v24 }
 0x1d3   : > { %v3704_v19 = vpop.f32.mrf.mxu0  ;;  %v1898_v62 = vld [vmem:[#allocation2 + $0xd4] sm:$0xf]  ;;  %v1896_v32 = vld [vmem:[#allocation2 + $0xcc] sm:$0x8] }
 0x1d4   : > { %v3864_v55 = vpop.f32.mrf.mxu3  ;;  %v3764_v14 = vadd.f32 %v10182_v57, %v3704_v19  ;;  %v1775_v57 = vrot.slane %v1773_v22, 4  ;;  %v7783_v19 = vor.u32 %v8911_v41, %v7782_v59  ;;  %v1767_v3 = vrot.slane %v1766_v9, 4 }
 0x1d5   : > { %v10315_v10 = vadd.f32 %v3864_v55, %v10247_v20  ;;  %v8916_v20 = vld [vmem:[#allocation4 + $0x1c4] sm:$0xf]  ;;  %v2084_v22 = vshrl.u32 %v1897_v37, 16  ;;  %v2093_v39 = vshrl.u32 %v1898_v62, 16  ;;  %v2079_v41 = vshrl.u32 %v1896_v32, 16 }
 0x1d6   : > { %v10323_v18 = vadd.f32 %v3822_v50, %v3764_v14  ;;  %v7823_v46 = vor.u32 %v8916_v20, %v7820_v11  ;;  %v1776_v21 = vor.u32 %v1775_v57, %v1771_v13  ;;  %v7795_v50 = vor.u32 %v8908_v40, %v7792_v60  ;;  %v1586_v57 = vld [vmem:[#allocation2 + $0xc0] sm:$0xf] }
 0x1d7   : > { %v7862_v0 = vld [vmem:[#allocation4 + $0x210] sm:$0xf]  ;;  %v1772_v20 = vsel %vm10004_vm8, %v1767_v3, %v1771_v13  ;;  %v2086_v11 = vrot.slane %v2084_v22, 7  ;;  %v2095_v40 = vrot.slane %v2093_v39, 7  ;;  %v2096_v23 = vshll.u32 %v1898_v62, 16 }
 0x1d8   : > { %3981 = vmatmul.bf16.gmra.mxu1 %v7823_v46  ;;  %v8930_v49 = vld [vmem:[#allocation4 + $0x230] sm:$0xf0]  ;;  %v1777_v14 = vrot.slane %v1776_v21, 4  ;;  %1865 = vst [vmem:[#allocation4 + $0x20c] sm:$0xf] %v1772_v20  ;;  %v1797_v3 = vshrl.u32 %v1586_v57, 16  ;;  %v3754_v22 = vadd.f32 %v10146_v34, %v10277_v1 }
 0x1d9   : > { %v7863_v26 = vor.u32 %v8930_v49, %v7862_v0  ;;  %v2091_v46 = vrot.slane %v2086_v11, 4  ;;  %v2089_v60 = vor.u32 %v2087_v7, %v2086_v11  ;;  %v1585_v13 = vld [vmem:[#allocation2 + $0xbc] sm:$0xf]  ;;  %v1538_v62 = vld [vmem:[#allocation2 + $0xc0] sm:$0xf]  ;;  %v9015_v20 = vld [vmem:[#allocation8 + $0x208] sm:$0xff] }
 0x1da   : > { %v1782_v59 = vsel %vm10004_vm8, %v1777_v14, %v1781_v63  ;;  %v1784_v21 = vshrl.u32 %v1585_v13, 16  ;;  %v1787_v63 = vshll.u32 %v1585_v13, 16  ;;  %v535_v49 = vld [vmem:[%s9927_s15 + $0xb8] sm:$0xff]  ;;  %v2178_v7 = vld [vmem:[#allocation2 + $0xd0] sm:$0xf]  ;;  %4126 = vmatpush.bf16.msrb.mxu0 %v9015_v20  ;;  %v3813_v13 = vadd.f32 %v10265_v28, %v3754_v22 }
 0x1db   : > { %v3775_v27 = vpop.f32.mrf.mxu0  ;;  %1866 = vst [vmem:[#allocation4 + $0x230] sm:$0xf] %v1782_v59  ;;  %v1537_v14 = vld [vmem:[#allocation2 + $0xbc] sm:$0xf]  ;;  %v7818_v39 = vld [vmem:[#allocation4 + $0x1c0] sm:$0xf]  ;;  %v559_v34 = vpack.c.bf16 %v535_v49, %v535_v49 }
 0x1dc   : > { %v3866_v55 = vpop.f32.mrf.mxu3  ;;  %v10329_v58 = vadd.f32 %v3775_v27, %v10128_v56  ;;  %4045 = vmatmul.bf16.gmra.mxu2 %v7863_v26  ;;  %v7582_v56 = vrot.slane %v2079_v41, 11  ;;  %v534_v27 = vld [vmem:[%s9927_s15 + $0xb0] sm:$0xff]  ;;  %v1786_v32 = vrot.slane %v1784_v21, 4  ;;  %v8920_v59 = vld [vmem:[#allocation4 + $0x1e0] sm:$0xf0] }
 0x1dd   : > { %v10326_v33 = vadd.f32 %v3866_v55, %v3808_v5  ;;  %v1587_v5 = vld [vmem:[#allocation2 + $0xc4] sm:$0x1]  ;;  %v2098_v55 = vor.u32 %v2096_v23, %v2095_v40  ;;  %1557 = vst [vmem:[#allocation4 + $0x250] sm:$0xf] %v1537_v14  ;;  %v558_v40 = vpack.c.bf16 %v534_v27, %v534_v27  ;;  %v1789_v23 = vrot.slane %v1787_v63, 5 }
 0x1de   : > { %3917 = vmatmul.bf16.gmra.mxu0 %v7783_v19  ;;  %v1793_v19 = vshll.u32 %v1586_v57, 16  ;;  %v2090_v0 = vsel %vm9946_vm5, %v7582_v56, %v2089_v60  ;;  %v1803_v37 = vshll.u32 %v1587_v5, 16  ;;  %v8917_v41 = vld [vmem:[#allocation4 + $0x1cc] sm:$0xf]  ;;  %1558 = vst [vmem:[#allocation4 + $0x274] sm:$0xf] %v1538_v62 }
 0x1df   : > { %v2099_v24 = vsel %vm9946_vm5, %v2091_v46, %v2098_v55  ;;  %2158 = vst [vmem:[#allocation4 + $0x258] sm:$0xf] %v2090_v0  ;;  %v2179_v46 = vld [vmem:[#allocation2 + $0xd4] sm:$0xf]  ;;  %v7828_v1 = vld [vmem:[#allocation4 + $0x1ec] sm:$0xf0]  ;;  %v1790_v57 = vor.u32 %v1789_v23, %v1786_v32  ;;  %v7819_v0 = vor.u32 %v8920_v59, %v7818_v39 }
 0x1e0   : > { %2159 = vst [vmem:[#allocation4 + $0x27c] sm:$0xf] %v2099_v24  ;;  %v1795_v60 = vrot.slane %v1793_v19, 5  ;;  %v1805_v55 = vrot.slane %v1803_v37, 5  ;;  %v7831_v27 = vor.u32 %v8917_v41, %v7828_v1  ;;  %v1899_v62 = vld [vmem:[#allocation2 + $0xe0] sm:$0x8]  ;;  %v3724_v41 = vadd.f32 %v10152_v12, %v10154_v15 }
 0x1e1   : > { %4094 = vmatmul.bf16.gmra.mxu3 %v7795_v50  ;;  %2198 = vst [vmem:[#allocation4 + $0x25c] sm:$0xf] %v2178_v7  ;;  %v1791_v63 = vrot.slane %v1790_v57, 4  ;;  %v1588_v37 = vld [vmem:[#allocation2 + $0xd0] sm:$0xf] }
 0x1e2   : > { %v7856_v11 = vld [vmem:[#allocation4 + $0x22c] sm:$0xf0]  ;;  %2199 = vst [vmem:[#allocation4 + $0x280] sm:$0xf] %v2179_v46  ;;  %v1808_v20 = vshrl.u32 %v1588_v37, 16 }
 0x1e3   : > { %v3777_v16 = vpop.f32.mrf.mxu0  ;;  %582 = vst [vmem:[#allocation2 + $0xe4] sm:$0xf] %v558_v40  ;;  %v1796_v14 = vsel %vm10004_vm8, %v1791_v63, %v1795_v60  ;;  %v1589_v32 = vld [vmem:[#allocation2 + $0xd4] sm:$0xf]  ;;  %v1590_v40 = vld [vmem:[#allocation2 + $0xd8] sm:$0x1] }
 0x1e4   : > { %v3869_v9 = vpop.f32.mrf.mxu3  ;;  %v10348_v26 = vadd.f32 %v3777_v16, %v3719_v61  ;;  %v1799_v61 = vrot.slane %v1797_v3, 4  ;;  %583 = vst [vmem:[#allocation2 + $0xe8] sm:$0xf] %v559_v34  ;;  %v1810_v39 = vrot.slane %v1808_v20, 4  ;;  %v1817_v59 = vshll.u32 %v1589_v32, 16 }
 0x1e5   : > { %v10338_v50 = vadd.f32 %v3869_v9, %v10270_v36  ;;  %v8925_v36 = vld [vmem:[#allocation4 + $0x20c] sm:$0xf]  ;;  %1867 = vst [vmem:[#allocation4 + $0x254] sm:$0xf] %v1796_v14  ;;  %v1540_v12 = vld [vmem:[#allocation2 + $0xd4] sm:$0xf] }
 0x1e6   : > { %v7859_v56 = vor.u32 %v8925_v36, %v7856_v11  ;;  %v1800_v9 = vor.u32 %v1799_v61, %v1795_v60  ;;  %v7898_v16 = vld [vmem:[#allocation4 + $0x258] sm:$0xf]  ;;  %v2101_v36 = vshrl.u32 %v1899_v62, 16  ;;  %v1819_v61 = vrot.slane %v1817_v59, 5  ;;  %v8929_v14 = vld [vmem:[#allocation4 + $0x228] sm:$0xf0] }
 0x1e7   : > { %v8939_v49 = vld [vmem:[#allocation4 + $0x278] sm:$0xf0]  ;;  %1560 = vst [vmem:[#allocation4 + $0x2bc] sm:$0xf] %v1540_v12 }
 0x1e8   : > { %3986 = vmatmul.bf16.gmra.mxu1 %v7859_v56  ;;  %v1801_v24 = vrot.slane %v1800_v9, 4  ;;  %v7899_v28 = vor.u32 %v8939_v49, %v7898_v16  ;;  %v7583_v7 = vrot.slane %v2101_v36, 11  ;;  %v1821_v56 = vshrl.u32 %v1589_v32, 16  ;;  %v8926_v36 = vld [vmem:[#allocation4 + $0x214] sm:$0xf] }
 0x1e9   : > { %v1827_v16 = vshll.u32 %v1590_v40, 16 }
 0x1ea   : > { %v1806_v22 = vsel %vm10004_vm8, %v1801_v24, %v1805_v55  ;;  %v1900_v11 = vld [vmem:[#allocation2 + $0xe4] sm:$0xf]  ;;  %v1823_v9 = vrot.slane %v1821_v56, 4 }
 0x1eb   : > { %v3780_v19 = vpop.f32.mrf.mxu0  ;;  %1868 = vst [vmem:[#allocation4 + $0x278] sm:$0xf] %v1806_v22  ;;  %v1901_v23 = vld [vmem:[#allocation2 + $0xe8] sm:$0xf]  ;;  %v2106_v60 = vshrl.u32 %v1900_v11, 16  ;;  %v2109_v34 = vshll.u32 %v1900_v11, 16 }
 0x1ec   : > { %v3871_v5 = vpop.f32.mrf.mxu3  ;;  %v10354_v3 = vadd.f32 %v3780_v19, %v10148_v48  ;;  %4050 = vmatmul.bf16.gmra.mxu2 %v7899_v28  ;;  %v1811_v48 = vshll.u32 %v1588_v37, 16  ;;  %v2115_v57 = vshrl.u32 %v1901_v23, 16  ;;  %v8934_v19 = vld [vmem:[#allocation4 + $0x254] sm:$0xf]  ;;  %v1824_v24 = vor.u32 %v1823_v9, %v1819_v61  ;;  %v7854_v28 = vld [vmem:[#allocation4 + $0x208] sm:$0xf] }
 0x1ed   : > { %v10351_v21 = vadd.f32 %v3871_v5, %v3813_v13  ;;  %v2118_v5 = vshll.u32 %v1901_v23, 16  ;;  %v7864_v11 = vld [vmem:[#allocation4 + $0x234] sm:$0xf0]  ;;  %v2181_v40 = vld [vmem:[#allocation2 + $0xe8] sm:$0xf] }
 0x1ee   : > { %3922 = vmatmul.bf16.gmra.mxu0 %v7819_v0  ;;  %v1813_v1 = vrot.slane %v1811_v48, 5  ;;  %v2108_v0 = vrot.slane %v2106_v60, 7  ;;  %v2117_v49 = vrot.slane %v2115_v57, 7  ;;  %v2180_v48 = vld [vmem:[#allocation2 + $0xe4] sm:$0xf]  ;;  %v1825_v59 = vrot.slane %v1824_v24, 4 }
 0x1ef   : > { %2200 = vst [vmem:[#allocation4 + $0x2a4] sm:$0xf] %v2180_v48  ;;  %v9014_v57 = vld [vmem:[#allocation8 + $0x200] sm:$0xff]  ;;  %v2202_v9 = vld [vmem:[#allocation2 + $0x30] sm:$0xf] }
 0x1f0   : > { %v1814_v15 = vor.u32 %v1813_v1, %v1810_v39  ;;  %v2113_v37 = vrot.slane %v2108_v0, 4  ;;  %v2120_v32 = vor.u32 %v2118_v5, %v2117_v49  ;;  %v1829_v39 = vrot.slane %v1827_v16, 5  ;;  %2201 = vst [vmem:[#allocation4 + $0x2c8] sm:$0xf] %v2181_v40  ;;  %4127 = vmatpush.bf16.msrb.mxu0 %v9014_v57  ;;  %v2204_v16 = vld [vmem:[#allocation2 + $0x38] sm:$0x1] }
 0x1f1   : > { %4099 = vmatmul.bf16.gmra.mxu3 %v7831_v27  ;;  %v1539_v27 = vld [vmem:[#allocation2 + $0xd0] sm:$0xf]  ;;  %v7855_v1 = vor.u32 %v8929_v14, %v7854_v28  ;;  %v3835_v57 = vadd.f32 %v10191_v42, %v10329_v58 }
 0x1f2   : > { %1559 = vst [vmem:[#allocation4 + $0x298] sm:$0xf] %v1539_v27  ;;  %v7892_v62 = vld [vmem:[#allocation4 + $0x274] sm:$0xf0]  ;;  %v1815_v22 = vrot.slane %v1814_v15, 4  ;;  %v2121_v56 = vsel %vm9946_vm5, %v2113_v37, %v2120_v32  ;;  %v1830_v60 = vsel %vm10004_vm8, %v1825_v59, %v1829_v39  ;;  %v2236_v27 = vshll.u32 %v2202_v9, 16 }
 0x1f3   : > { %v3782_v55 = vpop.f32.mrf.mxu0  ;;  %v7895_v20 = vor.u32 %v8934_v19, %v7892_v62  ;;  %2161 = vst [vmem:[#allocation4 + $0x2c4] sm:$0xf] %v2121_v56  ;;  %v2252_v62 = vshll.u32 %v2204_v16, 16 }
 0x1f4   : > { %v3874_v46 = vpop.f32.mrf.mxu3  ;;  %v10365_v63 = vadd.f32 %v3782_v55, %v3724_v41  ;;  %1870 = vst [vmem:[#allocation4 + $0x2c0] sm:$0xf] %v1830_v60  ;;  %v2238_v49 = vrot.slane %v2236_v27, 5  ;;  %v8938_v60 = vld [vmem:[#allocation4 + $0x270] sm:$0xf0] }
 0x1f5   : > { %v10363_v13 = vadd.f32 %v3874_v46, %v10291_v44  ;;  %v2111_v44 = vor.u32 %v2109_v34, %v2108_v0  ;;  %v1820_v46 = vsel %vm10004_vm8, %v1815_v22, %v1819_v61  ;;  %v2203_v61 = vld [vmem:[#allocation2 + $0x34] sm:$0xf]  ;;  %v2233_v0 = vshrl.u32 %v2202_v9, 16  ;;  %v2206_v27 = vld [vmem:[#allocation2 + $0x48] sm:$0xf] }
 0x1f6   : > { %1869 = vst [vmem:[#allocation4 + $0x29c] sm:$0xf] %v1820_v46  ;;  %v2242_v12 = vshll.u32 %v2203_v61, 16  ;;  %v3729_v22 = vadd.f32 %v10172_v25, %v10178_v29  ;;  %v2254_v48 = vrot.slane %v2252_v62, 5  ;;  %v8935_v29 = vld [vmem:[#allocation4 + $0x25c] sm:$0xf] }
 0x1f7   : > { %v2112_v41 = vsel %vm9946_vm5, %v7583_v7, %v2111_v44  ;;  %v7867_v7 = vor.u32 %v8926_v36, %v7864_v11  ;;  %v2235_v19 = vrot.slane %v2233_v0, 4  ;;  %v2205_v0 = vld [vmem:[#allocation2 + $0x44] sm:$0xf]  ;;  %v2266_v16 = vshll.u32 %v2206_v27, 16 }
 0x1f8   : > { %3991 = vmatmul.bf16.gmra.mxu1 %v7895_v20  ;;  %2160 = vst [vmem:[#allocation4 + $0x2a0] sm:$0xf] %v2112_v41  ;;  %v2244_v28 = vrot.slane %v2242_v12, 5 }
 0x1f9   : > { %v2239_v37 = vor.u32 %v2238_v49, %v2235_v19  ;;  %v2270_v19 = vshrl.u32 %v2206_v27, 16 }
 0x1fa   : > { %v8948_v24 = vld [vmem:[#allocation4 + $0x2c0] sm:$0xf0] }
 0x1fb   : > { %v3785_v5 = vpop.f32.mrf.mxu0  ;;  %v7928_v39 = vld [vmem:[#allocation4 + $0x2bc] sm:$0xf0]  ;;  %v2240_v11 = vrot.slane %v2239_v37, 4 }
 0x1fc   : > { %v3876_v23 = vpop.f32.mrf.mxu3  ;;  %v10379_v55 = vadd.f32 %v3785_v5, %v10166_v53 }
 0x1fd   : > { %v10376_v34 = vadd.f32 %v3876_v23, %v10301_v45  ;;  %v2246_v45 = vshrl.u32 %v2203_v61, 16  ;;  %v8943_v20 = vld [vmem:[#allocation4 + $0x29c] sm:$0xf]  ;;  %v2245_v46 = vsel %vm10004_vm8, %v2240_v11, %v2244_v28  ;;  %v7890_v23 = vld [vmem:[#allocation4 + $0x250] sm:$0xf] }
 0x1fe   : > { %3927 = vmatmul.bf16.gmra.mxu0 %v7855_v1  ;;  %v7931_v40 = vor.u32 %v8943_v20, %v7928_v39  ;;  %2492 = vst [vmem:[#allocation4 + $0x20] sm:$0xf] %v2245_v46  ;;  %v7891_v5 = vor.u32 %v8938_v60, %v7890_v23  ;;  %v7926_v39 = vld [vmem:[#allocation4 + $0x298] sm:$0xf]  ;;  %v8947_v11 = vld [vmem:[#allocation4 + $0x2b8] sm:$0xf0] }
 0x1ff   : > { %v7934_v15 = vld [vmem:[#allocation4 + $0x2a0] sm:$0xf]  ;;  %v2248_v14 = vrot.slane %v2246_v45, 4  ;;  %v2257_v45 = vshrl.u32 %v2205_v0, 16 }
 0x200   : > { %v7935_v53 = vor.u32 %v8948_v24, %v7934_v15  ;;  %v2260_v15 = vshll.u32 %v2205_v0, 16  ;;  %v2208_v60 = vld [vmem:[#allocation2 + $0x58] sm:$0xf]  ;;  %v2210_v0 = vld [vmem:[#allocation2 + $0x60] sm:$0x1] }
 0x201   : > { %4104 = vmatmul.bf16.gmra.mxu3 %v7867_v7  ;;  %v2249_v32 = vor.u32 %v2248_v14, %v2244_v28  ;;  %v2259_v49 = vrot.slane %v2257_v45, 4  ;;  %v2207_v28 = vld [vmem:[#allocation2 + $0x4c] sm:$0x1]  ;;  %v2272_v14 = vrot.slane %v2270_v19, 4 }
 0x202   : > { %4055 = vmatmul.bf16.gmra.mxu2 %v7935_v53  ;;  %v2262_v24 = vrot.slane %v2260_v15, 5  ;;  %v2276_v42 = vshll.u32 %v2207_v28, 16 }
 0x203   : > { %v3787_v59 = vpop.f32.mrf.mxu0  ;;  %v2250_v56 = vrot.slane %v2249_v32, 4 }
 0x204   : > { %v3879_v44 = vpop.f32.mrf.mxu3  ;;  %v10386_v41 = vadd.f32 %v3787_v59, %v3729_v22  ;;  %v2263_v62 = vor.u32 %v2262_v24, %v2259_v49  ;;  %v2278_v37 = vrot.slane %v2276_v42, 5 }
 0x205   : > { %v10384_v36 = vadd.f32 %v3879_v44, %v10312_v54  ;;  %v2255_v25 = vsel %vm10004_vm8, %v2250_v56, %v2254_v48  ;;  %v7900_v54 = vld [vmem:[#allocation4 + $0x27c] sm:$0xf0]  ;;  %v3837_v44 = vadd.f32 %v10203_v17, %v10348_v26  ;;  %v7936_v56 = vld [vmem:[#allocation4 + $0x2c4] sm:$0xf0]  ;;  %v3840_v17 = vadd.f32 %v10211_v6, %v10354_v3 }
 0x206   : > { %2493 = vst [vmem:[#allocation4 + $0x44] sm:$0xf] %v2255_v25  ;;  %v7903_v9 = vor.u32 %v8935_v29, %v7900_v54  ;;  %v2264_v53 = vrot.slane %v2263_v62, 4  ;;  %v7927_v26 = vor.u32 %v8947_v11, %v7926_v39  ;;  %v2209_v25 = vld [vmem:[#allocation2 + $0x5c] sm:$0xf]  ;;  %v2281_v54 = vshrl.u32 %v2208_v60, 16 }
 0x207   : > { %v2300_v6 = vshll.u32 %v2210_v0, 16  ;;  %v7618_v42 = vld [vmem:[#allocation4 + $0x20] sm:$0xf] }
 0x208   : > { %3996 = vmatmul.bf16.gmra.mxu1 %v7931_v40  ;;  %v8944_v40 = vld [vmem:[#allocation4 + $0x2a4] sm:$0xf] }
 0x209   : > { %v7939_v46 = vor.u32 %v8944_v40, %v7936_v56  ;;  %v2302_v49 = vrot.slane %v2300_v6, 5  ;;  %v2213_v56 = vld [vmem:[#allocation2 + $0x74] sm:$0x1] }
 0x20b   : > { %v3893_v61 = vpop.f32.mrf.mxu0 }
 0x20c   : > { %v3881_v1 = vpop.f32.mrf.mxu3  ;;  %v10397_v12 = vadd.f32 %v3893_v61, %v3835_v57  ;;  %v2290_v57 = vshll.u32 %v2209_v25, 16 }
 0x20d   : > { %v10393_v7 = vadd.f32 %v3881_v1, %v10323_v18  ;;  %v2268_v18 = vrot.slane %v2266_v16, 5  ;;  %v2284_v1 = vshll.u32 %v2208_v60, 16  ;;  %v3842_v16 = vadd.f32 %v10223_v52, %v10365_v63 }
 0x20e   : > { %3932 = vmatmul.bf16.gmra.mxu0 %v7891_v5  ;;  %v2294_v5 = vshrl.u32 %v2209_v25, 16  ;;  %v2292_v27 = vrot.slane %v2290_v57, 5 }
 0x20f   : > { %v2273_v58 = vor.u32 %v2272_v14, %v2268_v18  ;;  %v2269_v48 = vsel %vm10004_vm8, %v2264_v53, %v2268_v18  ;;  %v2286_v61 = vrot.slane %v2284_v1, 5  ;;  %v2211_v53 = vld [vmem:[#allocation2 + $0x6c] sm:$0xf] }
 0x210   : > { %2494 = vst [vmem:[#allocation4 + $0x68] sm:$0xf] %v2269_v48  ;;  %v2296_v45 = vrot.slane %v2294_v5, 4  ;;  %v2308_v48 = vshll.u32 %v2211_v53, 16 }
 0x211   : > { %4109 = vmatmul.bf16.gmra.mxu3 %v7903_v9  ;;  %v2274_v20 = vrot.slane %v2273_v58, 4  ;;  %v2283_v9 = vrot.slane %v2281_v54, 4  ;;  %v8868_v58 = vld [vmem:[#allocation4 + $0x40] sm:$0xf0] }
 0x212   : > { %v2297_v3 = vor.u32 %v2296_v45, %v2292_v27  ;;  %v7619_v52 = vor.u32 %v8868_v58, %v7618_v42  ;;  %v2310_v40 = vrot.slane %v2308_v48, 5 }
 0x213   : > { %v3895_v22 = vpop.f32.mrf.mxu0  ;;  %v2279_v59 = vsel %vm10004_vm8, %v2274_v20, %v2278_v37  ;;  %v2287_v15 = vor.u32 %v2286_v61, %v2283_v9  ;;  %v2212_v37 = vld [vmem:[#allocation2 + $0x70] sm:$0xf]  ;;  %v2305_v20 = vshrl.u32 %v2211_v53, 16 }
 0x214   : > { %v10401_v32 = vadd.f32 %v3895_v22, %v3837_v44  ;;  %2495 = vst [vmem:[#allocation4 + $0x8c] sm:$0xf] %v2279_v59  ;;  %v2298_v18 = vrot.slane %v2297_v3, 4  ;;  %v3845_v44 = vadd.f32 %v10231_v35, %v10379_v55  ;;  %v2314_v59 = vshll.u32 %v2212_v37, 16 }
 0x215   : > { %v2288_v19 = vrot.slane %v2287_v15, 4  ;;  %v2318_v39 = vshrl.u32 %v2212_v37, 16  ;;  %v2307_v11 = vrot.slane %v2305_v20, 4  ;;  %v3847_v35 = vadd.f32 %v10241_v43, %v10386_v41  ;;  %v2214_v15 = vld [vmem:[#allocation2 + $0x80] sm:$0xf] }
 0x216   : > { %v2303_v62 = vsel %vm10004_vm8, %v2298_v18, %v2302_v49  ;;  %v2215_v43 = vld [vmem:[#allocation2 + $0x84] sm:$0xf]  ;;  %v2329_v6 = vshrl.u32 %v2214_v15, 16  ;;  %v2332_v3 = vshll.u32 %v2214_v15, 16  ;;  %v2216_v18 = vld [vmem:[#allocation2 + $0x88] sm:$0x1] }
 0x217   : > { %v2293_v14 = vsel %vm10004_vm8, %v2288_v19, %v2292_v27  ;;  %2497 = vst [vmem:[#allocation4 + $0xd4] sm:$0xf] %v2303_v62  ;;  %v7654_v61 = vld [vmem:[#allocation4 + $0x68] sm:$0xf]  ;;  %v2342_v19 = vshrl.u32 %v2215_v43, 16  ;;  %v2348_v58 = vshll.u32 %v2216_v18, 16 }
 0x218   : > { %2496 = vst [vmem:[#allocation4 + $0xb0] sm:$0xf] %v2293_v14  ;;  %v2331_v49 = vrot.slane %v2329_v6, 4  ;;  %v2221_v18 = vld [vmem:[#allocation2 + $0xac] sm:$0xf] }
 0x219   : > { %v2344_v62 = vrot.slane %v2342_v19, 4 }
 0x21b   : > { %v3898_v23 = vpop.f32.mrf.mxu0  ;;  %v8877_v0 = vld [vmem:[#allocation4 + $0x88] sm:$0xf0] }
 0x21c   : > { %v10409_v29 = vadd.f32 %v3898_v23, %v3840_v17  ;;  %v2316_v17 = vrot.slane %v2314_v59, 5  ;;  %v2324_v23 = vshll.u32 %v2213_v56, 16  ;;  %v7655_v27 = vor.u32 %v8877_v0, %v7654_v61  ;;  %v2217_v56 = vld [vmem:[#allocation2 + $0x94] sm:$0xf] }
 0x21e   : > { %3937 = vmatmul.bf16.gmra.mxu0 %v7927_v26  ;;  %v2320_v26 = vrot.slane %v2318_v39, 4  ;;  %v2326_v25 = vrot.slane %v2324_v23, 5  ;;  %v8886_v39 = vld [vmem:[#allocation4 + $0xd0] sm:$0xf0] }
 0x21f   : > { %v7690_v59 = vld [vmem:[#allocation4 + $0xb0] sm:$0xf] }
 0x220   : > { %v2321_v60 = vor.u32 %v2320_v26, %v2316_v17 }
 0x221   : > { %4114 = vmatmul.bf16.gmra.mxu3 %v7939_v46  ;;  %v2311_v46 = vor.u32 %v2310_v40, %v2307_v11  ;;  %v7691_v11 = vor.u32 %v8886_v39, %v7690_v59 }
 0x222   : > { %v2322_v1 = vrot.slane %v2321_v60, 4 }
 0x223   : > { %v3900_v24 = vpop.f32.mrf.mxu0  ;;  %v2312_v55 = vrot.slane %v2311_v46, 4  ;;  %v2353_v46 = vshrl.u32 %v2217_v56, 16 }
 0x224   : > { %v10413_v28 = vadd.f32 %v3900_v24, %v3842_v16  ;;  %v2327_v9 = vsel %vm10004_vm8, %v2322_v1, %v2326_v25  ;;  %v2338_v16 = vshll.u32 %v2215_v43, 16  ;;  %v2334_v24 = vrot.slane %v2332_v3, 5  ;;  %v2219_v25 = vld [vmem:[#allocation2 + $0x9c] sm:$0x1] }
 0x225   : > { %v2317_v5 = vsel %vm10004_vm8, %v2312_v55, %v2316_v17  ;;  %2499 = vst [vmem:[#allocation4 + $0x11c] sm:$0xf] %v2327_v9  ;;  %v2218_v17 = vld [vmem:[#allocation2 + $0x98] sm:$0xf]  ;;  %v2372_v9 = vshll.u32 %v2219_v25, 16 }
 0x226   : > { %2498 = vst [vmem:[#allocation4 + $0xf8] sm:$0xf] %v2317_v5  ;;  %v2340_v14 = vrot.slane %v2338_v16, 5  ;;  %v2335_v42 = vor.u32 %v2334_v24, %v2331_v49  ;;  %v2362_v23 = vshll.u32 %v2218_v17, 16  ;;  %v2366_v60 = vshrl.u32 %v2218_v17, 16 }
 0x227   : > { %v2220_v24 = vld [vmem:[#allocation2 + $0xa8] sm:$0xf]  ;;  %v2224_v25 = vld [vmem:[#allocation2 + $0xc0] sm:$0xf] }
 0x228   : > { %v2368_v1 = vrot.slane %v2366_v60, 4 }
 0x22b   : > { %v3903_v63 = vpop.f32.mrf.mxu0 }
 0x22c   : > { %v10421_v22 = vadd.f32 %v3903_v63, %v3845_v44  ;;  %v2345_v44 = vor.u32 %v2344_v62, %v2340_v14  ;;  %v2350_v63 = vrot.slane %v2348_v58, 5  ;;  %v8895_v16 = vld [vmem:[#allocation4 + $0x118] sm:$0xf0]  ;;  %v2377_v62 = vshrl.u32 %v2220_v24, 16 }
 0x22d   : > { %v7726_v3 = vld [vmem:[#allocation4 + $0xf8] sm:$0xf]  ;;  %v2390_v58 = vshrl.u32 %v2221_v18, 16 }
 0x22e   : > { %4128 = vmatmul.bf16.vlgmr.msrb.gmra.mxu0 %v7619_v52  ;;  %v2336_v52 = vrot.slane %v2335_v42, 4  ;;  %v2346_v37 = vrot.slane %v2345_v44, 4  ;;  %v7727_v19 = vor.u32 %v8895_v16, %v7726_v3  ;;  %v2386_v42 = vshll.u32 %v2221_v18, 16 }
 0x22f   : > { %v2379_v44 = vrot.slane %v2377_v62, 4 }
 0x230   : > { %v2341_v20 = vsel %vm10004_vm8, %v2336_v52, %v2340_v14  ;;  %v2351_v48 = vsel %vm10004_vm8, %v2346_v37, %v2350_v63  ;;  %v2222_v63 = vld [vmem:[#allocation2 + $0xb0] sm:$0x1]  ;;  %v2392_v37 = vrot.slane %v2390_v58, 4  ;;  %v10471_v58 = vpop.f32.mrf.mxu1 }
 0x231   : > { %2500 = vst [vmem:[#allocation4 + $0x140] sm:$0xf] %v2341_v20 }
 0x232   : > { %2501 = vst [vmem:[#allocation4 + $0x164] sm:$0xf] %v2351_v48  ;;  %v2396_v48 = vshll.u32 %v2222_v63, 16  ;;  %v2226_v63 = vld [vmem:[#allocation2 + $0xd0] sm:$0xf] }
 0x233   : > { %v3905_v54 = vpop.f32.mrf.mxu0 }
 0x234   : > { %v10425_v57 = vadd.f32 %v3905_v54, %v3847_v35  ;;  %v2355_v35 = vrot.slane %v2353_v46, 4  ;;  %v2364_v54 = vrot.slane %v2362_v23, 5 }
 0x236   : > { %v2369_v61 = vor.u32 %v2368_v1, %v2364_v54 }
 0x238   : > { %v2370_v15 = vrot.slane %v2369_v61, 4 }
 0x239   : > { %v8904_v23 = vld [vmem:[#allocation4 + $0x160] sm:$0xf0] }
 0x23b   : > { %v3908_v45 = vpop.f32.mrf.mxu0 }
 0x23c   : > { %v10432_v41 = vadd.f32 %v3908_v45, %v10252_v2 }
 0x23e   : > { %4133 = vmatmul.bf16.gmra.mxu0 %v7655_v27  ;;  %v2374_v27 = vrot.slane %v2372_v9, 5  ;;  %v2414_v9 = vshrl.u32 %v2224_v25, 16 }
 0x240   : > { %v2375_v6 = vsel %vm10004_vm8, %v2370_v15, %v2374_v27  ;;  %v2225_v27 = vld [vmem:[#allocation2 + $0xc4] sm:$0x1]  ;;  %v2416_v15 = vrot.slane %v2414_v9, 4 }
 0x241   : > { %2503 = vst [vmem:[#allocation4 + $0x1ac] sm:$0xf] %v2375_v6  ;;  %v2420_v6 = vshll.u32 %v2225_v27, 16 }
 0x243   : > { %v3910_v53 = vpop.f32.mrf.mxu0 }
 0x244   : > { %v10435_v2 = vadd.f32 %v3910_v53, %v10263_v47  ;;  %v2356_v47 = vshll.u32 %v2217_v56, 16  ;;  %v2388_v53 = vrot.slane %v2386_v42, 5 }
 0x246   : > { %v2358_v55 = vrot.slane %v2356_v47, 5  ;;  %v2393_v59 = vor.u32 %v2392_v37, %v2388_v53  ;;  %v7762_v47 = vld [vmem:[#allocation4 + $0x140] sm:$0xf] }
 0x247   : > { %v7763_v60 = vor.u32 %v8904_v23, %v7762_v47 }
 0x248   : > { %v2359_v5 = vor.u32 %v2358_v55, %v2355_v35  ;;  %v2394_v56 = vrot.slane %v2393_v59, 4  ;;  %v2223_v55 = vld [vmem:[#allocation2 + $0xbc] sm:$0xf]  ;;  %v8913_v42 = vld [vmem:[#allocation4 + $0x1a8] sm:$0xf0]  ;;  %v10476_v59 = vpop.f32.mrf.mxu2 }
 0x249   : > { %v2401_v1 = vshrl.u32 %v2223_v55, 16 }
 0x24a   : > { %v2360_v0 = vrot.slane %v2359_v5, 4  ;;  %v2410_v5 = vshll.u32 %v2224_v25, 16  ;;  %v3954_v25 = vpop.f32.mrf.mxu1 }
 0x24b   : > { %v3913_v40 = vpop.f32.mrf.mxu0  ;;  %v2403_v61 = vrot.slane %v2401_v1, 4 }
 0x24c   : > { %v10442_v26 = vadd.f32 %v3913_v40, %v10275_v51  ;;  %v2365_v43 = vsel %vm10004_vm8, %v2360_v0, %v2364_v54 }
 0x24d   : > { %2502 = vst [vmem:[#allocation4 + $0x188] sm:$0xf] %v2365_v43 }
 0x24e   : > { %4138 = vmatmul.bf16.gmra.mxu0 %v7691_v11  ;;  %v2398_v11 = vrot.slane %v2396_v48, 5 }
 0x250   : > { %v2399_v46 = vsel %vm10004_vm8, %v2394_v56, %v2398_v11  ;;  %v2228_v56 = vld [vmem:[#allocation2 + $0xd8] sm:$0x1] }
 0x251   : > { %2505 = vst [vmem:[#allocation4 + $0x1f4] sm:$0xf] %v2399_v46  ;;  %v2444_v23 = vshll.u32 %v2228_v56, 16 }
 0x253   : > { %v3915_v45 = vpop.f32.mrf.mxu0 }
 0x254   : > { %v10445_v51 = vadd.f32 %v3915_v45, %v10284_v4  ;;  %v2380_v4 = vshll.u32 %v2220_v24, 16  ;;  %v2412_v45 = vrot.slane %v2410_v5, 5 }
 0x256   : > { %v2382_v52 = vrot.slane %v2380_v4, 5  ;;  %v2417_v3 = vor.u32 %v2416_v15, %v2412_v45  ;;  %v7798_v4 = vld [vmem:[#allocation4 + $0x188] sm:$0xf] }
 0x258   : > { %v2383_v20 = vor.u32 %v2382_v52, %v2379_v44  ;;  %v2418_v24 = vrot.slane %v2417_v3, 4  ;;  %v7799_v44 = vor.u32 %v8913_v42, %v7798_v4  ;;  %v2229_v3 = vld [vmem:[#allocation2 + $0xe4] sm:$0xf] }
 0x25a   : > { %v2384_v39 = vrot.slane %v2383_v20, 4  ;;  %v2428_v20 = vshll.u32 %v2226_v63, 16 }
 0x25b   : > { %v3918_v49 = vpop.f32.mrf.mxu0 }
 0x25c   : > { %v10452_v14 = vadd.f32 %v3918_v49, %v10294_v8  ;;  %v2389_v17 = vsel %vm10004_vm8, %v2384_v39, %v2388_v53  ;;  %v2227_v53 = vld [vmem:[#allocation2 + $0xd4] sm:$0xf] }
 0x25d   : > { %2504 = vst [vmem:[#allocation4 + $0x1d0] sm:$0xf] %v2389_v17  ;;  %v2434_v48 = vshll.u32 %v2227_v53, 16  ;;  %v2438_v39 = vshrl.u32 %v2227_v53, 16 }
 0x25e   : > { %4143 = vmatmul.bf16.gmra.mxu0 %v7727_v19  ;;  %v2422_v19 = vrot.slane %v2420_v6, 5 }
 0x25f   : > { %v2436_v17 = vrot.slane %v2434_v48, 5  ;;  %v2440_v46 = vrot.slane %v2438_v39, 4 }
 0x260   : > { %v2423_v62 = vsel %vm10004_vm8, %v2418_v24, %v2422_v19  ;;  %v3957_v24 = vpop.f32.mrf.mxu1 }
 0x261   : > { %2507 = vst [vmem:[#allocation4 + $0x23c] sm:$0xf] %v2423_v62 }
 0x263   : > { %v3920_v40 = vpop.f32.mrf.mxu0 }
 0x264   : > { %v10455_v8 = vadd.f32 %v3920_v40, %v10305_v30  ;;  %v2404_v30 = vshll.u32 %v2223_v55, 16  ;;  %v2430_v40 = vrot.slane %v2428_v20, 5  ;;  %v7834_v27 = vld [vmem:[#allocation4 + $0x1d0] sm:$0xf] }
 0x266   : > { %v2406_v0 = vrot.slane %v2404_v30, 5 }
 0x268   : > { %v2407_v43 = vor.u32 %v2406_v0, %v2403_v61  ;;  %v4013_v0 = vpop.f32.mrf.mxu2 }
 0x26a   : > { %v2408_v16 = vrot.slane %v2407_v43, 4 }
 0x26b   : > { %v3923_v35 = vpop.f32.mrf.mxu0 }
 0x26c   : > { %v10462_v54 = vadd.f32 %v3923_v35, %v10315_v10  ;;  %v2413_v18 = vsel %vm10004_vm8, %v2408_v16, %v2412_v45  ;;  %v2441_v35 = vor.u32 %v2440_v46, %v2436_v17  ;;  %v8922_v45 = vld [vmem:[#allocation4 + $0x1f0] sm:$0xf0]  ;;  %v2230_v16 = vld [vmem:[#allocation2 + $0xe8] sm:$0xf] }
 0x26d   : > { %2506 = vst [vmem:[#allocation4 + $0x218] sm:$0xf] %v2413_v18  ;;  %v7835_v15 = vor.u32 %v8922_v45, %v7834_v27  ;;  %v2458_v18 = vshll.u32 %v2230_v16, 16  ;;  %v2462_v62 = vshrl.u32 %v2230_v16, 16  ;;  %v3953_v45 = vadd.f32 %v10471_v58, %v10397_v12 }
 0x26e   : > { %4148 = vmatmul.bf16.gmra.mxu0 %v7763_v60  ;;  %v10478_v60 = vpop.f32.mrf.mxu3  ;;  %v2442_v30 = vrot.slane %v2441_v35, 4  ;;  %v3958_v58 = vadd.f32 %v3957_v24, %v10409_v29 }
 0x270   : > { %v4016_v20 = vpop.f32.mrf.mxu2 }
 0x273   : > { %v3925_v49 = vpop.f32.mrf.mxu0 }
 0x274   : > { %v10465_v10 = vadd.f32 %v3925_v49, %v10326_v33  ;;  %v2425_v33 = vshrl.u32 %v2226_v63, 16  ;;  %v2452_v49 = vshll.u32 %v2229_v3, 16  ;;  %v2464_v63 = vrot.slane %v2462_v62, 4  ;;  %v7870_v35 = vld [vmem:[#allocation4 + $0x218] sm:$0xf] }
 0x276   : > { %v2427_v11 = vrot.slane %v2425_v33, 4  ;;  %v4072_v43 = vpop.f32.mrf.mxu3  ;;  %v2454_v42 = vrot.slane %v2452_v49, 5 }
 0x278   : > { %v2431_v47 = vor.u32 %v2430_v40, %v2427_v11 }
 0x27a   : > { %v2432_v55 = vrot.slane %v2431_v47, 4 }
 0x27b   : > { %v3928_v52 = vpop.f32.mrf.mxu0 }
 0x27c   : > { %v10474_v37 = vadd.f32 %v3928_v52, %v10338_v50  ;;  %v2446_v50 = vrot.slane %v2444_v23, 5  ;;  %v2437_v9 = vsel %vm10004_vm8, %v2432_v55, %v2436_v17  ;;  %v2460_v52 = vrot.slane %v2458_v18, 5  ;;  %v3959_v23 = vpop.f32.mrf.mxu1  ;;  %v8931_v55 = vld [vmem:[#allocation4 + $0x238] sm:$0xf0] }
 0x27d   : > { %2508 = vst [vmem:[#allocation4 + $0x260] sm:$0xf] %v2437_v9  ;;  %v3955_v18 = vadd.f32 %v3954_v25, %v10401_v32  ;;  %v10518_v32 = vld [vmem:[%s11012_s4] ss:$0 sm:$0xff] }
 0x27e   : > { %4153 = vmatmul.bf16.gmra.mxu0 %v7799_v44  ;;  %v2447_v61 = vsel %vm10004_vm8, %v2442_v30, %v2446_v50  ;;  %v2231_v44 = vld [vmem:[#allocation2 + $0xec] sm:$0x1]  ;;  %v2465_v48 = vor.u32 %v2464_v63, %v2460_v52  ;;  %v4075_v46 = vpop.f32.mrf.mxu3  ;;  %v7871_v50 = vor.u32 %v8931_v55, %v7870_v35 }
 0x27f   : > { %2509 = vst [vmem:[#allocation4 + $0x284] sm:$0xf] %v2447_v61  ;;  %v2468_v33 = vshll.u32 %v2231_v44, 16  ;;  %v4014_v44 = vadd.f32 %v4013_v0, %v3955_v18 }
 0x281   : > { %v2470_v11 = vrot.slane %v2468_v33, 5 }
 0x283   : > { %v3930_v1 = vpop.f32.mrf.mxu0 }
 0x284   : > { %v10481_v5 = vadd.f32 %v3930_v1, %v10351_v21  ;;  %v2449_v21 = vshrl.u32 %v2229_v3, 16  ;;  %v4018_v1 = vpop.f32.mrf.mxu2  ;;  %v3962_v61 = vpop.f32.mrf.mxu1  ;;  %v7906_v3 = vld [vmem:[#allocation4 + $0x260] sm:$0xf] }
 0x286   : > { %v2451_v4 = vrot.slane %v2449_v21, 4  ;;  %v8940_v16 = vld [vmem:[#allocation4 + $0x280] sm:$0xf0]  ;;  %v4012_v21 = vadd.f32 %v10476_v59, %v3953_v45  ;;  %v4073_v59 = vadd.f32 %v4072_v43, %v4014_v44 }
 0x288   : > { %v2455_v53 = vor.u32 %v2454_v42, %v2451_v4  ;;  %v4071_v42 = vadd.f32 %v10478_v60, %v4012_v21 }
 0x28a   : > { %v2456_v39 = vrot.slane %v2455_v53, 4  ;;  %v4017_v53 = vadd.f32 %v4016_v20, %v3958_v58 }
 0x28b   : > { %v3933_v6 = vpop.f32.mrf.mxu0 }
 0x28c   : > { %v10488_v19 = vadd.f32 %v3933_v6, %v10363_v13  ;;  %v2466_v13 = vrot.slane %v2465_v48, 4  ;;  %v2461_v17 = vsel %vm10004_vm8, %v2456_v39, %v2460_v52  ;;  %v4021_v6 = vpop.f32.mrf.mxu2  ;;  %v3964_v62 = vpop.f32.mrf.mxu1  ;;  %v4076_v43 = vadd.f32 %v4075_v46, %v4017_v53 }
 0x28d   : > { %2510 = vst [vmem:[#allocation4 + $0x2a8] sm:$0xf] %v2461_v17 }
 0x28e   : > { %4158 = vmatmul.bf16.gmra.mxu0 %v7835_v15  ;;  %v2471_v47 = vsel %vm10004_vm8, %v2466_v13, %v2470_v11  ;;  %v3960_v13 = vadd.f32 %v3959_v23, %v10413_v28  ;;  %v3963_v28 = vadd.f32 %v3962_v61, %v10421_v22 }
 0x28f   : > { %2511 = vst [vmem:[#allocation4 + $0x2cc] sm:$0xf] %v2471_v47 }
 0x293   : > { %v3935_v40 = vpop.f32.mrf.mxu0 }
 0x294   : > { %v10491_v56 = vadd.f32 %v3935_v40, %v10376_v34  ;;  %v4077_v34 = vpop.f32.mrf.mxu3  ;;  %v4023_v12 = vpop.f32.mrf.mxu2  ;;  %v7942_v11 = vld [vmem:[#allocation4 + $0x2a8] sm:$0xf] }
 0x295   : > { %v3967_v33 = vpop.f32.mrf.mxu1 }
 0x296   : > { %v8949_v40 = vld [vmem:[#allocation4 + $0x2c8] sm:$0xf0] }
 0x297   : > { %v7943_v35 = vor.u32 %v8949_v40, %v7942_v11  ;;  %v3968_v11 = vadd.f32 %v3967_v33, %v10432_v41 }
 0x29b   : > { %v3938_v30 = vpop.f32.mrf.mxu0 }
 0x29c   : > { %v10498_v9 = vadd.f32 %v3938_v30, %v10384_v36  ;;  %v4080_v49 = vpop.f32.mrf.mxu3  ;;  %v7907_v36 = vor.u32 %v8940_v16, %v7906_v3  ;;  %v4026_v24 = vpop.f32.mrf.mxu2 }
 0x29d   : > { %v3969_v3 = vpop.f32.mrf.mxu1 }
 0x29e   : > { %4163 = vmatmul.bf16.gmra.mxu0 %v7871_v50 }
 0x2a3   : > { %v3940_v27 = vpop.f32.mrf.mxu0 }
 0x2a4   : > { %v10503_v15 = vadd.f32 %v3940_v27, %v10393_v7  ;;  %v10511_v7 = vld [vmem:[%s11011_s3] ss:$0 sm:$0xff]  ;;  %v4082_v60 = vpop.f32.mrf.mxu3  ;;  %v4019_v27 = vadd.f32 %v4018_v1, %v3960_v13  ;;  %v4028_v18 = vpop.f32.mrf.mxu2  ;;  %v4022_v1 = vadd.f32 %v4021_v6, %v3963_v28  ;;  %v4027_v13 = vadd.f32 %v4026_v24, %v3968_v11 }
 0x2a5   : > { %v3972_v58 = vpop.f32.mrf.mxu1 }
 0x2a6   : > { %v4078_v21 = vadd.f32 %v4077_v34, %v4019_v27  ;;  %v4081_v34 = vadd.f32 %v4080_v49, %v4022_v1 }
 0x2ab   : > { %v4129_v4 = vpop.f32.mrf.mxu0 }
 0x2ac   : > { %v4130_v52 = vadd.f32 %v4129_v4, %v4071_v42  ;;  %v4085_v20 = vpop.f32.mrf.mxu3  ;;  %v4031_v53 = vpop.f32.mrf.mxu2 }
 0x2ad   : > { %v3974_v6 = vpop.f32.mrf.mxu1 }
 0x2ae   : > { %4168 = vmatmul.bf16.gmra.mxu0 %v7907_v36  ;;  %v4183_v63 = vmul.f32 %v10511_v7, %v4130_v52  ;;  %v3975_v1 = vadd.f32 %v3974_v6, %v10445_v51 }
 0x2b0   : > { %v4207_v48 = vadd.f32 %v10518_v32, %v4183_v63 }
 0x2b2   : > { %v4227_v17 = vmax.f32 %v4207_v48, 0.0 }
 0x2b3   : > { %v4131_v25 = vpop.f32.mrf.mxu0 }
 0x2b4   : > { %v4132_v0 = vadd.f32 %v4131_v25, %v4073_v59  ;;  %v4087_v44 = vpop.f32.mrf.mxu3  ;;  %v3965_v59 = vadd.f32 %v3964_v62, %v10425_v57  ;;  %v4033_v49 = vpop.f32.mrf.mxu2 }
 0x2b6   : > { %v4184_v39 = vmul.f32 %v10511_v7, %v4132_v0  ;;  %v4024_v48 = vadd.f32 %v4023_v12, %v3965_v59  ;;  %v4086_v12 = vadd.f32 %v4085_v20, %v4027_v13  ;;  %v3973_v20 = vadd.f32 %v3972_v58, %v10442_v26 }
 0x2b8   : > { %v4208_v29 = vadd.f32 %v10518_v32, %v4184_v39  ;;  %v4083_v39 = vadd.f32 %v4082_v60, %v4024_v48 }
 0x2ba   : > { %v4228_v47 = vmax.f32 %v4208_v29, 0.0 }
 0x2bb   : > { %v4134_v55 = vpop.f32.mrf.mxu0 }
 0x2bc   : > { %v9201_v50 = vpack.c.bf16 %v4228_v47, %v4227_v17  ;;  %v4135_v30 = vadd.f32 %v4134_v55, %v4076_v43  ;;  %v4090_v61 = vpop.f32.mrf.mxu3  ;;  %v3970_v47 = vadd.f32 %v3969_v3, %v10435_v2 }
 0x2be   : > { %9229 = vst [vmem:[#allocation3 + $0x8] sm:$0xff] %v9201_v50   ;;  %v4185_v45 = vmul.f32 %v10511_v7, %v4135_v30  ;;  %4173 = vmatmul.bf16.gmra.mxu0 %v7943_v35  ;;  %v3977_v30 = vpop.f32.mrf.mxu1  ;;  %v4029_v27 = vadd.f32 %v4028_v18, %v3970_v47 }
 0x2c0   : > { %v4209_v16 = vadd.f32 %v10518_v32, %v4185_v45 }
 0x2c2   : > { %v4229_v46 = vmax.f32 %v4209_v16, 0.0  ;;  %v4036_v16 = vpop.f32.mrf.mxu2 }
 0x2c3   : > { %v4136_v36 = vpop.f32.mrf.mxu0 }
 0x2c4   : > { %v4249_v23 = vpack.c.bf16 %v4229_v46, %v4229_v46  ;;  %v4137_v4 = vadd.f32 %v4136_v36, %v4078_v21  ;;  %v4092_v55 = vpop.f32.mrf.mxu3  ;;  %v4088_v21 = vadd.f32 %v4087_v44, %v4029_v27 }
 0x2c6   : > { %4269 = vst [vmem:[#allocation3 + $0x1c] sm:$0xf] %v4249_v23  ;;  %v4186_v42 = vmul.f32 %v10511_v7, %v4137_v4  ;;  %v3979_v4 = vpop.f32.mrf.mxu1 }
 0x2c8   : > { %v4210_v52 = vadd.f32 %v10518_v32, %v4186_v42  ;;  %v4032_v42 = vadd.f32 %v4031_v53, %v3973_v20 }
 0x2ca   : > { %v4230_v63 = vmax.f32 %v4210_v52, 0.0  ;;  %v4038_v59 = vpop.f32.mrf.mxu2  ;;  %v4091_v44 = vadd.f32 %v4090_v61, %v4032_v42 }
 0x2cb   : > { %v4139_v25 = vpop.f32.mrf.mxu0 }
 0x2cc   : > { %v4250_v0 = vpack.c.bf16 %v4230_v63, %v4230_v63  ;;  %v4140_v22 = vadd.f32 %v4139_v25, %v4081_v34  ;;  %v4095_v28 = vpop.f32.mrf.mxu3  ;;  %v4034_v34 = vadd.f32 %v4033_v49, %v3975_v1 }
 0x2ce   : > { %4270 = vst [vmem:[#allocation3 + $0x20] sm:$0xf] %v4250_v0  ;;  %v4187_v40 = vmul.f32 %v10511_v7, %v4140_v22  ;;  %v3982_v0 = vpop.f32.mrf.mxu1  ;;  %v4093_v48 = vadd.f32 %v4092_v55, %v4034_v34  ;;  %v3978_v22 = vadd.f32 %v3977_v30, %v10452_v14 }
 0x2d0   : > { %v4211_v57 = vadd.f32 %v10518_v32, %v4187_v40 }
 0x2d2   : > { %v4231_v35 = vmax.f32 %v4211_v57, 0.0  ;;  %v4041_v40 = vpop.f32.mrf.mxu2  ;;  %v3980_v57 = vadd.f32 %v3979_v4, %v10455_v8 }
 0x2d3   : > { %v4141_v29 = vpop.f32.mrf.mxu0 }
 0x2d4   : > { %v4142_v43 = vadd.f32 %v4141_v29, %v4083_v39  ;;  %v4097_v58 = vpop.f32.mrf.mxu3  ;;  %v4037_v29 = vadd.f32 %v4036_v16, %v3978_v22 }
 0x2d6   : > { %v4188_v62 = vmul.f32 %v10511_v7, %v4142_v43  ;;  %v4096_v13 = vadd.f32 %v4095_v28, %v4037_v29 }
 0x2d8   : > { %v4212_v17 = vadd.f32 %v10518_v32, %v4188_v62 }
 0x2da   : > { %v4232_v60 = vmax.f32 %v4212_v17, 0.0  ;;  %v3984_v17 = vpop.f32.mrf.mxu1  ;;  %v4043_v55 = vpop.f32.mrf.mxu2 }
 0x2db   : > { %v4144_v41 = vpop.f32.mrf.mxu0 }
 0x2dc   : > { %v9206_v33 = vpack.c.bf16 %v4232_v60, %v4231_v35  ;;  %v4145_v50 = vadd.f32 %v4144_v41, %v4086_v12  ;;  %v4100_v43 = vpop.f32.mrf.mxu3  ;;  %v4039_v35 = vadd.f32 %v4038_v59, %v3980_v57 }
 0x2de   : > { %9230 = vst [vmem:[#allocation3 + $0x30] sm:$0xff] %v9206_v33   ;;  %v4189_v24 = vmul.f32 %v10511_v7, %v4145_v50  ;;  %v4098_v33 = vadd.f32 %v4097_v58, %v4039_v35 }
 0x2e0   : > { %v4213_v45 = vadd.f32 %v10518_v32, %v4189_v24  ;;  %v3983_v24 = vadd.f32 %v3982_v0, %v10462_v54 }
 0x2e2   : > { %v4233_v46 = vmax.f32 %v4213_v45, 0.0  ;;  %v3987_v16 = vpop.f32.mrf.mxu1  ;;  %v4046_v20 = vpop.f32.mrf.mxu2 }
 0x2e3   : > { %v4146_v36 = vpop.f32.mrf.mxu0  ;;  %v3988_v59 = vadd.f32 %v3987_v16, %v10474_v37 }
 0x2e4   : > { %v4253_v2 = vpack.c.bf16 %v4233_v46, %v4233_v46  ;;  %v4147_v3 = vadd.f32 %v4146_v36, %v4088_v21  ;;  %v4102_v30 = vpop.f32.mrf.mxu3  ;;  %v4042_v46 = vadd.f32 %v4041_v40, %v3983_v24 }
 0x2e6   : > { %4273 = vst [vmem:[#allocation3 + $0x44] sm:$0xf] %v4253_v2  ;;  %v4190_v23 = vmul.f32 %v10511_v7, %v4147_v3  ;;  %v3985_v2 = vadd.f32 %v3984_v17, %v10465_v10 }
 0x2e8   : > { %v4214_v18 = vadd.f32 %v10518_v32, %v4190_v23  ;;  %v4101_v23 = vadd.f32 %v4100_v43, %v4042_v46 }
 0x2ea   : > { %v4234_v52 = vmax.f32 %v4214_v18, 0.0  ;;  %v4044_v18 = vadd.f32 %v4043_v55, %v3985_v2  ;;  %v3989_v1 = vpop.f32.mrf.mxu1 }
 0x2eb   : > { %v4149_v63 = vpop.f32.mrf.mxu0 }
 0x2ec   : > { %v4254_v25 = vpack.c.bf16 %v4234_v52, %v4234_v52  ;;  %v4150_v26 = vadd.f32 %v4149_v63, %v4091_v44  ;;  %v4105_v42 = vpop.f32.mrf.mxu3  ;;  %v4103_v52 = vadd.f32 %v4102_v30, %v4044_v18  ;;  %v4048_v44 = vpop.f32.mrf.mxu2 }
 0x2ee   : > { %4274 = vst [vmem:[#allocation3 + $0x48] sm:$0xf] %v4254_v25  ;;  %v4191_v39 = vmul.f32 %v10511_v7, %v4150_v26  ;;  %v4047_v26 = vadd.f32 %v4046_v20, %v3988_v59 }
 0x2f0   : > { %v4215_v51 = vadd.f32 %v10518_v32, %v4191_v39  ;;  %v4106_v39 = vadd.f32 %v4105_v42, %v4047_v26 }
 0x2f2   : > { %v4235_v62 = vmax.f32 %v4215_v51, 0.0  ;;  %v3992_v22 = vpop.f32.mrf.mxu1 }
 0x2f3   : > { %v4151_v53 = vpop.f32.mrf.mxu0 }
 0x2f4   : > { %v4152_v11 = vadd.f32 %v4151_v53, %v4093_v48  ;;  %v4107_v0 = vpop.f32.mrf.mxu3  ;;  %v3990_v53 = vadd.f32 %v3989_v1, %v10481_v5 }
 0x2f6   : > { %v4192_v6 = vmul.f32 %v10511_v7, %v4152_v11 }
 0x2f8   : > { %v4216_v61 = vadd.f32 %v10518_v32, %v4192_v6  ;;  %v4051_v6 = vpop.f32.mrf.mxu2 }
 0x2fa   : > { %v4236_v49 = vmax.f32 %v4216_v61, 0.0  ;;  %v4049_v61 = vadd.f32 %v4048_v44, %v3990_v53  ;;  %v3994_v17 = vpop.f32.mrf.mxu1 }
 0x2fb   : > { %v4154_v14 = vpop.f32.mrf.mxu0 }
 0x2fc   : > { %v9211_v12 = vpack.c.bf16 %v4236_v49, %v4235_v62  ;;  %v4155_v47 = vadd.f32 %v4154_v14, %v4096_v13  ;;  %v4110_v57 = vpop.f32.mrf.mxu3  ;;  %v4108_v62 = vadd.f32 %v4107_v0, %v4049_v61 }
 0x2fe   : > { %9231 = vst [vmem:[#allocation3 + $0x58] sm:$0xff] %v9211_v12   ;;  %v4193_v60 = vmul.f32 %v10511_v7, %v4155_v47  ;;  %v3993_v12 = vadd.f32 %v3992_v22, %v10488_v19 }
 0x300   : > { %v4217_v41 = vadd.f32 %v10518_v32, %v4193_v60  ;;  %v4053_v60 = vpop.f32.mrf.mxu2  ;;  %v4052_v55 = vadd.f32 %v4051_v6, %v3993_v12 }
 0x302   : > { %v4237_v50 = vmax.f32 %v4217_v41, 0.0  ;;  %v4111_v24 = vadd.f32 %v4110_v57, %v4052_v55 }
 0x303   : > { %v4156_v27 = vpop.f32.mrf.mxu0 }
 0x304   : > { %v4257_v8 = vpack.c.bf16 %v4237_v50, %v4237_v50  ;;  %v4157_v45 = vadd.f32 %v4156_v27, %v4098_v33  ;;  %v3995_v33 = vadd.f32 %v3994_v17, %v10491_v56  ;;  %v4112_v30 = vpop.f32.mrf.mxu3 }
 0x306   : > { %4277 = vst [vmem:[#allocation3 + $0x6c] sm:$0xf] %v4257_v8  ;;  %v4194_v21 = vmul.f32 %v10511_v7, %v4157_v45  ;;  %v3997_v45 = vpop.f32.mrf.mxu1  ;;  %v4054_v16 = vadd.f32 %v4053_v60, %v3995_v33 }
 0x308   : > { %v4218_v36 = vadd.f32 %v10518_v32, %v4194_v21  ;;  %v4056_v21 = vpop.f32.mrf.mxu2  ;;  %v4113_v46 = vadd.f32 %v4112_v30, %v4054_v16 }
 0x30a   : > { %v4238_v3 = vmax.f32 %v4218_v36, 0.0  ;;  %v3998_v36 = vadd.f32 %v3997_v45, %v10498_v9 }
 0x30b   : > { %v4159_v28 = vpop.f32.mrf.mxu0 }
 0x30c   : > { %v4258_v4 = vpack.c.bf16 %v4238_v3, %v4238_v3  ;;  %v4160_v54 = vadd.f32 %v4159_v28, %v4101_v23  ;;  %v4115_v28 = vpop.f32.mrf.mxu3  ;;  %v4057_v23 = vadd.f32 %v4056_v21, %v3998_v36 }
 0x30e   : > { %4278 = vst [vmem:[#allocation3 + $0x70] sm:$0xf] %v4258_v4  ;;  %v4195_v63 = vmul.f32 %v10511_v7, %v4160_v54  ;;  %v3999_v42 = vpop.f32.mrf.mxu1  ;;  %v4116_v54 = vadd.f32 %v4115_v28, %v4057_v23 }
 0x30f   : > { %v4000_v1 = vadd.f32 %v3999_v42, %v10503_v15 }
 0x310   : > { %v4219_v10 = vadd.f32 %v10518_v32, %v4195_v63  ;;  %v4058_v63 = vpop.f32.mrf.mxu2 }
 0x312   : > { %v4239_v11 = vmax.f32 %v4219_v10, 0.0 }
 0x313   : > { %v4161_v25 = vpop.f32.mrf.mxu0 }
 0x314   : > { %v4162_v34 = vadd.f32 %v4161_v25, %v4103_v52  ;;  %v4117_v10 = vpop.f32.mrf.mxu3 }
 0x316   : > { %v4196_v58 = vmul.f32 %v10511_v7, %v4162_v34  ;;  %v4059_v34 = vadd.f32 %v4058_v63, %v4000_v1 }
 0x318   : > { %v4220_v48 = vadd.f32 %v10518_v32, %v4196_v58  ;;  %v4118_v0 = vadd.f32 %v4117_v10, %v4059_v34 }
 0x31a   : > { %v4240_v40 = vmax.f32 %v4220_v48, 0.0 }
 0x31b   : > { %v4164_v37 = vpop.f32.mrf.mxu0 }
 0x31c   : > { %v9216_v29 = vpack.c.bf16 %v4240_v40, %v4239_v11  ;;  %v4165_v51 = vadd.f32 %v4164_v37, %v4106_v39 }
 0x31e   : > { %9232 = vst [vmem:[#allocation3 + $0x80] sm:$0xff] %v9216_v29   ;;  %v4197_v43 = vmul.f32 %v10511_v7, %v4165_v51 }
 0x320   : > { %v4221_v13 = vadd.f32 %v10518_v32, %v4197_v43 }
 0x322   : > { %v4241_v49 = vmax.f32 %v4221_v13, 0.0 }
 0x323   : > { %v4166_v14 = vpop.f32.mrf.mxu0 }
 0x324   : > { %v4261_v5 = vpack.c.bf16 %v4241_v49, %v4241_v49  ;;  %v4167_v47 = vadd.f32 %v4166_v14, %v4108_v62 }
 0x326   : > { %4281 = vst [vmem:[#allocation3 + $0x94] sm:$0xf] %v4261_v5  ;;  %v4198_v35 = vmul.f32 %v10511_v7, %v4167_v47 }
 0x328   : > { %v4222_v41 = vadd.f32 %v10518_v32, %v4198_v35 }
 0x32a   : > { %v4242_v50 = vmax.f32 %v4222_v41, 0.0 }
 0x32b   : > { %v4169_v27 = vpop.f32.mrf.mxu0 }
 0x32c   : > { %v4262_v8 = vpack.c.bf16 %v4242_v50, %v4242_v50  ;;  %v4170_v19 = vadd.f32 %v4169_v27, %v4111_v24 }
 0x32e   : > { %4282 = vst [vmem:[#allocation3 + $0x98] sm:$0xf] %v4262_v8  ;;  %v4199_v20 = vmul.f32 %v10511_v7, %v4170_v19 }
 0x330   : > { %v4223_v56 = vadd.f32 %v10518_v32, %v4199_v20 }
 0x332   : > { %v4243_v52 = vmax.f32 %v4223_v56, 0.0 }
 0x333   : > { %v4171_v2 = vpop.f32.mrf.mxu0 }
 0x334   : > { %v4172_v3 = vadd.f32 %v4171_v2, %v4113_v46 }
 0x336   : > { %v4200_v4 = vmul.f32 %v10511_v7, %v4172_v3 }
 0x338   : > { %v4224_v18 = vadd.f32 %v10518_v32, %v4200_v4 }
 0x33a   : > { %v4244_v59 = vmax.f32 %v4224_v18, 0.0 }
 0x33b   : > { %v4174_v9 = vpop.f32.mrf.mxu0 }
 0x33c   : > { %v9221_v44 = vpack.c.bf16 %v4244_v59, %v4243_v52  ;;  %v4175_v25 = vadd.f32 %v4174_v9, %v4116_v54 }
 0x33e   : > { %9233 = vst [vmem:[#allocation3 + $0xa8] sm:$0xff] %v9221_v44   ;;  %v4201_v26 = vmul.f32 %v10511_v7, %v4175_v25 }
 0x340   : > { %v4225_v58 = vadd.f32 %v10518_v32, %v4201_v26 }
 0x342   : > { %v4245_v48 = vmax.f32 %v4225_v58, 0.0 }
 0x343   : > { %v4176_v22 = vpop.f32.mrf.mxu0 }
 0x344   : > { %v4265_v39 = vpack.c.bf16 %v4245_v48, %v4245_v48  ;;  %v4177_v53 = vadd.f32 %v4176_v22, %v4118_v0 }
 0x346   : > { %4285 = vst [vmem:[#allocation3 + $0xbc] sm:$0xf] %v4265_v39  ;;  %v4202_v15 = vmul.f32 %v10511_v7, %v4177_v53 }
 0x348   : > { %v4226_v11 = vadd.f32 %v10518_v32, %v4202_v15 }
 0x34a   : > { %v4246_v40 = vmax.f32 %v4226_v11, 0.0  ;;  %4289 = sbr.rel (%p7551_p11) target bundleno = 850 (0x352), region = 68 }
 0x34c   : > { %v4266_v37 = vpack.c.bf16 %v4246_v40, %v4246_v40 }
 0x34e   : > { %4286 = vst [vmem:[#allocation3 + $0xc0] sm:$0xf] %v4266_v37 }
 0x34f   : > { %v9614_v29 = vmov 0  }
 0x350   : > { %4290 = vst [vmem:[#allocation3 + $0x8] sm:$0xf] %v9614_v29 }
 0x351   : > { %4291 = vst [vmem:[#allocation3 + $0xc] sm:$0xf] %v9614_v29 }
 0x352 PF: > { %p8233_p1 = scmp.ne.s32.totalorder %s9589_s30, 1 }
 0x354   : > { %4295 = sbr.rel (%p8233_p1) target bundleno = 860 (0x35c), region = 72 }
 0x359   : > { %v9615_v51 = vmov 0  }
 0x35a   : > { %4297 = vst [vmem:[#allocation3 + $0xbc] sm:$0xf] %v9615_v51 }
 0x35b   : > { %4298 = vst [vmem:[#allocation3 + $0xc0] sm:$0xf] %v9615_v51 }
 0x35c PF: > { %v9101_v7 = vld [vmem:[#allocation10 + $0x38] sm:$0xff]  ;;  %v9100_v61 = vld [vmem:[#allocation10 + $0x30] sm:$0xff]  ;;  %v9099_v57 = vld [vmem:[#allocation10 + $0x28] sm:$0xff]  ;;  %s11050_s19 = sld [smem:[#allocation24_spill]]  ;;  %s9167_s24 = sshll.u32 %s9589_s30, 4 }
 0x35d   : > { %v9109_v6 = vld [vmem:[#allocation10 + $0x78] sm:$0xff]  ;;  %6861 = vmatpush.bf16.msra.mxu1 %v9101_v7  ;;  %v9108_v43 = vld [vmem:[#allocation10 + $0x70] sm:$0xff]  ;;  %v9107_v62 = vld [vmem:[#allocation10 + $0x68] sm:$0xff]  ;;  %s11051_s20 = sld [smem:[#allocation25_spill]]  ;;  %s7425_s1 = sshll.u32 %s9805_s8, 4  ;;  %s7426_s1 = int_to_ptr.vmem [resolvable:$true] %s7425_s1 }
 0x35e   : > { %v9117_v32 = vld [vmem:[#allocation10 + $0xb8] sm:$0xff]  ;;  %6910 = vmatpush.bf16.msra.mxu2 %v9109_v6  ;;  %v9116_v13 = vld [vmem:[#allocation10 + $0xb0] sm:$0xff]  ;;  %v9115_v49 = vld [vmem:[#allocation10 + $0xa8] sm:$0xff]  ;;  %s11052_s12 = sld [smem:[#allocation16_spill]]  ;;  %s7410_s13 = scalar_lea.sflag [#allocation7], %s343_s5 }
 0x35f   : > { %6959 = vmatpush.bf16.msrb.mxu3 %v9117_v32  ;;  %v9098_v17 = vld [vmem:[#allocation10 + $0x20] sm:$0xff]  ;;  %v4299_v14 = vld [vmem:[#allocation3 + $0x4] sm:$0x8]  ;;  %v4300_v12 = vld [vmem:[#allocation3 + $0x8] sm:$0xf]  ;;  %s11053_s16 = sld [smem:[#allocation26_spill]] }
 0x360   : > { %v4301_v5 = vld [vmem:[#allocation3 + $0xc] sm:$0xf]  ;;  %v4324_v47 = vshrl.u32 %v4299_v14, 16  ;;  %v4329_v35 = vshrl.u32 %v4300_v12, 16  ;;  %v4332_v60 = vshll.u32 %v4300_v12, 16  ;;  %v9106_v33 = vld [vmem:[#allocation10 + $0x60] sm:$0xff] }
 0x361   : > { %6862 = vmatpush.bf16.msra.mxu1 %v9100_v61  ;;  %v4338_v55 = vshrl.u32 %v4301_v5, 16  ;;  %v4531_v41 = vld [vmem:[#allocation3 + $0x8] sm:$0xf]  ;;  %v4341_v50 = vshll.u32 %v4301_v5, 16  ;;  %v4532_v30 = vld [vmem:[#allocation3 + $0xc] sm:$0xf] }
 0x362   : > { %6911 = vmatpush.bf16.msra.mxu2 %v9108_v43  ;;  %4547 = vst [vmem:[#allocation4 + $0x4] sm:$0xf] %v4531_v41  ;;  %v9114_v27 = vld [vmem:[#allocation10 + $0xa0] sm:$0xff]  ;;  %v8234_v24 = vrot.slane %v4324_v47, 11  ;;  %v4331_v8 = vrot.slane %v4329_v35, 7  ;;  %v9097_v16 = vld [vmem:[#allocation10 + $0x18] sm:$0xff] }
 0x363   : > { %6960 = vmatpush.bf16.msrb.mxu3 %v9116_v13  ;;  %v4340_v45 = vrot.slane %v4338_v55, 7  ;;  %4548 = vst [vmem:[#allocation4 + $0x28] sm:$0xf] %v4532_v30  ;;  %v9105_v19 = vld [vmem:[#allocation10 + $0x58] sm:$0xff]  ;;  %v4563_v21 = vld [vmem:[#allocation3 + $0x8] sm:$0xf] }
 0x364   : > { %v4564_v46 = vld [vmem:[#allocation3 + $0xc] sm:$0xf]  ;;  %v4565_v36 = vld [vmem:[#allocation3 + $0x10] sm:$0x1]  ;;  %v4334_v2 = vor.u32 %v4332_v60, %v4331_v8  ;;  %v4336_v3 = vrot.slane %v4331_v8, 4  ;;  %v4588_v23 = vshrl.u32 %v4563_v21, 16 }
 0x365   : > { %6863 = vmatpush.bf16.msra.mxu1 %v9099_v57  ;;  %v9113_v20 = vld [vmem:[#allocation10 + $0x98] sm:$0xff]  ;;  %v4343_v28 = vor.u32 %v4341_v50, %v4340_v45  ;;  %v4302_v56 = vld [vmem:[#allocation3 + $0x18] sm:$0x8]  ;;  %v4303_v4 = vld [vmem:[#allocation3 + $0x1c] sm:$0xf]  ;;  %v4591_v42 = vshll.u32 %v4563_v21, 16 }
 0x366   : > { %6912 = vmatpush.bf16.msra.mxu2 %v9107_v62  ;;  %v4597_v18 = vshll.u32 %v4564_v46, 16  ;;  %v4601_v54 = vshrl.u32 %v4564_v46, 16  ;;  %v4607_v1 = vshll.u32 %v4565_v36, 16  ;;  %v4304_v52 = vld [vmem:[#allocation3 + $0x20] sm:$0xf]  ;;  %v4335_v59 = vsel %vm9946_vm5, %v8234_v24, %v4334_v2  ;;  %v9096_v22 = vld [vmem:[#allocation10 + $0x10] sm:$0xff] }
 0x367   : > { %6961 = vmatpush.bf16.msrb.mxu3 %v9115_v49  ;;  %v4344_v63 = vsel %vm9946_vm5, %v4336_v3, %v4343_v28  ;;  %v4590_v9 = vrot.slane %v4588_v23, 4  ;;  %v4346_v44 = vshrl.u32 %v4302_v56, 16  ;;  %v4533_v25 = vld [vmem:[#allocation3 + $0x1c] sm:$0xf]  ;;  %v4534_v34 = vld [vmem:[#allocation3 + $0x20] sm:$0xf] }
 0x368   : > { %4515 = vst [vmem:[#allocation4] sm:$0xf] %v4335_v59  ;;  %v4593_v26 = vrot.slane %v4591_v42, 5  ;;  %v4599_v10 = vrot.slane %v4597_v18, 5  ;;  %v4603_v58 = vrot.slane %v4601_v54, 4  ;;  %v4609_v0 = vrot.slane %v4607_v1, 5 }
 0x369   : > { %6864 = vmatpush.bf16.msra.mxu1 %v9098_v17  ;;  %4516 = vst [vmem:[#allocation4 + $0x24] sm:$0xf] %v4344_v63  ;;  %v4351_v48 = vshrl.u32 %v4303_v4, 16  ;;  %v9104_v39 = vld [vmem:[#allocation10 + $0x50] sm:$0xff]  ;;  %v4354_v11 = vshll.u32 %v4303_v4, 16  ;;  %v4360_v40 = vshrl.u32 %v4304_v52, 16 }
 0x36a   : > { %6913 = vmatpush.bf16.msra.mxu2 %v9106_v33  ;;  %v4594_v53 = vor.u32 %v4593_v26, %v4590_v9  ;;  %v4604_v15 = vor.u32 %v4603_v58, %v4599_v10  ;;  %4549 = vst [vmem:[#allocation4 + $0x4c] sm:$0xf] %v4533_v25  ;;  %v9112_v37 = vld [vmem:[#allocation10 + $0x90] sm:$0xff]  ;;  %v8235_v29 = vrot.slane %v4346_v44, 11  ;;  %v4363_v7 = vshll.u32 %v4304_v52, 16  ;;  %v9095_v13 = vld [vmem:[#allocation10 + $0x8] sm:$0xff] }
 0x36b   : > { %6962 = vmatpush.bf16.msrb.mxu3 %v9114_v27  ;;  %v4353_v51 = vrot.slane %v4351_v48, 7  ;;  %4550 = vst [vmem:[#allocation4 + $0x70] sm:$0xf] %v4534_v34  ;;  %v4362_v61 = vrot.slane %v4360_v40, 7  ;;  %v4566_v43 = vld [vmem:[#allocation3 + $0x1c] sm:$0xf] }
 0x36c   : > { %v4595_v6 = vrot.slane %v4594_v53, 4  ;;  %v4605_v32 = vrot.slane %v4604_v15, 4  ;;  %v4567_v49 = vld [vmem:[#allocation3 + $0x20] sm:$0xf]  ;;  %v4612_v17 = vshrl.u32 %v4566_v43, 16  ;;  %v4615_v55 = vshll.u32 %v4566_v43, 16 }
 0x36d   : > { %6865 = vmatpush.bf16.msra.mxu1 %v9097_v16  ;;  %v4356_v57 = vor.u32 %v4354_v11, %v4353_v51  ;;  %v4358_v62 = vrot.slane %v4353_v51, 4  ;;  %v9103_v14 = vld [vmem:[#allocation10 + $0x48] sm:$0xff]  ;;  %v4365_v35 = vor.u32 %v4363_v7, %v4362_v61  ;;  %v4621_v50 = vshll.u32 %v4567_v49, 16  ;;  %v4305_v30 = vld [vmem:[#allocation3 + $0x2c] sm:$0x8]  ;;  %v9094_v27 = vld [vmem:[#allocation10] sm:$0xff] }
 0x36e   : > { %6914 = vmatpush.bf16.msra.mxu2 %v9105_v19  ;;  %v9111_v12 = vld [vmem:[#allocation10 + $0x88] sm:$0xff]  ;;  %v4600_v5 = vsel %vm10004_vm8, %v4595_v6, %v4599_v10  ;;  %v4610_v47 = vsel %vm10004_vm8, %v4605_v32, %v4609_v0  ;;  %v4614_v33 = vrot.slane %v4612_v17, 4  ;;  %v9102_v24 = vld [vmem:[#allocation10 + $0x40] sm:$0xff]  ;;  %v9022_v8 = vld [vmem:[#allocation4 + $0x4] sm:$0xf]  ;;  %v4617_v19 = vrot.slane %v4615_v55, 5 }
 0x36f   : > { %6963 = vmatpush.bf16.msrb.mxu3 %v9113_v20  ;;  %v4568_v60 = vld [vmem:[#allocation3 + $0x24] sm:$0x1]  ;;  %4795 = vst [vmem:[#allocation4 + $0x8] sm:$0xf] %v4600_v5  ;;  %v4357_v41 = vsel %vm9946_vm5, %v8235_v29, %v4356_v57  ;;  %v8262_v45 = vld [vmem:[#allocation4 + $0x24] sm:$0xf0]  ;;  %v4366_v16 = vsel %vm9946_vm5, %v4358_v62, %v4365_v35 }
 0x370   : > { %4796 = vst [vmem:[#allocation4 + $0x2c] sm:$0xf] %v4610_v47  ;;  %v4625_v21 = vshrl.u32 %v4567_v49, 16  ;;  %v4306_v46 = vld [vmem:[#allocation3 + $0x30] sm:$0xf]  ;;  %v9110_v36 = vld [vmem:[#allocation10 + $0x80] sm:$0xff]  ;;  %v4618_v23 = vor.u32 %v4617_v19, %v4614_v33  ;;  %v8265_v10 = vor.u32 %v9022_v8, %v8262_v45 }
 0x371   : > { %6866 = vmatpush.bf16.msra.mxu1 %v9096_v22  ;;  %v8260_v20 = vld [vmem:[#allocation4] sm:$0xf]  ;;  %4517 = vst [vmem:[#allocation4 + $0x48] sm:$0xf] %v4357_v41  ;;  %v4623_v2 = vrot.slane %v4621_v50, 5  ;;  %v4631_v3 = vshll.u32 %v4568_v60, 16 }
 0x372   : > { %6915 = vmatpush.bf16.msra.mxu2 %v9104_v39  ;;  %v9026_v28 = vld [vmem:[#allocation4 + $0x20] sm:$0xf0]  ;;  %4518 = vst [vmem:[#allocation4 + $0x6c] sm:$0xf] %v4366_v16  ;;  %v4627_v56 = vrot.slane %v4625_v21, 4  ;;  %v4368_v4 = vshrl.u32 %v4305_v30, 16 }
 0x373   : > { %6964 = vmatpush.bf16.msrb.mxu3 %v9112_v37  ;;  %v9133_v42 = vld [vmem:[#allocation10 + $0x138] sm:$0xff]  ;;  %v4633_v18 = vrot.slane %v4631_v3, 5  ;;  %v4373_v1 = vshrl.u32 %v4306_v46, 16  ;;  %v4376_v52 = vshll.u32 %v4306_v46, 16  ;;  %v4619_v63 = vrot.slane %v4618_v23, 4  ;;  %v9132_v40 = vld [vmem:[#allocation10 + $0x130] sm:$0xff] }
 0x374   : > { %v4307_v54 = vld [vmem:[#allocation3 + $0x34] sm:$0xf]  ;;  %v4628_v9 = vor.u32 %v4627_v56, %v4623_v2  ;;  %v8236_v44 = vrot.slane %v4368_v4, 11  ;;  %v4535_v34 = vld [vmem:[#allocation3 + $0x30] sm:$0xf]  ;;  %v8261_v26 = vor.u32 %v9026_v28, %v8260_v20  ;;  %v9124_v6 = vld [vmem:[#allocation10 + $0xf0] sm:$0xff] }
 0x375   : > { %6867 = vmatpush.bf16.msra.mxu1 %v9095_v13  ;;  %v9125_v59 = vld [vmem:[#allocation10 + $0xf8] sm:$0xff]  ;;  %v4382_v25 = vshrl.u32 %v4307_v54, 16  ;;  %v4375_v58 = vrot.slane %v4373_v1, 7  ;;  %v4385_v0 = vshll.u32 %v4307_v54, 16  ;;  %4551 = vst [vmem:[#allocation4 + $0x94] sm:$0xf] %v4535_v34  ;;  %v4624_v39 = vsel %vm10004_vm8, %v4619_v63, %v4623_v2 }
 0x376   : > { %6916 = vmatpush.bf16.msra.mxu2 %v9103_v14  ;;  %v4536_v48 = vld [vmem:[#allocation3 + $0x34] sm:$0xf]  ;;  %v8268_v22 = vld [vmem:[#allocation4 + $0x8] sm:$0xf]  ;;  %v4629_v53 = vrot.slane %v4628_v9, 4  ;;  %v9123_v41 = vld [vmem:[#allocation10 + $0xe8] sm:$0xff] }
 0x377   : > { %6965 = vmatpush.bf16.msrb.mxu3 %v9111_v12  ;;  %v4384_v15 = vrot.slane %v4382_v25, 7  ;;  %4552 = vst [vmem:[#allocation4 + $0xb8] sm:$0xf] %v4536_v48  ;;  %v9027_v11 = vld [vmem:[#allocation4 + $0x28] sm:$0xf0]  ;;  %v4378_v37 = vor.u32 %v4376_v52, %v4375_v58  ;;  %v4380_v29 = vrot.slane %v4375_v58, 4 }
 0x378   : > { %4797 = vst [vmem:[#allocation4 + $0x50] sm:$0xf] %v4624_v39  ;;  %v8269_v51 = vor.u32 %v9027_v11, %v8268_v22  ;;  %v4634_v7 = vsel %vm10004_vm8, %v4629_v53, %v4633_v18  ;;  %v4569_v61 = vld [vmem:[#allocation3 + $0x30] sm:$0xf]  ;;  %v4570_v43 = vld [vmem:[#allocation3 + $0x34] sm:$0xf] }
 0x379   : > { %6868 = vmatpush.bf16.msra.mxu1 %v9094_v27  ;;  %v4387_v32 = vor.u32 %v4385_v0, %v4384_v15  ;;  %4798 = vst [vmem:[#allocation4 + $0x74] sm:$0xf] %v4634_v7  ;;  %v4379_v13 = vsel %vm9946_vm5, %v8236_v44, %v4378_v37  ;;  %v4636_v57 = vshrl.u32 %v4569_v61, 16  ;;  %v4571_v49 = vld [vmem:[#allocation3 + $0x38] sm:$0x1]  ;;  %v4639_v17 = vshll.u32 %v4569_v61, 16 }
 0x37a   : > { %6917 = vmatpush.bf16.msra.mxu2 %v9102_v24  ;;  %4519 = vst [vmem:[#allocation4 + $0x90] sm:$0xf] %v4379_v13  ;;  %v4645_v14 = vshll.u32 %v4570_v43, 16  ;;  %v9131_v12 = vld [vmem:[#allocation10 + $0x128] sm:$0xff]  ;;  %v4649_v47 = vshrl.u32 %v4570_v43, 16  ;;  %v4655_v35 = vshll.u32 %v4571_v49, 16 }
 0x37b   : > { %6966 = vmatpush.bf16.msrb.mxu3 %v9110_v36  ;;  %v4388_v62 = vsel %vm9946_vm5, %v4380_v29, %v4387_v32  ;;  %v4638_v5 = vrot.slane %v4636_v57, 4  ;;  %v4641_v60 = vrot.slane %v4639_v17, 5  ;;  %v4308_v33 = vld [vmem:[#allocation3 + $0x40] sm:$0x8]  ;;  %v4309_v30 = vld [vmem:[#allocation3 + $0x44] sm:$0xf] }
 0x37c   : > { %6869 = vmatmul.bf16.vlgmr.msra.gmra.mxu1 %v8261_v26  ;;  %4520 = vst [vmem:[#allocation4 + $0xb4] sm:$0xf] %v4388_v62  ;;  %v4647_v55 = vrot.slane %v4645_v14, 5  ;;  %v4651_v50 = vrot.slane %v4649_v47, 4  ;;  %v9031_v27 = vld [vmem:[#allocation4 + $0x4c] sm:$0xf] }
 0x37d   : > { %7008 = vmatpush.bf16.msrb.mxu1 %v9125_v59  ;;  %6918 = vmatmul.bf16.vlgmr.msra.gmra.mxu2 %v8265_v10  ;;  %v8298_v24 = vld [vmem:[#allocation4 + $0x6c] sm:$0xf0]  ;;  %v4642_v8 = vor.u32 %v4641_v60, %v4638_v5  ;;  %v4657_v45 = vrot.slane %v4655_v35, 5  ;;  %v4310_v16 = vld [vmem:[#allocation3 + $0x48] sm:$0xf]  ;;  %v4390_v19 = vshrl.u32 %v4308_v33, 16 }
 0x37e   : > { %7057 = vmatpush.bf16.msrb.mxu2 %v9133_v42  ;;  %6967 = vmatmul.bf16.vlgmr.msrb.gmra.mxu3 %v8269_v51  ;;  %v4395_v21 = vshrl.u32 %v4309_v30, 16  ;;  %v8296_v46 = vld [vmem:[#allocation4 + $0x48] sm:$0xf]  ;;  %v4652_v36 = vor.u32 %v4651_v50, %v4647_v55  ;;  %v4398_v20 = vshll.u32 %v4309_v30, 16  ;;  %v4404_v2 = vshrl.u32 %v4310_v16, 16  ;;  %v9130_v62 = vld [vmem:[#allocation10 + $0x120] sm:$0xff] }
 0x37f   : > { %v4407_v3 = vshll.u32 %v4310_v16, 16  ;;  %v4537_v28 = vld [vmem:[#allocation3 + $0x44] sm:$0xf]  ;;  %v9035_v23 = vld [vmem:[#allocation4 + $0x68] sm:$0xf0]  ;;  %v4643_v56 = vrot.slane %v4642_v8, 4  ;;  %v8301_v25 = vor.u32 %v9031_v27, %v8298_v24 }
 0x380   : > { %v8237_v4 = vrot.slane %v4390_v19, 11  ;;  %v4397_v42 = vrot.slane %v4395_v21, 7  ;;  %v8304_v18 = vld [vmem:[#allocation4 + $0x50] sm:$0xf]  ;;  %v9036_v54 = vld [vmem:[#allocation4 + $0x70] sm:$0xf0]  ;;  %v8297_v0 = vor.u32 %v9035_v23, %v8296_v46 }
 0x381   : > { %7009 = vmatpush.bf16.msrb.mxu1 %v9124_v6  ;;  %v4653_v1 = vrot.slane %v4652_v36, 4  ;;  %v4406_v52 = vrot.slane %v4404_v2, 7  ;;  %v4648_v59 = vsel %vm10004_vm8, %v4643_v56, %v4647_v55  ;;  %v4538_v44 = vld [vmem:[#allocation3 + $0x48] sm:$0xf]  ;;  %4553 = vst [vmem:[#allocation4 + $0xdc] sm:$0xf] %v4537_v28  ;;  %v8305_v29 = vor.u32 %v9036_v54, %v8304_v18 }
 0x382   : > { %7058 = vmatpush.bf16.msrb.mxu2 %v9132_v40  ;;  %v4400_v63 = vor.u32 %v4398_v20, %v4397_v42  ;;  %v4402_v9 = vrot.slane %v4397_v42, 4  ;;  %4799 = vst [vmem:[#allocation4 + $0x98] sm:$0xf] %v4648_v59  ;;  %v4572_v10 = vld [vmem:[#allocation3 + $0x44] sm:$0xf]  ;;  %v9122_v47 = vld [vmem:[#allocation10 + $0xe0] sm:$0xff] }
 0x383   : > { %v4658_v34 = vsel %vm10004_vm8, %v4653_v1, %v4657_v45  ;;  %v4409_v26 = vor.u32 %v4407_v3, %v4406_v52  ;;  %v4573_v58 = vld [vmem:[#allocation3 + $0x48] sm:$0xf]  ;;  %v4574_v22 = vld [vmem:[#allocation3 + $0x4c] sm:$0x1]  ;;  %v4660_v39 = vshrl.u32 %v4572_v10, 16  ;;  %v4663_v53 = vshll.u32 %v4572_v10, 16 }
 0x384   : > { %4800 = vst [vmem:[#allocation4 + $0xbc] sm:$0xf] %v4658_v34  ;;  %v4401_v48 = vsel %vm9946_vm5, %v8237_v4, %v4400_v63  ;;  %v4669_v11 = vshll.u32 %v4573_v58, 16  ;;  %v4673_v40 = vshrl.u32 %v4573_v58, 16  ;;  %v4679_v37 = vshll.u32 %v4574_v22, 16  ;;  %s8855_s2 = sshll.u32 %s11052_s12, 5 }
 0x385   : > { %7010 = vmatpush.bf16.msrb.mxu1 %v9123_v41  ;;  %v4410_v15 = vsel %vm9946_vm5, %v4402_v9, %v4409_v26  ;;  %4521 = vst [vmem:[#allocation4 + $0xd8] sm:$0xf] %v4401_v48  ;;  %v4662_v51 = vrot.slane %v4660_v39, 4  ;;  %v4665_v7 = vrot.slane %v4663_v53, 5  ;;  %v4312_v13 = vld [vmem:[#allocation3 + $0x58] sm:$0xf]  ;;  %s7422_s6 = sadd.s32 %s9167_s24, %s8855_s2 }
 0x386   : > { %7059 = vmatpush.bf16.msrb.mxu2 %v9131_v12  ;;  %4522 = vst [vmem:[#allocation4 + $0xfc] sm:$0xf] %v4410_v15  ;;  %v4671_v6 = vrot.slane %v4669_v11, 5  ;;  %v4675_v32 = vrot.slane %v4673_v40, 4  ;;  %v4681_v43 = vrot.slane %v4679_v37, 5  ;;  %v4417_v14 = vshrl.u32 %v4312_v13, 16 }
 0x387   : > { %4554 = vst [vmem:[#allocation4 + $0x100] sm:$0xf] %v4538_v44  ;;  %v4666_v61 = vor.u32 %v4665_v7, %v4662_v51  ;;  %v4313_v57 = vld [vmem:[#allocation3 + $0x5c] sm:$0xf]  ;;  %v4311_v17 = vld [vmem:[#allocation3 + $0x54] sm:$0x8] }
 0x388   : > { %v4676_v49 = vor.u32 %v4675_v32, %v4671_v6  ;;  %v4575_v12 = vld [vmem:[#allocation3 + $0x58] sm:$0xf]  ;;  %v4412_v35 = vshrl.u32 %v4311_v17, 16  ;;  %v4420_v60 = vshll.u32 %v4312_v13, 16  ;;  %v4419_v41 = vrot.slane %v4417_v14, 7  ;;  %s8856_s7 = sshll.u32 %s7422_s6, 3 }
 0x389   : > { %v4667_v5 = vrot.slane %v4666_v61, 4  ;;  %v4426_v33 = vshrl.u32 %v4313_v57, 16  ;;  %v4429_v50 = vshll.u32 %v4313_v57, 16  ;;  %7011 = vmatpush.bf16.msrb.mxu1 %v9122_v47  ;;  %v4684_v24 = vshrl.u32 %v4575_v12, 16  ;;  %v4576_v21 = vld [vmem:[#allocation3 + $0x5c] sm:$0xf]  ;;  %s7424_s18 = scalar_lea.hbm %s11053_s16, %s8856_s7 }
 0x38a   : > { %7060 = vmatpush.bf16.msrb.mxu2 %v9130_v62  ;;  %v4677_v55 = vrot.slane %v4676_v49, 4  ;;  %v8238_v27 = vrot.slane %v4412_v35, 11  ;;  %v4422_v45 = vor.u32 %v4420_v60, %v4419_v41  ;;  %v4424_v16 = vrot.slane %v4419_v41, 4  ;;  %v4539_v46 = vld [vmem:[#allocation3 + $0x58] sm:$0xf]  ;;  %v9121_v61 = vld [vmem:[#allocation10 + $0xd8] sm:$0xff] }
 0x38b   : > { %v4672_v30 = vsel %vm10004_vm8, %v4667_v5, %v4671_v6  ;;  %v4428_v19 = vrot.slane %v4426_v33, 7  ;;  %v4540_v2 = vld [vmem:[#allocation3 + $0x5c] sm:$0xf]  ;;  %4555 = vst [vmem:[#allocation4 + $0x124] sm:$0xf] %v4539_v46  ;;  %v4686_v42 = vrot.slane %v4684_v24, 4 }
 0x38c   : > { %6874 = vmatmul.bf16.gmra.mxu1 %v8297_v0  ;;  %v4682_v8 = vsel %vm10004_vm8, %v4677_v55, %v4681_v43  ;;  %4801 = vst [vmem:[#allocation4 + $0xe0] sm:$0xf] %v4672_v30  ;;  %v4423_v36 = vsel %vm9946_vm5, %v8238_v27, %v4422_v45  ;;  %v4577_v3 = vld [vmem:[#allocation3 + $0x60] sm:$0x1]  ;;  %v8332_v28 = vld [vmem:[#allocation4 + $0x90] sm:$0xf] }
 0x38d   : > { %6923 = vmatmul.bf16.gmra.mxu2 %v8301_v25  ;;  %4802 = vst [vmem:[#allocation4 + $0x104] sm:$0xf] %v4682_v8  ;;  %v4431_v20 = vor.u32 %v4429_v50, %v4428_v19  ;;  %v9044_v23 = vld [vmem:[#allocation4 + $0xb0] sm:$0xf0]  ;;  %v8334_v4 = vld [vmem:[#allocation4 + $0xb4] sm:$0xf0]  ;;  %7012 = vmatpush.bf16.msrb.mxu1 %v9121_v61 }
 0x38e   : > { %6972 = vmatmul.bf16.gmra.mxu3 %v8305_v29  ;;  %v9040_v56 = vld [vmem:[#allocation4 + $0x94] sm:$0xf]  ;;  %4523 = vst [vmem:[#allocation4 + $0x120] sm:$0xf] %v4423_v36  ;;  %v4687_v18 = vshll.u32 %v4575_v12, 16  ;;  %v4693_v54 = vshll.u32 %v4576_v21, 16  ;;  %v8333_v0 = vor.u32 %v9044_v23, %v8332_v28 }
 0x38f   : > { %v4697_v1 = vshrl.u32 %v4576_v21, 16  ;;  %v4432_v52 = vsel %vm9946_vm5, %v4424_v16, %v4431_v20  ;;  %4556 = vst [vmem:[#allocation4 + $0x148] sm:$0xf] %v4540_v2  ;;  %v4703_v59 = vshll.u32 %v4577_v3, 16  ;;  %v8340_v25 = vld [vmem:[#allocation4 + $0x98] sm:$0xf]  ;;  %v8337_v48 = vor.u32 %v9040_v56, %v8334_v4 }
 0x390   : > { %4524 = vst [vmem:[#allocation4 + $0x144] sm:$0xf] %v4432_v52  ;;  %v4689_v63 = vrot.slane %v4687_v18, 5  ;;  %v4695_v9 = vrot.slane %v4693_v54, 5  ;;  %v9045_v34 = vld [vmem:[#allocation4 + $0xb8] sm:$0xf0] }
 0x391   : > { %v4699_v44 = vrot.slane %v4697_v1, 4  ;;  %v4705_v58 = vrot.slane %v4703_v59, 5  ;;  %v8341_v22 = vor.u32 %v9045_v34, %v8340_v25  ;;  %v4315_v15 = vld [vmem:[#allocation3 + $0x6c] sm:$0xf]  ;;  %v4316_v11 = vld [vmem:[#allocation3 + $0x70] sm:$0xf] }
 0x392   : > { %v4690_v26 = vor.u32 %v4689_v63, %v4686_v42  ;;  %v4439_v29 = vshrl.u32 %v4315_v15, 16  ;;  %v4448_v51 = vshrl.u32 %v4316_v11, 16  ;;  %v4578_v7 = vld [vmem:[#allocation3 + $0x6c] sm:$0xf]  ;;  %v9129_v6 = vld [vmem:[#allocation10 + $0x118] sm:$0xff]  ;;  %v4442_v62 = vshll.u32 %v4315_v15, 16 }
 0x393   : > { %v4700_v10 = vor.u32 %v4699_v44, %v4695_v9  ;;  %v4708_v32 = vshrl.u32 %v4578_v7, 16  ;;  %v4314_v43 = vld [vmem:[#allocation3 + $0x68] sm:$0x8]  ;;  %7061 = vmatpush.bf16.msrb.mxu2 %v9129_v6  ;;  %v4451_v17 = vshll.u32 %v4316_v11, 16  ;;  %v4579_v14 = vld [vmem:[#allocation3 + $0x70] sm:$0xf] }
 0x394   : > { %v4691_v39 = vrot.slane %v4690_v26, 4  ;;  %v4441_v13 = vrot.slane %v4439_v29, 7  ;;  %v4434_v57 = vshrl.u32 %v4314_v43, 16  ;;  %v4450_v49 = vrot.slane %v4448_v51, 7  ;;  %v4580_v5 = vld [vmem:[#allocation3 + $0x74] sm:$0x1] }
 0x395   : > { %v4701_v53 = vrot.slane %v4700_v10, 4  ;;  %v4710_v47 = vrot.slane %v4708_v32, 4  ;;  %v4711_v35 = vshll.u32 %v4578_v7, 16  ;;  %v4717_v60 = vshll.u32 %v4579_v14, 16  ;;  %v4541_v30 = vld [vmem:[#allocation3 + $0x6c] sm:$0xf] }
 0x396   : > { %v4696_v40 = vsel %vm10004_vm8, %v4691_v39, %v4695_v9  ;;  %v4446_v12 = vrot.slane %v4441_v13, 4  ;;  %v8239_v55 = vrot.slane %v4434_v57, 11  ;;  %v4444_v41 = vor.u32 %v4442_v62, %v4441_v13  ;;  %v4542_v16 = vld [vmem:[#allocation3 + $0x70] sm:$0xf]  ;;  %4557 = vst [vmem:[#allocation4 + $0x16c] sm:$0xf] %v4541_v30 }
 0x397   : > { %v4706_v37 = vsel %vm10004_vm8, %v4701_v53, %v4705_v58  ;;  %4803 = vst [vmem:[#allocation4 + $0x128] sm:$0xf] %v4696_v40  ;;  %v4453_v33 = vor.u32 %v4451_v17, %v4450_v49  ;;  %v4721_v50 = vshrl.u32 %v4579_v14, 16  ;;  %v4713_v27 = vrot.slane %v4711_v35, 5  ;;  %v8368_v46 = vld [vmem:[#allocation4 + $0xd8] sm:$0xf] }
 0x398   : > { %4804 = vst [vmem:[#allocation4 + $0x14c] sm:$0xf] %v4706_v37  ;;  %v4719_v24 = vrot.slane %v4717_v60, 5  ;;  %v4445_v8 = vsel %vm9946_vm5, %v8239_v55, %v4444_v41  ;;  %v4727_v21 = vshll.u32 %v4580_v5, 16  ;;  %v9049_v36 = vld [vmem:[#allocation4 + $0xdc] sm:$0xf] }
 0x399   : > { %v4454_v45 = vsel %vm9946_vm5, %v4446_v12, %v4453_v33  ;;  %v4723_v19 = vrot.slane %v4721_v50, 4  ;;  %4525 = vst [vmem:[#allocation4 + $0x168] sm:$0xf] %v4445_v8  ;;  %v4714_v20 = vor.u32 %v4713_v27, %v4710_v47  ;;  %v9053_v2 = vld [vmem:[#allocation4 + $0xf8] sm:$0xf0]  ;;  %v9128_v10 = vld [vmem:[#allocation10 + $0x110] sm:$0xff] }
 0x39a   : > { %4526 = vst [vmem:[#allocation4 + $0x18c] sm:$0xf] %v4454_v45  ;;  %v4729_v28 = vrot.slane %v4727_v21, 5  ;;  %v8370_v23 = vld [vmem:[#allocation4 + $0xfc] sm:$0xf0]  ;;  %v8369_v1 = vor.u32 %v9053_v2, %v8368_v46  ;;  %7062 = vmatpush.bf16.msrb.mxu2 %v9128_v10  ;;  %s7427_s23 = sshll.u32 %s7424_s18, 4  ;;  %s7428_s23 = int_to_ptr.hbm [resolvable:$true] %s7427_s23 }
 0x39b   : > { %v4724_v3 = vor.u32 %v4723_v19, %v4719_v24  ;;  %4558 = vst [vmem:[#allocation4 + $0x190] sm:$0xf] %v4542_v16  ;;  %v4715_v56 = vrot.slane %v4714_v20, 4  ;;  %v8376_v4 = vld [vmem:[#allocation4 + $0xe0] sm:$0xf]  ;;  %v8373_v52 = vor.u32 %v9049_v36, %v8370_v23 }
 0x39c   : > { %6879 = vmatmul.bf16.gmra.mxu1 %v8333_v0  ;;  %v9054_v42 = vld [vmem:[#allocation4 + $0x100] sm:$0xf0]  ;;  %v4318_v9 = vld [vmem:[#allocation3 + $0x80] sm:$0xf]  ;;  %v4319_v44 = vld [vmem:[#allocation3 + $0x84] sm:$0xf] }
 0x39d   : > { %6928 = vmatmul.bf16.gmra.mxu2 %v8337_v48  ;;  %v4725_v18 = vrot.slane %v4724_v3, 4  ;;  %v4720_v54 = vsel %vm10004_vm8, %v4715_v56, %v4719_v24  ;;  %v8377_v63 = vor.u32 %v9054_v42, %v8376_v4  ;;  %v4461_v25 = vshrl.u32 %v4318_v9, 16  ;;  %v4581_v26 = vld [vmem:[#allocation3 + $0x80] sm:$0xf]  ;;  %v4317_v58 = vld [vmem:[#allocation3 + $0x7c] sm:$0x8] }
 0x39e   : > { %6977 = vmatmul.bf16.gmra.mxu3 %v8341_v22  ;;  %4805 = vst [vmem:[#allocation4 + $0x170] sm:$0xf] %v4720_v54  ;;  %v4470_v34 = vshrl.u32 %v4319_v44, 16  ;;  %v4732_v0 = vshrl.u32 %v4581_v26, 16  ;;  %v9120_v48 = vld [vmem:[#allocation10 + $0xd0] sm:$0xff]  ;;  %v4456_v22 = vshrl.u32 %v4317_v58, 16 }
 0x39f   : > { %v4730_v59 = vsel %vm10004_vm8, %v4725_v18, %v4729_v28  ;;  %v4463_v39 = vrot.slane %v4461_v25, 7  ;;  %v4464_v53 = vshll.u32 %v4318_v9, 16  ;;  %v4582_v15 = vld [vmem:[#allocation3 + $0x84] sm:$0xf]  ;;  %v4473_v40 = vshll.u32 %v4319_v44, 16  ;;  %7013 = vmatpush.bf16.msrb.mxu1 %v9120_v48  ;;  %v9141_v18 = vld [vmem:[#allocation10 + $0x178] sm:$0xff] }
 0x3a0   : > { %4806 = vst [vmem:[#allocation4 + $0x194] sm:$0xf] %v4730_v59  ;;  %v4472_v11 = vrot.slane %v4470_v34, 7  ;;  %v4583_v37 = vld [vmem:[#allocation3 + $0x88] sm:$0x1]  ;;  %v4734_v29 = vrot.slane %v4732_v0, 4  ;;  %7106 = vmatpush.bf16.msra.mxu3 %v9141_v18 }
 0x3a1   : > { %v4735_v51 = vshll.u32 %v4581_v26, 16  ;;  %v8240_v7 = vrot.slane %v4456_v22, 11  ;;  %v4466_v6 = vor.u32 %v4464_v53, %v4463_v39  ;;  %v4468_v32 = vrot.slane %v4463_v39, 4  ;;  %v4543_v17 = vld [vmem:[#allocation3 + $0x80] sm:$0xf]  ;;  %v9140_v25 = vld [vmem:[#allocation10 + $0x170] sm:$0xff] }
 0x3a2   : > { %v4741_v61 = vshll.u32 %v4582_v15, 16  ;;  %v4475_v43 = vor.u32 %v4473_v40, %v4472_v11  ;;  %v4745_v57 = vshrl.u32 %v4582_v15, 16  ;;  %v4751_v62 = vshll.u32 %v4583_v37, 16  ;;  %v4544_v5 = vld [vmem:[#allocation3 + $0x84] sm:$0xf]  ;;  %v9148_v0 = vld [vmem:[#allocation10 + $0x1b0] sm:$0xff] }
 0x3a3   : > { %v4737_v13 = vrot.slane %v4735_v51, 5  ;;  %v4467_v49 = vsel %vm9946_vm5, %v8240_v7, %v4466_v6  ;;  %v9058_v60 = vld [vmem:[#allocation4 + $0x124] sm:$0xf]  ;;  %v8404_v55 = vld [vmem:[#allocation4 + $0x120] sm:$0xf]  ;;  %v9127_v56 = vld [vmem:[#allocation10 + $0x108] sm:$0xff] }
 0x3a4   : > { %v4743_v14 = vrot.slane %v4741_v61, 5  ;;  %v4476_v12 = vsel %vm9946_vm5, %v4468_v32, %v4475_v43  ;;  %4527 = vst [vmem:[#allocation4 + $0x1b0] sm:$0xf] %v4467_v49  ;;  %v4747_v35 = vrot.slane %v4745_v57, 4  ;;  %v4753_v50 = vrot.slane %v4751_v62, 5  ;;  %v9119_v54 = vld [vmem:[#allocation10 + $0xc8] sm:$0xff]  ;;  %7063 = vmatpush.bf16.msrb.mxu2 %v9127_v56  ;;  %7107 = vmatpush.bf16.msra.mxu3 %v9140_v25 }
 0x3a5   : > { %v4738_v47 = vor.u32 %v4737_v13, %v4734_v29  ;;  %4528 = vst [vmem:[#allocation4 + $0x1d4] sm:$0xf] %v4476_v12  ;;  %v9062_v30 = vld [vmem:[#allocation4 + $0x140] sm:$0xf0]  ;;  %v8406_v27 = vld [vmem:[#allocation4 + $0x144] sm:$0xf0]  ;;  %7014 = vmatpush.bf16.msrb.mxu1 %v9119_v54 }
 0x3a6   : > { %4559 = vst [vmem:[#allocation4 + $0x1b4] sm:$0xf] %v4543_v17  ;;  %v4748_v33 = vor.u32 %v4747_v35, %v4743_v14  ;;  %v8412_v24 = vld [vmem:[#allocation4 + $0x128] sm:$0xf]  ;;  %v9063_v8 = vld [vmem:[#allocation4 + $0x148] sm:$0xf0]  ;;  %v8405_v19 = vor.u32 %v9062_v30, %v8404_v55  ;;  %v8409_v21 = vor.u32 %v9058_v60, %v8406_v27 }
 0x3a7   : > { %v4739_v41 = vrot.slane %v4738_v47, 4  ;;  %4560 = vst [vmem:[#allocation4 + $0x1d8] sm:$0xf] %v4544_v5  ;;  %v8413_v36 = vor.u32 %v9063_v8, %v8412_v24  ;;  %v4321_v20 = vld [vmem:[#allocation3 + $0x94] sm:$0xf]  ;;  %v9139_v61 = vld [vmem:[#allocation10 + $0x168] sm:$0xff] }
 0x3a8   : > { %v4749_v16 = vrot.slane %v4748_v33, 4  ;;  %v4322_v2 = vld [vmem:[#allocation3 + $0x98] sm:$0xf]  ;;  %v4483_v3 = vshrl.u32 %v4321_v20, 16  ;;  %v4584_v23 = vld [vmem:[#allocation3 + $0x94] sm:$0xf]  ;;  %7108 = vmatpush.bf16.msra.mxu3 %v9139_v61 }
 0x3a9   : > { %v4744_v45 = vsel %vm10004_vm8, %v4739_v41, %v4743_v14  ;;  %v4492_v28 = vshrl.u32 %v4322_v2, 16  ;;  %v4320_v4 = vld [vmem:[#allocation3 + $0x90] sm:$0x8]  ;;  %v4756_v42 = vshrl.u32 %v4584_v23, 16  ;;  %v4486_v59 = vshll.u32 %v4321_v20, 16  ;;  %v9138_v60 = vld [vmem:[#allocation10 + $0x160] sm:$0xff] }
 0x3aa   : > { %4807 = vst [vmem:[#allocation4 + $0x1b8] sm:$0xf] %v4744_v45  ;;  %v4754_v46 = vsel %vm10004_vm8, %v4749_v16, %v4753_v50  ;;  %v4495_v44 = vshll.u32 %v4322_v2, 16  ;;  %v4585_v58 = vld [vmem:[#allocation3 + $0x98] sm:$0xf]  ;;  %v4759_v53 = vshll.u32 %v4584_v23, 16 }
 0x3ab   : > { %4808 = vst [vmem:[#allocation4 + $0x1dc] sm:$0xf] %v4754_v46  ;;  %v4494_v9 = vrot.slane %v4492_v28, 7  ;;  %v4586_v22 = vld [vmem:[#allocation3 + $0x9c] sm:$0x1]  ;;  %v4758_v39 = vrot.slane %v4756_v42, 4 }
 0x3ac   : > { %6884 = vmatmul.bf16.gmra.mxu1 %v8369_v1  ;;  %v4478_v1 = vshrl.u32 %v4320_v4, 16  ;;  %v4545_v11 = vld [vmem:[#allocation3 + $0x94] sm:$0xf]  ;;  %v4765_v40 = vshll.u32 %v4585_v58, 16  ;;  %v4769_v37 = vshrl.u32 %v4585_v58, 16  ;;  %v4761_v7 = vrot.slane %v4759_v53, 5  ;;  %7109 = vmatpush.bf16.msra.mxu3 %v9138_v60 }
 0x3ad   : > { %6933 = vmatmul.bf16.gmra.mxu2 %v8373_v52  ;;  %v4485_v52 = vrot.slane %v4483_v3, 7  ;;  %v4497_v48 = vor.u32 %v4495_v44, %v4494_v9  ;;  %v4546_v51 = vld [vmem:[#allocation3 + $0x98] sm:$0xf]  ;;  %v4775_v6 = vshll.u32 %v4586_v22, 16  ;;  %v9067_v32 = vld [vmem:[#allocation4 + $0x16c] sm:$0xf] }
 0x3ae   : > { %6982 = vmatmul.bf16.gmra.mxu3 %v8377_v63  ;;  %v9149_v63 = vld [vmem:[#allocation10 + $0x1b8] sm:$0xff]  ;;  %v8241_v34 = vrot.slane %v4478_v1, 11  ;;  %v4767_v43 = vrot.slane %v4765_v40, 5  ;;  %v4771_v13 = vrot.slane %v4769_v37, 4  ;;  %4561 = vst [vmem:[#allocation4 + $0x1fc] sm:$0xf] %v4545_v11  ;;  %v4762_v49 = vor.u32 %v4761_v7, %v4758_v39 }
 0x3af   : > { %v4488_v26 = vor.u32 %v4486_v59, %v4485_v52  ;;  %v4490_v10 = vrot.slane %v4485_v52, 4  ;;  %7155 = vmatpush.bf16.msra.mxu0 %v9149_v63  ;;  %v8440_v57 = vld [vmem:[#allocation4 + $0x168] sm:$0xf]  ;;  %v9071_v62 = vld [vmem:[#allocation4 + $0x188] sm:$0xf0]  ;;  %v4777_v12 = vrot.slane %v4775_v6, 5 }
 0x3b0   : > { %v8442_v17 = vld [vmem:[#allocation4 + $0x18c] sm:$0xf0]  ;;  %4562 = vst [vmem:[#allocation4 + $0x220] sm:$0xf] %v4546_v51  ;;  %v4772_v14 = vor.u32 %v4771_v13, %v4767_v43  ;;  %v9072_v47 = vld [vmem:[#allocation4 + $0x190] sm:$0xf0]  ;;  %v8441_v41 = vor.u32 %v9071_v62, %v8440_v57 }
 0x3b1   : > { %v4489_v15 = vsel %vm9946_vm5, %v8241_v34, %v4488_v26  ;;  %v4498_v29 = vsel %vm9946_vm5, %v4490_v10, %v4497_v48  ;;  %v8448_v5 = vld [vmem:[#allocation4 + $0x170] sm:$0xf]  ;;  %v4763_v35 = vrot.slane %v4762_v49, 4  ;;  %v8445_v33 = vor.u32 %v9067_v32, %v8442_v17  ;;  %v4813_v24 = vld [vmem:[#allocation3 + $0x1c] sm:$0xf]  ;;  %v9137_v46 = vld [vmem:[#allocation10 + $0x158] sm:$0xff] }
 0x3b2   : > { %4529 = vst [vmem:[#allocation4 + $0x1f8] sm:$0xf] %v4489_v15  ;;  %v4773_v55 = vrot.slane %v4772_v14, 4  ;;  %v8449_v30 = vor.u32 %v9072_v47, %v8448_v5  ;;  %v4814_v8 = vld [vmem:[#allocation3 + $0x20] sm:$0xf]  ;;  %v4842_v45 = vshrl.u32 %v4813_v24, 16  ;;  %7110 = vmatpush.bf16.msra.mxu3 %v9137_v46 }
 0x3b3   : > { %4530 = vst [vmem:[#allocation4 + $0x21c] sm:$0xf] %v4498_v29  ;;  %7156 = vmatpush.bf16.msra.mxu0 %v9148_v0  ;;  %v4768_v50 = vsel %vm10004_vm8, %v4763_v35, %v4767_v43  ;;  %v9126_v16 = vld [vmem:[#allocation10 + $0x100] sm:$0xff]  ;;  %v4845_v28 = vshll.u32 %v4813_v24, 16  ;;  %v4854_v56 = vshll.u32 %v4814_v8, 16  ;;  %v9136_v4 = vld [vmem:[#allocation10 + $0x150] sm:$0xff] }
 0x3b4   : > { %v4778_v27 = vsel %vm10004_vm8, %v4773_v55, %v4777_v12  ;;  %4809 = vst [vmem:[#allocation4 + $0x200] sm:$0xf] %v4768_v50  ;;  %v9118_v20 = vld [vmem:[#allocation10 + $0xc0] sm:$0xff]  ;;  %v4844_v3 = vrot.slane %v4842_v45, 7  ;;  %7064 = vmatpush.bf16.msrb.mxu2 %v9126_v16  ;;  %v5077_v63 = vld [vmem:[#allocation3 + $0x20] sm:$0xf] }
 0x3b5   : > { %4810 = vst [vmem:[#allocation4 + $0x224] sm:$0xf] %v4778_v27  ;;  %v9146_v42 = vld [vmem:[#allocation10 + $0x1a0] sm:$0xff]  ;;  %7015 = vmatpush.bf16.msrb.mxu1 %v9118_v20  ;;  %v5078_v9 = vld [vmem:[#allocation3 + $0x24] sm:$0x1]  ;;  %v9145_v15 = vld [vmem:[#allocation10 + $0x198] sm:$0xff] }
 0x3b6   : > { %v4847_v54 = vor.u32 %v4845_v28, %v4844_v3  ;;  %v4849_v1 = vrot.slane %v4844_v3, 4  ;;  %v5076_v52 = vld [vmem:[#allocation3 + $0x1c] sm:$0xf]  ;;  %v8476_v44 = vld [vmem:[#allocation4 + $0x1b0] sm:$0xf]  ;;  %v9135_v34 = vld [vmem:[#allocation10 + $0x148] sm:$0xff]  ;;  %7111 = vmatpush.bf16.msra.mxu3 %v9136_v4 }
 0x3b7   : > { %v9080_v25 = vld [vmem:[#allocation4 + $0x1d0] sm:$0xf0]  ;;  %v5045_v0 = vld [vmem:[#allocation3 + $0x20] sm:$0xf]  ;;  %v5101_v48 = vshrl.u32 %v5076_v52, 16  ;;  %v5104_v22 = vshll.u32 %v5076_v52, 16 }
 0x3b8   : > { %v5044_v10 = vld [vmem:[#allocation3 + $0x1c] sm:$0xf]  ;;  %v8478_v53 = vld [vmem:[#allocation4 + $0x1d4] sm:$0xf0]  ;;  %v5110_v11 = vshll.u32 %v5077_v63, 16  ;;  %v5114_v40 = vshrl.u32 %v5077_v63, 16  ;;  %v8477_v57 = vor.u32 %v9080_v25, %v8476_v44 }
 0x3b9   : > { %v9076_v39 = vld [vmem:[#allocation4 + $0x1b4] sm:$0xf]  ;;  %v5120_v37 = vshll.u32 %v5078_v9, 16  ;;  %v8484_v29 = vld [vmem:[#allocation4 + $0x1b8] sm:$0xf]  ;;  %v5103_v7 = vrot.slane %v5101_v48, 4 }
 0x3ba   : > { %v9081_v51 = vld [vmem:[#allocation4 + $0x1d8] sm:$0xf0]  ;;  %5060 = vst [vmem:[#allocation4 + $0x10] sm:$0xf] %v5044_v10  ;;  %v5106_v6 = vrot.slane %v5104_v22, 5  ;;  %v5112_v61 = vrot.slane %v5110_v11, 5  ;;  %7112 = vmatpush.bf16.msra.mxu3 %v9135_v34  ;;  %v8481_v60 = vor.u32 %v9076_v39, %v8478_v53 }
 0x3bb   : > { %v5326_v32 = vld [vmem:[#allocation3 + $0x30] sm:$0xf]  ;;  %5061 = vst [vmem:[#allocation4 + $0x34] sm:$0xf] %v5045_v0  ;;  %v5116_v43 = vrot.slane %v5114_v40, 4  ;;  %v5122_v49 = vrot.slane %v5120_v37, 5  ;;  %v8485_v50 = vor.u32 %v9081_v51, %v8484_v29 }
 0x3bc   : > { %6889 = vmatmul.bf16.gmra.mxu1 %v8405_v19  ;;  %v4812_v19 = vld [vmem:[#allocation3 + $0x18] sm:$0x8]  ;;  %v5355_v13 = vshrl.u32 %v5326_v32, 16  ;;  %v5107_v62 = vor.u32 %v5106_v6, %v5103_v7  ;;  %v5325_v17 = vld [vmem:[#allocation3 + $0x2c] sm:$0x8]  ;;  %v5358_v35 = vshll.u32 %v5326_v32, 16 }
 0x3bd   : > { %6938 = vmatmul.bf16.gmra.mxu2 %v8409_v21  ;;  %v4851_v21 = vshrl.u32 %v4814_v8, 16  ;;  %v4837_v2 = vshrl.u32 %v4812_v19, 16  ;;  %v5327_v14 = vld [vmem:[#allocation3 + $0x34] sm:$0xf]  ;;  %v5117_v12 = vor.u32 %v5116_v43, %v5112_v61  ;;  %v5350_v5 = vshrl.u32 %v5325_v17, 16  ;;  %v9144_v27 = vld [vmem:[#allocation10 + $0x190] sm:$0xff] }
 0x3be   : > { %6987 = vmatmul.bf16.gmra.mxu3 %v8413_v36  ;;  %v9147_v36 = vld [vmem:[#allocation10 + $0x1a8] sm:$0xff]  ;;  %v5357_v47 = vrot.slane %v5355_v13, 7  ;;  %v5108_v55 = vrot.slane %v5107_v62, 4  ;;  %v4816_v46 = vld [vmem:[#allocation3 + $0x30] sm:$0xf]  ;;  %v9142_v39 = vld [vmem:[#allocation10 + $0x180] sm:$0xff] }
 0x3bf   : > { %v4853_v23 = vrot.slane %v4851_v21, 7  ;;  %7157 = vmatpush.bf16.msra.mxu0 %v9147_v36  ;;  %v8242_v18 = vrot.slane %v4837_v2, 11  ;;  %v5118_v24 = vrot.slane %v5117_v12, 4  ;;  %v8250_v8 = vrot.slane %v5350_v5, 11  ;;  %v4817_v2 = vld [vmem:[#allocation3 + $0x34] sm:$0xf] }
 0x3c0   : > { %v5360_v45 = vor.u32 %v5358_v35, %v5357_v47  ;;  %v5113_v16 = vsel %vm10004_vm8, %v5108_v55, %v5112_v61  ;;  %v5362_v19 = vrot.slane %v5357_v47, 4  ;;  %v9165_v3 = vld [vmem:[#allocation10 + $0x238] sm:$0xff]  ;;  %v4815_v4 = vld [vmem:[#allocation3 + $0x2c] sm:$0x8]  ;;  %v4873_v52 = vshrl.u32 %v4817_v2, 16 }
 0x3c1   : > { %v4856_v59 = vor.u32 %v4854_v56, %v4853_v23  ;;  %v4848_v26 = vsel %vm9946_vm5, %v8242_v18, %v4847_v54  ;;  %v5123_v36 = vsel %vm10004_vm8, %v5118_v24, %v5122_v49  ;;  %5308 = vst [vmem:[#allocation4 + $0x14] sm:$0xf] %v5113_v16  ;;  %v4864_v23 = vshrl.u32 %v4816_v46, 16  ;;  %v9143_v56 = vld [vmem:[#allocation10 + $0x188] sm:$0xff]  ;;  %7253 = vmatpush.bf16.msra.mxu2 %v9165_v3  ;;  %v5080_v9 = vld [vmem:[#allocation3 + $0x34] sm:$0xf] }
 0x3c2   : > { %5028 = vst [vmem:[#allocation4 + $0xc] sm:$0xf] %v4848_v26  ;;  %v5361_v20 = vsel %vm9946_vm5, %v8250_v8, %v5360_v45  ;;  %v4859_v54 = vshrl.u32 %v4815_v4, 16  ;;  %v4876_v63 = vshll.u32 %v4817_v2, 16  ;;  %v9157_v25 = vld [vmem:[#allocation10 + $0x1f8] sm:$0xff]  ;;  %v5134_v7 = vshll.u32 %v5080_v9, 16 }
 0x3c3   : > { %v4857_v58 = vsel %vm9946_vm5, %v4849_v1, %v4856_v59  ;;  %7158 = vmatpush.bf16.msra.mxu0 %v9146_v42  ;;  %5309 = vst [vmem:[#allocation4 + $0x38] sm:$0xf] %v5123_v36  ;;  %v4867_v42 = vshll.u32 %v4816_v46, 16  ;;  %v4866_v1 = vrot.slane %v4864_v23, 7  ;;  %v5079_v59 = vld [vmem:[#allocation3 + $0x30] sm:$0xf]  ;;  %7204 = vmatpush.bf16.msra.mxu1 %v9157_v25 }
 0x3c4   : > { %5029 = vst [vmem:[#allocation4 + $0x30] sm:$0xf] %v4857_v58  ;;  %v5125_v44 = vshrl.u32 %v5079_v59, 16  ;;  %v8243_v34 = vrot.slane %v4859_v54, 11  ;;  %v4875_v58 = vrot.slane %v4873_v52, 7  ;;  %v5128_v51 = vshll.u32 %v5079_v59, 16 }
 0x3c5   : > { %5541 = vst [vmem:[#allocation4 + $0x18] sm:$0xf] %v5361_v20  ;;  %v4869_v26 = vor.u32 %v4867_v42, %v4866_v1  ;;  %v4871_v10 = vrot.slane %v4866_v1, 4  ;;  %v5081_v0 = vld [vmem:[#allocation3 + $0x38] sm:$0x1]  ;;  %v5138_v32 = vshrl.u32 %v5080_v9, 16 }
 0x3c6   : > { %v8512_v48 = vld [vmem:[#allocation4 + $0x1f8] sm:$0xf]  ;;  %v9089_v22 = vld [vmem:[#allocation4 + $0x218] sm:$0xf0]  ;;  %v5046_v53 = vld [vmem:[#allocation3 + $0x30] sm:$0xf]  ;;  %v4878_v29 = vor.u32 %v4876_v63, %v4875_v58 }
 0x3c7   : > { %7159 = vmatpush.bf16.msra.mxu0 %v9145_v15  ;;  %v5047_v15 = vld [vmem:[#allocation3 + $0x34] sm:$0xf]  ;;  %v5127_v11 = vrot.slane %v5125_v44, 4  ;;  %v9085_v40 = vld [vmem:[#allocation4 + $0x1fc] sm:$0xf]  ;;  %v4870_v37 = vsel %vm9946_vm5, %v8243_v34, %v4869_v26  ;;  %v5144_v61 = vshll.u32 %v5081_v0, 16  ;;  %v8513_v47 = vor.u32 %v9089_v22, %v8512_v48 }
 0x3c8   : > { %5062 = vst [vmem:[#allocation4 + $0x58] sm:$0xf] %v5046_v53  ;;  %v8514_v6 = vld [vmem:[#allocation4 + $0x21c] sm:$0xf0]  ;;  %v9090_v13 = vld [vmem:[#allocation4 + $0x220] sm:$0xf0]  ;;  %v4879_v62 = vsel %vm9946_vm5, %v4871_v10, %v4878_v29 }
 0x3c9   : > { %5030 = vst [vmem:[#allocation4 + $0x54] sm:$0xf] %v4870_v37  ;;  %v8520_v43 = vld [vmem:[#allocation4 + $0x200] sm:$0xf]  ;;  %v5130_v49 = vrot.slane %v5128_v51, 5  ;;  %v5136_v17 = vrot.slane %v5134_v7, 5  ;;  %v8517_v35 = vor.u32 %v9085_v40, %v8514_v6 }
 0x3ca   : > { %5063 = vst [vmem:[#allocation4 + $0x7c] sm:$0xf] %v5047_v15  ;;  %v5146_v12 = vrot.slane %v5144_v61, 5  ;;  %v5329_v5 = vld [vmem:[#allocation3 + $0x44] sm:$0xf] }
 0x3cb   : > { %7160 = vmatpush.bf16.msra.mxu0 %v9144_v27  ;;  %5031 = vst [vmem:[#allocation4 + $0x78] sm:$0xf] %v4879_v62  ;;  %v5131_v55 = vor.u32 %v5130_v49, %v5127_v11  ;;  %v5377_v24 = vshrl.u32 %v5329_v5, 16  ;;  %v5380_v45 = vshll.u32 %v5329_v5, 16  ;;  %v4818_v52 = vld [vmem:[#allocation3 + $0x40] sm:$0x8] }
 0x3cc   : > { %6894 = vmatmul.bf16.gmra.mxu1 %v8441_v41  ;;  %v5364_v41 = vshrl.u32 %v5327_v14, 16  ;;  %v4820_v59 = vld [vmem:[#allocation3 + $0x48] sm:$0xf]  ;;  %v4881_v25 = vshrl.u32 %v4818_v52, 16  ;;  %v5082_v0 = vld [vmem:[#allocation3 + $0x44] sm:$0xf] }
 0x3cd   : > { %6943 = vmatmul.bf16.gmra.mxu2 %v8445_v33  ;;  %v5367_v33 = vshll.u32 %v5327_v14, 16  ;;  %v5140_v14 = vrot.slane %v5138_v32, 4  ;;  %v5132_v8 = vrot.slane %v5131_v55, 4  ;;  %v5379_v20 = vrot.slane %v5377_v24, 7  ;;  %v9023_v48 = vld [vmem:[#allocation4 + $0xc] sm:$0xf] }
 0x3ce   : > { %6992 = vmatmul.bf16.gmra.mxu3 %v8449_v30  ;;  %v9134_v30 = vld [vmem:[#allocation10 + $0x140] sm:$0xff]  ;;  %v5366_v21 = vrot.slane %v5364_v41, 7  ;;  %v5328_v41 = vld [vmem:[#allocation3 + $0x40] sm:$0x8]  ;;  %v4895_v34 = vshrl.u32 %v4820_v59, 16  ;;  %v4898_v26 = vshll.u32 %v4820_v59, 16 }
 0x3cf   : > { %7113 = vmatpush.bf16.msra.mxu3 %v9134_v30  ;;  %7161 = vmatpush.bf16.msra.mxu0 %v9143_v56  ;;  %v5141_v30 = vor.u32 %v5140_v14, %v5136_v17  ;;  %v5372_v27 = vshrl.u32 %v5328_v41, 16  ;;  %v5137_v2 = vsel %vm10004_vm8, %v5132_v8, %v5136_v17  ;;  %v5382_v56 = vor.u32 %v5380_v45, %v5379_v20  ;;  %v8270_v22 = vld [vmem:[#allocation4 + $0x2c] sm:$0xf0]  ;;  %v5083_v11 = vld [vmem:[#allocation3 + $0x48] sm:$0xf] }
 0x3d0   : > { %v5369_v28 = vor.u32 %v5367_v33, %v5366_v21  ;;  %v5330_v33 = vld [vmem:[#allocation3 + $0x48] sm:$0xf]  ;;  %v8521_v21 = vor.u32 %v9090_v13, %v8520_v43  ;;  %5310 = vst [vmem:[#allocation4 + $0x5c] sm:$0xf] %v5137_v2  ;;  %v5384_v4 = vrot.slane %v5379_v20, 4  ;;  %v8244_v53 = vrot.slane %v4881_v25, 11 }
 0x3d1   : > { %v5386_v16 = vshrl.u32 %v5330_v33, 16  ;;  %v5142_v46 = vrot.slane %v5141_v30, 4  ;;  %v8251_v36 = vrot.slane %v5372_v27, 11  ;;  %v4897_v15 = vrot.slane %v4895_v34, 7  ;;  %v5048_v37 = vld [vmem:[#allocation3 + $0x44] sm:$0xf] }
 0x3d2   : > { %v5370_v18 = vsel %vm9946_vm5, %v5362_v19, %v5369_v28  ;;  %v5389_v19 = vshll.u32 %v5330_v33, 16  ;;  %v4819_v28 = vld [vmem:[#allocation3 + $0x44] sm:$0xf]  ;;  %v5149_v40 = vshrl.u32 %v5082_v0, 16  ;;  %v5049_v29 = vld [vmem:[#allocation3 + $0x48] sm:$0xf] }
 0x3d3   : > { %5542 = vst [vmem:[#allocation4 + $0x3c] sm:$0xf] %v5370_v18  ;;  %7162 = vmatpush.bf16.msra.mxu0 %v9142_v39  ;;  %v5388_v3 = vrot.slane %v5386_v16, 7  ;;  %v5147_v23 = vsel %vm10004_vm8, %v5142_v46, %v5146_v12  ;;  %v4886_v42 = vshrl.u32 %v4819_v28, 16  ;;  %v9164_v18 = vld [vmem:[#allocation10 + $0x230] sm:$0xff]  ;;  %v5383_v1 = vsel %vm9946_vm5, %v8251_v36, %v5382_v56 }
 0x3d4   : > { %5311 = vst [vmem:[#allocation4 + $0x80] sm:$0xf] %v5147_v23  ;;  %v4889_v9 = vshll.u32 %v4819_v28, 16  ;;  %7254 = vmatpush.bf16.msra.mxu2 %v9164_v18  ;;  %v9156_v39 = vld [vmem:[#allocation10 + $0x1f0] sm:$0xff]  ;;  %v8276_v7 = vld [vmem:[#allocation4 + $0x10] sm:$0xf]  ;;  %v4900_v32 = vor.u32 %v4898_v26, %v4897_v15 }
 0x3d5   : > { %v5391_v54 = vor.u32 %v5389_v19, %v5388_v3  ;;  %v4888_v63 = vrot.slane %v4886_v42, 7  ;;  %5543 = vst [vmem:[#allocation4 + $0x60] sm:$0xf] %v5383_v1  ;;  %v5084_v51 = vld [vmem:[#allocation3 + $0x4c] sm:$0x1]  ;;  %7205 = vmatpush.bf16.msra.mxu1 %v9156_v39  ;;  %v5151_v61 = vrot.slane %v5149_v40, 4 }
 0x3d6   : > { %5064 = vst [vmem:[#allocation4 + $0xa0] sm:$0xf] %v5048_v37  ;;  %v5152_v43 = vshll.u32 %v5082_v0, 16  ;;  %v9028_v13 = vld [vmem:[#allocation4 + $0x30] sm:$0xf0]  ;;  %v5162_v62 = vshrl.u32 %v5083_v11, 16 }
 0x3d7   : > { %v5392_v44 = vsel %vm9946_vm5, %v5384_v4, %v5391_v54  ;;  %v4891_v10 = vor.u32 %v4889_v9, %v4888_v63  ;;  %v4893_v58 = vrot.slane %v4888_v63, 4  ;;  %v9024_v49 = vld [vmem:[#allocation4 + $0x14] sm:$0xf]  ;;  %v8278_v17 = vld [vmem:[#allocation4 + $0x34] sm:$0xf0]  ;;  %v5168_v5 = vshll.u32 %v5084_v51, 16 }
 0x3d8   : > { %5544 = vst [vmem:[#allocation4 + $0x84] sm:$0xf] %v5392_v44  ;;  %v5154_v12 = vrot.slane %v5152_v43, 5  ;;  %v5164_v41 = vrot.slane %v5162_v62, 4  ;;  %v8277_v33 = vor.u32 %v9028_v13, %v8276_v7  ;;  %v5331_v24 = vld [vmem:[#allocation3 + $0x54] sm:$0x8]  ;;  %v8281_v23 = vor.u32 %v9024_v49, %v8278_v17 }
 0x3d9   : > { %v4892_v6 = vsel %vm9946_vm5, %v8244_v53, %v4891_v10  ;;  %v4901_v14 = vsel %vm9946_vm5, %v4893_v58, %v4900_v32  ;;  %5065 = vst [vmem:[#allocation4 + $0xc4] sm:$0xf] %v5049_v29  ;;  %v5170_v27 = vrot.slane %v5168_v5, 5  ;;  %v5333_v19 = vld [vmem:[#allocation3 + $0x5c] sm:$0xf]  ;;  %v9163_v9 = vld [vmem:[#allocation10 + $0x228] sm:$0xff] }
 0x3da   : > { %5032 = vst [vmem:[#allocation4 + $0x9c] sm:$0xf] %v4892_v6  ;;  %v5155_v30 = vor.u32 %v5154_v12, %v5151_v61  ;;  %v5408_v2 = vshrl.u32 %v5333_v19, 16  ;;  %v5411_v3 = vshll.u32 %v5333_v19, 16  ;;  %v4822_v52 = vld [vmem:[#allocation3 + $0x58] sm:$0xf]  ;;  %7255 = vmatpush.bf16.msra.mxu2 %v9163_v9 }
 0x3db   : > { %5033 = vst [vmem:[#allocation4 + $0xc0] sm:$0xf] %v4901_v14  ;;  %v4823_v63 = vld [vmem:[#allocation3 + $0x5c] sm:$0xf]  ;;  %v4821_v34 = vld [vmem:[#allocation3 + $0x54] sm:$0x8] }
 0x3dc   : > { %6899 = vmatmul.bf16.gmra.mxu1 %v8477_v57  ;;  %v8284_v57 = vld [vmem:[#allocation4 + $0x18] sm:$0xf]  ;;  %v5156_v36 = vrot.slane %v5155_v30, 4  ;;  %v5410_v1 = vrot.slane %v5408_v2, 7  ;;  %v4908_v26 = vshrl.u32 %v4822_v52, 16  ;;  %v4911_v10 = vshll.u32 %v4822_v52, 16 }
 0x3dd   : > { %6948 = vmatmul.bf16.gmra.mxu2 %v8481_v60  ;;  %v9029_v60 = vld [vmem:[#allocation4 + $0x38] sm:$0xf0]  ;;  %v4903_v0 = vshrl.u32 %v4821_v34, 16  ;;  %v5085_v39 = vld [vmem:[#allocation3 + $0x58] sm:$0xf] }
 0x3de   : > { %6997 = vmatmul.bf16.gmra.mxu3 %v8485_v50  ;;  %v8285_v50 = vor.u32 %v9029_v60, %v8284_v57  ;;  %v5158_v57 = vshll.u32 %v5083_v11, 16  ;;  %v8320_v60 = vld [vmem:[#allocation4 + $0x60] sm:$0xf]  ;;  %v5413_v25 = vor.u32 %v5411_v3, %v5410_v1  ;;  %v4910_v15 = vrot.slane %v4908_v26, 7  ;;  %v5086_v11 = vld [vmem:[#allocation3 + $0x5c] sm:$0xf] }
 0x3df   : > { %v5173_v40 = vshrl.u32 %v5085_v39, 16  ;;  %v9155_v51 = vld [vmem:[#allocation10 + $0x1e8] sm:$0xff]  ;;  %v8245_v7 = vrot.slane %v4903_v0, 11  ;;  %v5176_v61 = vshll.u32 %v5085_v39, 16  ;;  %v9032_v13 = vld [vmem:[#allocation4 + $0x54] sm:$0xf] }
 0x3e0   : > { %7163 = vmatmul.bf16.vlgmr.msra.gmra.mxu0 %v8285_v50  ;;  %v5160_v55 = vrot.slane %v5158_v57, 5  ;;  %v9038_v50 = vld [vmem:[#allocation4 + $0x80] sm:$0xf0]  ;;  %v5087_v32 = vld [vmem:[#allocation3 + $0x60] sm:$0x1]  ;;  %v4913_v62 = vor.u32 %v4911_v10, %v4910_v15  ;;  %v4915_v49 = vrot.slane %v4910_v15, 4  ;;  %7206 = vmatpush.bf16.msra.mxu1 %v9155_v51 }
 0x3e1   : > { %v8321_v45 = vor.u32 %v9038_v50, %v8320_v60  ;;  %v8312_v57 = vld [vmem:[#allocation4 + $0x58] sm:$0xf]  ;;  %v5050_v17 = vld [vmem:[#allocation3 + $0x58] sm:$0xf]  ;;  %v5051_v14 = vld [vmem:[#allocation3 + $0x5c] sm:$0xf] }
 0x3e2   : > { %v5165_v16 = vor.u32 %v5164_v41, %v5160_v55  ;;  %v5161_v42 = vsel %vm10004_vm8, %v5156_v36, %v5160_v55  ;;  %v5175_v12 = vrot.slane %v5173_v40, 4  ;;  %5066 = vst [vmem:[#allocation4 + $0xe8] sm:$0xf] %v5050_v17  ;;  %v5178_v60 = vrot.slane %v5176_v61, 5  ;;  %v8306_v41 = vld [vmem:[#allocation4 + $0x74] sm:$0xf0] }
 0x3e3   : > { %5312 = vst [vmem:[#allocation4 + $0xa4] sm:$0xf] %v5161_v42  ;;  %v5182_v55 = vshll.u32 %v5086_v11, 16  ;;  %v5186_v50 = vshrl.u32 %v5086_v11, 16  ;;  %v5192_v30 = vshll.u32 %v5087_v32, 16 }
 0x3e4   : > { %v5166_v56 = vrot.slane %v5165_v16, 4  ;;  %5067 = vst [vmem:[#allocation4 + $0x10c] sm:$0xf] %v5051_v14  ;;  %v5179_v16 = vor.u32 %v5178_v60, %v5175_v12  ;;  %v5335_v36 = vld [vmem:[#allocation3 + $0x6c] sm:$0xf] }
 0x3e5   : > { %v5184_v19 = vrot.slane %v5182_v55, 5  ;;  %v5424_v52 = vshll.u32 %v5335_v36, 16  ;;  %v4825_v39 = vld [vmem:[#allocation3 + $0x6c] sm:$0xf]  ;;  %v4826_v40 = vld [vmem:[#allocation3 + $0x70] sm:$0xf] }
 0x3e6   : > { %v5171_v59 = vsel %vm10004_vm8, %v5166_v56, %v5170_v27  ;;  %v9033_v27 = vld [vmem:[#allocation4 + $0x5c] sm:$0xf]  ;;  %v5421_v56 = vshrl.u32 %v5335_v36, 16  ;;  %v4824_v32 = vld [vmem:[#allocation3 + $0x68] sm:$0x8] }
 0x3e7   : > { %5313 = vst [vmem:[#allocation4 + $0xc8] sm:$0xf] %v5171_v59 }
 0x3ec   : > { %6904 = vmatmul.bf16.gmra.mxu1 %v8513_v47  ;;  %v5332_v47 = vld [vmem:[#allocation3 + $0x58] sm:$0xf] }
 0x3ed   : > { %6953 = vmatmul.bf16.gmra.mxu2 %v8517_v35  ;;  %v8273_v35 = vor.u32 %v9023_v48, %v8270_v22  ;;  %v5399_v8 = vshrl.u32 %v5332_v47, 16  ;;  %v5402_v46 = vshll.u32 %v5332_v47, 16  ;;  %v4917_v48 = vshrl.u32 %v4823_v63, 16  ;;  %v9037_v47 = vld [vmem:[#allocation4 + $0x78] sm:$0xf0] }
 0x3ee   : > { %7002 = vmatmul.bf16.gmra.mxu3 %v8521_v21  ;;  %v5394_v21 = vshrl.u32 %v5331_v24, 16  ;;  %v4920_v22 = vshll.u32 %v4823_v63, 16  ;;  %v8314_v24 = vld [vmem:[#allocation4 + $0x7c] sm:$0xf0]  ;;  %v8313_v2 = vor.u32 %v9037_v47, %v8312_v57 }
 0x3ef   : > { %v5401_v20 = vrot.slane %v5399_v8, 7  ;;  %v4919_v6 = vrot.slane %v4917_v48, 7  ;;  %v8317_v26 = vor.u32 %v9033_v27, %v8314_v24 }
 0x3f0   : > { %7168 = vmatmul.bf16.gmra.mxu0 %v8321_v45  ;;  %v8252_v4 = vrot.slane %v5394_v21, 11  ;;  %v5188_v21 = vrot.slane %v5186_v50, 4  ;;  %v10697_v50 = vld [vmem:[#allocation4 + $0xc0] sm:$0xf0] }
 0x3f1   : > { %v5404_v18 = vor.u32 %v5402_v46, %v5401_v20  ;;  %v5406_v54 = vrot.slane %v5401_v20, 4  ;;  %v5194_v46 = vrot.slane %v5192_v30, 5  ;;  %v8309_v20 = vor.u32 %v9032_v13, %v8306_v41  ;;  %v9154_v30 = vld [vmem:[#allocation10 + $0x1e0] sm:$0xff] }
 0x3f2   : > { %v4925_v13 = vshrl.u32 %v4824_v32, 16  ;;  %7207 = vmatpush.bf16.msra.mxu1 %v9154_v30 }
 0x3f3   : > { %v5405_v44 = vsel %vm9946_vm5, %v8252_v4, %v5404_v18  ;;  %v5414_v58 = vsel %vm9946_vm5, %v5406_v54, %v5413_v25  ;;  %v5189_v18 = vor.u32 %v5188_v21, %v5184_v19  ;;  %v5336_v54 = vld [vmem:[#allocation3 + $0x70] sm:$0xf]  ;;  %v5052_v21 = vld [vmem:[#allocation3 + $0x6c] sm:$0xf] }
 0x3f4   : > { %5545 = vst [vmem:[#allocation4 + $0xa8] sm:$0xf] %v5405_v44  ;;  %v5423_v44 = vrot.slane %v5421_v56, 7  ;;  %v5430_v25 = vshrl.u32 %v5336_v54, 16  ;;  %v5433_v11 = vshll.u32 %v5336_v54, 16  ;;  %v8246_v27 = vrot.slane %v4925_v13, 11 }
 0x3f5   : > { %5546 = vst [vmem:[#allocation4 + $0xcc] sm:$0xf] %v5414_v58  ;;  %v5190_v10 = vrot.slane %v5189_v18, 4 }
 0x3f6   : > { %v5426_v48 = vor.u32 %v5424_v52, %v5423_v44  ;;  %v5428_v15 = vrot.slane %v5423_v44, 4  ;;  %5068 = vst [vmem:[#allocation4 + $0x130] sm:$0xf] %v5052_v21  ;;  %v5338_v44 = vld [vmem:[#allocation3 + $0x80] sm:$0xf] }
 0x3f9   : > { %v6870_v28 = vpop.f32.mrf.mxu1 }
 0x3fb   : > { %v8356_v8 = vld [vmem:[#allocation4 + $0xa8] sm:$0xf] }
 0x3fc   : > { %7016 = vmatmul.bf16.vlgmr.msrb.gmra.mxu1 %v8273_v35  ;;  %v4922_v35 = vor.u32 %v4920_v22, %v4919_v6  ;;  %v9047_v3 = vld [vmem:[#allocation4 + $0xc8] sm:$0xf0]  ;;  %v5432_v22 = vrot.slane %v5430_v25, 7 }
 0x3fd   : > { %7065 = vmatmul.bf16.vlgmr.msrb.gmra.mxu2 %v8277_v33  ;;  %v4914_v33 = vsel %vm9946_vm5, %v8245_v7, %v4913_v62  ;;  %v8357_v42 = vor.u32 %v9047_v3, %v8356_v8  ;;  %v4939_v7 = vshrl.u32 %v4826_v40, 16  ;;  %v4942_v62 = vshll.u32 %v4826_v40, 16 }
 0x3fe   : > { %7114 = vmatmul.bf16.vlgmr.msra.gmra.mxu3 %v8281_v23  ;;  %v4923_v45 = vsel %vm9946_vm5, %v4915_v49, %v4922_v35  ;;  %5034 = vst [vmem:[#allocation4 + $0xe4] sm:$0xf] %v4914_v33  ;;  %v5334_v23 = vld [vmem:[#allocation3 + $0x68] sm:$0x8]  ;;  %v5435_v6 = vor.u32 %v5433_v11, %v5432_v22  ;;  %v5088_v49 = vld [vmem:[#allocation3 + $0x6c] sm:$0xf] }
 0x3ff   : > { %5035 = vst [vmem:[#allocation4 + $0x108] sm:$0xf] %v4923_v45  ;;  %v5416_v1 = vshrl.u32 %v5334_v23, 16  ;;  %v4941_v57 = vrot.slane %v4939_v7, 7  ;;  %v5089_v35 = vld [vmem:[#allocation3 + $0x70] sm:$0xf] }
 0x400   : > { %v6919_v53 = vpop.f32.mrf.mxu2  ;;  %7173 = vmatmul.bf16.gmra.mxu0 %v8357_v42  ;;  %v5436_v14 = vsel %vm9946_vm5, %v5428_v15, %v5435_v6  ;;  %v5197_v60 = vshrl.u32 %v5088_v49, 16  ;;  %v10695_v33 = vld [vmem:[#allocation4 + $0xa0] sm:$0xf]  ;;  %v9041_v45 = vld [vmem:[#allocation4 + $0x9c] sm:$0xf]  ;;  %v5206_v56 = vshll.u32 %v5089_v35, 16 }
 0x401   : > { %v6920_v37 = vadd.f32 %v6919_v53, %v6870_v28  ;;  %v6968_v29 = vpop.f32.mrf.mxu3  ;;  %v6872_v43 = vpop.f32.mrf.mxu1  ;;  %v5180_v28 = vrot.slane %v5179_v16, 4  ;;  %v8253_v58 = vrot.slane %v5416_v1, 11  ;;  %v5195_v53 = vsel %vm10004_vm8, %v5190_v10, %v5194_v46  ;;  %5548 = vst [vmem:[#allocation4 + $0x114] sm:$0xf] %v5436_v14  ;;  %v8342_v16 = vld [vmem:[#allocation4 + $0xbc] sm:$0xf0] }
 0x402   : > { %5315 = vst [vmem:[#allocation4 + $0x110] sm:$0xf] %v5195_v53  ;;  %v4944_v24 = vor.u32 %v4942_v62, %v4941_v57  ;;  %v5090_v46 = vld [vmem:[#allocation3 + $0x74] sm:$0x1]  ;;  %v5199_v36 = vrot.slane %v5197_v60, 4  ;;  %v5210_v18 = vshrl.u32 %v5089_v35, 16  ;;  %v8345_v25 = vor.u32 %v9041_v45, %v8342_v16 }
 0x403   : > { %v10679_v5 = vadd.f32 %v6968_v29, %v6920_v37  ;;  %v5185_v9 = vsel %vm10004_vm8, %v5180_v28, %v5184_v19  ;;  %v4930_v37 = vshrl.u32 %v4825_v39, 16  ;;  %v9162_v29 = vld [vmem:[#allocation10 + $0x220] sm:$0xff]  ;;  %v5427_v51 = vsel %vm9946_vm5, %v8253_v58, %v5426_v48  ;;  %v9042_v19 = vld [vmem:[#allocation4 + $0xa4] sm:$0xf]  ;;  %v5053_v23 = vld [vmem:[#allocation3 + $0x70] sm:$0xf] }
 0x404   : > { %5314 = vst [vmem:[#allocation4 + $0xec] sm:$0xf] %v5185_v9  ;;  %7256 = vmatpush.bf16.msra.mxu2 %v9162_v29  ;;  %v5208_v1 = vrot.slane %v5206_v56, 5  ;;  %v5216_v52 = vshll.u32 %v5090_v46, 16  ;;  %v5212_v9 = vrot.slane %v5210_v18, 4  ;;  %v5443_v48 = vshrl.u32 %v5338_v44, 16 }
 0x405   : > { %5547 = vst [vmem:[#allocation4 + $0xf0] sm:$0xf] %v5427_v51  ;;  %v4932_v61 = vrot.slane %v4930_v37, 7  ;;  %v5337_v10 = vld [vmem:[#allocation3 + $0x7c] sm:$0x8]  ;;  %v5446_v40 = vshll.u32 %v5338_v44, 16 }
 0x406   : > { %5069 = vst [vmem:[#allocation4 + $0x154] sm:$0xf] %v5053_v23  ;;  %v5339_v58 = vld [vmem:[#allocation3 + $0x84] sm:$0xf]  ;;  %v5213_v15 = vor.u32 %v5212_v9, %v5208_v1  ;;  %v5438_v11 = vshrl.u32 %v5337_v10, 16  ;;  %v5445_v7 = vrot.slane %v5443_v48, 7 }
 0x407   : > { %v4937_v47 = vrot.slane %v4932_v61, 4  ;;  %v5452_v6 = vshrl.u32 %v5339_v58, 16  ;;  %v5455_v57 = vshll.u32 %v5339_v58, 16  ;;  %v4829_v35 = vld [vmem:[#allocation3 + $0x84] sm:$0xf]  ;;  %v9161_v60 = vld [vmem:[#allocation10 + $0x218] sm:$0xff] }
 0x408   : > { %v6921_v4 = vpop.f32.mrf.mxu2  ;;  %v8254_v13 = vrot.slane %v5438_v11, 11  ;;  %7257 = vmatpush.bf16.msra.mxu2 %v9161_v60  ;;  %v4964_v45 = vshll.u32 %v4829_v35, 16  ;;  %v5091_v16 = vld [vmem:[#allocation3 + $0x80] sm:$0xf]  ;;  %v5092_v46 = vld [vmem:[#allocation3 + $0x84] sm:$0xf] }
 0x409   : > { %v6922_v59 = vadd.f32 %v6921_v4, %v6872_v43  ;;  %v6970_v63 = vpop.f32.mrf.mxu3  ;;  %v6875_v34 = vpop.f32.mrf.mxu1  ;;  %v4933_v43 = vshll.u32 %v4825_v39, 16  ;;  %v4945_v28 = vsel %vm9946_vm5, %v4937_v47, %v4944_v24  ;;  %v8350_v4 = vld [vmem:[#allocation4 + $0xc4] sm:$0xf0]  ;;  %v9056_v39 = vld [vmem:[#allocation4 + $0x110] sm:$0xf0]  ;;  %v5454_v14 = vrot.slane %v5452_v6, 7 }
 0x40a   : > { %5037 = vst [vmem:[#allocation4 + $0x150] sm:$0xf] %v4945_v28  ;;  %v4828_v47 = vld [vmem:[#allocation3 + $0x80] sm:$0xf]  ;;  %v9153_v28 = vld [vmem:[#allocation10 + $0x1d8] sm:$0xff]  ;;  %v5230_v58 = vshll.u32 %v5092_v46, 16 }
 0x40b   : > { %v10687_v0 = vadd.f32 %v6970_v63, %v6922_v59  ;;  %v4935_v12 = vor.u32 %v4933_v43, %v4932_v61  ;;  %v8349_v59 = vor.u32 %v10697_v50, %v10695_v33  ;;  %v5214_v43 = vrot.slane %v5213_v15, 4  ;;  %v4827_v33 = vld [vmem:[#allocation3 + $0x7c] sm:$0x8]  ;;  %v5054_v9 = vld [vmem:[#allocation3 + $0x80] sm:$0xf]  ;;  %7208 = vmatpush.bf16.msra.mxu1 %v9153_v28 }
 0x40c   : > { %7021 = vmatmul.bf16.gmra.mxu1 %v8309_v20  ;;  %v5200_v20 = vshll.u32 %v5088_v49, 16  ;;  %v8392_v54 = vld [vmem:[#allocation4 + $0xf0] sm:$0xf]  ;;  %v5448_v49 = vor.u32 %v5446_v40, %v5445_v7  ;;  %v4952_v50 = vshrl.u32 %v4828_v47, 16  ;;  %v4955_v30 = vshll.u32 %v4828_v47, 16 }
 0x40d   : > { %7070 = vmatmul.bf16.gmra.mxu2 %v8313_v2  ;;  %v4936_v3 = vsel %vm9946_vm5, %v8246_v27, %v4935_v12  ;;  %v8393_v51 = vor.u32 %v9056_v39, %v8392_v54  ;;  %v4947_v24 = vshrl.u32 %v4827_v33, 16  ;;  %v9050_v54 = vld [vmem:[#allocation4 + $0xe4] sm:$0xf]  ;;  %5070 = vst [vmem:[#allocation4 + $0x178] sm:$0xf] %v5054_v9  ;;  %v5234_v39 = vshrl.u32 %v5092_v46, 16 }
 0x40e   : > { %7119 = vmatmul.bf16.gmra.mxu3 %v8317_v26  ;;  %5036 = vst [vmem:[#allocation4 + $0x12c] sm:$0xf] %v4936_v3  ;;  %v5202_v42 = vrot.slane %v5200_v20, 5  ;;  %v5218_v26 = vrot.slane %v5216_v52, 5  ;;  %v4954_v21 = vrot.slane %v4952_v50, 7 }
 0x40f   : > { %v8247_v23 = vrot.slane %v4947_v24, 11  ;;  %v9055_v52 = vld [vmem:[#allocation4 + $0x108] sm:$0xf0]  ;;  %v8378_v48 = vld [vmem:[#allocation4 + $0x104] sm:$0xf0] }
 0x410   : > { %v6924_v17 = vpop.f32.mrf.mxu2  ;;  %v5203_v63 = vor.u32 %v5202_v42, %v5199_v36  ;;  %7178 = vmatmul.bf16.gmra.mxu0 %v8393_v51  ;;  %v5219_v12 = vsel %vm10004_vm8, %v5214_v43, %v5218_v26  ;;  %v5221_v36 = vshrl.u32 %v5091_v16, 16  ;;  %v5224_v42 = vshll.u32 %v5091_v16, 16  ;;  %v5055_v26 = vld [vmem:[#allocation3 + $0x84] sm:$0xf]  ;;  %v9051_v15 = vld [vmem:[#allocation4 + $0xec] sm:$0xf] }
 0x411   : > { %v6925_v55 = vadd.f32 %v6924_v17, %v6875_v34  ;;  %v6973_v41 = vpop.f32.mrf.mxu3  ;;  %v6877_v8 = vpop.f32.mrf.mxu1  ;;  %v8353_v34 = vor.u32 %v9042_v19, %v8350_v4  ;;  %v5450_v17 = vrot.slane %v5445_v7, 4  ;;  %5317 = vst [vmem:[#allocation4 + $0x158] sm:$0xf] %v5219_v12  ;;  %v5093_v4 = vld [vmem:[#allocation3 + $0x88] sm:$0x1]  ;;  %v5232_v51 = vrot.slane %v5230_v58, 5 }
 0x412   : > { %v5204_v53 = vrot.slane %v5203_v63, 4  ;;  %v4959_v63 = vrot.slane %v4954_v21, 4  ;;  %v5223_v44 = vrot.slane %v5221_v36, 4  ;;  %v5226_v10 = vrot.slane %v5224_v42, 5  ;;  %5071 = vst [vmem:[#allocation4 + $0x19c] sm:$0xf] %v5055_v26 }
 0x413   : > { %v10699_v2 = vadd.f32 %v6973_v41, %v6925_v55  ;;  %v5449_v55 = vsel %vm9946_vm5, %v8254_v13, %v5448_v49  ;;  %v5457_v41 = vor.u32 %v5455_v57, %v5454_v14  ;;  %v8386_v11 = vld [vmem:[#allocation4 + $0x10c] sm:$0xf0]  ;;  %v5236_v7 = vrot.slane %v5234_v39, 4  ;;  %v5340_v49 = vld [vmem:[#allocation3 + $0x90] sm:$0x8] }
 0x414   : > { %v5209_v61 = vsel %vm10004_vm8, %v5204_v53, %v5208_v1  ;;  %5549 = vst [vmem:[#allocation4 + $0x138] sm:$0xf] %v5449_v55  ;;  %v8384_v1 = vld [vmem:[#allocation4 + $0xe8] sm:$0xf]  ;;  %v5240_v53 = vshll.u32 %v5093_v4, 16  ;;  %v5460_v60 = vshrl.u32 %v5340_v49, 16 }
 0x415   : > { %5316 = vst [vmem:[#allocation4 + $0x134] sm:$0xf] %v5209_v61  ;;  %v5458_v27 = vsel %vm9946_vm5, %v5450_v17, %v5457_v41  ;;  %v8381_v61 = vor.u32 %v9050_v54, %v8378_v48  ;;  %v8385_v43 = vor.u32 %v9055_v52, %v8384_v1  ;;  %v5237_v47 = vor.u32 %v5236_v7, %v5232_v51  ;;  %v4831_v36 = vld [vmem:[#allocation3 + $0x94] sm:$0xf]  ;;  %v9160_v4 = vld [vmem:[#allocation10 + $0x210] sm:$0xff] }
 0x416   : > { %5550 = vst [vmem:[#allocation4 + $0x15c] sm:$0xf] %v5458_v27  ;;  %v5242_v6 = vrot.slane %v5240_v53, 5  ;;  %v8255_v16 = vrot.slane %v5460_v60, 11  ;;  %v4830_v1 = vld [vmem:[#allocation3 + $0x90] sm:$0x8]  ;;  %7258 = vmatpush.bf16.msra.mxu2 %v9160_v4 }
 0x418   : > { %v6926_v22 = vpop.f32.mrf.mxu2  ;;  %v8422_v60 = vld [vmem:[#allocation4 + $0x154] sm:$0xf0] }
 0x419   : > { %v6927_v37 = vadd.f32 %v6926_v22, %v6877_v8  ;;  %v6975_v29 = vpop.f32.mrf.mxu3  ;;  %v6880_v32 = vpop.f32.mrf.mxu1  ;;  %v4961_v8 = vshrl.u32 %v4829_v35, 16  ;;  %v5342_v35 = vld [vmem:[#allocation3 + $0x98] sm:$0xf] }
 0x41a   : > { %v5474_v27 = vshrl.u32 %v5342_v35, 16  ;;  %v5477_v28 = vshll.u32 %v5342_v35, 16 }
 0x41b   : > { %v10709_v62 = vadd.f32 %v6975_v29, %v6927_v37  ;;  %v4963_v56 = vrot.slane %v4961_v8, 7  ;;  %v8428_v40 = vld [vmem:[#allocation4 + $0x138] sm:$0xf]  ;;  %v5227_v29 = vor.u32 %v5226_v10, %v5223_v44  ;;  %v8389_v8 = vor.u32 %v9051_v15, %v8386_v11  ;;  %v10733_v11 = vld [vmem:[#allocation4 + $0x12c] sm:$0xf] }
 0x41c   : > { %7026 = vmatmul.bf16.gmra.mxu1 %v8345_v25  ;;  %v5476_v46 = vrot.slane %v5474_v27, 7 }
 0x41d   : > { %7075 = vmatmul.bf16.gmra.mxu2 %v8349_v59  ;;  %v4957_v59 = vor.u32 %v4955_v30, %v4954_v21  ;;  %v9065_v13 = vld [vmem:[#allocation4 + $0x158] sm:$0xf0]  ;;  %v5228_v57 = vrot.slane %v5227_v29, 4 }
 0x41e   : > { %7124 = vmatmul.bf16.gmra.mxu3 %v8353_v34  ;;  %v4966_v34 = vor.u32 %v4964_v45, %v4963_v56  ;;  %v8429_v12 = vor.u32 %v9065_v13, %v8428_v40  ;;  %v5238_v45 = vrot.slane %v5237_v47, 4  ;;  %v4974_v56 = vshrl.u32 %v4831_v36, 16  ;;  %v10735_v40 = vld [vmem:[#allocation4 + $0x14c] sm:$0xf0]  ;;  %v5096_v13 = vld [vmem:[#allocation3 + $0x9c] sm:$0x1] }
 0x41f   : > { %v4958_v22 = vsel %vm9946_vm5, %v8247_v23, %v4957_v59  ;;  %v5233_v50 = vsel %vm10004_vm8, %v5228_v57, %v5232_v51  ;;  %v4832_v23 = vld [vmem:[#allocation3 + $0x98] sm:$0xf]  ;;  %v5479_v54 = vor.u32 %v5477_v28, %v5476_v46  ;;  %v4977_v59 = vshll.u32 %v4831_v36, 16  ;;  %v5343_v36 = vld [vmem:[#allocation3 + $0xa4] sm:$0x8] }
 0x420   : > { %v6929_v19 = vpop.f32.mrf.mxu2  ;;  %v4967_v37 = vsel %vm9946_vm5, %v4959_v63, %v4966_v34  ;;  %5038 = vst [vmem:[#allocation4 + $0x174] sm:$0xf] %v4958_v22  ;;  %7183 = vmatmul.bf16.gmra.mxu0 %v8429_v12  ;;  %v4976_v52 = vrot.slane %v4974_v56, 7  ;;  %v4969_v63 = vshrl.u32 %v4830_v1, 16  ;;  %v4986_v44 = vshll.u32 %v4832_v23, 16 }
 0x421   : > { %v6930_v20 = vadd.f32 %v6929_v19, %v6880_v32  ;;  %v6978_v3 = vpop.f32.mrf.mxu3  ;;  %v6882_v18 = vpop.f32.mrf.mxu1  ;;  %5039 = vst [vmem:[#allocation4 + $0x198] sm:$0xf] %v4967_v37  ;;  %v5341_v32 = vld [vmem:[#allocation3 + $0x94] sm:$0xf]  ;;  %v5095_v22 = vld [vmem:[#allocation3 + $0x98] sm:$0xf]  ;;  %v8417_v27 = vor.u32 %v10733_v11, %v10735_v40 }
 0x422   : > { %v5465_v17 = vshrl.u32 %v5341_v32, 16  ;;  %v5468_v55 = vshll.u32 %v5341_v32, 16  ;;  %5318 = vst [vmem:[#allocation4 + $0x17c] sm:$0xf] %v5233_v50  ;;  %v5094_v34 = vld [vmem:[#allocation3 + $0x94] sm:$0xf]  ;;  %v4979_v58 = vor.u32 %v4977_v59, %v4976_v52 }
 0x423   : > { %v10717_v25 = vadd.f32 %v6978_v3, %v6930_v20  ;;  %v5243_v20 = vsel %vm10004_vm8, %v5238_v45, %v5242_v6  ;;  %v4981_v48 = vrot.slane %v4976_v52, 4  ;;  %v5245_v39 = vshrl.u32 %v5094_v34, 16  ;;  %v9152_v37 = vld [vmem:[#allocation10 + $0x1d0] sm:$0xff]  ;;  %v8420_v6 = vld [vmem:[#allocation4 + $0x130] sm:$0xf]  ;;  %v9159_v40 = vld [vmem:[#allocation10 + $0x208] sm:$0xff] }
 0x424   : > { %v5467_v30 = vrot.slane %v5465_v17, 7  ;;  %5319 = vst [vmem:[#allocation4 + $0x1a0] sm:$0xf] %v5243_v20  ;;  %v8248_v29 = vrot.slane %v4969_v63, 11  ;;  %v9064_v32 = vld [vmem:[#allocation4 + $0x150] sm:$0xf0]  ;;  %7209 = vmatpush.bf16.msra.mxu1 %v9152_v37  ;;  %7259 = vmatpush.bf16.msra.mxu2 %v9159_v40 }
 0x425   : > { %v5247_v57 = vrot.slane %v5245_v39, 4  ;;  %v5248_v49 = vshll.u32 %v5094_v34, 16  ;;  %v5057_v47 = vld [vmem:[#allocation3 + $0x98] sm:$0xf]  ;;  %v5254_v35 = vshll.u32 %v5095_v22, 16 }
 0x426   : > { %v5470_v21 = vor.u32 %v5468_v55, %v5467_v30  ;;  %v5472_v3 = vrot.slane %v5467_v30, 4  ;;  %v5264_v30 = vshll.u32 %v5096_v13, 16  ;;  %5073 = vst [vmem:[#allocation4 + $0x1e4] sm:$0xf] %v5057_v47  ;;  %v5344_v45 = vld [vmem:[#allocation3 + $0xa8] sm:$0xf] }
 0x427   : > { %v5250_v55 = vrot.slane %v5248_v49, 5  ;;  %v5256_v50 = vrot.slane %v5254_v35, 5  ;;  %v5345_v20 = vld [vmem:[#allocation3 + $0xac] sm:$0xf] }
 0x428   : > { %v6931_v14 = vpop.f32.mrf.mxu2  ;;  %v5471_v42 = vsel %vm9946_vm5, %v8255_v16, %v5470_v21  ;;  %v5480_v10 = vsel %vm9946_vm5, %v5472_v3, %v5479_v54  ;;  %v8421_v16 = vor.u32 %v9064_v32, %v8420_v6  ;;  %v5266_v46 = vrot.slane %v5264_v30, 5  ;;  %v4835_v11 = vld [vmem:[#allocation3 + $0xac] sm:$0xf] }
 0x429   : > { %v6932_v41 = vadd.f32 %v6931_v14, %v6882_v18  ;;  %v6980_v33 = vpop.f32.mrf.mxu3  ;;  %v6885_v24 = vpop.f32.mrf.mxu1  ;;  %v4983_v18 = vshrl.u32 %v4832_v23, 16  ;;  %5551 = vst [vmem:[#allocation4 + $0x180] sm:$0xf] %v5471_v42  ;;  %v4980_v14 = vsel %vm9946_vm5, %v8248_v29, %v4979_v58  ;;  %v5487_v3 = vshrl.u32 %v5344_v45, 16 }
 0x42a   : > { %5552 = vst [vmem:[#allocation4 + $0x1a4] sm:$0xf] %v5480_v10  ;;  %v5482_v42 = vshrl.u32 %v5343_v36, 16  ;;  %v5496_v63 = vshrl.u32 %v5345_v20, 16  ;;  %v5499_v10 = vshll.u32 %v5345_v20, 16  ;;  %v5008_v13 = vshll.u32 %v4835_v11, 16 }
 0x42b   : > { %v10725_v19 = vadd.f32 %v6980_v33, %v6932_v41  ;;  %v4985_v9 = vrot.slane %v4983_v18, 7  ;;  %5040 = vst [vmem:[#allocation4 + $0x1bc] sm:$0xf] %v4980_v14  ;;  %v5258_v41 = vshrl.u32 %v5095_v22, 16  ;;  %v5490_v18 = vshll.u32 %v5344_v45, 16 }
 0x42c   : > { %7031 = vmatmul.bf16.gmra.mxu1 %v8381_v61  ;;  %v9060_v61 = vld [vmem:[#allocation4 + $0x134] sm:$0xf]  ;;  %v5489_v59 = vrot.slane %v5487_v3, 7  ;;  %v5498_v39 = vrot.slane %v5496_v63, 7  ;;  %v9073_v45 = vld [vmem:[#allocation4 + $0x198] sm:$0xf0] }
 0x42d   : > { %7080 = vmatmul.bf16.gmra.mxu2 %v8385_v43  ;;  %v4988_v51 = vor.u32 %v4986_v44, %v4985_v9  ;;  %v5056_v43 = vld [vmem:[#allocation3 + $0x94] sm:$0xf]  ;;  %v8425_v21 = vor.u32 %v9060_v61, %v8422_v60 }
 0x42e   : > { %7129 = vmatmul.bf16.gmra.mxu3 %v8389_v8  ;;  %5072 = vst [vmem:[#allocation4 + $0x1c0] sm:$0xf] %v5056_v43  ;;  %v5260_v8 = vrot.slane %v5258_v41, 4  ;;  %v5494_v22 = vrot.slane %v5489_v59, 4  ;;  %v5501_v29 = vor.u32 %v5499_v10, %v5498_v39  ;;  %v5005_v43 = vshrl.u32 %v4835_v11, 16 }
 0x42f   : > { %v4989_v12 = vsel %vm9946_vm5, %v4981_v48, %v4988_v51  ;;  %v5492_v48 = vor.u32 %v5490_v18, %v5489_v59  ;;  %v4833_v51 = vld [vmem:[#allocation3 + $0xa4] sm:$0x8]  ;;  %v5347_v10 = vld [vmem:[#allocation3 + $0xbc] sm:$0xf] }
 0x430   : > { %v6934_v26 = vpop.f32.mrf.mxu2  ;;  %v8464_v33 = vld [vmem:[#allocation4 + $0x180] sm:$0xf]  ;;  %5041 = vst [vmem:[#allocation4 + $0x1e0] sm:$0xf] %v4989_v12  ;;  %v5261_v4 = vor.u32 %v5260_v8, %v5256_v50  ;;  %v5502_v32 = vsel %vm9946_vm5, %v5494_v22, %v5501_v29  ;;  %v4991_v61 = vshrl.u32 %v4833_v51, 16  ;;  %v5509_v11 = vshrl.u32 %v5347_v10, 16 }
 0x431   : > { %v6935_v53 = vadd.f32 %v6934_v26, %v6885_v24  ;;  %v6983_v15 = vpop.f32.mrf.mxu3  ;;  %v6887_v7 = vpop.f32.mrf.mxu1  ;;  %v5251_v24 = vor.u32 %v5250_v55, %v5247_v57  ;;  %v9074_v23 = vld [vmem:[#allocation4 + $0x1a0] sm:$0xf0]  ;;  %v8256_v26 = vrot.slane %v5482_v42, 11  ;;  %v5097_v57 = vld [vmem:[#allocation3 + $0xa8] sm:$0xf]  ;;  %v9151_v55 = vld [vmem:[#allocation10 + $0x1c8] sm:$0xff] }
 0x432   : > { %v8465_v52 = vor.u32 %v9074_v23, %v8464_v33  ;;  %v5262_v34 = vrot.slane %v5261_v4, 4  ;;  %5554 = vst [vmem:[#allocation4 + $0x1ec] sm:$0xf] %v5502_v32  ;;  %v5098_v12 = vld [vmem:[#allocation3 + $0xac] sm:$0xf]  ;;  %v5269_v47 = vshrl.u32 %v5097_v57, 16  ;;  %7210 = vmatpush.bf16.msra.mxu1 %v9151_v55 }
 0x433   : > { %v10737_v17 = vadd.f32 %v6983_v15, %v6935_v53  ;;  %v5252_v56 = vrot.slane %v5251_v24, 4  ;;  %v4834_v15 = vld [vmem:[#allocation3 + $0xa8] sm:$0xf]  ;;  %v5493_v37 = vsel %vm9946_vm5, %v8256_v26, %v5492_v48  ;;  %v8249_v41 = vrot.slane %v4991_v61, 11  ;;  %v9068_v24 = vld [vmem:[#allocation4 + $0x174] sm:$0xf] }
 0x434   : > { %7188 = vmatmul.bf16.gmra.mxu0 %v8465_v52  ;;  %v5267_v53 = vsel %vm10004_vm8, %v5262_v34, %v5266_v46  ;;  %5553 = vst [vmem:[#allocation4 + $0x1c8] sm:$0xf] %v5493_v37  ;;  %v4999_v6 = vshll.u32 %v4834_v15, 16  ;;  %v5007_v33 = vrot.slane %v5005_v43, 7  ;;  %v5272_v30 = vshll.u32 %v5097_v57, 16 }
 0x435   : > { %v5257_v44 = vsel %vm10004_vm8, %v5252_v56, %v5256_v50  ;;  %5321 = vst [vmem:[#allocation4 + $0x1e8] sm:$0xf] %v5267_v53  ;;  %v5099_v50 = vld [vmem:[#allocation3 + $0xb0] sm:$0x1]  ;;  %v8456_v8 = vld [vmem:[#allocation4 + $0x178] sm:$0xf] }
 0x436   : > { %5320 = vst [vmem:[#allocation4 + $0x1c4] sm:$0xf] %v5257_v44  ;;  %v5058_v46 = vld [vmem:[#allocation3 + $0xa8] sm:$0xf]  ;;  %v5271_v36 = vrot.slane %v5269_v47, 4  ;;  %v5010_v3 = vor.u32 %v5008_v13, %v5007_v33  ;;  %v5274_v23 = vrot.slane %v5272_v30, 5  ;;  %v8457_v22 = vor.u32 %v9073_v45, %v8456_v8 }
 0x437   : > { %5074 = vst [vmem:[#allocation4 + $0x208] sm:$0xf] %v5058_v46  ;;  %v5278_v56 = vshll.u32 %v5098_v12, 16  ;;  %v8450_v4 = vld [vmem:[#allocation4 + $0x194] sm:$0xf0]  ;;  %v5282_v18 = vshrl.u32 %v5098_v12, 16 }
 0x438   : > { %v6936_v28 = vpop.f32.mrf.mxu2  ;;  %v8458_v52 = vld [vmem:[#allocation4 + $0x19c] sm:$0xf0]  ;;  %v8453_v48 = vor.u32 %v9068_v24, %v8450_v4  ;;  %v5348_v51 = vld [vmem:[#allocation3 + $0xc0] sm:$0xf]  ;;  %v5511_v13 = vrot.slane %v5509_v11, 7  ;;  %v9158_v8 = vld [vmem:[#allocation10 + $0x200] sm:$0xff] }
 0x439   : > { %v6937_v54 = vadd.f32 %v6936_v28, %v6887_v7  ;;  %v6985_v1 = vpop.f32.mrf.mxu3  ;;  %v6890_v9 = vpop.f32.mrf.mxu1  ;;  %v4996_v7 = vshrl.u32 %v4834_v15, 16  ;;  %v5059_v28 = vld [vmem:[#allocation3 + $0xac] sm:$0xf]  ;;  %v5280_v44 = vrot.slane %v5278_v56, 5  ;;  %v5284_v34 = vrot.slane %v5282_v18, 4  ;;  %7260 = vmatpush.bf16.msra.mxu2 %v9158_v8 }
 0x43a   : > { %5075 = vst [vmem:[#allocation4 + $0x22c] sm:$0xf] %v5059_v28  ;;  %v9083_v39 = vld [vmem:[#allocation4 + $0x1e8] sm:$0xf0]  ;;  %v5346_v15 = vld [vmem:[#allocation3 + $0xb8] sm:$0x8] }
 0x43b   : > { %v10747_v58 = vadd.f32 %v6985_v1, %v6937_v54  ;;  %v4998_v14 = vrot.slane %v4996_v7, 7  ;;  %v5288_v54 = vshll.u32 %v5099_v50, 16  ;;  %v9069_v1 = vld [vmem:[#allocation4 + $0x17c] sm:$0xf]  ;;  %v8500_v59 = vld [vmem:[#allocation4 + $0x1c8] sm:$0xf]  ;;  %v5285_v29 = vor.u32 %v5284_v34, %v5280_v44 }
 0x43c   : > { %7036 = vmatmul.bf16.gmra.mxu1 %v8417_v27  ;;  %v8501_v37 = vor.u32 %v9083_v39, %v8500_v59  ;;  %v5504_v7 = vshrl.u32 %v5346_v15, 16  ;;  %v5518_v57 = vshrl.u32 %v5348_v51, 16  ;;  %v8461_v12 = vor.u32 %v9069_v1, %v8458_v52  ;;  %v5590_v33 = vld [vmem:[#allocation3 + $0x34] sm:$0xf]  ;;  %v5591_v46 = vld [vmem:[#allocation3 + $0x38] sm:$0x1] }
 0x43d   : > { %7085 = vmatmul.bf16.gmra.mxu2 %v8421_v16  ;;  %v5001_v16 = vor.u32 %v4999_v6, %v4998_v14  ;;  %v5290_v26 = vrot.slane %v5288_v54, 5  ;;  %v5512_v6 = vshll.u32 %v5347_v10, 16  ;;  %v5286_v47 = vrot.slane %v5285_v29, 4  ;;  %v9150_v52 = vld [vmem:[#allocation10 + $0x1c0] sm:$0xff]  ;;  %v5558_v34 = vld [vmem:[#allocation3 + $0x34] sm:$0xf] }
 0x43e   : > { %7134 = vmatmul.bf16.gmra.mxu3 %v8425_v21  ;;  %v5003_v21 = vrot.slane %v4998_v14, 4  ;;  %v5516_v30 = vrot.slane %v5511_v13, 4  ;;  %v5633_v56 = vshll.u32 %v5591_v46, 16  ;;  %7211 = vmatpush.bf16.msra.mxu1 %v9150_v52  ;;  %v9077_v39 = vld [vmem:[#allocation4 + $0x1bc] sm:$0xf] }
 0x43f   : > { %v5002_v42 = vsel %vm9946_vm5, %v8249_v41, %v5001_v16  ;;  %v5514_v55 = vor.u32 %v5512_v6, %v5511_v13  ;;  %v5520_v41 = vrot.slane %v5518_v57, 7  ;;  %v5291_v50 = vsel %vm10004_vm8, %v5286_v47, %v5290_v26  ;;  %v8486_v31 = vld [vmem:[#allocation4 + $0x1dc] sm:$0xf0]  ;;  %5574 = vst [vmem:[#allocation4 + $0x40] sm:$0xf] %v5558_v34 }
 0x440   : > { %v6939_v49 = vpop.f32.mrf.mxu2  ;;  %v5011_v63 = vsel %vm9946_vm5, %v5003_v21, %v5010_v3  ;;  %5042 = vst [vmem:[#allocation4 + $0x204] sm:$0xf] %v5002_v42  ;;  %v5623_v3 = vshll.u32 %v5590_v33, 16  ;;  %v9082_v15 = vld [vmem:[#allocation4 + $0x1e0] sm:$0xf0] }
 0x441   : > { %v6940_v35 = vadd.f32 %v6939_v49, %v6890_v9  ;;  %v6988_v60 = vpop.f32.mrf.mxu3  ;;  %v6892_v27 = vpop.f32.mrf.mxu1  ;;  %v5275_v9 = vor.u32 %v5274_v23, %v5271_v36  ;;  %5043 = vst [vmem:[#allocation4 + $0x228] sm:$0xf] %v5011_v63  ;;  %v5589_v49 = vld [vmem:[#allocation3 + $0x30] sm:$0xf]  ;;  %v5627_v23 = vshrl.u32 %v5590_v33, 16 }
 0x442   : > { %v5614_v24 = vshrl.u32 %v5589_v49, 16  ;;  %5323 = vst [vmem:[#allocation4 + $0x230] sm:$0xf] %v5291_v50  ;;  %v5617_v16 = vshll.u32 %v5589_v49, 16  ;;  %v5625_v18 = vrot.slane %v5623_v3, 5 }
 0x443   : > { %v10755_v20 = vadd.f32 %v6988_v60, %v6940_v35  ;;  %v5276_v53 = vrot.slane %v5275_v9, 4  ;;  %v8257_v35 = vrot.slane %v5504_v7, 11  ;;  %v5629_v63 = vrot.slane %v5627_v23, 4  ;;  %v9078_v11 = vld [vmem:[#allocation4 + $0x1c4] sm:$0xf] }
 0x444   : > { %7193 = vmatmul.bf16.gmra.mxu0 %v8501_v37  ;;  %v5616_v36 = vrot.slane %v5614_v24, 4  ;;  %v5619_v28 = vrot.slane %v5617_v16, 5  ;;  %v8494_v29 = vld [vmem:[#allocation4 + $0x1e4] sm:$0xf0]  ;;  %v5593_v47 = vld [vmem:[#allocation3 + $0x48] sm:$0xf] }
 0x445   : > { %v5281_v43 = vsel %vm10004_vm8, %v5276_v53, %v5280_v44  ;;  %v5515_v45 = vsel %vm9946_vm5, %v8257_v35, %v5514_v55  ;;  %v5557_v44 = vld [vmem:[#allocation3 + $0x30] sm:$0xf]  ;;  %v8492_v53 = vld [vmem:[#allocation4 + $0x1c0] sm:$0xf]  ;;  %v8497_v49 = vor.u32 %v9078_v11, %v8494_v29  ;;  %v5647_v33 = vshll.u32 %v5593_v47, 16 }
 0x446   : > { %5322 = vst [vmem:[#allocation4 + $0x20c] sm:$0xf] %v5281_v43  ;;  %v5620_v59 = vor.u32 %v5619_v28, %v5616_v36  ;;  %v8493_v57 = vor.u32 %v9082_v15, %v8492_v53  ;;  %v5651_v50 = vshrl.u32 %v5593_v47, 16  ;;  %v5596_v29 = vld [vmem:[#allocation3 + $0x5c] sm:$0xf] }
 0x447   : > { %5555 = vst [vmem:[#allocation4 + $0x210] sm:$0xf] %v5515_v45  ;;  %v5649_v8 = vrot.slane %v5647_v33, 5  ;;  %v5594_v45 = vld [vmem:[#allocation3 + $0x4c] sm:$0x1] }
 0x448   : > { %v6941_v40 = vpop.f32.mrf.mxu2  ;;  %5573 = vst [vmem:[#allocation4 + $0x1c] sm:$0xf] %v5557_v44  ;;  %v5621_v10 = vrot.slane %v5620_v59, 4  ;;  %v5653_v16 = vrot.slane %v5651_v50, 4  ;;  %v5657_v46 = vshll.u32 %v5594_v45, 16 }
 0x449   : > { %v6942_v32 = vadd.f32 %v6941_v40, %v6892_v27  ;;  %v6990_v61 = vpop.f32.mrf.mxu3  ;;  %v6895_v14 = vpop.f32.mrf.mxu1  ;;  %v5521_v27 = vshll.u32 %v5348_v51, 16  ;;  %v9091_v44 = vld [vmem:[#allocation4 + $0x228] sm:$0xf0]  ;;  %v9086_v34 = vld [vmem:[#allocation4 + $0x204] sm:$0xf] }
 0x44a   : > { %v5626_v40 = vsel %vm10004_vm8, %v5621_v10, %v5625_v18  ;;  %v5654_v36 = vor.u32 %v5653_v16, %v5649_v8  ;;  %v5659_v23 = vrot.slane %v5657_v46, 5  ;;  %v8522_v10 = vld [vmem:[#allocation4 + $0x224] sm:$0xf0]  ;;  %v5561_v16 = vld [vmem:[#allocation3 + $0x58] sm:$0xf] }
 0x44b   : > { %v10763_v60 = vadd.f32 %v6990_v61, %v6942_v32  ;;  %v5523_v21 = vor.u32 %v5521_v27, %v5520_v41  ;;  %5821 = vst [vmem:[#allocation4 + $0x20] sm:$0xf] %v5626_v40  ;;  %v8489_v32 = vor.u32 %v9077_v39, %v8486_v31  ;;  %v8525_v15 = vor.u32 %v9086_v34, %v8522_v10 }
 0x44c   : > { %7041 = vmatmul.bf16.gmra.mxu1 %v8453_v48  ;;  %v5630_v48 = vor.u32 %v5629_v63, %v5625_v18  ;;  %5577 = vst [vmem:[#allocation4 + $0xac] sm:$0xf] %v5561_v16  ;;  %v5601_v16 = vld [vmem:[#allocation3 + $0x80] sm:$0xf] }
 0x44d   : > { %7090 = vmatmul.bf16.gmra.mxu2 %v8457_v22  ;;  %v5524_v42 = vsel %vm9946_vm5, %v5516_v30, %v5523_v21  ;;  %v5635_v22 = vrot.slane %v5633_v56, 5 }
 0x44e   : > { %7139 = vmatmul.bf16.gmra.mxu3 %v8461_v12  ;;  %5556 = vst [vmem:[#allocation4 + $0x234] sm:$0xf] %v5524_v42  ;;  %v5631_v37 = vrot.slane %v5630_v48, 4  ;;  %v8536_v51 = vld [vmem:[#allocation4 + $0x210] sm:$0xf]  ;;  %v5655_v42 = vrot.slane %v5654_v36, 4 }
 0x44f   : > { %v5592_v12 = vld [vmem:[#allocation3 + $0x44] sm:$0xf]  ;;  %v9087_v48 = vld [vmem:[#allocation4 + $0x20c] sm:$0xf] }
 0x450   : > { %v6944_v4 = vpop.f32.mrf.mxu2  ;;  %v5636_v7 = vsel %vm10004_vm8, %v5631_v37, %v5635_v22  ;;  %v5638_v55 = vshrl.u32 %v5592_v12, 16  ;;  %v5641_v41 = vshll.u32 %v5592_v12, 16  ;;  %v5660_v63 = vsel %vm10004_vm8, %v5655_v42, %v5659_v23  ;;  %v8530_v22 = vld [vmem:[#allocation4 + $0x22c] sm:$0xf0]  ;;  %v8286_v23 = vld [vmem:[#allocation4 + $0x3c] sm:$0xf0] }
 0x451   : > { %v6945_v54 = vadd.f32 %v6944_v4, %v6895_v14  ;;  %v6993_v1 = vpop.f32.mrf.mxu3  ;;  %v6897_v9 = vpop.f32.mrf.mxu1  ;;  %5822 = vst [vmem:[#allocation4 + $0x44] sm:$0xf] %v5636_v7  ;;  %v8533_v40 = vor.u32 %v9087_v48, %v8530_v22  ;;  %v5595_v37 = vld [vmem:[#allocation3 + $0x58] sm:$0xf] }
 0x452   : > { %v5640_v27 = vrot.slane %v5638_v55, 4  ;;  %v5643_v24 = vrot.slane %v5641_v41, 5  ;;  %5824 = vst [vmem:[#allocation4 + $0x8c] sm:$0xf] %v5660_v63  ;;  %v5662_v7 = vshrl.u32 %v5595_v37, 16 }
 0x453   : > { %v10771_v26 = vadd.f32 %v6993_v1, %v6945_v54  ;;  %v5559_v54 = vld [vmem:[#allocation3 + $0x44] sm:$0xf]  ;;  %v5560_v1 = vld [vmem:[#allocation3 + $0x48] sm:$0xf]  ;;  %v5598_v63 = vld [vmem:[#allocation3 + $0x6c] sm:$0xf] }
 0x454   : > { %v5644_v21 = vor.u32 %v5643_v24, %v5640_v27  ;;  %5575 = vst [vmem:[#allocation4 + $0x64] sm:$0xf] %v5559_v54  ;;  %v5686_v34 = vshrl.u32 %v5598_v63, 16  ;;  %v5689_v10 = vshll.u32 %v5598_v63, 16 }
 0x455   : > { %v9092_v61 = vld [vmem:[#allocation4 + $0x230] sm:$0xf0]  ;;  %5576 = vst [vmem:[#allocation4 + $0x88] sm:$0xf] %v5560_v1 }
 0x456   : > { %v8537_v14 = vor.u32 %v9092_v61, %v8536_v51  ;;  %v5645_v28 = vrot.slane %v5644_v21, 4  ;;  %v5675_v61 = vshrl.u32 %v5596_v29, 16  ;;  %v5562_v21 = vld [vmem:[#allocation3 + $0x5c] sm:$0xf] }
 0x457   : > { %5578 = vst [vmem:[#allocation4 + $0xd0] sm:$0xf] %v5562_v21  ;;  %v5602_v21 = vld [vmem:[#allocation3 + $0x84] sm:$0xf] }
 0x458   : > { %v6946_v6 = vpop.f32.mrf.mxu2  ;;  %7198 = vmatmul.bf16.gmra.mxu0 %v8537_v14  ;;  %v5650_v52 = vsel %vm10004_vm8, %v5645_v28, %v5649_v8  ;;  %v5597_v14 = vld [vmem:[#allocation3 + $0x60] sm:$0x1]  ;;  %v5677_v12 = vrot.slane %v5675_v61, 4  ;;  %v9025_v28 = vld [vmem:[#allocation4 + $0x1c] sm:$0xf] }
 0x459   : > { %v6947_v43 = vadd.f32 %v6946_v6, %v6897_v9  ;;  %v6995_v13 = vpop.f32.mrf.mxu3  ;;  %v6900_v35 = vpop.f32.mrf.mxu1  ;;  %v8528_v9 = vld [vmem:[#allocation4 + $0x208] sm:$0xf]  ;;  %5823 = vst [vmem:[#allocation4 + $0x68] sm:$0xf] %v5650_v52  ;;  %v5665_v6 = vshll.u32 %v5595_v37, 16  ;;  %v8289_v1 = vor.u32 %v9025_v28, %v8286_v23  ;;  %v5719_v28 = vshll.u32 %v5602_v21, 16 }
 0x45a   : > { %v8529_v11 = vor.u32 %v9091_v44, %v8528_v9  ;;  %v5599_v9 = vld [vmem:[#allocation3 + $0x70] sm:$0xf]  ;;  %v5723_v23 = vshrl.u32 %v5602_v21, 16 }
 0x45b   : > { %v10777_v30 = vadd.f32 %v6995_v13, %v6947_v43  ;;  %v5664_v13 = vrot.slane %v5662_v7, 4  ;;  %v5695_v48 = vshll.u32 %v5599_v9, 16  ;;  %v5699_v22 = vshrl.u32 %v5599_v9, 16 }
 0x45c   : > { %7046 = vmatmul.bf16.gmra.mxu1 %v8489_v32  ;;  %v5671_v32 = vshll.u32 %v5596_v29, 16 }
 0x45d   : > { %7095 = vmatmul.bf16.gmra.mxu2 %v8493_v57  ;;  %v5667_v57 = vrot.slane %v5665_v6, 5  ;;  %v5701_v37 = vrot.slane %v5699_v22, 4 }
 0x45e   : > { %7144 = vmatmul.bf16.gmra.mxu3 %v8497_v49  ;;  %v5673_v49 = vrot.slane %v5671_v32, 5 }
 0x45f   : > { %v5668_v47 = vor.u32 %v5667_v57, %v5664_v13 }
 0x460   : > { %v6949_v3 = vpop.f32.mrf.mxu2  ;;  %v5678_v55 = vor.u32 %v5677_v12, %v5673_v49  ;;  %v5564_v12 = vld [vmem:[#allocation3 + $0x70] sm:$0xf] }
 0x461   : > { %v6950_v56 = vadd.f32 %v6949_v3, %v6900_v35  ;;  %v6998_v4 = vpop.f32.mrf.mxu3  ;;  %v6902_v18 = vpop.f32.mrf.mxu1  ;;  %v5681_v35 = vshll.u32 %v5597_v14, 16  ;;  %v5669_v33 = vrot.slane %v5668_v47, 4  ;;  %v5563_v14 = vld [vmem:[#allocation3 + $0x6c] sm:$0xf]  ;;  %5580 = vst [vmem:[#allocation4 + $0x118] sm:$0xf] %v5564_v12 }
 0x462   : > { %v5679_v8 = vrot.slane %v5678_v55, 4  ;;  %5579 = vst [vmem:[#allocation4 + $0xf4] sm:$0xf] %v5563_v14  ;;  %v9034_v55 = vld [vmem:[#allocation4 + $0x64] sm:$0xf] }
 0x463   : > { %v10781_v59 = vadd.f32 %v6998_v4, %v6950_v56  ;;  %v5683_v50 = vrot.slane %v5681_v35, 5  ;;  %v5674_v46 = vsel %vm10004_vm8, %v5669_v33, %v5673_v49  ;;  %v8292_v56 = vld [vmem:[#allocation4 + $0x20] sm:$0xf]  ;;  %v9030_v4 = vld [vmem:[#allocation4 + $0x40] sm:$0xf0] }
 0x464   : > { %5825 = vst [vmem:[#allocation4 + $0xb0] sm:$0xf] %v5674_v46  ;;  %v8293_v52 = vor.u32 %v9030_v4, %v8292_v56  ;;  %v8328_v33 = vld [vmem:[#allocation4 + $0x68] sm:$0xf]  ;;  %v5605_v14 = vld [vmem:[#allocation3 + $0x98] sm:$0xf] }
 0x465   : > { %v5684_v3 = vsel %vm10004_vm8, %v5679_v8, %v5683_v50  ;;  %v9039_v50 = vld [vmem:[#allocation4 + $0x88] sm:$0xf0] }
 0x466   : > { %5826 = vst [vmem:[#allocation4 + $0xd4] sm:$0xf] %v5684_v3  ;;  %v5713_v3 = vshll.u32 %v5601_v16, 16 }
 0x468   : > { %v6951_v39 = vpop.f32.mrf.mxu2 }
 0x469   : > { %v6952_v31 = vadd.f32 %v6951_v39, %v6902_v18  ;;  %v7000_v53 = vpop.f32.mrf.mxu3  ;;  %v6905_v51 = vpop.f32.mrf.mxu1 }
 0x46b   : > { %v10785_v43 = vadd.f32 %v7000_v53, %v6952_v31  ;;  %v5688_v53 = vrot.slane %v5686_v34, 4 }
 0x46c   : > { %7051 = vmatmul.bf16.gmra.mxu1 %v8525_v15  ;;  %v5691_v15 = vrot.slane %v5689_v10, 5 }
 0x46d   : > { %7100 = vmatmul.bf16.gmra.mxu2 %v8529_v11  ;;  %v5697_v11 = vrot.slane %v5695_v48, 5 }
 0x46e   : > { %7149 = vmatmul.bf16.gmra.mxu3 %v8533_v40  ;;  %v5600_v40 = vld [vmem:[#allocation3 + $0x74] sm:$0x1]  ;;  %v5692_v29 = vor.u32 %v5691_v15, %v5688_v53  ;;  %v5565_v53 = vld [vmem:[#allocation3 + $0x80] sm:$0xf]  ;;  %v5566_v15 = vld [vmem:[#allocation3 + $0x84] sm:$0xf] }
 0x46f   : > { %v5702_v7 = vor.u32 %v5701_v37, %v5697_v11  ;;  %5581 = vst [vmem:[#allocation4 + $0x13c] sm:$0xf] %v5565_v53  ;;  %v9043_v37 = vld [vmem:[#allocation4 + $0xac] sm:$0xf]  ;;  %v5608_v53 = vld [vmem:[#allocation3 + $0xac] sm:$0xf] }
 0x470   : > { %v6954_v41 = vpop.f32.mrf.mxu2  ;;  %v5693_v32 = vrot.slane %v5692_v29, 4  ;;  %5582 = vst [vmem:[#allocation4 + $0x160] sm:$0xf] %v5566_v15  ;;  %v8358_v29 = vld [vmem:[#allocation4 + $0xcc] sm:$0xf0] }
 0x471   : > { %v6955_v27 = vadd.f32 %v6954_v41, %v6905_v51  ;;  %v7003_v24 = vpop.f32.mrf.mxu3  ;;  %v6907_v45 = vpop.f32.mrf.mxu1  ;;  %v5705_v51 = vshll.u32 %v5600_v40, 16  ;;  %v5703_v57 = vrot.slane %v5702_v7, 4  ;;  %v8322_v41 = vld [vmem:[#allocation4 + $0x84] sm:$0xf0]  ;;  %v9048_v7 = vld [vmem:[#allocation4 + $0xd0] sm:$0xf0] }
 0x472   : > { %v8325_v8 = vor.u32 %v9034_v55, %v8322_v41 }
 0x473   : > { %v10789_v36 = vadd.f32 %v7003_v24, %v6955_v27  ;;  %v5707_v61 = vrot.slane %v5705_v51, 5  ;;  %v8364_v51 = vld [vmem:[#allocation4 + $0xb0] sm:$0xf] }
 0x475   : > { %v5708_v35 = vsel %vm10004_vm8, %v5703_v57, %v5707_v61  ;;  %v8361_v61 = vor.u32 %v9043_v37, %v8358_v29  ;;  %v8365_v57 = vor.u32 %v9048_v7, %v8364_v51 }
 0x476   : > { %5828 = vst [vmem:[#allocation4 + $0x11c] sm:$0xf] %v5708_v35  ;;  %v5747_v35 = vshrl.u32 %v5605_v14, 16 }
 0x478   : > { %v6956_v42 = vpop.f32.mrf.mxu2 }
 0x479   : > { %v6957_v18 = vadd.f32 %v6956_v42, %v6907_v45  ;;  %v7005_v54 = vpop.f32.mrf.mxu3  ;;  %v7017_v44 = vpop.f32.mrf.mxu1  ;;  %v8329_v45 = vor.u32 %v9039_v50, %v8328_v33  ;;  %v5715_v42 = vrot.slane %v5713_v3, 5 }
 0x47a   : > { %v7018_v31 = vadd.f32 %v7017_v44, %v10679_v5  ;;  %v5698_v5 = vsel %vm10004_vm8, %v5693_v32, %v5697_v11 }
 0x47b   : > { %v10793_v39 = vadd.f32 %v7005_v54, %v6957_v18  ;;  %5827 = vst [vmem:[#allocation4 + $0xf8] sm:$0xf] %v5698_v5  ;;  %v5721_v18 = vrot.slane %v5719_v28, 5  ;;  %v5603_v54 = vld [vmem:[#allocation3 + $0x88] sm:$0x1] }
 0x47c   : > { %7212 = vmatmul.bf16.vlgmr.msra.gmra.mxu1 %v8289_v1  ;;  %v5725_v1 = vrot.slane %v5723_v23, 4  ;;  %v5729_v63 = vshll.u32 %v5603_v54, 16 }
 0x47d   : > { %7261 = vmatmul.bf16.vlgmr.msra.gmra.mxu2 %v8293_v52 }
 0x47e   : > { %v5726_v9 = vor.u32 %v5725_v1, %v5721_v18  ;;  %v5731_v10 = vrot.slane %v5729_v63, 5  ;;  %v9052_v1 = vld [vmem:[#allocation4 + $0xf4] sm:$0xf] }
 0x480   : > { %v7066_v6 = vpop.f32.mrf.mxu2  ;;  %v5727_v22 = vrot.slane %v5726_v9, 4  ;;  %v9057_v9 = vld [vmem:[#allocation4 + $0x118] sm:$0xf0] }
 0x481   : > { %v10796_v13 = vadd.f32 %v7066_v6, %v7018_v31  ;;  %v7019_v49 = vpop.f32.mrf.mxu1 }
 0x482   : > { %v7020_v47 = vadd.f32 %v7019_v49, %v10687_v0  ;;  %v5710_v0 = vshrl.u32 %v5601_v16, 16  ;;  %v5732_v40 = vsel %vm10004_vm8, %v5727_v22, %v5731_v10  ;;  %v5604_v49 = vld [vmem:[#allocation3 + $0x94] sm:$0xf]  ;;  %v8400_v63 = vld [vmem:[#allocation4 + $0xf8] sm:$0xf] }
 0x483   : > { %5830 = vst [vmem:[#allocation4 + $0x164] sm:$0xf] %v5732_v40  ;;  %v5737_v5 = vshll.u32 %v5604_v49, 16  ;;  %v8401_v22 = vor.u32 %v9057_v9, %v8400_v63  ;;  %v5771_v40 = vshrl.u32 %v5608_v53, 16 }
 0x484   : > { %v5712_v4 = vrot.slane %v5710_v0, 4 }
 0x485   : > { %v5739_v33 = vrot.slane %v5737_v5, 5 }
 0x486   : > { %v5716_v52 = vor.u32 %v5715_v42, %v5712_v4  ;;  %v5567_v4 = vld [vmem:[#allocation3 + $0x94] sm:$0xf]  ;;  %v5568_v42 = vld [vmem:[#allocation3 + $0x98] sm:$0xf] }
 0x487   : > { %5583 = vst [vmem:[#allocation4 + $0x184] sm:$0xf] %v5567_v4  ;;  %v5611_v4 = vld [vmem:[#allocation3 + $0xc0] sm:$0xf] }
 0x488   : > { %v7068_v27 = vpop.f32.mrf.mxu2  ;;  %v5717_v34 = vrot.slane %v5716_v52, 4  ;;  %5584 = vst [vmem:[#allocation4 + $0x1a8] sm:$0xf] %v5568_v42  ;;  %v8394_v52 = vld [vmem:[#allocation4 + $0x114] sm:$0xf0] }
 0x489   : > { %v10803_v24 = vadd.f32 %v7068_v27, %v7020_v47  ;;  %v7022_v46 = vpop.f32.mrf.mxu1  ;;  %v5743_v47 = vshll.u32 %v5605_v14, 16  ;;  %v5606_v27 = vld [vmem:[#allocation3 + $0x9c] sm:$0x1]  ;;  %v8397_v10 = vor.u32 %v9052_v1, %v8394_v52 }
 0x48a   : > { %v7023_v56 = vadd.f32 %v7022_v46, %v10699_v2  ;;  %v5722_v2 = vsel %vm10004_vm8, %v5717_v34, %v5721_v18  ;;  %v5753_v16 = vshll.u32 %v5606_v27, 16 }
 0x48b   : > { %5829 = vst [vmem:[#allocation4 + $0x140] sm:$0xf] %v5722_v2  ;;  %v5745_v50 = vrot.slane %v5743_v47, 5 }
 0x48c   : > { %7217 = vmatmul.bf16.gmra.mxu1 %v8325_v8  ;;  %v5749_v8 = vrot.slane %v5747_v35, 4  ;;  %v5755_v3 = vrot.slane %v5753_v16, 5 }
 0x48d   : > { %7266 = vmatmul.bf16.gmra.mxu2 %v8329_v45 }
 0x48e   : > { %v5750_v21 = vor.u32 %v5749_v8, %v5745_v50  ;;  %v9061_v8 = vld [vmem:[#allocation4 + $0x13c] sm:$0xf] }
 0x490   : > { %v7071_v44 = vpop.f32.mrf.mxu2  ;;  %v5751_v23 = vrot.slane %v5750_v21, 4  ;;  %v9066_v21 = vld [vmem:[#allocation4 + $0x160] sm:$0xf0] }
 0x491   : > { %v10806_v48 = vadd.f32 %v7071_v44, %v7023_v56  ;;  %v7024_v31 = vpop.f32.mrf.mxu1 }
 0x492   : > { %v7025_v11 = vadd.f32 %v7024_v31, %v10709_v62  ;;  %v5734_v62 = vshrl.u32 %v5604_v49, 16  ;;  %v5756_v54 = vsel %vm10004_vm8, %v5751_v23, %v5755_v3  ;;  %v5607_v31 = vld [vmem:[#allocation3 + $0xa8] sm:$0xf] }
 0x493   : > { %5832 = vst [vmem:[#allocation4 + $0x1ac] sm:$0xf] %v5756_v54  ;;  %v5761_v2 = vshll.u32 %v5607_v31, 16  ;;  %v8436_v16 = vld [vmem:[#allocation4 + $0x140] sm:$0xf]  ;;  %v5795_v54 = vshrl.u32 %v5611_v4, 16 }
 0x494   : > { %v5736_v41 = vrot.slane %v5734_v62, 4  ;;  %v8437_v23 = vor.u32 %v9066_v21, %v8436_v16  ;;  %v7115_v16 = vpop.f32.mrf.mxu3 }
 0x495   : > { %v5763_v51 = vrot.slane %v5761_v2, 5 }
 0x496   : > { %v5740_v45 = vor.u32 %v5739_v33, %v5736_v41  ;;  %v5569_v41 = vld [vmem:[#allocation3 + $0xa8] sm:$0xf]  ;;  %v5570_v33 = vld [vmem:[#allocation3 + $0xac] sm:$0xf] }
 0x497   : > { %5585 = vst [vmem:[#allocation4 + $0x1cc] sm:$0xf] %v5569_v41 }
 0x498   : > { %v7073_v6 = vpop.f32.mrf.mxu2  ;;  %v5741_v0 = vrot.slane %v5740_v45, 4  ;;  %5586 = vst [vmem:[#allocation4 + $0x1f0] sm:$0xf] %v5570_v33  ;;  %v8430_v45 = vld [vmem:[#allocation4 + $0x15c] sm:$0xf0] }
 0x499   : > { %v10813_v32 = vadd.f32 %v7073_v6, %v7025_v11  ;;  %v7027_v12 = vpop.f32.mrf.mxu1  ;;  %v5767_v11 = vshll.u32 %v5608_v53, 16  ;;  %v5609_v6 = vld [vmem:[#allocation3 + $0xb0] sm:$0x1]  ;;  %v8433_v3 = vor.u32 %v9061_v8, %v8430_v45 }
 0x49a   : > { %v7028_v55 = vadd.f32 %v7027_v12, %v10717_v25  ;;  %v5746_v25 = vsel %vm10004_vm8, %v5741_v0, %v5745_v50  ;;  %v5777_v49 = vshll.u32 %v5609_v6, 16 }
 0x49b   : > { %5831 = vst [vmem:[#allocation4 + $0x188] sm:$0xf] %v5746_v25  ;;  %v5769_v7 = vrot.slane %v5767_v11, 5 }
 0x49c   : > { %7222 = vmatmul.bf16.gmra.mxu1 %v8361_v61  ;;  %v5773_v61 = vrot.slane %v5771_v40, 4  ;;  %v5779_v5 = vrot.slane %v5777_v49, 5 }
 0x49d   : > { %7271 = vmatmul.bf16.gmra.mxu2 %v8365_v57 }
 0x49e   : > { %v5774_v14 = vor.u32 %v5773_v61, %v5769_v7  ;;  %v9070_v61 = vld [vmem:[#allocation4 + $0x184] sm:$0xf] }
 0x4a0   : > { %v7076_v46 = vpop.f32.mrf.mxu2  ;;  %v5775_v35 = vrot.slane %v5774_v14, 4  ;;  %v9075_v14 = vld [vmem:[#allocation4 + $0x1a8] sm:$0xf0] }
 0x4a1   : > { %v10816_v28 = vadd.f32 %v7076_v46, %v7028_v55  ;;  %v7029_v56 = vpop.f32.mrf.mxu1 }
 0x4a2   : > { %v7030_v18 = vadd.f32 %v7029_v56, %v10725_v19  ;;  %v5758_v19 = vshrl.u32 %v5607_v31, 16  ;;  %v5780_v27 = vsel %vm10004_vm8, %v5775_v35, %v5779_v5  ;;  %v5610_v56 = vld [vmem:[#allocation3 + $0xbc] sm:$0xf]  ;;  %v8472_v49 = vld [vmem:[#allocation4 + $0x188] sm:$0xf] }
 0x4a3   : > { %5834 = vst [vmem:[#allocation4 + $0x1f4] sm:$0xf] %v5780_v27  ;;  %v5785_v25 = vshll.u32 %v5610_v56, 16  ;;  %v8473_v35 = vor.u32 %v9075_v14, %v8472_v49  ;;  %v8502_v27 = vld [vmem:[#allocation4 + $0x1ec] sm:$0xf0] }
 0x4a4   : > { %v5760_v29 = vrot.slane %v5758_v19, 4  ;;  %v10867_v49 = vld [vmem:[%s11050_s19] ss:$0 sm:$0xff]  ;;  %s9493_s19 = sshra.s32 %s7428_s23, 4  ;;  %s9494_s19 = int_to_ptr.hbm [resolvable:$true] %s9493_s19 }
 0x4a5   : > { %v5787_v63 = vrot.slane %v5785_v25, 5  ;;  %s9495_s22 = scalar_lea.hbm %s9494_s19, 128  ;;  %p9500_p3 = scmp.lt.s32.totalorder %s9494_s19, %s11053_s16 }
 0x4a6   : > { %v5764_v57 = vor.u32 %v5763_v51, %v5760_v29  ;;  %v5571_v29 = vld [vmem:[#allocation3 + $0xbc] sm:$0xf]  ;;  %v5572_v51 = vld [vmem:[#allocation3 + $0xc0] sm:$0xf]  ;;  %p9496_p4 = scmp.ne.s32.totalorder %s9494_s19, %s9495_s22 }
 0x4a7   : > { %5587 = vst [vmem:[#allocation4 + $0x214] sm:$0xf] %v5571_v29 }
 0x4a8   : > { %v7078_v44 = vpop.f32.mrf.mxu2  ;;  %v5765_v62 = vrot.slane %v5764_v57, 4  ;;  %5588 = vst [vmem:[#allocation4 + $0x238] sm:$0xf] %v5572_v51  ;;  %v8466_v57 = vld [vmem:[#allocation4 + $0x1a4] sm:$0xf0]  ;;  %p9497_p0 = pnand %p9496_p4, %p9728_p6 }
 0x4a9   : > { %v10823_v34 = vadd.f32 %v7078_v44, %v7030_v18  ;;  %v7032_v15 = vpop.f32.mrf.mxu1  ;;  %v5791_v18 = vshll.u32 %v5611_v4, 16  ;;  %v5612_v44 = vld [vmem:[#allocation3 + $0xc4] sm:$0x1]  ;;  %v8469_v5 = vor.u32 %v9070_v61, %v8466_v57  ;;  %v7164_v4 = vpop.f32.mrf.mxu0 }
 0x4aa   : > { %v7033_v37 = vadd.f32 %v7032_v15, %v10737_v17  ;;  %v5770_v17 = vsel %vm10004_vm8, %v5765_v62, %v5769_v7  ;;  %v5801_v31 = vshll.u32 %v5612_v44, 16  ;;  %v9084_v45 = vld [vmem:[#allocation4 + $0x1f0] sm:$0xf0]  ;;  %p9498_p2 = pneg %p9497_p0 }
 0x4ab   : > { %5833 = vst [vmem:[#allocation4 + $0x1d0] sm:$0xf] %v5770_v17  ;;  %v5793_v9 = vrot.slane %v5791_v18, 5 }
 0x4ac   : > { %7227 = vmatmul.bf16.gmra.mxu1 %v8397_v10  ;;  %v5797_v10 = vrot.slane %v5795_v54, 4  ;;  %v5803_v2 = vrot.slane %v5801_v31, 5 }
 0x4ad   : > { %7276 = vmatmul.bf16.gmra.mxu2 %v8401_v22 }
 0x4ae   : > { %v5798_v53 = vor.u32 %v5797_v10, %v5793_v9  ;;  %v9088_v54 = vld [vmem:[#allocation4 + $0x214] sm:$0xf] }
 0x4b0   : > { %v7081_v12 = vpop.f32.mrf.mxu2  ;;  %v5799_v40 = vrot.slane %v5798_v53, 4 }
 0x4b1   : > { %v10826_v47 = vadd.f32 %v7081_v12, %v7033_v37  ;;  %v7034_v55 = vpop.f32.mrf.mxu1 }
 0x4b2   : > { %v7035_v50 = vadd.f32 %v7034_v55, %v10747_v58  ;;  %v5782_v58 = vshrl.u32 %v5610_v56, 16  ;;  %v5804_v6 = vsel %vm10004_vm8, %v5799_v40, %v5803_v2  ;;  %v8508_v8 = vld [vmem:[#allocation4 + $0x1d0] sm:$0xf] }
 0x4b3   : > { %5836 = vst [vmem:[#allocation4 + $0x23c] sm:$0xf] %v5804_v6 }
 0x4b4   : > { %v5784_v52 = vrot.slane %v5782_v58, 4 }
 0x4b6   : > { %v5788_v22 = vor.u32 %v5787_v63, %v5784_v52  ;;  %v8538_v52 = vld [vmem:[#allocation4 + $0x234] sm:$0xf0] }
 0x4b8   : > { %v7083_v46 = vpop.f32.mrf.mxu2  ;;  %v5789_v19 = vrot.slane %v5788_v22, 4  ;;  %v8541_v22 = vor.u32 %v9088_v54, %v8538_v52 }
 0x4b9   : > { %v10833_v0 = vadd.f32 %v7083_v46, %v7035_v50  ;;  %v7037_v42 = vpop.f32.mrf.mxu1  ;;  %v9079_v50 = vld [vmem:[#allocation4 + $0x1cc] sm:$0xf] }
 0x4ba   : > { %v7038_v1 = vadd.f32 %v7037_v42, %v10755_v20  ;;  %v5794_v20 = vsel %vm10004_vm8, %v5789_v19, %v5793_v9  ;;  %v9093_v9 = vld [vmem:[#allocation4 + $0x238] sm:$0xf0] }
 0x4bb   : > { %5835 = vst [vmem:[#allocation4 + $0x218] sm:$0xf] %v5794_v20  ;;  %v7116_v20 = vadd.f32 %v7115_v16, %v10796_v13  ;;  %v10873_v13 = vld [vmem:[%s11051_s20] ss:$0 sm:$0xff]  ;;  %s9499_s20 = scalar_lea.hbm %s11053_s16, 512 }
 0x4bc   : > { %7232 = vmatmul.bf16.gmra.mxu1 %v8433_v3  ;;  %v8505_v3 = vor.u32 %v9079_v50, %v8502_v27  ;;  %p9501_p5 = scmp.lt.s32.totalorder %s9499_s20, %s9495_s22 }
 0x4bd   : > { %7281 = vmatmul.bf16.gmra.mxu2 %v8437_v23  ;;  %v8509_v23 = vor.u32 %v9084_v45, %v8508_v8 }
 0x4be   : > { %p9502_p7 = por %p9501_p5, %p9500_p3 }
 0x4c0   : > { %v7086_v15 = vpop.f32.mrf.mxu2  ;;  %p9503_p8 = pnand %p9502_p7, %p9498_p2 }
 0x4c1   : > { %v10836_v11 = vadd.f32 %v7086_v15, %v7038_v1  ;;  %v7039_v37 = vpop.f32.mrf.mxu1  ;;  %v7166_v1 = vpop.f32.mrf.mxu0 }
 0x4c2   : > { %v7040_v7 = vadd.f32 %v7039_v37, %v10763_v60  ;;  %v8544_v63 = vld [vmem:[#allocation4 + $0x218] sm:$0xf] }
 0x4c8   : > { %v7088_v12 = vpop.f32.mrf.mxu2 }
 0x4c9   : > { %v10843_v62 = vadd.f32 %v7088_v12, %v7040_v7  ;;  %v7042_v55 = vpop.f32.mrf.mxu1  ;;  %v7169_v19 = vpop.f32.mrf.mxu0 }
 0x4ca   : > { %v7043_v41 = vadd.f32 %v7042_v55, %v10771_v26 }
 0x4cc   : > { %7237 = vmatmul.bf16.gmra.mxu1 %v8469_v5 }
 0x4cd   : > { %7286 = vmatmul.bf16.gmra.mxu2 %v8473_v35 }
 0x4d0   : > { %v7091_v60 = vpop.f32.mrf.mxu2 }
 0x4d1   : > { %v10846_v38 = vadd.f32 %v7091_v60, %v7043_v41  ;;  %v7044_v33 = vpop.f32.mrf.mxu1  ;;  %v7171_v6 = vpop.f32.mrf.mxu0  ;;  %v8836_v60 = vld [vmem:[%s9927_s15 + $0x20] sm:$0xff] }
 0x4d2   : > { %v7045_v17 = vadd.f32 %v7044_v33, %v10777_v30  ;;  %v7117_v30 = vpop.f32.mrf.mxu3 }
 0x4d8   : > { %v7093_v21 = vpop.f32.mrf.mxu2 }
 0x4d9   : > { %v10849_v46 = vadd.f32 %v7093_v21, %v7045_v17  ;;  %v7047_v56 = vpop.f32.mrf.mxu1  ;;  %v7174_v41 = vpop.f32.mrf.mxu0 }
 0x4da   : > { %v7048_v26 = vadd.f32 %v7047_v56, %v10781_v59  ;;  %v8545_v59 = vor.u32 %v9093_v9, %v8544_v63  ;;  %v7120_v15 = vpop.f32.mrf.mxu3  ;;  %v8837_v56 = vld [vmem:[%s9927_s15 + $0x28] sm:$0xff] }
 0x4dc   : > { %7242 = vmatmul.bf16.gmra.mxu1 %v8505_v3 }
 0x4dd   : > { %7291 = vmatmul.bf16.gmra.mxu2 %v8509_v23 }
 0x4e0   : > { %v7096_v42 = vpop.f32.mrf.mxu2 }
 0x4e1   : > { %v10852_v58 = vadd.f32 %v7096_v42, %v7048_v26  ;;  %v7049_v25 = vpop.f32.mrf.mxu1  ;;  %v7176_v42 = vpop.f32.mrf.mxu0 }
 0x4e2   : > { %v7050_v18 = vadd.f32 %v7049_v25, %v10785_v43  ;;  %v7122_v29 = vpop.f32.mrf.mxu3 }
 0x4e3   : > { %v7123_v54 = vadd.f32 %v7122_v29, %v10813_v32 }
 0x4e8   : > { %v7098_v44 = vpop.f32.mrf.mxu2 }
 0x4e9   : > { %v10855_v10 = vadd.f32 %v7098_v44, %v7050_v18  ;;  %v7052_v31 = vpop.f32.mrf.mxu1  ;;  %v8838_v44 = vld [vmem:[%s9927_s15 + $0x30] sm:$0xff] }
 0x4ea   : > { %v7053_v53 = vadd.f32 %v7052_v31, %v10789_v36  ;;  %v7165_v36 = vadd.f32 %v7164_v4, %v7116_v20  ;;  %v7125_v14 = vpop.f32.mrf.mxu3 }
 0x4ec   : > { %7247 = vmatmul.bf16.gmra.mxu1 %v8541_v22  ;;  %v7172_v22 = vadd.f32 %v7171_v6, %v7123_v54 }
 0x4ed   : > { %7296 = vmatmul.bf16.gmra.mxu2 %v8545_v59 }
 0x4f0   : > { %v7101_v2 = vpop.f32.mrf.mxu2 }
 0x4f1   : > { %v10858_v40 = vadd.f32 %v7101_v2, %v7053_v53  ;;  %v7054_v43 = vpop.f32.mrf.mxu1  ;;  %v7126_v2 = vadd.f32 %v7125_v14, %v10816_v28 }
 0x4f2   : > { %v7055_v37 = vadd.f32 %v7054_v43, %v10793_v39  ;;  %v7118_v39 = vadd.f32 %v7117_v30, %v10803_v24  ;;  %v7121_v24 = vadd.f32 %v7120_v15, %v10806_v48  ;;  %v7127_v21 = vpop.f32.mrf.mxu3  ;;  %v7179_v15 = vpop.f32.mrf.mxu0 }
 0x4f3   : > { %v7175_v20 = vadd.f32 %v7174_v41, %v7126_v2 }
 0x4f4   : > { %v7167_v33 = vadd.f32 %v7166_v1, %v7118_v39  ;;  %v7170_v26 = vadd.f32 %v7169_v19, %v7121_v24  ;;  %v7128_v39 = vadd.f32 %v7127_v21, %v10823_v34 }
 0x4f8   : > { %v7103_v51 = vpop.f32.mrf.mxu2 }
 0x4f9   : > { %v10862_v7 = vadd.f32 %v7103_v51, %v7055_v37  ;;  %v7213_v61 = vpop.f32.mrf.mxu1  ;;  %v8839_v51 = vld [vmem:[%s9927_s15 + $0x38] sm:$0xff] }
 0x4fa   : > { %v7214_v57 = vadd.f32 %v7213_v61, %v7165_v36  ;;  %v7130_v9 = vpop.f32.mrf.mxu3  ;;  %v7181_v14 = vpop.f32.mrf.mxu0 }
 0x4fb   : > { %v7131_v24 = vadd.f32 %v7130_v9, %v10826_v47 }
 0x500   : > { %v7262_v12 = vpop.f32.mrf.mxu2 }
 0x501   : > { %v7263_v5 = vadd.f32 %v7262_v12, %v7214_v57  ;;  %v7215_v35 = vpop.f32.mrf.mxu1 }
 0x502   : > { %v7216_v27 = vadd.f32 %v7215_v35, %v7167_v33  ;;  %v7132_v61 = vpop.f32.mrf.mxu3  ;;  %v7177_v33 = vadd.f32 %v7176_v42, %v7128_v39 }
 0x503   : > { %v7306_v55 = vmul.f32 %v10867_v49, %v7263_v5 }
 0x505   : > { %v7326_v17 = vadd.f32 %v10873_v13, %v7306_v55 }
 0x507   : > { %v7361_v50 = vadd.f32 %v8836_v60, %v7326_v17  ;;  %v8840_v60 = vld [vmem:[%s9927_s15 + $0x40] sm:$0xff] }
 0x508   : > { %v7264_v8 = vpop.f32.mrf.mxu2 }
 0x509   : > { %v7377_v45 = vmax.f32 %v7361_v50, 0.0  ;;  %v7265_v16 = vadd.f32 %v7264_v8, %v7216_v27  ;;  %v7218_v3 = vpop.f32.mrf.mxu1 }
 0x50a   : > { %v7219_v25 = vadd.f32 %v7218_v3, %v7170_v26  ;;  %v7135_v27 = vpop.f32.mrf.mxu3  ;;  %v7184_v3 = vpop.f32.mrf.mxu0 }
 0x50b   : > { %7393 = vst [vmem:[%s9805_s8] sm:$0xff] %v7377_v45  ;;  %v7307_v23 = vmul.f32 %v10867_v49, %v7265_v16 }
 0x50d   : > { %v7327_v4 = vadd.f32 %v10873_v13, %v7307_v23  ;;  %v8841_v23 = vld [vmem:[%s9927_s15 + $0x48] sm:$0xff] }
 0x50f   : > { %v7362_v30 = vadd.f32 %v8837_v56, %v7327_v4  ;;  %v7180_v56 = vadd.f32 %v7179_v15, %v7131_v24  ;;  %v8845_v24 = vld [vmem:[%s9927_s15 + $0x68] sm:$0xff] }
 0x510   : > { %v7267_v18 = vpop.f32.mrf.mxu2 }
 0x511   : > { %v7378_v48 = vmax.f32 %v7362_v30, 0.0  ;;  %v7268_v1 = vadd.f32 %v7267_v18, %v7219_v25  ;;  %v7220_v52 = vpop.f32.mrf.mxu1  ;;  %v7133_v25 = vadd.f32 %v7132_v61, %v10833_v0 }
 0x512   : > { %v7221_v53 = vadd.f32 %v7220_v52, %v7172_v22  ;;  %v7137_v54 = vpop.f32.mrf.mxu3  ;;  %v8842_v52 = vld [vmem:[%s9927_s15 + $0x50] sm:$0xff] }
 0x513   : > { %7394 = vst [vmem:[%s9805_s8 + $0x8] sm:$0xff] %v7378_v48  ;;  %v7308_v63 = vmul.f32 %v10867_v49, %v7268_v1 }
 0x515   : > { %v7328_v59 = vadd.f32 %v10873_v13, %v7308_v63  ;;  %v7182_v63 = vadd.f32 %v7181_v14, %v7133_v25  ;;  %v8846_v25 = vld [vmem:[%s9927_s15 + $0x70] sm:$0xff] }
 0x517   : > { %v7363_v31 = vadd.f32 %v8838_v44, %v7328_v59  ;;  %v7186_v44 = vpop.f32.mrf.mxu0 }
 0x518   : > { %v7269_v19 = vpop.f32.mrf.mxu2 }
 0x519   : > { %v7379_v32 = vmax.f32 %v7363_v31, 0.0  ;;  %v7270_v43 = vadd.f32 %v7269_v19, %v7221_v53  ;;  %v7223_v37 = vpop.f32.mrf.mxu1  ;;  %v7136_v53 = vadd.f32 %v7135_v27, %v10836_v11 }
 0x51a   : > { %v7224_v57 = vadd.f32 %v7223_v37, %v7175_v20 }
 0x51b   : > { %7395 = vst [vmem:[%s9805_s8 + $0x10] sm:$0xff] %v7379_v32  ;;  %v7309_v29 = vmul.f32 %v10867_v49, %v7270_v43  ;;  %v7140_v32 = vpop.f32.mrf.mxu3  ;;  %v8843_v43 = vld [vmem:[%s9927_s15 + $0x58] sm:$0xff]  ;;  %v7185_v37 = vadd.f32 %v7184_v3, %v7136_v53 }
 0x51d   : > { %v7329_v6 = vadd.f32 %v10873_v13, %v7309_v29 }
 0x51f   : > { %v7364_v36 = vadd.f32 %v8839_v51, %v7329_v6  ;;  %v7189_v6 = vpop.f32.mrf.mxu0 }
 0x520   : > { %v7272_v12 = vpop.f32.mrf.mxu2 }
 0x521   : > { %v7380_v5 = vmax.f32 %v7364_v36, 0.0  ;;  %v7273_v28 = vadd.f32 %v7272_v12, %v7224_v57  ;;  %v7225_v35 = vpop.f32.mrf.mxu1  ;;  %v7138_v36 = vadd.f32 %v7137_v54, %v10843_v62 }
 0x522   : > { %v7226_v50 = vadd.f32 %v7225_v35, %v7177_v33 }
 0x523   : > { %7396 = vst [vmem:[%s9805_s8 + $0x18] sm:$0xff] %v7380_v5  ;;  %v7310_v55 = vmul.f32 %v10867_v49, %v7273_v28  ;;  %v8844_v5 = vld [vmem:[%s9927_s15 + $0x60] sm:$0xff]  ;;  %v7187_v28 = vadd.f32 %v7186_v44, %v7138_v36  ;;  %v7142_v35 = vpop.f32.mrf.mxu3 }
 0x525   : > { %v7330_v41 = vadd.f32 %v10873_v13, %v7310_v55 }
 0x527   : > { %v7365_v17 = vadd.f32 %v8840_v60, %v7330_v41  ;;  %v7141_v41 = vadd.f32 %v7140_v32, %v10846_v38 }
 0x528   : > { %v7274_v8 = vpop.f32.mrf.mxu2 }
 0x529   : > { %v7381_v34 = vmax.f32 %v7365_v17, 0.0  ;;  %v7275_v45 = vadd.f32 %v7274_v8, %v7226_v50  ;;  %v7228_v16 = vpop.f32.mrf.mxu1  ;;  %v7191_v50 = vpop.f32.mrf.mxu0 }
 0x52a   : > { %v7229_v42 = vadd.f32 %v7228_v16, %v7180_v56  ;;  %v7143_v56 = vadd.f32 %v7142_v35, %v10849_v46  ;;  %v8849_v35 = vld [vmem:[%s9927_s15 + $0x88] sm:$0xff] }
 0x52b   : > { %7397 = vst [vmem:[%s9805_s8 + $0x20] sm:$0xff] %v7381_v34  ;;  %v7311_v21 = vmul.f32 %v10867_v49, %v7275_v45  ;;  %v7190_v34 = vadd.f32 %v7189_v6, %v7141_v41  ;;  %v7145_v3 = vpop.f32.mrf.mxu3 }
 0x52d   : > { %v7331_v26 = vadd.f32 %v10873_v13, %v7311_v21 }
 0x52f   : > { %v7366_v4 = vadd.f32 %v8841_v23, %v7331_v26 }
 0x530   : > { %v7277_v30 = vpop.f32.mrf.mxu2 }
 0x531   : > { %v7382_v18 = vmax.f32 %v7366_v4, 0.0  ;;  %v7278_v47 = vadd.f32 %v7277_v30, %v7229_v42  ;;  %v7230_v48 = vpop.f32.mrf.mxu1  ;;  %v7194_v30 = vpop.f32.mrf.mxu0 }
 0x532   : > { %v7231_v59 = vadd.f32 %v7230_v48, %v7182_v63 }
 0x533   : > { %7398 = vst [vmem:[%s9805_s8 + $0x28] sm:$0xff] %v7382_v18  ;;  %v7312_v1 = vmul.f32 %v10867_v49, %v7278_v47  ;;  %v7192_v18 = vadd.f32 %v7191_v50, %v7143_v56 }
 0x535   : > { %v7332_v9 = vadd.f32 %v10873_v13, %v7312_v1 }
 0x537   : > { %v7367_v22 = vadd.f32 %v8842_v52, %v7332_v9  ;;  %v7146_v52 = vadd.f32 %v7145_v3, %v10852_v58  ;;  %v7147_v9 = vpop.f32.mrf.mxu3 }
 0x538   : > { %v7279_v31 = vpop.f32.mrf.mxu2  ;;  %v7148_v32 = vadd.f32 %v7147_v9, %v10855_v10 }
 0x539   : > { %v7383_v0 = vmax.f32 %v7367_v22, 0.0  ;;  %v7280_v15 = vadd.f32 %v7279_v31, %v7231_v59  ;;  %v7233_v19 = vpop.f32.mrf.mxu1  ;;  %v8847_v59 = vld [vmem:[%s9927_s15 + $0x78] sm:$0xff]  ;;  %v7195_v31 = vadd.f32 %v7194_v30, %v7146_v52 }
 0x53a   : > { %v7234_v20 = vadd.f32 %v7233_v19, %v7185_v37 }
 0x53b   : > { %7399 = vst [vmem:[%s9805_s8 + $0x30] sm:$0xff] %v7383_v0  ;;  %v7313_v2 = vmul.f32 %v10867_v49, %v7280_v15  ;;  %v7196_v0 = vpop.f32.mrf.mxu0 }
 0x53c   : > { %v7197_v6 = vadd.f32 %v7196_v0, %v7148_v32 }
 0x53d   : > { %v7333_v29 = vadd.f32 %v10873_v13, %v7313_v2 }
 0x53f   : > { %v7368_v51 = vadd.f32 %v8843_v43, %v7333_v29 }
 0x540   : > { %v7282_v61 = vpop.f32.mrf.mxu2 }
 0x541   : > { %v7384_v11 = vmax.f32 %v7368_v51, 0.0  ;;  %v7283_v57 = vadd.f32 %v7282_v61, %v7234_v20  ;;  %v7235_v12 = vpop.f32.mrf.mxu1  ;;  %v7150_v51 = vpop.f32.mrf.mxu3  ;;  %v8848_v20 = vld [vmem:[%s9927_s15 + $0x80] sm:$0xff] }
 0x542   : > { %v7236_v60 = vadd.f32 %v7235_v12, %v7187_v28 }
 0x543   : > { %7400 = vst [vmem:[%s9805_s8 + $0x38] sm:$0xff] %v7384_v11  ;;  %v7314_v39 = vmul.f32 %v10867_v49, %v7283_v57  ;;  %v7199_v57 = vpop.f32.mrf.mxu0 }
 0x545   : > { %v7334_v14 = vadd.f32 %v10873_v13, %v7314_v39  ;;  %v7151_v39 = vadd.f32 %v7150_v51, %v10858_v40 }
 0x547   : > { %v7369_v55 = vadd.f32 %v8844_v5, %v7334_v14 }
 0x548   : > { %v7284_v33 = vpop.f32.mrf.mxu2 }
 0x549   : > { %v7385_v17 = vmax.f32 %v7369_v55, 0.0  ;;  %v7285_v62 = vadd.f32 %v7284_v33, %v7236_v60  ;;  %v7238_v27 = vpop.f32.mrf.mxu1  ;;  %v7200_v55 = vadd.f32 %v7199_v57, %v7151_v39  ;;  %v7152_v33 = vpop.f32.mrf.mxu3 }
 0x54a   : > { %v7239_v21 = vadd.f32 %v7238_v27, %v7190_v34  ;;  %v7153_v40 = vadd.f32 %v7152_v33, %v10862_v7  ;;  %v8850_v34 = vld [vmem:[%s9927_s15 + $0x90] sm:$0xff] }
 0x54b   : > { %7401 = vst [vmem:[%s9805_s8 + $0x40] sm:$0xff] %v7385_v17  ;;  %v7315_v8 = vmul.f32 %v10867_v49, %v7285_v62 }
 0x54d   : > { %v7335_v45 = vadd.f32 %v10873_v13, %v7315_v8  ;;  %v7201_v8 = vpop.f32.mrf.mxu0 }
 0x54f   : > { %v7370_v16 = vadd.f32 %v8845_v24, %v7335_v45 }
 0x550   : > { %v7287_v23 = vpop.f32.mrf.mxu2 }
 0x551   : > { %v7386_v38 = vmax.f32 %v7370_v16, 0.0  ;;  %v7288_v26 = vadd.f32 %v7287_v23, %v7239_v21  ;;  %v7240_v4 = vpop.f32.mrf.mxu1  ;;  %v7202_v16 = vadd.f32 %v7201_v8, %v7153_v40 }
 0x552   : > { %v7241_v48 = vadd.f32 %v7240_v4, %v7192_v18  ;;  %v8851_v4 = vld [vmem:[%s9927_s15 + $0x98] sm:$0xff] }
 0x553   : > { %7402 = vst [vmem:[%s9805_s8 + $0x48] sm:$0xff] %v7386_v38  ;;  %v7316_v42 = vmul.f32 %v10867_v49, %v7288_v26 }
 0x555   : > { %v7336_v47 = vadd.f32 %v10873_v13, %v7316_v42 }
 0x557   : > { %v7371_v54 = vadd.f32 %v8846_v25, %v7336_v47 }
 0x558   : > { %v7289_v1 = vpop.f32.mrf.mxu2 }
 0x559   : > { %v7387_v63 = vmax.f32 %v7371_v54, 0.0  ;;  %v7290_v46 = vadd.f32 %v7289_v1, %v7241_v48  ;;  %v7243_v44 = vpop.f32.mrf.mxu1 }
 0x55a   : > { %v7244_v19 = vadd.f32 %v7243_v44, %v7195_v31 }
 0x55b   : > { %7403 = vst [vmem:[%s9805_s8 + $0x50] sm:$0xff] %v7387_v63  ;;  %v7317_v22 = vmul.f32 %v10867_v49, %v7290_v46 }
 0x55d   : > { %v7337_v53 = vadd.f32 %v10873_v13, %v7317_v22 }
 0x55f   : > { %v7372_v15 = vadd.f32 %v8847_v59, %v7337_v53 }
 0x560   : > { %v7292_v2 = vpop.f32.mrf.mxu2 }
 0x561   : > { %v7388_v58 = vmax.f32 %v7372_v15, 0.0  ;;  %v7293_v43 = vadd.f32 %v7292_v2, %v7244_v19  ;;  %v7245_v37 = vpop.f32.mrf.mxu1 }
 0x562   : > { %v7246_v11 = vadd.f32 %v7245_v37, %v7197_v6 }
 0x563   : > { %7404 = vst [vmem:[%s9805_s8 + $0x58] sm:$0xff] %v7388_v58  ;;  %v7318_v29 = vmul.f32 %v10867_v49, %v7293_v43 }
 0x565   : > { %v7338_v61 = vadd.f32 %v10873_v13, %v7318_v29 }
 0x567   : > { %v7373_v36 = vadd.f32 %v8848_v20, %v7338_v61 }
 0x568   : > { %v7294_v12 = vpop.f32.mrf.mxu2 }
 0x569   : > { %v7389_v10 = vmax.f32 %v7373_v36, 0.0  ;;  %v7295_v5 = vadd.f32 %v7294_v12, %v7246_v11  ;;  %v7248_v28 = vpop.f32.mrf.mxu1 }
 0x56a   : > { %v7249_v17 = vadd.f32 %v7248_v28, %v7200_v55 }
 0x56b   : > { %7405 = vst [vmem:[%s9805_s8 + $0x60] sm:$0xff] %v7389_v10  ;;  %v7319_v14 = vmul.f32 %v10867_v49, %v7295_v5 }
 0x56d   : > { %v7339_v60 = vadd.f32 %v10873_v13, %v7319_v14 }
 0x56f   : > { %v7374_v41 = vadd.f32 %v8849_v35, %v7339_v60 }
 0x570   : > { %v7297_v62 = vpop.f32.mrf.mxu2 }
 0x571   : > { %v7390_v50 = vmax.f32 %v7374_v41, 0.0  ;;  %v7298_v27 = vadd.f32 %v7297_v62, %v7249_v17  ;;  %v7250_v45 = vpop.f32.mrf.mxu1 }
 0x572   : > { %v7251_v23 = vadd.f32 %v7250_v45, %v7202_v16 }
 0x573   : > { %7406 = vst [vmem:[%s9805_s8 + $0x68] sm:$0xff] %v7390_v50  ;;  %v7320_v24 = vmul.f32 %v10867_v49, %v7298_v27 }
 0x575   : > { %v7340_v21 = vadd.f32 %v10873_v13, %v7320_v24 }
 0x577   : > { %v7375_v3 = vadd.f32 %v8850_v34, %v7340_v21 }
 0x578   : > { %v7299_v7 = vpop.f32.mrf.mxu2 }
 0x579   : > { %v7391_v56 = vmax.f32 %v7375_v3, 0.0  ;;  %v7300_v38 = vadd.f32 %v7299_v7, %v7251_v23 }
 0x57b   : > { %7407 = vst [vmem:[%s9805_s8 + $0x70] sm:$0xff] %v7391_v56  ;;  %v7321_v26 = vmul.f32 %v10867_v49, %v7300_v38 }
 0x57d   : > { %v7341_v42 = vadd.f32 %v10873_v13, %v7321_v26 }
 0x57f   : > { %v7376_v30 = vadd.f32 %v8851_v4, %v7341_v42 }
 0x581   : > { %v7392_v25 = vmax.f32 %v7376_v30, 0.0 }
 0x583   : > { %7408 = vst [vmem:[%s9805_s8 + $0x78] sm:$0xff] %v7392_v25 }
 0x584   : > { %9506 = shalt.err (!%p9503_p8)
}
 0x585   : > { %s9616_s5 = smov 128   ;;  %s9617_s8 = smov 8  }
 0x586   : > { %9263 = dma.vmem_to_hbm [thread:$0]  (%p9728_p6), %s7426_s1, 2048, %s7428_s23, %s7410_s13, %s9616_s5, %s9616_s5, %s9617_s8  }
 0x587 PF: > { %s11055_s2 = sld [smem:[#allocation15_spill]]  ;;  %p9285_p9 = scmp.ge.s32.totalorder %s9605_s11, 2 }
 0x589   : > { %p9277_p12 = pnand %p9285_p9, %p9734_p10 }
 0x58b   : > { %p9278_p13 = pneg %p9277_p12 }
 0x58d   : > { %s7442_s7 = sand.u32 1, %s11055_s2  }
 0x58e   : > { %s7443_s30 = scalar_lea.sflag [#allocation7], %s7442_s7 }
 0x58f   : > { %9560 = dma.done.wait (%p9278_p13), %s7443_s30, 2048  }
 0x590   : > { %9562 = vsyncadd (%p9278_p13), %s7443_s30, 4294965248  ;;  %s24_s11 = sadd.s32 1, %s9605_s11   ;;  %s11057_s30 = sld [smem:[#allocation17_spill]] }
 0x591   : > { %p21_p11 = scmp.ge.s32.totalorder %s24_s11, 6   ;;  %s11058_s14 = sld [smem:[#allocation20_spill]] }
 0x592   : > { %s11059_s18 = sld [smem:[#allocation21_spill]]  ;;  %s11060_s24 = smov %s9569_s25 }
 0x593   : > { %s11061_s25 = smov %s9573_s26  ;;  %s11062_s26 = smov %s9779_s9 }
 0x594   : > { %s11063_s27 = smov %s9581_s28  ;;  %s11064_s28 = smov %s9585_s29 }
 0x595   : > { %s11065_s29 = smov %s9776_s17  ;;  %s11066_s8 = smov %s9601_s10 }
 0x596   :  { %23 = sbr.rel (!%p21_p11) target bundleno = 16 (0x10), region = 120 }
 0x597   : > { %s11067_s9 = smov %s11058_s14 }
 0x598   : > { %s11068_s10 = smov %s11059_s18 }
 0x59b   :  { %7449 = vsyncpa [#allocation6], 1 }
 0x59c   :  { %7451 = vsyncpa [#allocation6 + $0x1], 1 }
 0x59d   :  { %7452 = vsyncpa [#allocation9], 1 }
 0x59e   :  { %7453 = vsyncpa [#allocation7], 1 }
 0x59f   :  { %7455 = vsyncpa [#allocation7 + $0x1], 1 }

</bundles_post_ra>
